<compile_context>
chip_gen: v7x
topology: tpu7x:2x2x1
jax: 0.10.0
libtpu: 0.0.40
codegen_flags: <defaults>
</compile_context>

<pallas_src>
import jax
import jax.numpy as jnp
from jax.experimental import pallas as pl
from jax.experimental.pallas import tpu as pltpu

# (c_out, k, stride) per conv layer; c_in chains from img_stack.
CONV_CFG = [(8, 4, 2), (16, 3, 2), (32, 3, 2), (64, 3, 2), (128, 3, 1), (256, 3, 1)]

TILE_M = 2048                     # rows per grid step for the conv1-3 matmuls
MAX_TAIL_TILE_B = 64              # samples per grid step in the fused tail (cap)
VMEM_LIMIT = 32 * 1024 * 1024     # well above actual use; safe on v5e/v6e/v7x


def _round_up(a, m):
    return (a + m - 1) // m * m


def _softplus(z):
    # numerically stable softplus: max(z,0) + log(1 + exp(-|z|))  (f32 on VPU/EUP)
    return jnp.maximum(z, 0.0) + jnp.log(1.0 + jnp.exp(-jnp.abs(z)))


# ---------------------------------------------------------------------------
# Kernel 1: tiled matmul + bias + ReLU (used for conv1-3 im2col matmuls)
# ---------------------------------------------------------------------------
def _conv_mm_kernel(x_ref, w_ref, b_ref, o_ref):
    """o = relu(x @ w + b).  x:(TM,K) bf16, w:(K,N) bf16, b:(1,N) f32."""
    acc = jnp.dot(x_ref[...], w_ref[...], preferred_element_type=jnp.float32)
    o_ref[...] = jnp.maximum(acc + b_ref[...], 0.0).astype(o_ref.dtype)


def conv_matmul_relu(patches, w_mat, bias, tile_m=TILE_M):
    """patches:(M,K) bf16, w_mat:(K,N) bf16, bias:(1,N) f32 -> (M,N) bf16."""
    M, K = patches.shape
    N = w_mat.shape[1]
    # Largest tile up to TILE_M, but keep >=2 grid steps when M allows so both
    # v7x TensorCores get sharded work via the "parallel" axis.
    tm = min(tile_m, _round_up(max((M + 1) // 2, 8), 8))
    M_pad = _round_up(M, tm)
    if M_pad != M:
        patches = jnp.pad(patches, ((0, M_pad - M), (0, 0)))
    grid = (M_pad // tm,)
    out = pl.pallas_call(
        _conv_mm_kernel,
        out_shape=jax.ShapeDtypeStruct((M_pad, N), jnp.bfloat16),
        grid=grid,
        in_specs=[
            pl.BlockSpec((tm, K), lambda i: (i, 0)),
            pl.BlockSpec((K, N), lambda i: (0, 0)),
            pl.BlockSpec((1, N), lambda i: (0, 0)),
        ],
        out_specs=pl.BlockSpec((tm, N), lambda i: (i, 0)),
        compiler_params=pltpu.CompilerParams(
            dimension_semantics=("parallel",),
            vmem_limit_bytes=VMEM_LIMIT),
        cost_estimate=pl.CostEstimate(
            flops=2 * M_pad * K * N,
            transcendentals=0,
            bytes_accessed=M_pad * K * 2 + K * N * 2 + N * 4 + M_pad * N * 2),
    )(patches, w_mat, bias)
    return out[:M]


# ---------------------------------------------------------------------------
# Kernel 2: fused tail — conv4 + conv5 + conv6 + value/fc/alpha/beta heads
# ---------------------------------------------------------------------------
def _tail_kernel(x3_ref, w4_ref, b4_ref, w5_ref, b5_ref, w6_ref, b6_ref,
                 wh1_ref, bh1_ref, wh2_ref, bh2_ref, out_ref):
    """x3:(TB, 11*11*32) bf16 -> packed (TB, 128) f32: [v(1)|alpha(3)|beta(3)|0...]."""
    x3 = x3_ref[...]                  # (TB, 3872) bf16, per-sample (ho, wo, c)
    TB = x3.shape[0]                  # static, multiple of 16

    def relu(z):
        return jnp.maximum(z, 0.0)

    def sp3(r, c):                    # channels of conv3 output at spatial (r, c)
        s = (r * 11 + c) * 32
        return x3[:, s:s + 32]

    # ---- conv4: k=3 s=2, 11x11x32 -> 5x5x64.  All 25 output positions are
    # stacked along the row axis -> ONE (25*TB, 288) x (288, 64) MXU dot. ----
    p4 = jnp.concatenate(
        [jnp.concatenate([sp3(2 * ho + i, 2 * wo + j)
                          for i in range(3) for j in range(3)], axis=-1)
         for ho in range(5) for wo in range(5)], axis=0)            # (25*TB, 288)
    h4 = relu(jnp.dot(p4, w4_ref[...], preferred_element_type=jnp.float32)
              + b4_ref[...]).astype(jnp.bfloat16)                   # (25*TB, 64)

    def sp4(r, c):                    # conv4 output at spatial (r, c): aligned row slice
        s = (r * 5 + c) * TB
        return h4[s:s + TB, :]

    # ---- conv5: k=3 s=1, 5x5x64 -> 3x3x128.  One (9*TB, 576) x (576, 128) dot. ----
    p5 = jnp.concatenate(
        [jnp.concatenate([sp4(ho + i, wo + j)
                          for i in range(3) for j in range(3)], axis=-1)
         for ho in range(3) for wo in range(3)], axis=0)            # (9*TB, 576)
    h5 = relu(jnp.dot(p5, w5_ref[...], preferred_element_type=jnp.float32)
              + b5_ref[...]).astype(jnp.bfloat16)                   # (9*TB, 128)

    def sp5(r, c):
        s = (r * 3 + c) * TB
        return h5[s:s + TB, :]

    # ---- conv6: k=3 s=1, 3x3x128 -> 1x1x256 ----
    p6 = jnp.concatenate([sp5(i, j) for i in range(3) for j in range(3)],
                         axis=-1)                                   # (TB, 1152)
    feats = relu(jnp.dot(p6, w6_ref[...], preferred_element_type=jnp.float32)
                 + b6_ref[...]).astype(jnp.bfloat16)                # (TB, 256)

    # ---- fused heads:
    #   h  = relu(feats @ [v1_w | fc_w] + [v1_b | fc_b])            (TB, 200)
    #   z  = h @ block_diag([v2_w], [alpha_w | beta_w]) + bias      (TB, 7)
    h = relu(jnp.dot(feats, wh1_ref[...], preferred_element_type=jnp.float32)
             + bh1_ref[...]).astype(jnp.bfloat16)                   # (TB, 200)
    z = jnp.dot(h, wh2_ref[...], preferred_element_type=jnp.float32) + bh2_ref[...]

    v = z[:, 0:1]                                                   # value head
    ab = _softplus(z[:, 1:7]) + 1.0                                 # alpha(3)|beta(3)
    out_ref[...] = jnp.concatenate(
        [v, ab, jnp.zeros((TB, 121), jnp.float32)], axis=-1)        # (TB, 128)


def tail_fused(x3_flat, params):
    """x3_flat: (B, 11*11*32) bf16 -> packed (B, 128) f32."""
    B, D3 = x3_flat.shape
    # Batch tile: multiple of 16 (bf16 sublane alignment), >=2 grid steps when
    # the batch allows (v7x megacore), capped at 64 (VMEM stays tiny).
    tb = max(16, min(MAX_TAIL_TILE_B, _round_up(max((B + 1) // 2, 1), 16)))
    B_pad = _round_up(B, tb)
    if B_pad != B:
        x3_flat = jnp.pad(x3_flat, ((0, B_pad - B), (0, 0)))

    w4, b4 = params["convs"][3]
    w5, b5 = params["convs"][4]
    w6, b6 = params["convs"][5]
    weights = [w4, b4, w5, b5, w6, b6,
               params["h1_w"], params["h1_b"], params["h2_w"], params["h2_b"]]

    flops_per_sample = 2 * (25 * 288 * 64 + 9 * 576 * 128 + 1152 * 256
                            + 256 * 200 + 200 * 7)
    weight_bytes = sum(int(w.size) * w.dtype.itemsize for w in weights)

    packed = pl.pallas_call(
        _tail_kernel,
        out_shape=jax.ShapeDtypeStruct((B_pad, 128), jnp.float32),
        grid=(B_pad // tb,),
        in_specs=[pl.BlockSpec((tb, D3), lambda i: (i, 0))]
                 + [pl.BlockSpec(w.shape, lambda i: (0, 0)) for w in weights],
        out_specs=pl.BlockSpec((tb, 128), lambda i: (i, 0)),
        compiler_params=pltpu.CompilerParams(
            dimension_semantics=("parallel",),
            vmem_limit_bytes=VMEM_LIMIT),
        cost_estimate=pl.CostEstimate(
            flops=B_pad * flops_per_sample,
            transcendentals=B_pad * 12,
            bytes_accessed=B_pad * D3 * 2 + B_pad * 128 * 4 + weight_bytes),
    )(x3_flat, *weights)
    return packed[:B]


# ---------------------------------------------------------------------------
# im2col glue for the big early conv layers (pure data movement, bf16)
# TODO(synk): move this gather in-kernel to avoid the kh*kw-duplicated HBM tensor.
# ---------------------------------------------------------------------------
def im2col(x, kh, kw, stride):
    """x: (B, H, W, C) -> patches (B*Ho*Wo, kh*kw*C), plus (Ho, Wo)."""
    B, H, W, C = x.shape
    Ho = (H - kh) // stride + 1
    Wo = (W - kw) // stride + 1
    cols = []
    for i in range(kh):
        for j in range(kw):
            cols.append(x[:, i:i + Ho * stride:stride, j:j + Wo * stride:stride, :])
    patches = jnp.concatenate(cols, axis=-1)          # (B, Ho, Wo, kh*kw*C)
    return patches.reshape(B * Ho * Wo, kh * kw * C), Ho, Wo


# ---------------------------------------------------------------------------
# Parameter initialization (mirrors module __init__; weights pre-reordered)
# ---------------------------------------------------------------------------
def init_params(key, img_stack):
    params = {"convs": []}
    gain = 2.0 ** 0.5                                  # calculate_gain('relu')
    c_in = img_stack
    for (c_out, k, _s) in CONV_CFG:
        key, wk = jax.random.split(key)
        fan_in = c_in * k * k
        fan_out = c_out * k * k
        bound = gain * (6.0 / (fan_in + fan_out)) ** 0.5      # xavier_uniform_
        w = jax.random.uniform(wk, (c_out, c_in, k, k), jnp.float32, -bound, bound)
        # pre-reorder to im2col layout [(kh, kw, c_in), c_out], bf16
        w_mat = jnp.transpose(w, (2, 3, 1, 0)).reshape(k * k * c_in, c_out)
        b = jnp.full((1, c_out), 0.1, jnp.float32)            # constant_(bias, 0.1)
        params["convs"].append((w_mat.astype(jnp.bfloat16), b))
        c_in = c_out

    def linear(k_, fan_in, fan_out):
        kw_, kb_ = jax.random.split(k_)
        bound = 1.0 / (fan_in ** 0.5)
        w = jax.random.uniform(kw_, (fan_in, fan_out), jnp.float32, -bound, bound)
        b = jax.random.uniform(kb_, (1, fan_out), jnp.float32, -bound, bound)
        return w, b

    keys = jax.random.split(key, 5)
    v1w, v1b = linear(keys[0], 256, 100)     # value head layer 1
    v2w, v2b = linear(keys[1], 100, 1)       # value head layer 2
    fcw, fcb = linear(keys[2], 256, 100)     # fc
    aw, a_b = linear(keys[3], 100, 3)        # alpha head
    bw, b_b = linear(keys[4], 100, 3)        # beta head

    # fused head layer 1: feats @ [v1 | fc] -> (B, 200)
    params["h1_w"] = jnp.concatenate([v1w, fcw], axis=1).astype(jnp.bfloat16)  # (256, 200)
    params["h1_b"] = jnp.concatenate([v1b, fcb], axis=1)                        # (1, 200) f32
    # fused head layer 2 (block-diagonal): col 0 = value, cols 1:7 = alpha|beta
    wh2 = jnp.zeros((200, 7), jnp.float32)
    wh2 = wh2.at[:100, 0:1].set(v2w)
    wh2 = wh2.at[100:, 1:4].set(aw)
    wh2 = wh2.at[100:, 4:7].set(bw)
    params["h2_w"] = wh2.astype(jnp.bfloat16)                                   # (200, 7)
    params["h2_b"] = jnp.concatenate([v2b, a_b, b_b], axis=1)                   # (1, 7) f32
    return params


# ---------------------------------------------------------------------------
# Forward pass (mirrors BasicCNNForPPO.forward)
# ---------------------------------------------------------------------------
def forward(params, x_nchw):
    # PyTorch NCHW -> NHWC, bf16 for MXU / halved HBM traffic (f32 accum inside)
    x = jnp.transpose(x_nchw, (0, 2, 3, 1)).astype(jnp.bfloat16)
    B = x.shape[0]

    # conv1-3: wrapper im2col + tiled Pallas matmul (grid over M, parallel)
    for li in range(3):
        w_mat, b = params["convs"][li]
        c_out, k, s = CONV_CFG[li]
        patches, Ho, Wo = im2col(x, k, k, s)
        y = conv_matmul_relu(patches, w_mat, b)
        x = y.reshape(B, Ho, Wo, c_out)

    # conv4 + conv5 + conv6 + heads: single fused Pallas kernel
    assert x.shape == (B, 11, 11, 32), "BasicCNNForPPO requires 96x96 inputs"
    x3_flat = x.reshape(B, 11 * 11 * 32)
    packed = tail_fused(x3_flat, params)                      # (B, 128) f32
    v = packed[:, 0:1]
    alpha = packed[:, 1:4]
    beta = packed[:, 4:7]
    return (alpha, beta), v


# ---------------------------------------------------------------------------
if __name__ == "__main__":
    key = jax.random.PRNGKey(0)
    pkey, xkey = jax.random.split(key)

    img_stack = 4               # Config['Data.ImageStackCount']
    batch = 2
    # The conv stack requires 96x96 input for the final view(-1, 256) to hold.
    x = jax.random.normal(xkey, (batch, img_stack, 96, 96), jnp.float32)

    params = init_params(pkey, img_stack)

    (alpha, beta), v = jax.jit(forward)(params, x)
    jax.block_until_ready((alpha, beta, v))

    assert alpha.shape == (batch, 3) and beta.shape == (batch, 3) and v.shape == (batch, 1)
    assert bool(jnp.all(jnp.isfinite(alpha))) and bool(jnp.all(jnp.isfinite(beta)))
    assert bool(jnp.all(jnp.isfinite(v)))
    assert bool(jnp.all(alpha > 1.0)) and bool(jnp.all(beta > 1.0))  # softplus(.)+1 > 1
    print("KERNEL_OK")
</pallas_src>

<mosaic_0001>
module attributes {stable_mosaic.version = 11 : i64} {
  func.func @_conv_mm_kernel(%arg0: i32, %arg1: memref<2048x64xbf16, #tpu.memory_space<vmem>>, %arg2: memref<64x8xbf16, #tpu.memory_space<vmem>>, %arg3: memref<1x8xf32, #tpu.memory_space<vmem>>, %arg4: memref<2048x8xbf16, #tpu.memory_space<vmem>>) attributes {dimension_semantics = [#tpu.dimension_semantics<parallel>], iteration_bounds = array<i64: 3>, scalar_prefetch = 0 : i64, scratch_operands = 0 : i64, tpu.core_type = #tpu.core_type<tc>, window_params = [{transform_indices = @transform_0, window_bounds = array<i64: 2048, 64>}, {pipeline_mode = #tpu.pipeline_mode<synchronous>, transform_indices = @transform_1, window_bounds = array<i64: 64, 8>}, {pipeline_mode = #tpu.pipeline_mode<synchronous>, transform_indices = @transform_2, window_bounds = array<i64: 1, 8>}, {transform_indices = @transform_3, window_bounds = array<i64: 2048, 8>}]} {
    %c0 = arith.constant 0 : index
    %c0_0 = arith.constant 0 : index
    %0 = vector.load %arg1[%c0, %c0_0] : memref<2048x64xbf16, #tpu.memory_space<vmem>>, vector<2048x64xbf16>
    %c0_1 = arith.constant 0 : index
    %c0_2 = arith.constant 0 : index
    %1 = vector.load %arg2[%c0_1, %c0_2] : memref<64x8xbf16, #tpu.memory_space<vmem>>, vector<64x8xbf16>
    %cst = arith.constant dense<0.000000e+00> : vector<2048x8xf32>
    %2 = tpu.matmul %0, %1, %cst {dimension_numbers = #tpu.dot_dimension_numbers<[1], [0], [0], [1], [0, 0, 1, 1], [], []>} : vector<2048x64xbf16>, vector<64x8xbf16>, vector<2048x8xf32> -> vector<2048x8xf32>
    %c0_3 = arith.constant 0 : index
    %c0_4 = arith.constant 0 : index
    %3 = vector.load %arg3[%c0_3, %c0_4] : memref<1x8xf32, #tpu.memory_space<vmem>>, vector<1x8xf32>
    %4 = vector.broadcast %3 : vector<1x8xf32> to vector<2048x8xf32>
    %5 = arith.addf %2, %4 : vector<2048x8xf32>
    %cst_5 = arith.constant 0.000000e+00 : f32
    %6 = vector.broadcast %cst_5 : f32 to vector<2048x8xf32>
    %7 = arith.maximumf %5, %6 : vector<2048x8xf32>
    %8 = arith.truncf %7 : vector<2048x8xf32> to vector<2048x8xbf16>
    %c0_6 = arith.constant 0 : index
    %c0_7 = arith.constant 0 : index
    %9 = vector.load %arg4[%c0_6, %c0_7] : memref<2048x8xbf16, #tpu.memory_space<vmem>>, vector<2048x8xbf16>
    tpu.vector_store %arg4[%c0_6, %c0_7], %8 {strides = array<i32>} : memref<2048x8xbf16, #tpu.memory_space<vmem>>, vector<2048x8xbf16>,
    return
  }
  func.func @transform_0(%arg0: i32) -> (i32, i32) {
    %c0_i32 = arith.constant 0 : i32
    %c0_i32_0 = arith.constant 0 : i32
    return %arg0, %c0_i32 : i32, i32
  }
  func.func @transform_1(%arg0: i32) -> (i32, i32) {
    %c0_i32 = arith.constant 0 : i32
    %c0_i32_0 = arith.constant 0 : i32
    %c0_i32_1 = arith.constant 0 : i32
    return %c0_i32, %c0_i32_0 : i32, i32
  }
  func.func @transform_2(%arg0: i32) -> (i32, i32) {
    %c0_i32 = arith.constant 0 : i32
    %c0_i32_0 = arith.constant 0 : i32
    %c0_i32_1 = arith.constant 0 : i32
    return %c0_i32, %c0_i32_0 : i32, i32
  }
  func.func @transform_3(%arg0: i32) -> (i32, i32) {
    %c0_i32 = arith.constant 0 : i32
    %c0_i32_0 = arith.constant 0 : i32
    return %arg0, %c0_i32 : i32, i32
  }
}

module attributes {stable_mosaic.version = 11 : i64} {
  func.func @_conv_mm_kernel(%arg0: i32, %arg1: memref<536x72xbf16, #tpu.memory_space<vmem>>, %arg2: memref<72x16xbf16, #tpu.memory_space<vmem>>, %arg3: memref<1x16xf32, #tpu.memory_space<vmem>>, %arg4: memref<536x16xbf16, #tpu.memory_space<vmem>>) attributes {dimension_semantics = [#tpu.dimension_semantics<parallel>], iteration_bounds = array<i64: 2>, scalar_prefetch = 0 : i64, scratch_operands = 0 : i64, tpu.core_type = #tpu.core_type<tc>, window_params = [{transform_indices = @transform_0, window_bounds = array<i64: 536, 72>}, {pipeline_mode = #tpu.pipeline_mode<synchronous>, transform_indices = @transform_1, window_bounds = array<i64: 72, 16>}, {pipeline_mode = #tpu.pipeline_mode<synchronous>, transform_indices = @transform_2, window_bounds = array<i64: 1, 16>}, {transform_indices = @transform_3, window_bounds = array<i64: 536, 16>}]} {
    %c0 = arith.constant 0 : index
    %c0_0 = arith.constant 0 : index
    %0 = vector.load %arg1[%c0, %c0_0] : memref<536x72xbf16, #tpu.memory_space<vmem>>, vector<536x72xbf16>
    %c0_1 = arith.constant 0 : index
    %c0_2 = arith.constant 0 : index
    %1 = vector.load %arg2[%c0_1, %c0_2] : memref<72x16xbf16, #tpu.memory_space<vmem>>, vector<72x16xbf16>
    %cst = arith.constant dense<0.000000e+00> : vector<536x16xf32>
    %2 = tpu.matmul %0, %1, %cst {dimension_numbers = #tpu.dot_dimension_numbers<[1], [0], [0], [1], [0, 0, 1, 1], [], []>} : vector<536x72xbf16>, vector<72x16xbf16>, vector<536x16xf32> -> vector<536x16xf32>
    %c0_3 = arith.constant 0 : index
    %c0_4 = arith.constant 0 : index
    %3 = vector.load %arg3[%c0_3, %c0_4] : memref<1x16xf32, #tpu.memory_space<vmem>>, vector<1x16xf32>
    %4 = vector.broadcast %3 : vector<1x16xf32> to vector<536x16xf32>
    %5 = arith.addf %2, %4 : vector<536x16xf32>
    %cst_5 = arith.constant 0.000000e+00 : f32
    %6 = vector.broadcast %cst_5 : f32 to vector<536x16xf32>
    %7 = arith.maximumf %5, %6 : vector<536x16xf32>
    %8 = arith.truncf %7 : vector<536x16xf32> to vector<536x16xbf16>
    %c0_6 = arith.constant 0 : index
    %c0_7 = arith.constant 0 : index
    %9 = vector.load %arg4[%c0_6, %c0_7] : memref<536x16xbf16, #tpu.memory_space<vmem>>, vector<536x16xbf16>
    tpu.vector_store %arg4[%c0_6, %c0_7], %8 {strides = array<i32>} : memref<536x16xbf16, #tpu.memory_space<vmem>>, vector<536x16xbf16>,
    return
  }
  func.func @transform_0(%arg0: i32) -> (i32, i32) {
    %c0_i32 = arith.constant 0 : i32
    %c0_i32_0 = arith.constant 0 : i32
    return %arg0, %c0_i32 : i32, i32
  }
  func.func @transform_1(%arg0: i32) -> (i32, i32) {
    %c0_i32 = arith.constant 0 : i32
    %c0_i32_0 = arith.constant 0 : i32
    %c0_i32_1 = arith.constant 0 : i32
    return %c0_i32, %c0_i32_0 : i32, i32
  }
  func.func @transform_2(%arg0: i32) -> (i32, i32) {
    %c0_i32 = arith.constant 0 : i32
    %c0_i32_0 = arith.constant 0 : i32
    %c0_i32_1 = arith.constant 0 : i32
    return %c0_i32, %c0_i32_0 : i32, i32
  }
  func.func @transform_3(%arg0: i32) -> (i32, i32) {
    %c0_i32 = arith.constant 0 : i32
    %c0_i32_0 = arith.constant 0 : i32
    return %arg0, %c0_i32 : i32, i32
  }
}

module attributes {stable_mosaic.version = 11 : i64} {
  func.func @_conv_mm_kernel(%arg0: i32, %arg1: memref<128x144xbf16, #tpu.memory_space<vmem>>, %arg2: memref<144x32xbf16, #tpu.memory_space<vmem>>, %arg3: memref<1x32xf32, #tpu.memory_space<vmem>>, %arg4: memref<128x32xbf16, #tpu.memory_space<vmem>>) attributes {dimension_semantics = [#tpu.dimension_semantics<parallel>], iteration_bounds = array<i64: 2>, scalar_prefetch = 0 : i64, scratch_operands = 0 : i64, tpu.core_type = #tpu.core_type<tc>, window_params = [{transform_indices = @transform_0, window_bounds = array<i64: 128, 144>}, {pipeline_mode = #tpu.pipeline_mode<synchronous>, transform_indices = @transform_1, window_bounds = array<i64: 144, 32>}, {pipeline_mode = #tpu.pipeline_mode<synchronous>, transform_indices = @transform_2, window_bounds = array<i64: 1, 32>}, {transform_indices = @transform_3, window_bounds = array<i64: 128, 32>}]} {
    %c0 = arith.constant 0 : index
    %c0_0 = arith.constant 0 : index
    %0 = vector.load %arg1[%c0, %c0_0] : memref<128x144xbf16, #tpu.memory_space<vmem>>, vector<128x144xbf16>
    %c0_1 = arith.constant 0 : index
    %c0_2 = arith.constant 0 : index
    %1 = vector.load %arg2[%c0_1, %c0_2] : memref<144x32xbf16, #tpu.memory_space<vmem>>, vector<144x32xbf16>
    %cst = arith.constant dense<0.000000e+00> : vector<128x32xf32>
    %2 = tpu.matmul %0, %1, %cst {dimension_numbers = #tpu.dot_dimension_numbers<[1], [0], [0], [1], [0, 0, 1, 1], [], []>} : vector<128x144xbf16>, vector<144x32xbf16>, vector<128x32xf32> -> vector<128x32xf32>
    %c0_3 = arith.constant 0 : index
    %c0_4 = arith.constant 0 : index
    %3 = vector.load %arg3[%c0_3, %c0_4] : memref<1x32xf32, #tpu.memory_space<vmem>>, vector<1x32xf32>
    %4 = vector.broadcast %3 : vector<1x32xf32> to vector<128x32xf32>
    %5 = arith.addf %2, %4 : vector<128x32xf32>
    %cst_5 = arith.constant 0.000000e+00 : f32
    %6 = vector.broadcast %cst_5 : f32 to vector<128x32xf32>
    %7 = arith.maximumf %5, %6 : vector<128x32xf32>
    %8 = arith.truncf %7 : vector<128x32xf32> to vector<128x32xbf16>
    %c0_6 = arith.constant 0 : index
    %c0_7 = arith.constant 0 : index
    %9 = vector.load %arg4[%c0_6, %c0_7] : memref<128x32xbf16, #tpu.memory_space<vmem>>, vector<128x32xbf16>
    tpu.vector_store %arg4[%c0_6, %c0_7], %8 {strides = array<i32>} : memref<128x32xbf16, #tpu.memory_space<vmem>>, vector<128x32xbf16>,
    return
  }
  func.func @transform_0(%arg0: i32) -> (i32, i32) {
    %c0_i32 = arith.constant 0 : i32
    %c0_i32_0 = arith.constant 0 : i32
    return %arg0, %c0_i32 : i32, i32
  }
  func.func @transform_1(%arg0: i32) -> (i32, i32) {
    %c0_i32 = arith.constant 0 : i32
    %c0_i32_0 = arith.constant 0 : i32
    %c0_i32_1 = arith.constant 0 : i32
    return %c0_i32, %c0_i32_0 : i32, i32
  }
  func.func @transform_2(%arg0: i32) -> (i32, i32) {
    %c0_i32 = arith.constant 0 : i32
    %c0_i32_0 = arith.constant 0 : i32
    %c0_i32_1 = arith.constant 0 : i32
    return %c0_i32, %c0_i32_0 : i32, i32
  }
  func.func @transform_3(%arg0: i32) -> (i32, i32) {
    %c0_i32 = arith.constant 0 : i32
    %c0_i32_0 = arith.constant 0 : i32
    return %arg0, %c0_i32 : i32, i32
  }
}

module attributes {stable_mosaic.version = 11 : i64} {
  func.func @_tail_kernel(%arg0: i32, %arg1: memref<16x3872xbf16, #tpu.memory_space<vmem>>, %arg2: memref<288x64xbf16, #tpu.memory_space<vmem>>, %arg3: memref<1x64xf32, #tpu.memory_space<vmem>>, %arg4: memref<576x128xbf16, #tpu.memory_space<vmem>>, %arg5: memref<1x128xf32, #tpu.memory_space<vmem>>, %arg6: memref<1152x256xbf16, #tpu.memory_space<vmem>>, %arg7: memref<1x256xf32, #tpu.memory_space<vmem>>, %arg8: memref<256x200xbf16, #tpu.memory_space<vmem>>, %arg9: memref<1x200xf32, #tpu.memory_space<vmem>>, %arg10: memref<200x7xbf16, #tpu.memory_space<vmem>>, %arg11: memref<1x7xf32, #tpu.memory_space<vmem>>, %arg12: memref<16x128xf32, #tpu.memory_space<vmem>>) attributes {dimension_semantics = [#tpu.dimension_semantics<parallel>], iteration_bounds = array<i64: 1>, scalar_prefetch = 0 : i64, scratch_operands = 0 : i64, tpu.core_type = #tpu.core_type<tc>, window_params = [{transform_indices = @transform_0, window_bounds = array<i64: 16, 3872>}, {pipeline_mode = #tpu.pipeline_mode<synchronous>, transform_indices = @transform_1, window_bounds = array<i64: 288, 64>}, {pipeline_mode = #tpu.pipeline_mode<synchronous>, transform_indices = @transform_2, window_bounds = array<i64: 1, 64>}, {pipeline_mode = #tpu.pipeline_mode<synchronous>, transform_indices = @transform_3, window_bounds = array<i64: 576, 128>}, {pipeline_mode = #tpu.pipeline_mode<synchronous>, transform_indices = @transform_4, window_bounds = array<i64: 1, 128>}, {pipeline_mode = #tpu.pipeline_mode<synchronous>, transform_indices = @transform_5, window_bounds = array<i64: 1152, 256>}, {pipeline_mode = #tpu.pipeline_mode<synchronous>, transform_indices = @transform_6, window_bounds = array<i64: 1, 256>}, {pipeline_mode = #tpu.pipeline_mode<synchronous>, transform_indices = @transform_7, window_bounds = array<i64: 256, 200>}, {pipeline_mode = #tpu.pipeline_mode<synchronous>, transform_indices = @transform_8, window_bounds = array<i64: 1, 200>}, {pipeline_mode = #tpu.pipeline_mode<synchronous>, transform_indices = @transform_9, window_bounds = array<i64: 200, 7>}, {pipeline_mode = #tpu.pipeline_mode<synchronous>, transform_indices = @transform_10, window_bounds = array<i64: 1, 7>}, {transform_indices = @transform_11, window_bounds = array<i64: 16, 128>}]} {
    %c0 = arith.constant 0 : index
    %c0_0 = arith.constant 0 : index
    %0 = vector.load %arg1[%c0, %c0_0] : memref<16x3872xbf16, #tpu.memory_space<vmem>>, vector<16x3872xbf16>
    %1 = vector.extract_strided_slice %0 {offsets = [0, 0], sizes = [16, 32], strides = [1, 1]} : vector<16x3872xbf16> to vector<16x32xbf16>
    %2 = vector.extract_strided_slice %0 {offsets = [0, 32], sizes = [16, 32], strides = [1, 1]} : vector<16x3872xbf16> to vector<16x32xbf16>
    %3 = vector.extract_strided_slice %0 {offsets = [0, 64], sizes = [16, 32], strides = [1, 1]} : vector<16x3872xbf16> to vector<16x32xbf16>
    %4 = vector.extract_strided_slice %0 {offsets = [0, 352], sizes = [16, 32], strides = [1, 1]} : vector<16x3872xbf16> to vector<16x32xbf16>
    %5 = vector.extract_strided_slice %0 {offsets = [0, 384], sizes = [16, 32], strides = [1, 1]} : vector<16x3872xbf16> to vector<16x32xbf16>
    %6 = vector.extract_strided_slice %0 {offsets = [0, 416], sizes = [16, 32], strides = [1, 1]} : vector<16x3872xbf16> to vector<16x32xbf16>
    %7 = vector.extract_strided_slice %0 {offsets = [0, 704], sizes = [16, 32], strides = [1, 1]} : vector<16x3872xbf16> to vector<16x32xbf16>
    %8 = vector.extract_strided_slice %0 {offsets = [0, 736], sizes = [16, 32], strides = [1, 1]} : vector<16x3872xbf16> to vector<16x32xbf16>
    %9 = vector.extract_strided_slice %0 {offsets = [0, 768], sizes = [16, 32], strides = [1, 1]} : vector<16x3872xbf16> to vector<16x32xbf16>
    %10 = tpu.concatenate %1, %2, %3, %4, %5, %6, %7, %8, %9 in 1 : vector<16x32xbf16>, vector<16x32xbf16>, vector<16x32xbf16>, vector<16x32xbf16>, vector<16x32xbf16>, vector<16x32xbf16>, vector<16x32xbf16>, vector<16x32xbf16>, vector<16x32xbf16> -> vector<16x288xbf16>
    %11 = vector.extract_strided_slice %0 {offsets = [0, 64], sizes = [16, 32], strides = [1, 1]} : vector<16x3872xbf16> to vector<16x32xbf16>
    %12 = vector.extract_strided_slice %0 {offsets = [0, 96], sizes = [16, 32], strides = [1, 1]} : vector<16x3872xbf16> to vector<16x32xbf16>
    %13 = vector.extract_strided_slice %0 {offsets = [0, 128], sizes = [16, 32], strides = [1, 1]} : vector<16x3872xbf16> to vector<16x32xbf16>
    %14 = vector.extract_strided_slice %0 {offsets = [0, 416], sizes = [16, 32], strides = [1, 1]} : vector<16x3872xbf16> to vector<16x32xbf16>
    %15 = vector.extract_strided_slice %0 {offsets = [0, 448], sizes = [16, 32], strides = [1, 1]} : vector<16x3872xbf16> to vector<16x32xbf16>
    %16 = vector.extract_strided_slice %0 {offsets = [0, 480], sizes = [16, 32], strides = [1, 1]} : vector<16x3872xbf16> to vector<16x32xbf16>
    %17 = vector.extract_strided_slice %0 {offsets = [0, 768], sizes = [16, 32], strides = [1, 1]} : vector<16x3872xbf16> to vector<16x32xbf16>
    %18 = vector.extract_strided_slice %0 {offsets = [0, 800], sizes = [16, 32], strides = [1, 1]} : vector<16x3872xbf16> to vector<16x32xbf16>
    %19 = vector.extract_strided_slice %0 {offsets = [0, 832], sizes = [16, 32], strides = [1, 1]} : vector<16x3872xbf16> to vector<16x32xbf16>
    %20 = tpu.concatenate %11, %12, %13, %14, %15, %16, %17, %18, %19 in 1 : vector<16x32xbf16>, vector<16x32xbf16>, vector<16x32xbf16>, vector<16x32xbf16>, vector<16x32xbf16>, vector<16x32xbf16>, vector<16x32xbf16>, vector<16x32xbf16>, vector<16x32xbf16> -> vector<16x288xbf16>
    %21 = vector.extract_strided_slice %0 {offsets = [0, 128], sizes = [16, 32], strides = [1, 1]} : vector<16x3872xbf16> to vector<16x32xbf16>
    %22 = vector.extract_strided_slice %0 {offsets = [0, 160], sizes = [16, 32], strides = [1, 1]} : vector<16x3872xbf16> to vector<16x32xbf16>
    %23 = vector.extract_strided_slice %0 {offsets = [0, 192], sizes = [16, 32], strides = [1, 1]} : vector<16x3872xbf16> to vector<16x32xbf16>
    %24 = vector.extract_strided_slice %0 {offsets = [0, 480], sizes = [16, 32], strides = [1, 1]} : vector<16x3872xbf16> to vector<16x32xbf16>
    %25 = vector.extract_strided_slice %0 {offsets = [0, 512], sizes = [16, 32], strides = [1, 1]} : vector<16x3872xbf16> to vector<16x32xbf16>
    %26 = vector.extract_strided_slice %0 {offsets = [0, 544], sizes = [16, 32], strides = [1, 1]} : vector<16x3872xbf16> to vector<16x32xbf16>
    %27 = vector.extract_strided_slice %0 {offsets = [0, 832], sizes = [16, 32], strides = [1, 1]} : vector<16x3872xbf16> to vector<16x32xbf16>
    %28 = vector.extract_strided_slice %0 {offsets = [0, 864], sizes = [16, 32], strides = [1, 1]} : vector<16x3872xbf16> to vector<16x32xbf16>
    %29 = vector.extract_strided_slice %0 {offsets = [0, 896], sizes = [16, 32], strides = [1, 1]} : vector<16x3872xbf16> to vector<16x32xbf16>
    %30 = tpu.concatenate %21, %22, %23, %24, %25, %26, %27, %28, %29 in 1 : vector<16x32xbf16>, vector<16x32xbf16>, vector<16x32xbf16>, vector<16x32xbf16>, vector<16x32xbf16>, vector<16x32xbf16>, vector<16x32xbf16>, vector<16x32xbf16>, vector<16x32xbf16> -> vector<16x288xbf16>
    %31 = vector.extract_strided_slice %0 {offsets = [0, 192], sizes = [16, 32], strides = [1, 1]} : vector<16x3872xbf16> to vector<16x32xbf16>
    %32 = vector.extract_strided_slice %0 {offsets = [0, 224], sizes = [16, 32], strides = [1, 1]} : vector<16x3872xbf16> to vector<16x32xbf16>
    %33 = vector.extract_strided_slice %0 {offsets = [0, 256], sizes = [16, 32], strides = [1, 1]} : vector<16x3872xbf16> to vector<16x32xbf16>
    %34 = vector.extract_strided_slice %0 {offsets = [0, 544], sizes = [16, 32], strides = [1, 1]} : vector<16x3872xbf16> to vector<16x32xbf16>
    %35 = vector.extract_strided_slice %0 {offsets = [0, 576], sizes = [16, 32], strides = [1, 1]} : vector<16x3872xbf16> to vector<16x32xbf16>
    %36 = vector.extract_strided_slice %0 {offsets = [0, 608], sizes = [16, 32], strides = [1, 1]} : vector<16x3872xbf16> to vector<16x32xbf16>
    %37 = vector.extract_strided_slice %0 {offsets = [0, 896], sizes = [16, 32], strides = [1, 1]} : vector<16x3872xbf16> to vector<16x32xbf16>
    %38 = vector.extract_strided_slice %0 {offsets = [0, 928], sizes = [16, 32], strides = [1, 1]} : vector<16x3872xbf16> to vector<16x32xbf16>
    %39 = vector.extract_strided_slice %0 {offsets = [0, 960], sizes = [16, 32], strides = [1, 1]} : vector<16x3872xbf16> to vector<16x32xbf16>
    %40 = tpu.concatenate %31, %32, %33, %34, %35, %36, %37, %38, %39 in 1 : vector<16x32xbf16>, vector<16x32xbf16>, vector<16x32xbf16>, vector<16x32xbf16>, vector<16x32xbf16>, vector<16x32xbf16>, vector<16x32xbf16>, vector<16x32xbf16>, vector<16x32xbf16> -> vector<16x288xbf16>
    %41 = vector.extract_strided_slice %0 {offsets = [0, 256], sizes = [16, 32], strides = [1, 1]} : vector<16x3872xbf16> to vector<16x32xbf16>
    %42 = vector.extract_strided_slice %0 {offsets = [0, 288], sizes = [16, 32], strides = [1, 1]} : vector<16x3872xbf16> to vector<16x32xbf16>
    %43 = vector.extract_strided_slice %0 {offsets = [0, 320], sizes = [16, 32], strides = [1, 1]} : vector<16x3872xbf16> to vector<16x32xbf16>
    %44 = vector.extract_strided_slice %0 {offsets = [0, 608], sizes = [16, 32], strides = [1, 1]} : vector<16x3872xbf16> to vector<16x32xbf16>
    %45 = vector.extract_strided_slice %0 {offsets = [0, 640], sizes = [16, 32], strides = [1, 1]} : vector<16x3872xbf16> to vector<16x32xbf16>
    %46 = vector.extract_strided_slice %0 {offsets = [0, 672], sizes = [16, 32], strides = [1, 1]} : vector<16x3872xbf16> to vector<16x32xbf16>
    %47 = vector.extract_strided_slice %0 {offsets = [0, 960], sizes = [16, 32], strides = [1, 1]} : vector<16x3872xbf16> to vector<16x32xbf16>
    %48 = vector.extract_strided_slice %0 {offsets = [0, 992], sizes = [16, 32], strides = [1, 1]} : vector<16x3872xbf16> to vector<16x32xbf16>
    %49 = vector.extract_strided_slice %0 {offsets = [0, 1024], sizes = [16, 32], strides = [1, 1]} : vector<16x3872xbf16> to vector<16x32xbf16>
    %50 = tpu.concatenate %41, %42, %43, %44, %45, %46, %47, %48, %49 in 1 : vector<16x32xbf16>, vector<16x32xbf16>, vector<16x32xbf16>, vector<16x32xbf16>, vector<16x32xbf16>, vector<16x32xbf16>, vector<16x32xbf16>, vector<16x32xbf16>, vector<16x32xbf16> -> vector<16x288xbf16>
    %51 = vector.extract_strided_slice %0 {offsets = [0, 704], sizes = [16, 32], strides = [1, 1]} : vector<16x3872xbf16> to vector<16x32xbf16>
    %52 = vector.extract_strided_slice %0 {offsets = [0, 736], sizes = [16, 32], strides = [1, 1]} : vector<16x3872xbf16> to vector<16x32xbf16>
    %53 = vector.extract_strided_slice %0 {offsets = [0, 768], sizes = [16, 32], strides = [1, 1]} : vector<16x3872xbf16> to vector<16x32xbf16>
    %54 = vector.extract_strided_slice %0 {offsets = [0, 1056], sizes = [16, 32], strides = [1, 1]} : vector<16x3872xbf16> to vector<16x32xbf16>
    %55 = vector.extract_strided_slice %0 {offsets = [0, 1088], sizes = [16, 32], strides = [1, 1]} : vector<16x3872xbf16> to vector<16x32xbf16>
    %56 = vector.extract_strided_slice %0 {offsets = [0, 1120], sizes = [16, 32], strides = [1, 1]} : vector<16x3872xbf16> to vector<16x32xbf16>
    %57 = vector.extract_strided_slice %0 {offsets = [0, 1408], sizes = [16, 32], strides = [1, 1]} : vector<16x3872xbf16> to vector<16x32xbf16>
    %58 = vector.extract_strided_slice %0 {offsets = [0, 1440], sizes = [16, 32], strides = [1, 1]} : vector<16x3872xbf16> to vector<16x32xbf16>
    %59 = vector.extract_strided_slice %0 {offsets = [0, 1472], sizes = [16, 32], strides = [1, 1]} : vector<16x3872xbf16> to vector<16x32xbf16>
    %60 = tpu.concatenate %51, %52, %53, %54, %55, %56, %57, %58, %59 in 1 : vector<16x32xbf16>, vector<16x32xbf16>, vector<16x32xbf16>, vector<16x32xbf16>, vector<16x32xbf16>, vector<16x32xbf16>, vector<16x32xbf16>, vector<16x32xbf16>, vector<16x32xbf16> -> vector<16x288xbf16>
    %61 = vector.extract_strided_slice %0 {offsets = [0, 768], sizes = [16, 32], strides = [1, 1]} : vector<16x3872xbf16> to vector<16x32xbf16>
    %62 = vector.extract_strided_slice %0 {offsets = [0, 800], sizes = [16, 32], strides = [1, 1]} : vector<16x3872xbf16> to vector<16x32xbf16>
    %63 = vector.extract_strided_slice %0 {offsets = [0, 832], sizes = [16, 32], strides = [1, 1]} : vector<16x3872xbf16> to vector<16x32xbf16>
    %64 = vector.extract_strided_slice %0 {offsets = [0, 1120], sizes = [16, 32], strides = [1, 1]} : vector<16x3872xbf16> to vector<16x32xbf16>
    %65 = vector.extract_strided_slice %0 {offsets = [0, 1152], sizes = [16, 32], strides = [1, 1]} : vector<16x3872xbf16> to vector<16x32xbf16>
    %66 = vector.extract_strided_slice %0 {offsets = [0, 1184], sizes = [16, 32], strides = [1, 1]} : vector<16x3872xbf16> to vector<16x32xbf16>
    %67 = vector.extract_strided_slice %0 {offsets = [0, 1472], sizes = [16, 32], strides = [1, 1]} : vector<16x3872xbf16> to vector<16x32xbf16>
    %68 = vector.extract_strided_slice %0 {offsets = [0, 1504], sizes = [16, 32], strides = [1, 1]} : vector<16x3872xbf16> to vector<16x32xbf16>
    %69 = vector.extract_strided_slice %0 {offsets = [0, 1536], sizes = [16, 32], strides = [1, 1]} : vector<16x3872xbf16> to vector<16x32xbf16>
    %70 = tpu.concatenate %61, %62, %63, %64, %65, %66, %67, %68, %69 in 1 : vector<16x32xbf16>, vector<16x32xbf16>, vector<16x32xbf16>, vector<16x32xbf16>, vector<16x32xbf16>, vector<16x32xbf16>, vector<16x32xbf16>, vector<16x32xbf16>, vector<16x32xbf16> -> vector<16x288xbf16>
    %71 = vector.extract_strided_slice %0 {offsets = [0, 832], sizes = [16, 32], strides = [1, 1]} : vector<16x3872xbf16> to vector<16x32xbf16>
    %72 = vector.extract_strided_slice %0 {offsets = [0, 864], sizes = [16, 32], strides = [1, 1]} : vector<16x3872xbf16> to vector<16x32xbf16>
    %73 = vector.extract_strided_slice %0 {offsets = [0, 896], sizes = [16, 32], strides = [1, 1]} : vector<16x3872xbf16> to vector<16x32xbf16>
    %74 = vector.extract_strided_slice %0 {offsets = [0, 1184], sizes = [16, 32], strides = [1, 1]} : vector<16x3872xbf16> to vector<16x32xbf16>
    %75 = vector.extract_strided_slice %0 {offsets = [0, 1216], sizes = [16, 32], strides = [1, 1]} : vector<16x3872xbf16> to vector<16x32xbf16>
    %76 = vector.extract_strided_slice %0 {offsets = [0, 1248], sizes = [16, 32], strides = [1, 1]} : vector<16x3872xbf16> to vector<16x32xbf16>
    %77 = vector.extract_strided_slice %0 {offsets = [0, 1536], sizes = [16, 32], strides = [1, 1]} : vector<16x3872xbf16> to vector<16x32xbf16>
    %78 = vector.extract_strided_slice %0 {offsets = [0, 1568], sizes = [16, 32], strides = [1, 1]} : vector<16x3872xbf16> to vector<16x32xbf16>
    %79 = vector.extract_strided_slice %0 {offsets = [0, 1600], sizes = [16, 32], strides = [1, 1]} : vector<16x3872xbf16> to vector<16x32xbf16>
    %80 = tpu.concatenate %71, %72, %73, %74, %75, %76, %77, %78, %79 in 1 : vector<16x32xbf16>, vector<16x32xbf16>, vector<16x32xbf16>, vector<16x32xbf16>, vector<16x32xbf16>, vector<16x32xbf16>, vector<16x32xbf16>, vector<16x32xbf16>, vector<16x32xbf16> -> vector<16x288xbf16>
    %81 = vector.extract_strided_slice %0 {offsets = [0, 896], sizes = [16, 32], strides = [1, 1]} : vector<16x3872xbf16> to vector<16x32xbf16>
    %82 = vector.extract_strided_slice %0 {offsets = [0, 928], sizes = [16, 32], strides = [1, 1]} : vector<16x3872xbf16> to vector<16x32xbf16>
    %83 = vector.extract_strided_slice %0 {offsets = [0, 960], sizes = [16, 32], strides = [1, 1]} : vector<16x3872xbf16> to vector<16x32xbf16>
    %84 = vector.extract_strided_slice %0 {offsets = [0, 1248], sizes = [16, 32], strides = [1, 1]} : vector<16x3872xbf16> to vector<16x32xbf16>
    %85 = vector.extract_strided_slice %0 {offsets = [0, 1280], sizes = [16, 32], strides = [1, 1]} : vector<16x3872xbf16> to vector<16x32xbf16>
    %86 = vector.extract_strided_slice %0 {offsets = [0, 1312], sizes = [16, 32], strides = [1, 1]} : vector<16x3872xbf16> to vector<16x32xbf16>
    %87 = vector.extract_strided_slice %0 {offsets = [0, 1600], sizes = [16, 32], strides = [1, 1]} : vector<16x3872xbf16> to vector<16x32xbf16>
    %88 = vector.extract_strided_slice %0 {offsets = [0, 1632], sizes = [16, 32], strides = [1, 1]} : vector<16x3872xbf16> to vector<16x32xbf16>
    %89 = vector.extract_strided_slice %0 {offsets = [0, 1664], sizes = [16, 32], strides = [1, 1]} : vector<16x3872xbf16> to vector<16x32xbf16>
    %90 = tpu.concatenate %81, %82, %83, %84, %85, %86, %87, %88, %89 in 1 : vector<16x32xbf16>, vector<16x32xbf16>, vector<16x32xbf16>, vector<16x32xbf16>, vector<16x32xbf16>, vector<16x32xbf16>, vector<16x32xbf16>, vector<16x32xbf16>, vector<16x32xbf16> -> vector<16x288xbf16>
    %91 = vector.extract_strided_slice %0 {offsets = [0, 960], sizes = [16, 32], strides = [1, 1]} : vector<16x3872xbf16> to vector<16x32xbf16>
    %92 = vector.extract_strided_slice %0 {offsets = [0, 992], sizes = [16, 32], strides = [1, 1]} : vector<16x3872xbf16> to vector<16x32xbf16>
    %93 = vector.extract_strided_slice %0 {offsets = [0, 1024], sizes = [16, 32], strides = [1, 1]} : vector<16x3872xbf16> to vector<16x32xbf16>
    %94 = vector.extract_strided_slice %0 {offsets = [0, 1312], sizes = [16, 32], strides = [1, 1]} : vector<16x3872xbf16> to vector<16x32xbf16>
    %95 = vector.extract_strided_slice %0 {offsets = [0, 1344], sizes = [16, 32], strides = [1, 1]} : vector<16x3872xbf16> to vector<16x32xbf16>
    %96 = vector.extract_strided_slice %0 {offsets = [0, 1376], sizes = [16, 32], strides = [1, 1]} : vector<16x3872xbf16> to vector<16x32xbf16>
    %97 = vector.extract_strided_slice %0 {offsets = [0, 1664], sizes = [16, 32], strides = [1, 1]} : vector<16x3872xbf16> to vector<16x32xbf16>
    %98 = vector.extract_strided_slice %0 {offsets = [0, 1696], sizes = [16, 32], strides = [1, 1]} : vector<16x3872xbf16> to vector<16x32xbf16>
    %99 = vector.extract_strided_slice %0 {offsets = [0, 1728], sizes = [16, 32], strides = [1, 1]} : vector<16x3872xbf16> to vector<16x32xbf16>
    %100 = tpu.concatenate %91, %92, %93, %94, %95, %96, %97, %98, %99 in 1 : vector<16x32xbf16>, vector<16x32xbf16>, vector<16x32xbf16>, vector<16x32xbf16>, vector<16x32xbf16>, vector<16x32xbf16>, vector<16x32xbf16>, vector<16x32xbf16>, vector<16x32xbf16> -> vector<16x288xbf16>
    %101 = vector.extract_strided_slice %0 {offsets = [0, 1408], sizes = [16, 32], strides = [1, 1]} : vector<16x3872xbf16> to vector<16x32xbf16>
    %102 = vector.extract_strided_slice %0 {offsets = [0, 1440], sizes = [16, 32], strides = [1, 1]} : vector<16x3872xbf16> to vector<16x32xbf16>
    %103 = vector.extract_strided_slice %0 {offsets = [0, 1472], sizes = [16, 32], strides = [1, 1]} : vector<16x3872xbf16> to vector<16x32xbf16>
    %104 = vector.extract_strided_slice %0 {offsets = [0, 1760], sizes = [16, 32], strides = [1, 1]} : vector<16x3872xbf16> to vector<16x32xbf16>
    %105 = vector.extract_strided_slice %0 {offsets = [0, 1792], sizes = [16, 32], strides = [1, 1]} : vector<16x3872xbf16> to vector<16x32xbf16>
    %106 = vector.extract_strided_slice %0 {offsets = [0, 1824], sizes = [16, 32], strides = [1, 1]} : vector<16x3872xbf16> to vector<16x32xbf16>
    %107 = vector.extract_strided_slice %0 {offsets = [0, 2112], sizes = [16, 32], strides = [1, 1]} : vector<16x3872xbf16> to vector<16x32xbf16>
    %108 = vector.extract_strided_slice %0 {offsets = [0, 2144], sizes = [16, 32], strides = [1, 1]} : vector<16x3872xbf16> to vector<16x32xbf16>
    %109 = vector.extract_strided_slice %0 {offsets = [0, 2176], sizes = [16, 32], strides = [1, 1]} : vector<16x3872xbf16> to vector<16x32xbf16>
    %110 = tpu.concatenate %101, %102, %103, %104, %105, %106, %107, %108, %109 in 1 : vector<16x32xbf16>, vector<16x32xbf16>, vector<16x32xbf16>, vector<16x32xbf16>, vector<16x32xbf16>, vector<16x32xbf16>, vector<16x32xbf16>, vector<16x32xbf16>, vector<16x32xbf16> -> vector<16x288xbf16>
    %111 = vector.extract_strided_slice %0 {offsets = [0, 1472], sizes = [16, 32], strides = [1, 1]} : vector<16x3872xbf16> to vector<16x32xbf16>
    %112 = vector.extract_strided_slice %0 {offsets = [0, 1504], sizes = [16, 32], strides = [1, 1]} : vector<16x3872xbf16> to vector<16x32xbf16>
    %113 = vector.extract_strided_slice %0 {offsets = [0, 1536], sizes = [16, 32], strides = [1, 1]} : vector<16x3872xbf16> to vector<16x32xbf16>
    %114 = vector.extract_strided_slice %0 {offsets = [0, 1824], sizes = [16, 32], strides = [1, 1]} : vector<16x3872xbf16> to vector<16x32xbf16>
    %115 = vector.extract_strided_slice %0 {offsets = [0, 1856], sizes = [16, 32], strides = [1, 1]} : vector<16x3872xbf16> to vector<16x32xbf16>
    %116 = vector.extract_strided_slice %0 {offsets = [0, 1888], sizes = [16, 32], strides = [1, 1]} : vector<16x3872xbf16> to vector<16x32xbf16>
    %117 = vector.extract_strided_slice %0 {offsets = [0, 2176], sizes = [16, 32], strides = [1, 1]} : vector<16x3872xbf16> to vector<16x32xbf16>
    %118 = vector.extract_strided_slice %0 {offsets = [0, 2208], sizes = [16, 32], strides = [1, 1]} : vector<16x3872xbf16> to vector<16x32xbf16>
    %119 = vector.extract_strided_slice %0 {offsets = [0, 2240], sizes = [16, 32], strides = [1, 1]} : vector<16x3872xbf16> to vector<16x32xbf16>
    %120 = tpu.concatenate %111, %112, %113, %114, %115, %116, %117, %118, %119 in 1 : vector<16x32xbf16>, vector<16x32xbf16>, vector<16x32xbf16>, vector<16x32xbf16>, vector<16x32xbf16>, vector<16x32xbf16>, vector<16x32xbf16>, vector<16x32xbf16>, vector<16x32xbf16> -> vector<16x288xbf16>
    %121 = vector.extract_strided_slice %0 {offsets = [0, 1536], sizes = [16, 32], strides = [1, 1]} : vector<16x3872xbf16> to vector<16x32xbf16>
    %122 = vector.extract_strided_slice %0 {offsets = [0, 1568], sizes = [16, 32], strides = [1, 1]} : vector<16x3872xbf16> to vector<16x32xbf16>
    %123 = vector.extract_strided_slice %0 {offsets = [0, 1600], sizes = [16, 32], strides = [1, 1]} : vector<16x3872xbf16> to vector<16x32xbf16>
    %124 = vector.extract_strided_slice %0 {offsets = [0, 1888], sizes = [16, 32], strides = [1, 1]} : vector<16x3872xbf16> to vector<16x32xbf16>
    %125 = vector.extract_strided_slice %0 {offsets = [0, 1920], sizes = [16, 32], strides = [1, 1]} : vector<16x3872xbf16> to vector<16x32xbf16>
    %126 = vector.extract_strided_slice %0 {offsets = [0, 1952], sizes = [16, 32], strides = [1, 1]} : vector<16x3872xbf16> to vector<16x32xbf16>
    %127 = vector.extract_strided_slice %0 {offsets = [0, 2240], sizes = [16, 32], strides = [1, 1]} : vector<16x3872xbf16> to vector<16x32xbf16>
    %128 = vector.extract_strided_slice %0 {offsets = [0, 2272], sizes = [16, 32], strides = [1, 1]} : vector<16x3872xbf16> to vector<16x32xbf16>
    %129 = vector.extract_strided_slice %0 {offsets = [0, 2304], sizes = [16, 32], strides = [1, 1]} : vector<16x3872xbf16> to vector<16x32xbf16>
    %130 = tpu.concatenate %121, %122, %123, %124, %125, %126, %127, %128, %129 in 1 : vector<16x32xbf16>, vector<16x32xbf16>, vector<16x32xbf16>, vector<16x32xbf16>, vector<16x32xbf16>, vector<16x32xbf16>, vector<16x32xbf16>, vector<16x32xbf16>, vector<16x32xbf16> -> vector<16x288xbf16>
    %131 = vector.extract_strided_slice %0 {offsets = [0, 1600], sizes = [16, 32], strides = [1, 1]} : vector<16x3872xbf16> to vector<16x32xbf16>
    %132 = vector.extract_strided_slice %0 {offsets = [0, 1632], sizes = [16, 32], strides = [1, 1]} : vector<16x3872xbf16> to vector<16x32xbf16>
    %133 = vector.extract_strided_slice %0 {offsets = [0, 1664], sizes = [16, 32], strides = [1, 1]} : vector<16x3872xbf16> to vector<16x32xbf16>
    %134 = vector.extract_strided_slice %0 {offsets = [0, 1952], sizes = [16, 32], strides = [1, 1]} : vector<16x3872xbf16> to vector<16x32xbf16>
    %135 = vector.extract_strided_slice %0 {offsets = [0, 1984], sizes = [16, 32], strides = [1, 1]} : vector<16x3872xbf16> to vector<16x32xbf16>
    %136 = vector.extract_strided_slice %0 {offsets = [0, 2016], sizes = [16, 32], strides = [1, 1]} : vector<16x3872xbf16> to vector<16x32xbf16>
    %137 = vector.extract_strided_slice %0 {offsets = [0, 2304], sizes = [16, 32], strides = [1, 1]} : vector<16x3872xbf16> to vector<16x32xbf16>
    %138 = vector.extract_strided_slice %0 {offsets = [0, 2336], sizes = [16, 32], strides = [1, 1]} : vector<16x3872xbf16> to vector<16x32xbf16>
    %139 = vector.extract_strided_slice %0 {offsets = [0, 2368], sizes = [16, 32], strides = [1, 1]} : vector<16x3872xbf16> to vector<16x32xbf16>
    %140 = tpu.concatenate %131, %132, %133, %134, %135, %136, %137, %138, %139 in 1 : vector<16x32xbf16>, vector<16x32xbf16>, vector<16x32xbf16>, vector<16x32xbf16>, vector<16x32xbf16>, vector<16x32xbf16>, vector<16x32xbf16>, vector<16x32xbf16>, vector<16x32xbf16> -> vector<16x288xbf16>
    %141 = vector.extract_strided_slice %0 {offsets = [0, 1664], sizes = [16, 32], strides = [1, 1]} : vector<16x3872xbf16> to vector<16x32xbf16>
    %142 = vector.extract_strided_slice %0 {offsets = [0, 1696], sizes = [16, 32], strides = [1, 1]} : vector<16x3872xbf16> to vector<16x32xbf16>
    %143 = vector.extract_strided_slice %0 {offsets = [0, 1728], sizes = [16, 32], strides = [1, 1]} : vector<16x3872xbf16> to vector<16x32xbf16>
    %144 = vector.extract_strided_slice %0 {offsets = [0, 2016], sizes = [16, 32], strides = [1, 1]} : vector<16x3872xbf16> to vector<16x32xbf16>
    %145 = vector.extract_strided_slice %0 {offsets = [0, 2048], sizes = [16, 32], strides = [1, 1]} : vector<16x3872xbf16> to vector<16x32xbf16>
    %146 = vector.extract_strided_slice %0 {offsets = [0, 2080], sizes = [16, 32], strides = [1, 1]} : vector<16x3872xbf16> to vector<16x32xbf16>
    %147 = vector.extract_strided_slice %0 {offsets = [0, 2368], sizes = [16, 32], strides = [1, 1]} : vector<16x3872xbf16> to vector<16x32xbf16>
    %148 = vector.extract_strided_slice %0 {offsets = [0, 2400], sizes = [16, 32], strides = [1, 1]} : vector<16x3872xbf16> to vector<16x32xbf16>
    %149 = vector.extract_strided_slice %0 {offsets = [0, 2432], sizes = [16, 32], strides = [1, 1]} : vector<16x3872xbf16> to vector<16x32xbf16>
    %150 = tpu.concatenate %141, %142, %143, %144, %145, %146, %147, %148, %149 in 1 : vector<16x32xbf16>, vector<16x32xbf16>, vector<16x32xbf16>, vector<16x32xbf16>, vector<16x32xbf16>, vector<16x32xbf16>, vector<16x32xbf16>, vector<16x32xbf16>, vector<16x32xbf16> -> vector<16x288xbf16>
    %151 = vector.extract_strided_slice %0 {offsets = [0, 2112], sizes = [16, 32], strides = [1, 1]} : vector<16x3872xbf16> to vector<16x32xbf16>
    %152 = vector.extract_strided_slice %0 {offsets = [0, 2144], sizes = [16, 32], strides = [1, 1]} : vector<16x3872xbf16> to vector<16x32xbf16>
    %153 = vector.extract_strided_slice %0 {offsets = [0, 2176], sizes = [16, 32], strides = [1, 1]} : vector<16x3872xbf16> to vector<16x32xbf16>
    %154 = vector.extract_strided_slice %0 {offsets = [0, 2464], sizes = [16, 32], strides = [1, 1]} : vector<16x3872xbf16> to vector<16x32xbf16>
    %155 = vector.extract_strided_slice %0 {offsets = [0, 2496], sizes = [16, 32], strides = [1, 1]} : vector<16x3872xbf16> to vector<16x32xbf16>
    %156 = vector.extract_strided_slice %0 {offsets = [0, 2528], sizes = [16, 32], strides = [1, 1]} : vector<16x3872xbf16> to vector<16x32xbf16>
    %157 = vector.extract_strided_slice %0 {offsets = [0, 2816], sizes = [16, 32], strides = [1, 1]} : vector<16x3872xbf16> to vector<16x32xbf16>
    %158 = vector.extract_strided_slice %0 {offsets = [0, 2848], sizes = [16, 32], strides = [1, 1]} : vector<16x3872xbf16> to vector<16x32xbf16>
    %159 = vector.extract_strided_slice %0 {offsets = [0, 2880], sizes = [16, 32], strides = [1, 1]} : vector<16x3872xbf16> to vector<16x32xbf16>
    %160 = tpu.concatenate %151, %152, %153, %154, %155, %156, %157, %158, %159 in 1 : vector<16x32xbf16>, vector<16x32xbf16>, vector<16x32xbf16>, vector<16x32xbf16>, vector<16x32xbf16>, vector<16x32xbf16>, vector<16x32xbf16>, vector<16x32xbf16>, vector<16x32xbf16> -> vector<16x288xbf16>
    %161 = vector.extract_strided_slice %0 {offsets = [0, 2176], sizes = [16, 32], strides = [1, 1]} : vector<16x3872xbf16> to vector<16x32xbf16>
    %162 = vector.extract_strided_slice %0 {offsets = [0, 2208], sizes = [16, 32], strides = [1, 1]} : vector<16x3872xbf16> to vector<16x32xbf16>
    %163 = vector.extract_strided_slice %0 {offsets = [0, 2240], sizes = [16, 32], strides = [1, 1]} : vector<16x3872xbf16> to vector<16x32xbf16>
    %164 = vector.extract_strided_slice %0 {offsets = [0, 2528], sizes = [16, 32], strides = [1, 1]} : vector<16x3872xbf16> to vector<16x32xbf16>
    %165 = vector.extract_strided_slice %0 {offsets = [0, 2560], sizes = [16, 32], strides = [1, 1]} : vector<16x3872xbf16> to vector<16x32xbf16>
    %166 = vector.extract_strided_slice %0 {offsets = [0, 2592], sizes = [16, 32], strides = [1, 1]} : vector<16x3872xbf16> to vector<16x32xbf16>
    %167 = vector.extract_strided_slice %0 {offsets = [0, 2880], sizes = [16, 32], strides = [1, 1]} : vector<16x3872xbf16> to vector<16x32xbf16>
    %168 = vector.extract_strided_slice %0 {offsets = [0, 2912], sizes = [16, 32], strides = [1, 1]} : vector<16x3872xbf16> to vector<16x32xbf16>
    %169 = vector.extract_strided_slice %0 {offsets = [0, 2944], sizes = [16, 32], strides = [1, 1]} : vector<16x3872xbf16> to vector<16x32xbf16>
    %170 = tpu.concatenate %161, %162, %163, %164, %165, %166, %167, %168, %169 in 1 : vector<16x32xbf16>, vector<16x32xbf16>, vector<16x32xbf16>, vector<16x32xbf16>, vector<16x32xbf16>, vector<16x32xbf16>, vector<16x32xbf16>, vector<16x32xbf16>, vector<16x32xbf16> -> vector<16x288xbf16>
    %171 = vector.extract_strided_slice %0 {offsets = [0, 2240], sizes = [16, 32], strides = [1, 1]} : vector<16x3872xbf16> to vector<16x32xbf16>
    %172 = vector.extract_strided_slice %0 {offsets = [0, 2272], sizes = [16, 32], strides = [1, 1]} : vector<16x3872xbf16> to vector<16x32xbf16>
    %173 = vector.extract_strided_slice %0 {offsets = [0, 2304], sizes = [16, 32], strides = [1, 1]} : vector<16x3872xbf16> to vector<16x32xbf16>
    %174 = vector.extract_strided_slice %0 {offsets = [0, 2592], sizes = [16, 32], strides = [1, 1]} : vector<16x3872xbf16> to vector<16x32xbf16>
    %175 = vector.extract_strided_slice %0 {offsets = [0, 2624], sizes = [16, 32], strides = [1, 1]} : vector<16x3872xbf16> to vector<16x32xbf16>
    %176 = vector.extract_strided_slice %0 {offsets = [0, 2656], sizes = [16, 32], strides = [1, 1]} : vector<16x3872xbf16> to vector<16x32xbf16>
    %177 = vector.extract_strided_slice %0 {offsets = [0, 2944], sizes = [16, 32], strides = [1, 1]} : vector<16x3872xbf16> to vector<16x32xbf16>
    %178 = vector.extract_strided_slice %0 {offsets = [0, 2976], sizes = [16, 32], strides = [1, 1]} : vector<16x3872xbf16> to vector<16x32xbf16>
    %179 = vector.extract_strided_slice %0 {offsets = [0, 3008], sizes = [16, 32], strides = [1, 1]} : vector<16x3872xbf16> to vector<16x32xbf16>
    %180 = tpu.concatenate %171, %172, %173, %174, %175, %176, %177, %178, %179 in 1 : vector<16x32xbf16>, vector<16x32xbf16>, vector<16x32xbf16>, vector<16x32xbf16>, vector<16x32xbf16>, vector<16x32xbf16>, vector<16x32xbf16>, vector<16x32xbf16>, vector<16x32xbf16> -> vector<16x288xbf16>
    %181 = vector.extract_strided_slice %0 {offsets = [0, 2304], sizes = [16, 32], strides = [1, 1]} : vector<16x3872xbf16> to vector<16x32xbf16>
    %182 = vector.extract_strided_slice %0 {offsets = [0, 2336], sizes = [16, 32], strides = [1, 1]} : vector<16x3872xbf16> to vector<16x32xbf16>
    %183 = vector.extract_strided_slice %0 {offsets = [0, 2368], sizes = [16, 32], strides = [1, 1]} : vector<16x3872xbf16> to vector<16x32xbf16>
    %184 = vector.extract_strided_slice %0 {offsets = [0, 2656], sizes = [16, 32], strides = [1, 1]} : vector<16x3872xbf16> to vector<16x32xbf16>
    %185 = vector.extract_strided_slice %0 {offsets = [0, 2688], sizes = [16, 32], strides = [1, 1]} : vector<16x3872xbf16> to vector<16x32xbf16>
    %186 = vector.extract_strided_slice %0 {offsets = [0, 2720], sizes = [16, 32], strides = [1, 1]} : vector<16x3872xbf16> to vector<16x32xbf16>
    %187 = vector.extract_strided_slice %0 {offsets = [0, 3008], sizes = [16, 32], strides = [1, 1]} : vector<16x3872xbf16> to vector<16x32xbf16>
    %188 = vector.extract_strided_slice %0 {offsets = [0, 3040], sizes = [16, 32], strides = [1, 1]} : vector<16x3872xbf16> to vector<16x32xbf16>
    %189 = vector.extract_strided_slice %0 {offsets = [0, 3072], sizes = [16, 32], strides = [1, 1]} : vector<16x3872xbf16> to vector<16x32xbf16>
    %190 = tpu.concatenate %181, %182, %183, %184, %185, %186, %187, %188, %189 in 1 : vector<16x32xbf16>, vector<16x32xbf16>, vector<16x32xbf16>, vector<16x32xbf16>, vector<16x32xbf16>, vector<16x32xbf16>, vector<16x32xbf16>, vector<16x32xbf16>, vector<16x32xbf16> -> vector<16x288xbf16>
    %191 = vector.extract_strided_slice %0 {offsets = [0, 2368], sizes = [16, 32], strides = [1, 1]} : vector<16x3872xbf16> to vector<16x32xbf16>
    %192 = vector.extract_strided_slice %0 {offsets = [0, 2400], sizes = [16, 32], strides = [1, 1]} : vector<16x3872xbf16> to vector<16x32xbf16>
    %193 = vector.extract_strided_slice %0 {offsets = [0, 2432], sizes = [16, 32], strides = [1, 1]} : vector<16x3872xbf16> to vector<16x32xbf16>
    %194 = vector.extract_strided_slice %0 {offsets = [0, 2720], sizes = [16, 32], strides = [1, 1]} : vector<16x3872xbf16> to vector<16x32xbf16>
    %195 = vector.extract_strided_slice %0 {offsets = [0, 2752], sizes = [16, 32], strides = [1, 1]} : vector<16x3872xbf16> to vector<16x32xbf16>
    %196 = vector.extract_strided_slice %0 {offsets = [0, 2784], sizes = [16, 32], strides = [1, 1]} : vector<16x3872xbf16> to vector<16x32xbf16>
    %197 = vector.extract_strided_slice %0 {offsets = [0, 3072], sizes = [16, 32], strides = [1, 1]} : vector<16x3872xbf16> to vector<16x32xbf16>
    %198 = vector.extract_strided_slice %0 {offsets = [0, 3104], sizes = [16, 32], strides = [1, 1]} : vector<16x3872xbf16> to vector<16x32xbf16>
    %199 = vector.extract_strided_slice %0 {offsets = [0, 3136], sizes = [16, 32], strides = [1, 1]} : vector<16x3872xbf16> to vector<16x32xbf16>
    %200 = tpu.concatenate %191, %192, %193, %194, %195, %196, %197, %198, %199 in 1 : vector<16x32xbf16>, vector<16x32xbf16>, vector<16x32xbf16>, vector<16x32xbf16>, vector<16x32xbf16>, vector<16x32xbf16>, vector<16x32xbf16>, vector<16x32xbf16>, vector<16x32xbf16> -> vector<16x288xbf16>
    %201 = vector.extract_strided_slice %0 {offsets = [0, 2816], sizes = [16, 32], strides = [1, 1]} : vector<16x3872xbf16> to vector<16x32xbf16>
    %202 = vector.extract_strided_slice %0 {offsets = [0, 2848], sizes = [16, 32], strides = [1, 1]} : vector<16x3872xbf16> to vector<16x32xbf16>
    %203 = vector.extract_strided_slice %0 {offsets = [0, 2880], sizes = [16, 32], strides = [1, 1]} : vector<16x3872xbf16> to vector<16x32xbf16>
    %204 = vector.extract_strided_slice %0 {offsets = [0, 3168], sizes = [16, 32], strides = [1, 1]} : vector<16x3872xbf16> to vector<16x32xbf16>
    %205 = vector.extract_strided_slice %0 {offsets = [0, 3200], sizes = [16, 32], strides = [1, 1]} : vector<16x3872xbf16> to vector<16x32xbf16>
    %206 = vector.extract_strided_slice %0 {offsets = [0, 3232], sizes = [16, 32], strides = [1, 1]} : vector<16x3872xbf16> to vector<16x32xbf16>
    %207 = vector.extract_strided_slice %0 {offsets = [0, 3520], sizes = [16, 32], strides = [1, 1]} : vector<16x3872xbf16> to vector<16x32xbf16>
    %208 = vector.extract_strided_slice %0 {offsets = [0, 3552], sizes = [16, 32], strides = [1, 1]} : vector<16x3872xbf16> to vector<16x32xbf16>
    %209 = vector.extract_strided_slice %0 {offsets = [0, 3584], sizes = [16, 32], strides = [1, 1]} : vector<16x3872xbf16> to vector<16x32xbf16>
    %210 = tpu.concatenate %201, %202, %203, %204, %205, %206, %207, %208, %209 in 1 : vector<16x32xbf16>, vector<16x32xbf16>, vector<16x32xbf16>, vector<16x32xbf16>, vector<16x32xbf16>, vector<16x32xbf16>, vector<16x32xbf16>, vector<16x32xbf16>, vector<16x32xbf16> -> vector<16x288xbf16>
    %211 = vector.extract_strided_slice %0 {offsets = [0, 2880], sizes = [16, 32], strides = [1, 1]} : vector<16x3872xbf16> to vector<16x32xbf16>
    %212 = vector.extract_strided_slice %0 {offsets = [0, 2912], sizes = [16, 32], strides = [1, 1]} : vector<16x3872xbf16> to vector<16x32xbf16>
    %213 = vector.extract_strided_slice %0 {offsets = [0, 2944], sizes = [16, 32], strides = [1, 1]} : vector<16x3872xbf16> to vector<16x32xbf16>
    %214 = vector.extract_strided_slice %0 {offsets = [0, 3232], sizes = [16, 32], strides = [1, 1]} : vector<16x3872xbf16> to vector<16x32xbf16>
    %215 = vector.extract_strided_slice %0 {offsets = [0, 3264], sizes = [16, 32], strides = [1, 1]} : vector<16x3872xbf16> to vector<16x32xbf16>
    %216 = vector.extract_strided_slice %0 {offsets = [0, 3296], sizes = [16, 32], strides = [1, 1]} : vector<16x3872xbf16> to vector<16x32xbf16>
    %217 = vector.extract_strided_slice %0 {offsets = [0, 3584], sizes = [16, 32], strides = [1, 1]} : vector<16x3872xbf16> to vector<16x32xbf16>
    %218 = vector.extract_strided_slice %0 {offsets = [0, 3616], sizes = [16, 32], strides = [1, 1]} : vector<16x3872xbf16> to vector<16x32xbf16>
    %219 = vector.extract_strided_slice %0 {offsets = [0, 3648], sizes = [16, 32], strides = [1, 1]} : vector<16x3872xbf16> to vector<16x32xbf16>
    %220 = tpu.concatenate %211, %212, %213, %214, %215, %216, %217, %218, %219 in 1 : vector<16x32xbf16>, vector<16x32xbf16>, vector<16x32xbf16>, vector<16x32xbf16>, vector<16x32xbf16>, vector<16x32xbf16>, vector<16x32xbf16>, vector<16x32xbf16>, vector<16x32xbf16> -> vector<16x288xbf16>
    %221 = vector.extract_strided_slice %0 {offsets = [0, 2944], sizes = [16, 32], strides = [1, 1]} : vector<16x3872xbf16> to vector<16x32xbf16>
    %222 = vector.extract_strided_slice %0 {offsets = [0, 2976], sizes = [16, 32], strides = [1, 1]} : vector<16x3872xbf16> to vector<16x32xbf16>
    %223 = vector.extract_strided_slice %0 {offsets = [0, 3008], sizes = [16, 32], strides = [1, 1]} : vector<16x3872xbf16> to vector<16x32xbf16>
    %224 = vector.extract_strided_slice %0 {offsets = [0, 3296], sizes = [16, 32], strides = [1, 1]} : vector<16x3872xbf16> to vector<16x32xbf16>
    %225 = vector.extract_strided_slice %0 {offsets = [0, 3328], sizes = [16, 32], strides = [1, 1]} : vector<16x3872xbf16> to vector<16x32xbf16>
    %226 = vector.extract_strided_slice %0 {offsets = [0, 3360], sizes = [16, 32], strides = [1, 1]} : vector<16x3872xbf16> to vector<16x32xbf16>
    %227 = vector.extract_strided_slice %0 {offsets = [0, 3648], sizes = [16, 32], strides = [1, 1]} : vector<16x3872xbf16> to vector<16x32xbf16>
    %228 = vector.extract_strided_slice %0 {offsets = [0, 3680], sizes = [16, 32], strides = [1, 1]} : vector<16x3872xbf16> to vector<16x32xbf16>
    %229 = vector.extract_strided_slice %0 {offsets = [0, 3712], sizes = [16, 32], strides = [1, 1]} : vector<16x3872xbf16> to vector<16x32xbf16>
    %230 = tpu.concatenate %221, %222, %223, %224, %225, %226, %227, %228, %229 in 1 : vector<16x32xbf16>, vector<16x32xbf16>, vector<16x32xbf16>, vector<16x32xbf16>, vector<16x32xbf16>, vector<16x32xbf16>, vector<16x32xbf16>, vector<16x32xbf16>, vector<16x32xbf16> -> vector<16x288xbf16>
    %231 = vector.extract_strided_slice %0 {offsets = [0, 3008], sizes = [16, 32], strides = [1, 1]} : vector<16x3872xbf16> to vector<16x32xbf16>
    %232 = vector.extract_strided_slice %0 {offsets = [0, 3040], sizes = [16, 32], strides = [1, 1]} : vector<16x3872xbf16> to vector<16x32xbf16>
    %233 = vector.extract_strided_slice %0 {offsets = [0, 3072], sizes = [16, 32], strides = [1, 1]} : vector<16x3872xbf16> to vector<16x32xbf16>
    %234 = vector.extract_strided_slice %0 {offsets = [0, 3360], sizes = [16, 32], strides = [1, 1]} : vector<16x3872xbf16> to vector<16x32xbf16>
    %235 = vector.extract_strided_slice %0 {offsets = [0, 3392], sizes = [16, 32], strides = [1, 1]} : vector<16x3872xbf16> to vector<16x32xbf16>
    %236 = vector.extract_strided_slice %0 {offsets = [0, 3424], sizes = [16, 32], strides = [1, 1]} : vector<16x3872xbf16> to vector<16x32xbf16>
    %237 = vector.extract_strided_slice %0 {offsets = [0, 3712], sizes = [16, 32], strides = [1, 1]} : vector<16x3872xbf16> to vector<16x32xbf16>
    %238 = vector.extract_strided_slice %0 {offsets = [0, 3744], sizes = [16, 32], strides = [1, 1]} : vector<16x3872xbf16> to vector<16x32xbf16>
    %239 = vector.extract_strided_slice %0 {offsets = [0, 3776], sizes = [16, 32], strides = [1, 1]} : vector<16x3872xbf16> to vector<16x32xbf16>
    %240 = tpu.concatenate %231, %232, %233, %234, %235, %236, %237, %238, %239 in 1 : vector<16x32xbf16>, vector<16x32xbf16>, vector<16x32xbf16>, vector<16x32xbf16>, vector<16x32xbf16>, vector<16x32xbf16>, vector<16x32xbf16>, vector<16x32xbf16>, vector<16x32xbf16> -> vector<16x288xbf16>
    %241 = vector.extract_strided_slice %0 {offsets = [0, 3072], sizes = [16, 32], strides = [1, 1]} : vector<16x3872xbf16> to vector<16x32xbf16>
    %242 = vector.extract_strided_slice %0 {offsets = [0, 3104], sizes = [16, 32], strides = [1, 1]} : vector<16x3872xbf16> to vector<16x32xbf16>
    %243 = vector.extract_strided_slice %0 {offsets = [0, 3136], sizes = [16, 32], strides = [1, 1]} : vector<16x3872xbf16> to vector<16x32xbf16>
    %244 = vector.extract_strided_slice %0 {offsets = [0, 3424], sizes = [16, 32], strides = [1, 1]} : vector<16x3872xbf16> to vector<16x32xbf16>
    %245 = vector.extract_strided_slice %0 {offsets = [0, 3456], sizes = [16, 32], strides = [1, 1]} : vector<16x3872xbf16> to vector<16x32xbf16>
    %246 = vector.extract_strided_slice %0 {offsets = [0, 3488], sizes = [16, 32], strides = [1, 1]} : vector<16x3872xbf16> to vector<16x32xbf16>
    %247 = vector.extract_strided_slice %0 {offsets = [0, 3776], sizes = [16, 32], strides = [1, 1]} : vector<16x3872xbf16> to vector<16x32xbf16>
    %248 = vector.extract_strided_slice %0 {offsets = [0, 3808], sizes = [16, 32], strides = [1, 1]} : vector<16x3872xbf16> to vector<16x32xbf16>
    %249 = vector.extract_strided_slice %0 {offsets = [0, 3840], sizes = [16, 32], strides = [1, 1]} : vector<16x3872xbf16> to vector<16x32xbf16>
    %250 = tpu.concatenate %241, %242, %243, %244, %245, %246, %247, %248, %249 in 1 : vector<16x32xbf16>, vector<16x32xbf16>, vector<16x32xbf16>, vector<16x32xbf16>, vector<16x32xbf16>, vector<16x32xbf16>, vector<16x32xbf16>, vector<16x32xbf16>, vector<16x32xbf16> -> vector<16x288xbf16>
    %251 = tpu.concatenate %10, %20, %30, %40, %50, %60, %70, %80, %90, %100, %110, %120, %130, %140, %150, %160 in 0 : vector<16x288xbf16>, vector<16x288xbf16>, vector<16x288xbf16>, vector<16x288xbf16>, vector<16x288xbf16>, vector<16x288xbf16>, vector<16x288xbf16>, vector<16x288xbf16>, vector<16x288xbf16>, vector<16x288xbf16>, vector<16x288xbf16>, vector<16x288xbf16>, vector<16x288xbf16>, vector<16x288xbf16>, vector<16x288xbf16>, vector<16x288xbf16> -> vector<256x288xbf16>
    %252 = tpu.concatenate %170, %180, %190, %200, %210, %220, %230, %240, %250 in 0 : vector<16x288xbf16>, vector<16x288xbf16>, vector<16x288xbf16>, vector<16x288xbf16>, vector<16x288xbf16>, vector<16x288xbf16>, vector<16x288xbf16>, vector<16x288xbf16>, vector<16x288xbf16> -> vector<144x288xbf16>
    %253 = tpu.concatenate %251, %252 in 0 : vector<256x288xbf16>, vector<144x288xbf16> -> vector<400x288xbf16>
    %c0_1 = arith.constant 0 : index
    %c0_2 = arith.constant 0 : index
    %254 = vector.load %arg2[%c0_1, %c0_2] : memref<288x64xbf16, #tpu.memory_space<vmem>>, vector<288x64xbf16>
    %cst = arith.constant dense<0.000000e+00> : vector<400x64xf32>
    %255 = tpu.matmul %253, %254, %cst {dimension_numbers = #tpu.dot_dimension_numbers<[1], [0], [0], [1], [0, 0, 1, 1], [], []>} : vector<400x288xbf16>, vector<288x64xbf16>, vector<400x64xf32> -> vector<400x64xf32>
    %c0_3 = arith.constant 0 : index
    %c0_4 = arith.constant 0 : index
    %256 = vector.load %arg3[%c0_3, %c0_4] : memref<1x64xf32, #tpu.memory_space<vmem>>, vector<1x64xf32>
    %257 = vector.broadcast %256 : vector<1x64xf32> to vector<400x64xf32>
    %258 = arith.addf %255, %257 : vector<400x64xf32>
    %cst_5 = arith.constant 0.000000e+00 : f32
    %259 = vector.broadcast %cst_5 : f32 to vector<400x64xf32>
    %260 = arith.maximumf %258, %259 : vector<400x64xf32>
    %261 = arith.truncf %260 : vector<400x64xf32> to vector<400x64xbf16>
    %262 = vector.extract_strided_slice %261 {offsets = [0, 0], sizes = [16, 64], strides = [1, 1]} : vector<400x64xbf16> to vector<16x64xbf16>
    %263 = vector.extract_strided_slice %261 {offsets = [16, 0], sizes = [16, 64], strides = [1, 1]} : vector<400x64xbf16> to vector<16x64xbf16>
    %264 = vector.extract_strided_slice %261 {offsets = [32, 0], sizes = [16, 64], strides = [1, 1]} : vector<400x64xbf16> to vector<16x64xbf16>
    %265 = vector.extract_strided_slice %261 {offsets = [80, 0], sizes = [16, 64], strides = [1, 1]} : vector<400x64xbf16> to vector<16x64xbf16>
    %266 = vector.extract_strided_slice %261 {offsets = [96, 0], sizes = [16, 64], strides = [1, 1]} : vector<400x64xbf16> to vector<16x64xbf16>
    %267 = vector.extract_strided_slice %261 {offsets = [112, 0], sizes = [16, 64], strides = [1, 1]} : vector<400x64xbf16> to vector<16x64xbf16>
    %268 = vector.extract_strided_slice %261 {offsets = [160, 0], sizes = [16, 64], strides = [1, 1]} : vector<400x64xbf16> to vector<16x64xbf16>
    %269 = vector.extract_strided_slice %261 {offsets = [176, 0], sizes = [16, 64], strides = [1, 1]} : vector<400x64xbf16> to vector<16x64xbf16>
    %270 = vector.extract_strided_slice %261 {offsets = [192, 0], sizes = [16, 64], strides = [1, 1]} : vector<400x64xbf16> to vector<16x64xbf16>
    %271 = tpu.concatenate %262, %263, %264, %265, %266, %267, %268, %269, %270 in 1 : vector<16x64xbf16>, vector<16x64xbf16>, vector<16x64xbf16>, vector<16x64xbf16>, vector<16x64xbf16>, vector<16x64xbf16>, vector<16x64xbf16>, vector<16x64xbf16>, vector<16x64xbf16> -> vector<16x576xbf16>
    %272 = vector.extract_strided_slice %261 {offsets = [16, 0], sizes = [16, 64], strides = [1, 1]} : vector<400x64xbf16> to vector<16x64xbf16>
    %273 = vector.extract_strided_slice %261 {offsets = [32, 0], sizes = [16, 64], strides = [1, 1]} : vector<400x64xbf16> to vector<16x64xbf16>
    %274 = vector.extract_strided_slice %261 {offsets = [48, 0], sizes = [16, 64], strides = [1, 1]} : vector<400x64xbf16> to vector<16x64xbf16>
    %275 = vector.extract_strided_slice %261 {offsets = [96, 0], sizes = [16, 64], strides = [1, 1]} : vector<400x64xbf16> to vector<16x64xbf16>
    %276 = vector.extract_strided_slice %261 {offsets = [112, 0], sizes = [16, 64], strides = [1, 1]} : vector<400x64xbf16> to vector<16x64xbf16>
    %277 = vector.extract_strided_slice %261 {offsets = [128, 0], sizes = [16, 64], strides = [1, 1]} : vector<400x64xbf16> to vector<16x64xbf16>
    %278 = vector.extract_strided_slice %261 {offsets = [176, 0], sizes = [16, 64], strides = [1, 1]} : vector<400x64xbf16> to vector<16x64xbf16>
    %279 = vector.extract_strided_slice %261 {offsets = [192, 0], sizes = [16, 64], strides = [1, 1]} : vector<400x64xbf16> to vector<16x64xbf16>
    %280 = vector.extract_strided_slice %261 {offsets = [208, 0], sizes = [16, 64], strides = [1, 1]} : vector<400x64xbf16> to vector<16x64xbf16>
    %281 = tpu.concatenate %272, %273, %274, %275, %276, %277, %278, %279, %280 in 1 : vector<16x64xbf16>, vector<16x64xbf16>, vector<16x64xbf16>, vector<16x64xbf16>, vector<16x64xbf16>, vector<16x64xbf16>, vector<16x64xbf16>, vector<16x64xbf16>, vector<16x64xbf16> -> vector<16x576xbf16>
    %282 = vector.extract_strided_slice %261 {offsets = [32, 0], sizes = [16, 64], strides = [1, 1]} : vector<400x64xbf16> to vector<16x64xbf16>
    %283 = vector.extract_strided_slice %261 {offsets = [48, 0], sizes = [16, 64], strides = [1, 1]} : vector<400x64xbf16> to vector<16x64xbf16>
    %284 = vector.extract_strided_slice %261 {offsets = [64, 0], sizes = [16, 64], strides = [1, 1]} : vector<400x64xbf16> to vector<16x64xbf16>
    %285 = vector.extract_strided_slice %261 {offsets = [112, 0], sizes = [16, 64], strides = [1, 1]} : vector<400x64xbf16> to vector<16x64xbf16>
    %286 = vector.extract_strided_slice %261 {offsets = [128, 0], sizes = [16, 64], strides = [1, 1]} : vector<400x64xbf16> to vector<16x64xbf16>
    %287 = vector.extract_strided_slice %261 {offsets = [144, 0], sizes = [16, 64], strides = [1, 1]} : vector<400x64xbf16> to vector<16x64xbf16>
    %288 = vector.extract_strided_slice %261 {offsets = [192, 0], sizes = [16, 64], strides = [1, 1]} : vector<400x64xbf16> to vector<16x64xbf16>
    %289 = vector.extract_strided_slice %261 {offsets = [208, 0], sizes = [16, 64], strides = [1, 1]} : vector<400x64xbf16> to vector<16x64xbf16>
    %290 = vector.extract_strided_slice %261 {offsets = [224, 0], sizes = [16, 64], strides = [1, 1]} : vector<400x64xbf16> to vector<16x64xbf16>
    %291 = tpu.concatenate %282, %283, %284, %285, %286, %287, %288, %289, %290 in 1 : vector<16x64xbf16>, vector<16x64xbf16>, vector<16x64xbf16>, vector<16x64xbf16>, vector<16x64xbf16>, vector<16x64xbf16>, vector<16x64xbf16>, vector<16x64xbf16>, vector<16x64xbf16> -> vector<16x576xbf16>
    %292 = vector.extract_strided_slice %261 {offsets = [80, 0], sizes = [16, 64], strides = [1, 1]} : vector<400x64xbf16> to vector<16x64xbf16>
    %293 = vector.extract_strided_slice %261 {offsets = [96, 0], sizes = [16, 64], strides = [1, 1]} : vector<400x64xbf16> to vector<16x64xbf16>
    %294 = vector.extract_strided_slice %261 {offsets = [112, 0], sizes = [16, 64], strides = [1, 1]} : vector<400x64xbf16> to vector<16x64xbf16>
    %295 = vector.extract_strided_slice %261 {offsets = [160, 0], sizes = [16, 64], strides = [1, 1]} : vector<400x64xbf16> to vector<16x64xbf16>
    %296 = vector.extract_strided_slice %261 {offsets = [176, 0], sizes = [16, 64], strides = [1, 1]} : vector<400x64xbf16> to vector<16x64xbf16>
    %297 = vector.extract_strided_slice %261 {offsets = [192, 0], sizes = [16, 64], strides = [1, 1]} : vector<400x64xbf16> to vector<16x64xbf16>
    %298 = vector.extract_strided_slice %261 {offsets = [240, 0], sizes = [16, 64], strides = [1, 1]} : vector<400x64xbf16> to vector<16x64xbf16>
    %299 = vector.extract_strided_slice %261 {offsets = [256, 0], sizes = [16, 64], strides = [1, 1]} : vector<400x64xbf16> to vector<16x64xbf16>
    %300 = vector.extract_strided_slice %261 {offsets = [272, 0], sizes = [16, 64], strides = [1, 1]} : vector<400x64xbf16> to vector<16x64xbf16>
    %301 = tpu.concatenate %292, %293, %294, %295, %296, %297, %298, %299, %300 in 1 : vector<16x64xbf16>, vector<16x64xbf16>, vector<16x64xbf16>, vector<16x64xbf16>, vector<16x64xbf16>, vector<16x64xbf16>, vector<16x64xbf16>, vector<16x64xbf16>, vector<16x64xbf16> -> vector<16x576xbf16>
    %302 = vector.extract_strided_slice %261 {offsets = [96, 0], sizes = [16, 64], strides = [1, 1]} : vector<400x64xbf16> to vector<16x64xbf16>
    %303 = vector.extract_strided_slice %261 {offsets = [112, 0], sizes = [16, 64], strides = [1, 1]} : vector<400x64xbf16> to vector<16x64xbf16>
    %304 = vector.extract_strided_slice %261 {offsets = [128, 0], sizes = [16, 64], strides = [1, 1]} : vector<400x64xbf16> to vector<16x64xbf16>
    %305 = vector.extract_strided_slice %261 {offsets = [176, 0], sizes = [16, 64], strides = [1, 1]} : vector<400x64xbf16> to vector<16x64xbf16>
    %306 = vector.extract_strided_slice %261 {offsets = [192, 0], sizes = [16, 64], strides = [1, 1]} : vector<400x64xbf16> to vector<16x64xbf16>
    %307 = vector.extract_strided_slice %261 {offsets = [208, 0], sizes = [16, 64], strides = [1, 1]} : vector<400x64xbf16> to vector<16x64xbf16>
    %308 = vector.extract_strided_slice %261 {offsets = [256, 0], sizes = [16, 64], strides = [1, 1]} : vector<400x64xbf16> to vector<16x64xbf16>
    %309 = vector.extract_strided_slice %261 {offsets = [272, 0], sizes = [16, 64], strides = [1, 1]} : vector<400x64xbf16> to vector<16x64xbf16>
    %310 = vector.extract_strided_slice %261 {offsets = [288, 0], sizes = [16, 64], strides = [1, 1]} : vector<400x64xbf16> to vector<16x64xbf16>
    %311 = tpu.concatenate %302, %303, %304, %305, %306, %307, %308, %309, %310 in 1 : vector<16x64xbf16>, vector<16x64xbf16>, vector<16x64xbf16>, vector<16x64xbf16>, vector<16x64xbf16>, vector<16x64xbf16>, vector<16x64xbf16>, vector<16x64xbf16>, vector<16x64xbf16> -> vector<16x576xbf16>
    %312 = vector.extract_strided_slice %261 {offsets = [112, 0], sizes = [16, 64], strides = [1, 1]} : vector<400x64xbf16> to vector<16x64xbf16>
    %313 = vector.extract_strided_slice %261 {offsets = [128, 0], sizes = [16, 64], strides = [1, 1]} : vector<400x64xbf16> to vector<16x64xbf16>
    %314 = vector.extract_strided_slice %261 {offsets = [144, 0], sizes = [16, 64], strides = [1, 1]} : vector<400x64xbf16> to vector<16x64xbf16>
    %315 = vector.extract_strided_slice %261 {offsets = [192, 0], sizes = [16, 64], strides = [1, 1]} : vector<400x64xbf16> to vector<16x64xbf16>
    %316 = vector.extract_strided_slice %261 {offsets = [208, 0], sizes = [16, 64], strides = [1, 1]} : vector<400x64xbf16> to vector<16x64xbf16>
    %317 = vector.extract_strided_slice %261 {offsets = [224, 0], sizes = [16, 64], strides = [1, 1]} : vector<400x64xbf16> to vector<16x64xbf16>
    %318 = vector.extract_strided_slice %261 {offsets = [272, 0], sizes = [16, 64], strides = [1, 1]} : vector<400x64xbf16> to vector<16x64xbf16>
    %319 = vector.extract_strided_slice %261 {offsets = [288, 0], sizes = [16, 64], strides = [1, 1]} : vector<400x64xbf16> to vector<16x64xbf16>
    %320 = vector.extract_strided_slice %261 {offsets = [304, 0], sizes = [16, 64], strides = [1, 1]} : vector<400x64xbf16> to vector<16x64xbf16>
    %321 = tpu.concatenate %312, %313, %314, %315, %316, %317, %318, %319, %320 in 1 : vector<16x64xbf16>, vector<16x64xbf16>, vector<16x64xbf16>, vector<16x64xbf16>, vector<16x64xbf16>, vector<16x64xbf16>, vector<16x64xbf16>, vector<16x64xbf16>, vector<16x64xbf16> -> vector<16x576xbf16>
    %322 = vector.extract_strided_slice %261 {offsets = [160, 0], sizes = [16, 64], strides = [1, 1]} : vector<400x64xbf16> to vector<16x64xbf16>
    %323 = vector.extract_strided_slice %261 {offsets = [176, 0], sizes = [16, 64], strides = [1, 1]} : vector<400x64xbf16> to vector<16x64xbf16>
    %324 = vector.extract_strided_slice %261 {offsets = [192, 0], sizes = [16, 64], strides = [1, 1]} : vector<400x64xbf16> to vector<16x64xbf16>
    %325 = vector.extract_strided_slice %261 {offsets = [240, 0], sizes = [16, 64], strides = [1, 1]} : vector<400x64xbf16> to vector<16x64xbf16>
    %326 = vector.extract_strided_slice %261 {offsets = [256, 0], sizes = [16, 64], strides = [1, 1]} : vector<400x64xbf16> to vector<16x64xbf16>
    %327 = vector.extract_strided_slice %261 {offsets = [272, 0], sizes = [16, 64], strides = [1, 1]} : vector<400x64xbf16> to vector<16x64xbf16>
    %328 = vector.extract_strided_slice %261 {offsets = [320, 0], sizes = [16, 64], strides = [1, 1]} : vector<400x64xbf16> to vector<16x64xbf16>
    %329 = vector.extract_strided_slice %261 {offsets = [336, 0], sizes = [16, 64], strides = [1, 1]} : vector<400x64xbf16> to vector<16x64xbf16>
    %330 = vector.extract_strided_slice %261 {offsets = [352, 0], sizes = [16, 64], strides = [1, 1]} : vector<400x64xbf16> to vector<16x64xbf16>
    %331 = tpu.concatenate %322, %323, %324, %325, %326, %327, %328, %329, %330 in 1 : vector<16x64xbf16>, vector<16x64xbf16>, vector<16x64xbf16>, vector<16x64xbf16>, vector<16x64xbf16>, vector<16x64xbf16>, vector<16x64xbf16>, vector<16x64xbf16>, vector<16x64xbf16> -> vector<16x576xbf16>
    %332 = vector.extract_strided_slice %261 {offsets = [176, 0], sizes = [16, 64], strides = [1, 1]} : vector<400x64xbf16> to vector<16x64xbf16>
    %333 = vector.extract_strided_slice %261 {offsets = [192, 0], sizes = [16, 64], strides = [1, 1]} : vector<400x64xbf16> to vector<16x64xbf16>
    %334 = vector.extract_strided_slice %261 {offsets = [208, 0], sizes = [16, 64], strides = [1, 1]} : vector<400x64xbf16> to vector<16x64xbf16>
    %335 = vector.extract_strided_slice %261 {offsets = [256, 0], sizes = [16, 64], strides = [1, 1]} : vector<400x64xbf16> to vector<16x64xbf16>
    %336 = vector.extract_strided_slice %261 {offsets = [272, 0], sizes = [16, 64], strides = [1, 1]} : vector<400x64xbf16> to vector<16x64xbf16>
    %337 = vector.extract_strided_slice %261 {offsets = [288, 0], sizes = [16, 64], strides = [1, 1]} : vector<400x64xbf16> to vector<16x64xbf16>
    %338 = vector.extract_strided_slice %261 {offsets = [336, 0], sizes = [16, 64], strides = [1, 1]} : vector<400x64xbf16> to vector<16x64xbf16>
    %339 = vector.extract_strided_slice %261 {offsets = [352, 0], sizes = [16, 64], strides = [1, 1]} : vector<400x64xbf16> to vector<16x64xbf16>
    %340 = vector.extract_strided_slice %261 {offsets = [368, 0], sizes = [16, 64], strides = [1, 1]} : vector<400x64xbf16> to vector<16x64xbf16>
    %341 = tpu.concatenate %332, %333, %334, %335, %336, %337, %338, %339, %340 in 1 : vector<16x64xbf16>, vector<16x64xbf16>, vector<16x64xbf16>, vector<16x64xbf16>, vector<16x64xbf16>, vector<16x64xbf16>, vector<16x64xbf16>, vector<16x64xbf16>, vector<16x64xbf16> -> vector<16x576xbf16>
    %342 = vector.extract_strided_slice %261 {offsets = [192, 0], sizes = [16, 64], strides = [1, 1]} : vector<400x64xbf16> to vector<16x64xbf16>
    %343 = vector.extract_strided_slice %261 {offsets = [208, 0], sizes = [16, 64], strides = [1, 1]} : vector<400x64xbf16> to vector<16x64xbf16>
    %344 = vector.extract_strided_slice %261 {offsets = [224, 0], sizes = [16, 64], strides = [1, 1]} : vector<400x64xbf16> to vector<16x64xbf16>
    %345 = vector.extract_strided_slice %261 {offsets = [272, 0], sizes = [16, 64], strides = [1, 1]} : vector<400x64xbf16> to vector<16x64xbf16>
    %346 = vector.extract_strided_slice %261 {offsets = [288, 0], sizes = [16, 64], strides = [1, 1]} : vector<400x64xbf16> to vector<16x64xbf16>
    %347 = vector.extract_strided_slice %261 {offsets = [304, 0], sizes = [16, 64], strides = [1, 1]} : vector<400x64xbf16> to vector<16x64xbf16>
    %348 = vector.extract_strided_slice %261 {offsets = [352, 0], sizes = [16, 64], strides = [1, 1]} : vector<400x64xbf16> to vector<16x64xbf16>
    %349 = vector.extract_strided_slice %261 {offsets = [368, 0], sizes = [16, 64], strides = [1, 1]} : vector<400x64xbf16> to vector<16x64xbf16>
    %350 = vector.extract_strided_slice %261 {offsets = [384, 0], sizes = [16, 64], strides = [1, 1]} : vector<400x64xbf16> to vector<16x64xbf16>
    %351 = tpu.concatenate %342, %343, %344, %345, %346, %347, %348, %349, %350 in 1 : vector<16x64xbf16>, vector<16x64xbf16>, vector<16x64xbf16>, vector<16x64xbf16>, vector<16x64xbf16>, vector<16x64xbf16>, vector<16x64xbf16>, vector<16x64xbf16>, vector<16x64xbf16> -> vector<16x576xbf16>
    %352 = tpu.concatenate %271, %281, %291, %301, %311, %321, %331, %341, %351 in 0 : vector<16x576xbf16>, vector<16x576xbf16>, vector<16x576xbf16>, vector<16x576xbf16>, vector<16x576xbf16>, vector<16x576xbf16>, vector<16x576xbf16>, vector<16x576xbf16>, vector<16x576xbf16> -> vector<144x576xbf16>
    %c0_6 = arith.constant 0 : index
    %c0_7 = arith.constant 0 : index
    %353 = vector.load %arg4[%c0_6, %c0_7] : memref<576x128xbf16, #tpu.memory_space<vmem>>, vector<576x128xbf16>
    %cst_8 = arith.constant dense<0.000000e+00> : vector<144x128xf32>
    %354 = tpu.matmul %352, %353, %cst_8 {dimension_numbers = #tpu.dot_dimension_numbers<[1], [0], [0], [1], [0, 0, 1, 1], [], []>} : vector<144x576xbf16>, vector<576x128xbf16>, vector<144x128xf32> -> vector<144x128xf32>
    %c0_9 = arith.constant 0 : index
    %c0_10 = arith.constant 0 : index
    %355 = vector.load %arg5[%c0_9, %c0_10] : memref<1x128xf32, #tpu.memory_space<vmem>>, vector<1x128xf32>
    %356 = vector.broadcast %355 : vector<1x128xf32> to vector<144x128xf32>
    %357 = arith.addf %354, %356 : vector<144x128xf32>
    %cst_11 = arith.constant 0.000000e+00 : f32
    %358 = vector.broadcast %cst_11 : f32 to vector<144x128xf32>
    %359 = arith.maximumf %357, %358 : vector<144x128xf32>
    %360 = arith.truncf %359 : vector<144x128xf32> to vector<144x128xbf16>
    %361 = vector.extract_strided_slice %360 {offsets = [0, 0], sizes = [16, 128], strides = [1, 1]} : vector<144x128xbf16> to vector<16x128xbf16>
    %362 = vector.extract_strided_slice %360 {offsets = [16, 0], sizes = [16, 128], strides = [1, 1]} : vector<144x128xbf16> to vector<16x128xbf16>
    %363 = vector.extract_strided_slice %360 {offsets = [32, 0], sizes = [16, 128], strides = [1, 1]} : vector<144x128xbf16> to vector<16x128xbf16>
    %364 = vector.extract_strided_slice %360 {offsets = [48, 0], sizes = [16, 128], strides = [1, 1]} : vector<144x128xbf16> to vector<16x128xbf16>
    %365 = vector.extract_strided_slice %360 {offsets = [64, 0], sizes = [16, 128], strides = [1, 1]} : vector<144x128xbf16> to vector<16x128xbf16>
    %366 = vector.extract_strided_slice %360 {offsets = [80, 0], sizes = [16, 128], strides = [1, 1]} : vector<144x128xbf16> to vector<16x128xbf16>
    %367 = vector.extract_strided_slice %360 {offsets = [96, 0], sizes = [16, 128], strides = [1, 1]} : vector<144x128xbf16> to vector<16x128xbf16>
    %368 = vector.extract_strided_slice %360 {offsets = [112, 0], sizes = [16, 128], strides = [1, 1]} : vector<144x128xbf16> to vector<16x128xbf16>
    %369 = vector.extract_strided_slice %360 {offsets = [128, 0], sizes = [16, 128], strides = [1, 1]} : vector<144x128xbf16> to vector<16x128xbf16>
    %370 = tpu.concatenate %361, %362, %363, %364, %365, %366, %367, %368, %369 in 1 : vector<16x128xbf16>, vector<16x128xbf16>, vector<16x128xbf16>, vector<16x128xbf16>, vector<16x128xbf16>, vector<16x128xbf16>, vector<16x128xbf16>, vector<16x128xbf16>, vector<16x128xbf16> -> vector<16x1152xbf16>
    %c0_12 = arith.constant 0 : index
    %c0_13 = arith.constant 0 : index
    %371 = vector.load %arg6[%c0_12, %c0_13] : memref<1152x256xbf16, #tpu.memory_space<vmem>>, vector<1152x256xbf16>
    %cst_14 = arith.constant dense<0.000000e+00> : vector<16x256xf32>
    %372 = tpu.matmul %370, %371, %cst_14 {dimension_numbers = #tpu.dot_dimension_numbers<[1], [0], [0], [1], [0, 0, 1, 1], [], []>} : vector<16x1152xbf16>, vector<1152x256xbf16>, vector<16x256xf32> -> vector<16x256xf32>
    %c0_15 = arith.constant 0 : index
    %c0_16 = arith.constant 0 : index
    %373 = vector.load %arg7[%c0_15, %c0_16] : memref<1x256xf32, #tpu.memory_space<vmem>>, vector<1x256xf32>
    %374 = vector.broadcast %373 : vector<1x256xf32> to vector<16x256xf32>
    %375 = arith.addf %372, %374 : vector<16x256xf32>
    %cst_17 = arith.constant 0.000000e+00 : f32
    %376 = vector.broadcast %cst_17 : f32 to vector<16x256xf32>
    %377 = arith.maximumf %375, %376 : vector<16x256xf32>
    %378 = arith.truncf %377 : vector<16x256xf32> to vector<16x256xbf16>
    %c0_18 = arith.constant 0 : index
    %c0_19 = arith.constant 0 : index
    %379 = vector.load %arg8[%c0_18, %c0_19] : memref<256x200xbf16, #tpu.memory_space<vmem>>, vector<256x200xbf16>
    %cst_20 = arith.constant dense<0.000000e+00> : vector<16x200xf32>
    %380 = tpu.matmul %378, %379, %cst_20 {dimension_numbers = #tpu.dot_dimension_numbers<[1], [0], [0], [1], [0, 0, 1, 1], [], []>} : vector<16x256xbf16>, vector<256x200xbf16>, vector<16x200xf32> -> vector<16x200xf32>
    %c0_21 = arith.constant 0 : index
    %c0_22 = arith.constant 0 : index
    %381 = vector.load %arg9[%c0_21, %c0_22] : memref<1x200xf32, #tpu.memory_space<vmem>>, vector<1x200xf32>
    %382 = vector.broadcast %381 : vector<1x200xf32> to vector<16x200xf32>
    %383 = arith.addf %380, %382 : vector<16x200xf32>
    %cst_23 = arith.constant 0.000000e+00 : f32
    %384 = vector.broadcast %cst_23 : f32 to vector<16x200xf32>
    %385 = arith.maximumf %383, %384 : vector<16x200xf32>
    %386 = arith.truncf %385 : vector<16x200xf32> to vector<16x200xbf16>
    %c0_24 = arith.constant 0 : index
    %c0_25 = arith.constant 0 : index
    %387 = vector.load %arg10[%c0_24, %c0_25] : memref<200x7xbf16, #tpu.memory_space<vmem>>, vector<200x7xbf16>
    %cst_26 = arith.constant dense<0.000000e+00> : vector<16x7xf32>
    %388 = tpu.matmul %386, %387, %cst_26 {dimension_numbers = #tpu.dot_dimension_numbers<[1], [0], [0], [1], [0, 0, 1, 1], [], []>} : vector<16x200xbf16>, vector<200x7xbf16>, vector<16x7xf32> -> vector<16x7xf32>
    %c0_27 = arith.constant 0 : index
    %c0_28 = arith.constant 0 : index
    %389 = vector.load %arg11[%c0_27, %c0_28] : memref<1x7xf32, #tpu.memory_space<vmem>>, vector<1x7xf32>
    %390 = vector.broadcast %389 : vector<1x7xf32> to vector<16x7xf32>
    %391 = arith.addf %388, %390 : vector<16x7xf32>
    %392 = vector.extract_strided_slice %391 {offsets = [0, 0], sizes = [16, 1], strides = [1, 1]} : vector<16x7xf32> to vector<16x1xf32>
    %393 = vector.extract_strided_slice %391 {offsets = [0, 1], sizes = [16, 6], strides = [1, 1]} : vector<16x7xf32> to vector<16x6xf32>
    %cst_29 = arith.constant 0.000000e+00 : f32
    %394 = vector.broadcast %cst_29 : f32 to vector<16x6xf32>
    %395 = arith.maximumf %393, %394 : vector<16x6xf32>
    %396 = math.absf %393 : vector<16x6xf32>
    %cst_30 = arith.constant 0.000000e+00 : f32
    %397 = vector.broadcast %cst_30 : f32 to vector<16x6xf32>
    %398 = arith.subf %397, %396 : vector<16x6xf32>
    %399 = math.exp %398 : vector<16x6xf32>
    %cst_31 = arith.constant 1.000000e+00 : f32
    %400 = vector.broadcast %cst_31 : f32 to vector<16x6xf32>
    %401 = arith.addf %400, %399 : vector<16x6xf32>
    %402 = math.log %401 : vector<16x6xf32>
    %403 = arith.addf %395, %402 : vector<16x6xf32>
    %cst_32 = arith.constant 1.000000e+00 : f32
    %404 = vector.broadcast %cst_32 : f32 to vector<16x6xf32>
    %405 = arith.addf %403, %404 : vector<16x6xf32>
    %cst_33 = arith.constant 0.000000e+00 : f32
    %406 = vector.broadcast %cst_33 : f32 to vector<16x121xf32>
    %407 = tpu.concatenate %392, %405, %406 in 1 : vector<16x1xf32>, vector<16x6xf32>, vector<16x121xf32> -> vector<16x128xf32>
    %c0_34 = arith.constant 0 : index
    %c0_35 = arith.constant 0 : index
    %408 = vector.load %arg12[%c0_34, %c0_35] : memref<16x128xf32, #tpu.memory_space<vmem>>, vector<16x128xf32>
    tpu.vector_store %arg12[%c0_34, %c0_35], %407 {strides = array<i32>} : memref<16x128xf32, #tpu.memory_space<vmem>>, vector<16x128xf32>,
    return
  }
  func.func @transform_0(%arg0: i32) -> (i32, i32) {
    %c0_i32 = arith.constant 0 : i32
    %c0_i32_0 = arith.constant 0 : i32
    return %arg0, %c0_i32 : i32, i32
  }
  func.func @transform_1(%arg0: i32) -> (i32, i32) {
    %c0_i32 = arith.constant 0 : i32
    %c0_i32_0 = arith.constant 0 : i32
    %c0_i32_1 = arith.constant 0 : i32
    return %c0_i32, %c0_i32_0 : i32, i32
  }
  func.func @transform_2(%arg0: i32) -> (i32, i32) {
    %c0_i32 = arith.constant 0 : i32
    %c0_i32_0 = arith.constant 0 : i32
    %c0_i32_1 = arith.constant 0 : i32
    return %c0_i32, %c0_i32_0 : i32, i32
  }
  func.func @transform_3(%arg0: i32) -> (i32, i32) {
    %c0_i32 = arith.constant 0 : i32
    %c0_i32_0 = arith.constant 0 : i32
    %c0_i32_1 = arith.constant 0 : i32
    return %c0_i32, %c0_i32_0 : i32, i32
  }
  func.func @transform_4(%arg0: i32) -> (i32, i32) {
    %c0_i32 = arith.constant 0 : i32
    %c0_i32_0 = arith.constant 0 : i32
    %c0_i32_1 = arith.constant 0 : i32
    return %c0_i32, %c0_i32_0 : i32, i32
  }
  func.func @transform_5(%arg0: i32) -> (i32, i32) {
    %c0_i32 = arith.constant 0 : i32
    %c0_i32_0 = arith.constant 0 : i32
    %c0_i32_1 = arith.constant 0 : i32
    return %c0_i32, %c0_i32_0 : i32, i32
  }
  func.func @transform_6(%arg0: i32) -> (i32, i32) {
    %c0_i32 = arith.constant 0 : i32
    %c0_i32_0 = arith.constant 0 : i32
    %c0_i32_1 = arith.constant 0 : i32
    return %c0_i32, %c0_i32_0 : i32, i32
  }
  func.func @transform_7(%arg0: i32) -> (i32, i32) {
    %c0_i32 = arith.constant 0 : i32
    %c0_i32_0 = arith.constant 0 : i32
    %c0_i32_1 = arith.constant 0 : i32
    return %c0_i32, %c0_i32_0 : i32, i32
  }
  func.func @transform_8(%arg0: i32) -> (i32, i32) {
    %c0_i32 = arith.constant 0 : i32
    %c0_i32_0 = arith.constant 0 : i32
    %c0_i32_1 = arith.constant 0 : i32
    return %c0_i32, %c0_i32_0 : i32, i32
  }
  func.func @transform_9(%arg0: i32) -> (i32, i32) {
    %c0_i32 = arith.constant 0 : i32
    %c0_i32_0 = arith.constant 0 : i32
    %c0_i32_1 = arith.constant 0 : i32
    return %c0_i32, %c0_i32_0 : i32, i32
  }
  func.func @transform_10(%arg0: i32) -> (i32, i32) {
    %c0_i32 = arith.constant 0 : i32
    %c0_i32_0 = arith.constant 0 : i32
    %c0_i32_1 = arith.constant 0 : i32
    return %c0_i32, %c0_i32_0 : i32, i32
  }
  func.func @transform_11(%arg0: i32) -> (i32, i32) {
    %c0_i32 = arith.constant 0 : i32
    %c0_i32_0 = arith.constant 0 : i32
    return %arg0, %c0_i32 : i32, i32
  }
}

</mosaic_0001>

<bundles_post_ra>
// kernel: forward.4
= control target key start
LH: loop header
LB: loop body
LE: loop exit
PB: predicated region body
PF: predicated region fallthrough
CT: control target
= control target key end

     0   :  { %s5503_s12 = smov 0   ;;  %s6582_s0 = inlined_call_operand.vmem [shape: bf16[6144,64], index: 0, kind: input, shape index: {}]   ;;  %s6583_s1 = inlined_call_operand.vmem [shape: bf16[64,8], index: 1, kind: input, shape index: {}]   ;;  %s6584_s2 = inlined_call_operand.vmem [shape: f32[1,8], index: 2, kind: input, shape index: {}]   ;;  %s6585_s3 = inlined_call_operand.vmem [shape: bf16[6144,8], index: 3, kind: output, shape index: {}]  }
   0x1 LB: > { %s4145_s13 = sadd.s32 4294967295, %s5481_s12   ;;  %p4149_p0 = scmp.ge.s32.totalorder %s5481_s12, 1  ;;  %s5481_s12 = sphi %s5503_s12, %s13_s12  }
   0x2   : > { %p138_p1 = scmp.lt.s32.totalorder %s5481_s12, 4 }
   0x4   : > { %p139_p2 = pnand %p4149_p0, %p138_p1 }
   0x5   : > { %v5341_v0 = vld [vmem:[%s6583_s1] sm:$0xff] (!%p139_p2)   ;;  %s4150_s16 = sshll.u32 (!%p139_p2), %s4145_s13, 8  ;;  %v5342_v1 = vld [vmem:[%s6583_s1 + $0x8] sm:$0xff] (!%p139_p2)   ;;  %v5343_v2 = vld [vmem:[%s6583_s1 + $0x10] sm:$0xff] (!%p139_p2)   ;;  %vm1110_vm0 = vcmask (!%p139_p2), 523264   ;;  %vm3832_vm1 = vcmask (!%p139_p2), 60416  }
   0x6   : > { %142 = sbr.rel (%p139_p2) target bundleno = 492 (0x1ec), region = 32  ;;  %p163_p3 = scmp.lt.s32.totalorder (!%p139_p2), %s4150_s16, 767  ;;  %5061 = vmatprep.subr.bf16.mxu0 (!%p139_p2), %v5341_v0  ;;  %5325 = vmatprep.subr.bf16.mxu1 (!%p139_p2), %v5341_v0  ;;  %v5344_v3 = vld [vmem:[%s6583_s1 + $0x18] sm:$0xff] (!%p139_p2)  }
   0x7   : > { %5062 = vmatpush3.bf16.msra.mxu0 (!%p139_p2), %v5341_v0  ;;  %5329 = vmatpush3.bf16.msra.mxu1 (!%p139_p2), %v5341_v0 }
   0x8   : > { %5063 = vmatprep.subr.bf16.mxu0 (!%p139_p2), %v5342_v1  ;;  %5326 = vmatprep.subr.bf16.mxu1 (!%p139_p2), %v5342_v1 }
   0xb   : > { %5064 = vmatpush3.bf16.msra.mxu0 (!%p139_p2), %v5342_v1  ;;  %5330 = vmatpush3.bf16.msra.mxu1 (!%p139_p2), %v5342_v1 }
   0xc   : > { %5065 = vmatprep.subr.bf16.mxu0 (!%p139_p2), %v5343_v2  ;;  %5327 = vmatprep.subr.bf16.mxu1 (!%p139_p2), %v5343_v2 }
   0xd   : > { %s6587_s16 = smov (!%p163_p3, %s4150_s16), 767 }
   0xe   : > { %s4151_s21 = sshll.u32 %s6587_s16, 2 }
   0xf   : > { %s5531_s26 = scalar_lea.vmem %s6582_s0, %s4151_s21  ;;  %5066 = vmatpush3.bf16.msra.mxu0 %v5343_v2  ;;  %5331 = vmatpush3.bf16.msra.mxu1 %v5343_v2  ;;  %s5773_s4 = scalar_lea.vmem %s6585_s3, %s4151_s21 }
  0x10   : > { %v5345_v4 = vld [vmem:[%s5531_s26] sm:$0xff]   ;;  %5067 = vmatprep.subr.bf16.mxu0 %v5344_v3  ;;  %5328 = vmatprep.subr.bf16.mxu1 %v5344_v3  ;;  %v5347_v6 = vld [vmem:[%s5531_s26 + $0x8] sm:$0xff]   ;;  %v5349_v8 = vld [vmem:[%s5531_s26 + $0x10] sm:$0xff]  }
  0x11   : > { %v5346_v5 = vld [vmem:[%s5531_s26 + $0x200] sm:$0xff]   ;;  %5069 = vmatprep.mubr.msk.bf16.mxu0 %vm1110_vm0, %v5345_v4  ;;  %v5348_v7 = vld [vmem:[%s5531_s26 + $0x208] sm:$0xff]   ;;  %v5350_v9 = vld [vmem:[%s5531_s26 + $0x210] sm:$0xff]  }
  0x12   : > { %5197 = vmatprep.mubr.msk.bf16.mxu1 %vm1110_vm0, %v5346_v5  ;;  %v5351_v10 = vld [vmem:[%s5531_s26 + $0x18] sm:$0xff]   ;;  %v5353_v12 = vld [vmem:[%s5531_s26 + $0x20] sm:$0xff]   ;;  %v5355_v14 = vld [vmem:[%s5531_s26 + $0x28] sm:$0xff]  }
  0x13   : > { %5068 = vmatpush3.bf16.msra.mxu0 %v5344_v3  ;;  %5332 = vmatpush3.bf16.msra.mxu1 %v5344_v3  ;;  %v5352_v11 = vld [vmem:[%s5531_s26 + $0x218] sm:$0xff]   ;;  %v5354_v13 = vld [vmem:[%s5531_s26 + $0x220] sm:$0xff]   ;;  %v5356_v15 = vld [vmem:[%s5531_s26 + $0x228] sm:$0xff]  }
  0x14   : > { %v5357_v16 = vld [vmem:[%s5531_s26 + $0x30] sm:$0xff]   ;;  %v5359_v18 = vld [vmem:[%s5531_s26 + $0x38] sm:$0xff]   ;;  %v5361_v20 = vld [vmem:[%s5531_s26 + $0x40] sm:$0xff]  }
  0x15   : > { %v5358_v17 = vld [vmem:[%s5531_s26 + $0x230] sm:$0xff]   ;;  %v5360_v19 = vld [vmem:[%s5531_s26 + $0x238] sm:$0xff]   ;;  %v5362_v21 = vld [vmem:[%s5531_s26 + $0x240] sm:$0xff]  }
  0x16   : > { %5070 = vmatmul.mubr.msk.bf16.vlgmr.msra.gmra.mrb[0].mxu0 %vm1110_vm0, %v5347_v6  ;;  %5198 = vmatmul.mubr.msk.bf16.vlgmr.msra.gmra.mrb[0].mxu1 %vm1110_vm0, %v5348_v7  ;;  %v5363_v22 = vld [vmem:[%s5531_s26 + $0x48] sm:$0xff]   ;;  %v5365_v24 = vld [vmem:[%s5531_s26 + $0x50] sm:$0xff]   ;;  %v5367_v26 = vld [vmem:[%s5531_s26 + $0x58] sm:$0xff]  }
  0x17   : > { %5073 = vmatprep.mubr.msk.bf16.mxu0 %vm1110_vm0, %v5349_v8  ;;  %5201 = vmatprep.mubr.msk.bf16.mxu1 %vm1110_vm0, %v5350_v9  ;;  %v5364_v23 = vld [vmem:[%s5531_s26 + $0x248] sm:$0xff]   ;;  %v5366_v25 = vld [vmem:[%s5531_s26 + $0x250] sm:$0xff]   ;;  %v5368_v27 = vld [vmem:[%s5531_s26 + $0x258] sm:$0xff]  }
  0x18   : > { %v5369_v28 = vld [vmem:[%s5531_s26 + $0x60] sm:$0xff]   ;;  %v5371_v30 = vld [vmem:[%s5531_s26 + $0x68] sm:$0xff]   ;;  %v5373_v32 = vld [vmem:[%s5531_s26 + $0x70] sm:$0xff]  }
  0x19   : > { %v5370_v29 = vld [vmem:[%s5531_s26 + $0x260] sm:$0xff]   ;;  %v5372_v31 = vld [vmem:[%s5531_s26 + $0x268] sm:$0xff]   ;;  %v5374_v33 = vld [vmem:[%s5531_s26 + $0x270] sm:$0xff]  }
  0x1a   : > { %v5375_v34 = vld [vmem:[%s5531_s26 + $0x78] sm:$0xff]   ;;  %v5377_v36 = vld [vmem:[%s5531_s26 + $0x80] sm:$0xff]   ;;  %v5379_v38 = vld [vmem:[%s5531_s26 + $0x88] sm:$0xff]  }
  0x1b   : > { %v5376_v35 = vld [vmem:[%s5531_s26 + $0x278] sm:$0xff]   ;;  %v5378_v37 = vld [vmem:[%s5531_s26 + $0x280] sm:$0xff]   ;;  %v5380_v39 = vld [vmem:[%s5531_s26 + $0x288] sm:$0xff]  }
  0x1c   : > { %v5381_v40 = vld [vmem:[%s5531_s26 + $0x90] sm:$0xff]   ;;  %v5383_v42 = vld [vmem:[%s5531_s26 + $0x98] sm:$0xff]   ;;  %v5385_v44 = vld [vmem:[%s5531_s26 + $0xa0] sm:$0xff]  }
  0x1d   : > { %v5382_v41 = vld [vmem:[%s5531_s26 + $0x290] sm:$0xff]   ;;  %v5384_v43 = vld [vmem:[%s5531_s26 + $0x298] sm:$0xff]   ;;  %v5386_v45 = vld [vmem:[%s5531_s26 + $0x2a0] sm:$0xff]  }
  0x1e   : > { %5074 = vmatmul.mubr.msk.bf16.gmra.mrb[4].mxu0 %vm1110_vm0, %v5351_v10  ;;  %5202 = vmatmul.mubr.msk.bf16.gmra.mrb[4].mxu1 %vm1110_vm0, %v5352_v11  ;;  %v5387_v46 = vld [vmem:[%s5531_s26 + $0xa8] sm:$0xff]   ;;  %v5389_v48 = vld [vmem:[%s5531_s26 + $0xb0] sm:$0xff]   ;;  %v5391_v50 = vld [vmem:[%s5531_s26 + $0xb8] sm:$0xff]  }
  0x1f   : > { %5077 = vmatprep.mubr.msk.bf16.mxu0 %vm1110_vm0, %v5353_v12  ;;  %5205 = vmatprep.mubr.msk.bf16.mxu1 %vm1110_vm0, %v5354_v13  ;;  %v5388_v47 = vld [vmem:[%s5531_s26 + $0x2a8] sm:$0xff]   ;;  %v5390_v49 = vld [vmem:[%s5531_s26 + $0x2b0] sm:$0xff]   ;;  %v5392_v51 = vld [vmem:[%s5531_s26 + $0x2b8] sm:$0xff]  }
  0x20   : > { %v5393_v52 = vld [vmem:[%s5531_s26 + $0xc0] sm:$0xff]   ;;  %v5395_v54 = vld [vmem:[%s5531_s26 + $0xc8] sm:$0xff]   ;;  %v5397_v56 = vld [vmem:[%s5531_s26 + $0xd0] sm:$0xff]  }
  0x21   : > { %v5394_v53 = vld [vmem:[%s5531_s26 + $0x2c0] sm:$0xff]   ;;  %v5396_v55 = vld [vmem:[%s5531_s26 + $0x2c8] sm:$0xff]   ;;  %v5398_v57 = vld [vmem:[%s5531_s26 + $0x2d0] sm:$0xff]  }
  0x22   : > { %v5399_v58 = vld [vmem:[%s5531_s26 + $0xd8] sm:$0xff]   ;;  %v5401_v60 = vld [vmem:[%s5531_s26 + $0xe0] sm:$0xff]   ;;  %v5403_v62 = vld [vmem:[%s5531_s26 + $0xe8] sm:$0xff]  }
  0x23   : > { %v5400_v59 = vld [vmem:[%s5531_s26 + $0x2d8] sm:$0xff]   ;;  %v5402_v61 = vld [vmem:[%s5531_s26 + $0x2e0] sm:$0xff]   ;;  %v5404_v63 = vld [vmem:[%s5531_s26 + $0x2e8] sm:$0xff]  }
  0x24   : > { %v5405_v0 = vld [vmem:[%s5531_s26 + $0xf0] sm:$0xff]   ;;  %v5407_v2 = vld [vmem:[%s5531_s26 + $0xf8] sm:$0xff]   ;;  %v5409_v4 = vld [vmem:[%s5531_s26 + $0x100] sm:$0xff]  }
  0x25   : > { %v5406_v1 = vld [vmem:[%s5531_s26 + $0x2f0] sm:$0xff]   ;;  %v5408_v3 = vld [vmem:[%s5531_s26 + $0x2f8] sm:$0xff]   ;;  %v5410_v5 = vld [vmem:[%s5531_s26 + $0x300] sm:$0xff]  }
  0x26   : > { %5078 = vmatmul.mubr.msk.bf16.gmra.mrb[8].mxu0 %vm1110_vm0, %v5355_v14  ;;  %5206 = vmatmul.mubr.msk.bf16.gmra.mrb[8].mxu1 %vm1110_vm0, %v5356_v15  ;;  %v5411_v6 = vld [vmem:[%s5531_s26 + $0x108] sm:$0xff]   ;;  %v5413_v8 = vld [vmem:[%s5531_s26 + $0x110] sm:$0xff]   ;;  %v5415_v10 = vld [vmem:[%s5531_s26 + $0x118] sm:$0xff]  }
  0x27   : > { %5081 = vmatprep.mubr.msk.bf16.mxu0 %vm1110_vm0, %v5357_v16  ;;  %5209 = vmatprep.mubr.msk.bf16.mxu1 %vm1110_vm0, %v5358_v17  ;;  %v5412_v7 = vld [vmem:[%s5531_s26 + $0x308] sm:$0xff]   ;;  %v5414_v9 = vld [vmem:[%s5531_s26 + $0x310] sm:$0xff]   ;;  %v5416_v11 = vld [vmem:[%s5531_s26 + $0x318] sm:$0xff]  }
  0x28   : > { %v5417_v12 = vld [vmem:[%s5531_s26 + $0x120] sm:$0xff]   ;;  %v5419_v14 = vld [vmem:[%s5531_s26 + $0x128] sm:$0xff]   ;;  %v5421_v16 = vld [vmem:[%s5531_s26 + $0x130] sm:$0xff]  }
  0x29   : > { %v5418_v13 = vld [vmem:[%s5531_s26 + $0x320] sm:$0xff]   ;;  %v5420_v15 = vld [vmem:[%s5531_s26 + $0x328] sm:$0xff]   ;;  %v5422_v17 = vld [vmem:[%s5531_s26 + $0x330] sm:$0xff]  }
  0x2e   : > { %5082 = vmatmul.mubr.msk.bf16.gmra.mrb[12].mxu0 %vm1110_vm0, %v5359_v18  ;;  %5210 = vmatmul.mubr.msk.bf16.gmra.mrb[12].mxu1 %vm1110_vm0, %v5360_v19  ;;  %v5423_v18 = vld [vmem:[%s5531_s26 + $0x138] sm:$0xff]  }
  0x2f   : > { %5085 = vmatprep.mubr.msk.bf16.mxu0 %vm1110_vm0, %v5361_v20  ;;  %5213 = vmatprep.mubr.msk.bf16.mxu1 %vm1110_vm0, %v5362_v21  ;;  %v5424_v19 = vld [vmem:[%s5531_s26 + $0x338] sm:$0xff]   ;;  %v5425_v20 = vld [vmem:[%s5531_s26 + $0x140] sm:$0xff]  }
  0x30   : > { %v5426_v21 = vld [vmem:[%s5531_s26 + $0x340] sm:$0xff]  }
  0x36   : > { %5086 = vmatmul.mubr.msk.bf16.gmra.mrb[16].mxu0 %vm1110_vm0, %v5363_v22  ;;  %5214 = vmatmul.mubr.msk.bf16.gmra.mrb[16].mxu1 %vm1110_vm0, %v5364_v23  ;;  %v5427_v22 = vld [vmem:[%s5531_s26 + $0x148] sm:$0xff]  }
  0x37   : > { %5089 = vmatprep.mubr.msk.bf16.mxu0 %vm1110_vm0, %v5365_v24  ;;  %5217 = vmatprep.mubr.msk.bf16.mxu1 %vm1110_vm0, %v5366_v25  ;;  %v5428_v23 = vld [vmem:[%s5531_s26 + $0x348] sm:$0xff]   ;;  %v5429_v24 = vld [vmem:[%s5531_s26 + $0x150] sm:$0xff]  }
  0x38   : > { %v5430_v25 = vld [vmem:[%s5531_s26 + $0x350] sm:$0xff]  }
  0x3e   : > { %5090 = vmatmul.mubr.msk.bf16.gmra.mrb[20].mxu0 %vm1110_vm0, %v5367_v26  ;;  %5218 = vmatmul.mubr.msk.bf16.gmra.mrb[20].mxu1 %vm1110_vm0, %v5368_v27  ;;  %v5431_v26 = vld [vmem:[%s5531_s26 + $0x158] sm:$0xff]  }
  0x3f   : > { %5093 = vmatprep.mubr.msk.bf16.mxu0 %vm1110_vm0, %v5369_v28  ;;  %5221 = vmatprep.mubr.msk.bf16.mxu1 %vm1110_vm0, %v5370_v29  ;;  %v5432_v27 = vld [vmem:[%s5531_s26 + $0x358] sm:$0xff]   ;;  %v5433_v28 = vld [vmem:[%s5531_s26 + $0x160] sm:$0xff]  }
  0x40   : > { %v5434_v29 = vld [vmem:[%s5531_s26 + $0x360] sm:$0xff]  }
  0x46   : > { %5094 = vmatmul.mubr.msk.bf16.gmra.mrb[24].mxu0 %vm1110_vm0, %v5371_v30  ;;  %5222 = vmatmul.mubr.msk.bf16.gmra.mrb[24].mxu1 %vm1110_vm0, %v5372_v31  ;;  %v5435_v30 = vld [vmem:[%s5531_s26 + $0x168] sm:$0xff]  }
  0x47   : > { %5097 = vmatprep.mubr.msk.bf16.mxu0 %vm1110_vm0, %v5373_v32  ;;  %5225 = vmatprep.mubr.msk.bf16.mxu1 %vm1110_vm0, %v5374_v33  ;;  %v5436_v31 = vld [vmem:[%s5531_s26 + $0x368] sm:$0xff]   ;;  %v5437_v32 = vld [vmem:[%s5531_s26 + $0x170] sm:$0xff]  }
  0x48   : > { %v5438_v33 = vld [vmem:[%s5531_s26 + $0x370] sm:$0xff]  }
  0x4e   : > { %5098 = vmatmul.mubr.msk.bf16.gmra.mrb[28].mxu0 %vm1110_vm0, %v5375_v34  ;;  %5226 = vmatmul.mubr.msk.bf16.gmra.mrb[28].mxu1 %vm1110_vm0, %v5376_v35  ;;  %v5439_v34 = vld [vmem:[%s5531_s26 + $0x178] sm:$0xff]  }
  0x4f   : > { %5101 = vmatprep.mubr.msk.bf16.mxu0 %vm1110_vm0, %v5377_v36  ;;  %5229 = vmatprep.mubr.msk.bf16.mxu1 %vm1110_vm0, %v5378_v37  ;;  %v5440_v35 = vld [vmem:[%s5531_s26 + $0x378] sm:$0xff]   ;;  %v5441_v36 = vld [vmem:[%s5531_s26 + $0x180] sm:$0xff]  }
  0x50   : > { %v5442_v37 = vld [vmem:[%s5531_s26 + $0x380] sm:$0xff]  }
  0x56   : > { %5102 = vmatmul.mubr.msk.bf16.gmra.mrb[32].mxu0 %vm1110_vm0, %v5379_v38  ;;  %5230 = vmatmul.mubr.msk.bf16.gmra.mrb[32].mxu1 %vm1110_vm0, %v5380_v39  ;;  %v5443_v38 = vld [vmem:[%s5531_s26 + $0x188] sm:$0xff]  }
  0x57   : > { %5105 = vmatprep.mubr.msk.bf16.mxu0 %vm1110_vm0, %v5381_v40  ;;  %5233 = vmatprep.mubr.msk.bf16.mxu1 %vm1110_vm0, %v5382_v41  ;;  %v5444_v39 = vld [vmem:[%s5531_s26 + $0x388] sm:$0xff]   ;;  %v5445_v40 = vld [vmem:[%s5531_s26 + $0x190] sm:$0xff]  }
  0x58   : > { %v5446_v41 = vld [vmem:[%s5531_s26 + $0x390] sm:$0xff]  }
  0x5e   : > { %5106 = vmatmul.mubr.msk.bf16.gmra.mrb[36].mxu0 %vm1110_vm0, %v5383_v42  ;;  %5234 = vmatmul.mubr.msk.bf16.gmra.mrb[36].mxu1 %vm1110_vm0, %v5384_v43  ;;  %v5447_v42 = vld [vmem:[%s5531_s26 + $0x198] sm:$0xff]  }
  0x5f   : > { %5109 = vmatprep.mubr.msk.bf16.mxu0 %vm1110_vm0, %v5385_v44  ;;  %5237 = vmatprep.mubr.msk.bf16.mxu1 %vm1110_vm0, %v5386_v45  ;;  %v5448_v43 = vld [vmem:[%s5531_s26 + $0x398] sm:$0xff]   ;;  %v5449_v44 = vld [vmem:[%s5531_s26 + $0x1a0] sm:$0xff]  }
  0x60   : > { %v5450_v45 = vld [vmem:[%s5531_s26 + $0x3a0] sm:$0xff]  }
  0x66   : > { %5110 = vmatmul.mubr.msk.bf16.gmra.mrb[40].mxu0 %vm1110_vm0, %v5387_v46  ;;  %5238 = vmatmul.mubr.msk.bf16.gmra.mrb[40].mxu1 %vm1110_vm0, %v5388_v47  ;;  %v5451_v46 = vld [vmem:[%s5531_s26 + $0x1a8] sm:$0xff]  }
  0x67   : > { %5113 = vmatprep.mubr.msk.bf16.mxu0 %vm1110_vm0, %v5389_v48  ;;  %5241 = vmatprep.mubr.msk.bf16.mxu1 %vm1110_vm0, %v5390_v49  ;;  %v5452_v47 = vld [vmem:[%s5531_s26 + $0x3a8] sm:$0xff]   ;;  %v5453_v48 = vld [vmem:[%s5531_s26 + $0x1b0] sm:$0xff]  }
  0x68   : > { %v5454_v49 = vld [vmem:[%s5531_s26 + $0x3b0] sm:$0xff]  }
  0x6e   : > { %5114 = vmatmul.mubr.msk.bf16.gmra.mrb[44].mxu0 %vm1110_vm0, %v5391_v50  ;;  %5242 = vmatmul.mubr.msk.bf16.gmra.mrb[44].mxu1 %vm1110_vm0, %v5392_v51  ;;  %v5754_v50 = vld [vmem:[%s6584_s2] ss:$0 sm:$0xff] }
  0x6f   : > { %5117 = vmatprep.mubr.msk.bf16.mxu0 %vm1110_vm0, %v5393_v52  ;;  %5245 = vmatprep.mubr.msk.bf16.mxu1 %vm1110_vm0, %v5394_v53 }
  0x76   : > { %5118 = vmatmul.mubr.msk.bf16.gmra.mrb[48].mxu0 %vm1110_vm0, %v5395_v54  ;;  %5246 = vmatmul.mubr.msk.bf16.gmra.mrb[48].mxu1 %vm1110_vm0, %v5396_v55 }
  0x77   : > { %5121 = vmatprep.mubr.msk.bf16.mxu0 %vm1110_vm0, %v5397_v56  ;;  %5249 = vmatprep.mubr.msk.bf16.mxu1 %vm1110_vm0, %v5398_v57  ;;  %v5455_v57 = vld [vmem:[%s5531_s26 + $0x1b8] sm:$0xff]  }
  0x7e   : > { %5122 = vmatmul.mubr.msk.bf16.gmra.mrb[52].mxu0 %vm1110_vm0, %v5399_v58  ;;  %5250 = vmatmul.mubr.msk.bf16.gmra.mrb[52].mxu1 %vm1110_vm0, %v5400_v59  ;;  %v5456_v58 = vld [vmem:[%s5531_s26 + $0x3b8] sm:$0xff]  }
  0x7f   : > { %5125 = vmatprep.mubr.msk.bf16.mxu0 %vm1110_vm0, %v5401_v60  ;;  %5253 = vmatprep.mubr.msk.bf16.mxu1 %vm1110_vm0, %v5402_v61 }
  0x86   : > { %5126 = vmatmul.mubr.msk.bf16.gmra.mrb[56].mxu0 %vm1110_vm0, %v5403_v62  ;;  %5254 = vmatmul.mubr.msk.bf16.gmra.mrb[56].mxu1 %vm1110_vm0, %v5404_v63  ;;  %v5457_v63 = vld [vmem:[%s5531_s26 + $0x1c0] sm:$0xff]  }
  0x87   : > { %5129 = vmatprep.mubr.msk.bf16.mxu0 %vm1110_vm0, %v5405_v0  ;;  %5257 = vmatprep.mubr.msk.bf16.mxu1 %vm1110_vm0, %v5406_v1  ;;  %v5458_v0 = vld [vmem:[%s5531_s26 + $0x3c0] sm:$0xff]  }
  0x8e   : > { %5130 = vmatmul.mubr.msk.bf16.gmra.mrb[60].mxu0 %vm1110_vm0, %v5407_v2  ;;  %5258 = vmatmul.mubr.msk.bf16.gmra.mrb[60].mxu1 %vm1110_vm0, %v5408_v3 }
  0x8f   : > { %5133 = vmatprep.mubr.msk.bf16.mxu0 %vm1110_vm0, %v5409_v4  ;;  %5261 = vmatprep.mubr.msk.bf16.mxu1 %vm1110_vm0, %v5410_v5 }
  0x96   : > { %5134 = vmatmul.mubr.msk.bf16.gmra.mrb[64].mxu0 %vm1110_vm0, %v5411_v6  ;;  %5262 = vmatmul.mubr.msk.bf16.gmra.mrb[64].mxu1 %vm1110_vm0, %v5412_v7 }
  0x97   : > { %5137 = vmatprep.mubr.msk.bf16.mxu0 %vm1110_vm0, %v5413_v8  ;;  %5265 = vmatprep.mubr.msk.bf16.mxu1 %vm1110_vm0, %v5414_v9 }
  0x9e   : > { %5138 = vmatmul.mubr.msk.bf16.gmra.mrb[68].mxu0 %vm1110_vm0, %v5415_v10  ;;  %5266 = vmatmul.mubr.msk.bf16.gmra.mrb[68].mxu1 %vm1110_vm0, %v5416_v11 }
  0x9f   : > { %5141 = vmatprep.mubr.msk.bf16.mxu0 %vm1110_vm0, %v5417_v12  ;;  %5269 = vmatprep.mubr.msk.bf16.mxu1 %vm1110_vm0, %v5418_v13 }
  0xa6   : > { %5142 = vmatmul.mubr.msk.bf16.gmra.mrb[72].mxu0 %vm1110_vm0, %v5419_v14  ;;  %5270 = vmatmul.mubr.msk.bf16.gmra.mrb[72].mxu1 %vm1110_vm0, %v5420_v15 }
  0xa7   : > { %5145 = vmatprep.mubr.msk.bf16.mxu0 %vm1110_vm0, %v5421_v16  ;;  %5273 = vmatprep.mubr.msk.bf16.mxu1 %vm1110_vm0, %v5422_v17 }
  0xae   : > { %5146 = vmatmul.mubr.msk.bf16.gmra.mrb[76].mxu0 %vm1110_vm0, %v5423_v18  ;;  %5274 = vmatmul.mubr.msk.bf16.gmra.mrb[76].mxu1 %vm1110_vm0, %v5424_v19 }
  0xaf   : > { %5149 = vmatprep.mubr.msk.bf16.mxu0 %vm1110_vm0, %v5425_v20  ;;  %5277 = vmatprep.mubr.msk.bf16.mxu1 %vm1110_vm0, %v5426_v21 }
  0xb6   : > { %5150 = vmatmul.mubr.msk.bf16.gmra.mrb[80].mxu0 %vm1110_vm0, %v5427_v22  ;;  %5278 = vmatmul.mubr.msk.bf16.gmra.mrb[80].mxu1 %vm1110_vm0, %v5428_v23 }
  0xb7   : > { %5153 = vmatprep.mubr.msk.bf16.mxu0 %vm1110_vm0, %v5429_v24  ;;  %5281 = vmatprep.mubr.msk.bf16.mxu1 %vm1110_vm0, %v5430_v25 }
  0xbe   : > { %5154 = vmatmul.mubr.msk.bf16.gmra.mrb[84].mxu0 %vm1110_vm0, %v5431_v26  ;;  %5282 = vmatmul.mubr.msk.bf16.gmra.mrb[84].mxu1 %vm1110_vm0, %v5432_v27 }
  0xbf   : > { %5157 = vmatprep.mubr.msk.bf16.mxu0 %vm1110_vm0, %v5433_v28  ;;  %5285 = vmatprep.mubr.msk.bf16.mxu1 %vm1110_vm0, %v5434_v29  ;;  %v5459_v29 = vld [vmem:[%s5531_s26 + $0x1c8] sm:$0xff]  }
  0xc6   : > { %5158 = vmatmul.mubr.msk.bf16.gmra.mrb[88].mxu0 %vm1110_vm0, %v5435_v30  ;;  %5286 = vmatmul.mubr.msk.bf16.gmra.mrb[88].mxu1 %vm1110_vm0, %v5436_v31  ;;  %v5460_v30 = vld [vmem:[%s5531_s26 + $0x3c8] sm:$0xff]  }
  0xc7   : > { %5161 = vmatprep.mubr.msk.bf16.mxu0 %vm1110_vm0, %v5437_v32  ;;  %5289 = vmatprep.mubr.msk.bf16.mxu1 %vm1110_vm0, %v5438_v33 }
  0xce   : > { %5162 = vmatmul.mubr.msk.bf16.gmra.mrb[92].mxu0 %vm1110_vm0, %v5439_v34  ;;  %5290 = vmatmul.mubr.msk.bf16.gmra.mrb[92].mxu1 %vm1110_vm0, %v5440_v35  ;;  %v5461_v35 = vld [vmem:[%s5531_s26 + $0x1d0] sm:$0xff]  }
  0xcf   : > { %5165 = vmatprep.mubr.msk.bf16.mxu0 %vm1110_vm0, %v5441_v36  ;;  %5293 = vmatprep.mubr.msk.bf16.mxu1 %vm1110_vm0, %v5442_v37  ;;  %v5462_v36 = vld [vmem:[%s5531_s26 + $0x3d0] sm:$0xff]  }
  0xd6   : > { %5166 = vmatmul.mubr.msk.bf16.gmra.mrb[96].mxu0 %vm1110_vm0, %v5443_v38  ;;  %5294 = vmatmul.mubr.msk.bf16.gmra.mrb[96].mxu1 %vm1110_vm0, %v5444_v39 }
  0xd7   : > { %5169 = vmatprep.mubr.msk.bf16.mxu0 %vm1110_vm0, %v5445_v40  ;;  %5297 = vmatprep.mubr.msk.bf16.mxu1 %vm1110_vm0, %v5446_v41 }
  0xde   : > { %5170 = vmatmul.mubr.msk.bf16.gmra.mrb[100].mxu0 %vm1110_vm0, %v5447_v42  ;;  %5298 = vmatmul.mubr.msk.bf16.gmra.mrb[100].mxu1 %vm1110_vm0, %v5448_v43 }
  0xdf   : > { %5173 = vmatprep.mubr.msk.bf16.mxu0 %vm1110_vm0, %v5449_v44  ;;  %5301 = vmatprep.mubr.msk.bf16.mxu1 %vm1110_vm0, %v5450_v45 }
  0xe6   : > { %5174 = vmatmul.mubr.msk.bf16.gmra.mrb[104].mxu0 %vm1110_vm0, %v5451_v46  ;;  %5302 = vmatmul.mubr.msk.bf16.gmra.mrb[104].mxu1 %vm1110_vm0, %v5452_v47 }
  0xe7   : > { %5177 = vmatprep.mubr.msk.bf16.mxu0 %vm1110_vm0, %v5453_v48  ;;  %5305 = vmatprep.mubr.msk.bf16.mxu1 %vm1110_vm0, %v5454_v49 }
  0xe9   : > { %v5071_v51 = vpop.f32.mrb[0].mxu0  ;;  %v5199_v52 = vpop.f32.mrb[0].mxu1 }
  0xea   : > { %v1538_v53 = vadd.f32 %v5071_v51, %v5754_v50  ;;  %v2050_v54 = vadd.f32 %v5199_v52, %v5754_v50  ;;  %v1529_v55 = vpop.f32.mrb[1].mxu0  ;;  %v2041_v56 = vpop.f32.mrb[1].mxu1 }
  0xeb   : > { %v1530_v59 = vadd.f32 %v5754_v50, %v1529_v55  ;;  %v2042_v60 = vadd.f32 %v5754_v50, %v2041_v56  ;;  %v5072_v61 = vpop.f32.mrb[2].mxu0  ;;  %v5200_v62 = vpop.f32.mrb[2].mxu1 }
  0xec   : > { %v2554_v1 = vmax.f32 %v1538_v53, 0.0  ;;  %v2682_v2 = vmax.f32 %v2050_v54, 0.0  ;;  %v1541_v3 = vadd.f32 %v5072_v61, %v5754_v50  ;;  %v2053_v4 = vadd.f32 %v5200_v62, %v5754_v50  ;;  %v1532_v5 = vpop.f32.mrb[3].mxu0  ;;  %v2044_v6 = vpop.f32.mrb[3].mxu1 }
  0xed   : > { %v2552_v7 = vmax.f32 %v1530_v59, 0.0  ;;  %v2680_v8 = vmax.f32 %v2042_v60, 0.0  ;;  %v1533_v9 = vadd.f32 %v5754_v50, %v1532_v5  ;;  %v2045_v10 = vadd.f32 %v5754_v50, %v2044_v6 }
  0xee   : > { %v4675_v11 = vpack.c.bf16 %v2554_v1, %v2554_v1  ;;  %v4803_v12 = vpack.c.bf16 %v2682_v2, %v2682_v2  ;;  %v2555_v13 = vmax.f32 %v1541_v3, 0.0  ;;  %v2683_v14 = vmax.f32 %v2053_v4, 0.0  ;;  %5178 = vmatmul.mubr.msk.bf16.gmra.mrb[108].mxu0 %vm1110_vm0, %v5455_v57  ;;  %5306 = vmatmul.mubr.msk.bf16.gmra.mrb[108].mxu1 %vm1110_vm0, %v5456_v58  ;;  %v5463_v2 = vld [vmem:[%s5531_s26 + $0x1d8] sm:$0xff]  }
  0xef   : > { %v4673_v15 = vpack.c.bf16 %v2552_v7, %v2552_v7  ;;  %v4801_v16 = vpack.c.bf16 %v2680_v8, %v2680_v8  ;;  %v2553_v17 = vmax.f32 %v1533_v9, 0.0  ;;  %v2681_v18 = vmax.f32 %v2045_v10, 0.0  ;;  %5181 = vmatprep.mubr.msk.bf16.mxu0 %vm1110_vm0, %v5457_v63  ;;  %5309 = vmatprep.mubr.msk.bf16.mxu1 %vm1110_vm0, %v5458_v0  ;;  %v5464_v3 = vld [vmem:[%s5531_s26 + $0x3d8] sm:$0xff]   ;;  %v5465_v8 = vld [vmem:[%s5531_s26 + $0x1e0] sm:$0xff]  }
  0xf0   : > { %3835 = vst.msk [vmem:[%s5773_s4 + $0x8] sm:$0xf] %vm3832_vm1, %v4675_v11  ;;  %3963 = vst.msk [vmem:[%s5773_s4 + $0x208] sm:$0xf] %vm3832_vm1, %v4803_v12  ;;  %v4676_v19 = vpack.c.bf16 %v2555_v13, %v2555_v13  ;;  %v4804_v20 = vpack.c.bf16 %v2683_v14, %v2683_v14  ;;  %v5466_v9 = vld [vmem:[%s5531_s26 + $0x3e0] sm:$0xff]  }
  0xf1   : > { %3833 = vst.msk [vmem:[%s5773_s4] sm:$0xf] %vm3832_vm1, %v4673_v15  ;;  %3961 = vst.msk [vmem:[%s5773_s4 + $0x200] sm:$0xf] %vm3832_vm1, %v4801_v16  ;;  %v4674_v21 = vpack.c.bf16 %v2553_v17, %v2553_v17  ;;  %v4802_v22 = vpack.c.bf16 %v2681_v18, %v2681_v18  ;;  %v5075_v23 = vpop.f32.mrb[4].mxu0  ;;  %v5203_v24 = vpop.f32.mrb[4].mxu1 }
  0xf2   : > { %3836 = vst.msk [vmem:[%s5773_s4 + $0xc] sm:$0xf] %vm3832_vm1, %v4676_v19  ;;  %3964 = vst.msk [vmem:[%s5773_s4 + $0x20c] sm:$0xf] %vm3832_vm1, %v4804_v20  ;;  %v1554_v25 = vadd.f32 %v5075_v23, %v5754_v50  ;;  %v2066_v26 = vadd.f32 %v5203_v24, %v5754_v50  ;;  %v1545_v27 = vpop.f32.mrb[5].mxu0  ;;  %v2057_v28 = vpop.f32.mrb[5].mxu1 }
  0xf3   : > { %3834 = vst.msk [vmem:[%s5773_s4 + $0x4] sm:$0xf] %vm3832_vm1, %v4674_v21  ;;  %3962 = vst.msk [vmem:[%s5773_s4 + $0x204] sm:$0xf] %vm3832_vm1, %v4802_v22  ;;  %v1546_v31 = vadd.f32 %v5754_v50, %v1545_v27  ;;  %v2058_v32 = vadd.f32 %v5754_v50, %v2057_v28  ;;  %v5076_v33 = vpop.f32.mrb[6].mxu0  ;;  %v5204_v34 = vpop.f32.mrb[6].mxu1 }
  0xf4   : > { %v2558_v37 = vmax.f32 %v1554_v25, 0.0  ;;  %v2686_v38 = vmax.f32 %v2066_v26, 0.0  ;;  %v1557_v39 = vadd.f32 %v5076_v33, %v5754_v50  ;;  %v2069_v40 = vadd.f32 %v5204_v34, %v5754_v50  ;;  %v1548_v41 = vpop.f32.mrb[7].mxu0  ;;  %v2060_v42 = vpop.f32.mrb[7].mxu1 }
  0xf5   : > { %v2556_v43 = vmax.f32 %v1546_v31, 0.0  ;;  %v2684_v44 = vmax.f32 %v2058_v32, 0.0  ;;  %v1549_v45 = vadd.f32 %v5754_v50, %v1548_v41  ;;  %v2061_v46 = vadd.f32 %v5754_v50, %v2060_v42 }
  0xf6   : > { %v4679_v47 = vpack.c.bf16 %v2558_v37, %v2558_v37  ;;  %v4807_v48 = vpack.c.bf16 %v2686_v38, %v2686_v38  ;;  %v2559_v49 = vmax.f32 %v1557_v39, 0.0  ;;  %v2687_v51 = vmax.f32 %v2069_v40, 0.0  ;;  %5182 = vmatmul.mubr.msk.bf16.gmra.mrb[112].mxu0 %vm1110_vm0, %v5459_v29  ;;  %5310 = vmatmul.mubr.msk.bf16.gmra.mrb[112].mxu1 %vm1110_vm0, %v5460_v30  ;;  %v5467_v38 = vld [vmem:[%s5531_s26 + $0x1e8] sm:$0xff]  }
  0xf7   : > { %v4677_v52 = vpack.c.bf16 %v2556_v43, %v2556_v43  ;;  %v4805_v53 = vpack.c.bf16 %v2684_v44, %v2684_v44  ;;  %v2557_v54 = vmax.f32 %v1549_v45, 0.0  ;;  %v2685_v55 = vmax.f32 %v2061_v46, 0.0  ;;  %5185 = vmatprep.mubr.msk.bf16.mxu0 %vm1110_vm0, %v5461_v35  ;;  %5313 = vmatprep.mubr.msk.bf16.mxu1 %vm1110_vm0, %v5462_v36  ;;  %v5468_v39 = vld [vmem:[%s5531_s26 + $0x3e8] sm:$0xff]   ;;  %v5469_v44 = vld [vmem:[%s5531_s26 + $0x1f0] sm:$0xff]  }
  0xf8   : > { %3839 = vst.msk [vmem:[%s5773_s4 + $0x18] sm:$0xf] %vm3832_vm1, %v4679_v47  ;;  %3967 = vst.msk [vmem:[%s5773_s4 + $0x218] sm:$0xf] %vm3832_vm1, %v4807_v48  ;;  %v4680_v56 = vpack.c.bf16 %v2559_v49, %v2559_v49  ;;  %v4808_v57 = vpack.c.bf16 %v2687_v51, %v2687_v51  ;;  %v5470_v45 = vld [vmem:[%s5531_s26 + $0x3f0] sm:$0xff]  }
  0xf9   : > { %3837 = vst.msk [vmem:[%s5773_s4 + $0x10] sm:$0xf] %vm3832_vm1, %v4677_v52  ;;  %3965 = vst.msk [vmem:[%s5773_s4 + $0x210] sm:$0xf] %vm3832_vm1, %v4805_v53  ;;  %v4678_v58 = vpack.c.bf16 %v2557_v54, %v2557_v54  ;;  %v4806_v59 = vpack.c.bf16 %v2685_v55, %v2685_v55  ;;  %v5079_v60 = vpop.f32.mrb[8].mxu0  ;;  %v5207_v61 = vpop.f32.mrb[8].mxu1 }
  0xfa   : > { %3840 = vst.msk [vmem:[%s5773_s4 + $0x1c] sm:$0xf] %vm3832_vm1, %v4680_v56  ;;  %3968 = vst.msk [vmem:[%s5773_s4 + $0x21c] sm:$0xf] %vm3832_vm1, %v4808_v57  ;;  %v1570_v62 = vadd.f32 %v5079_v60, %v5754_v50  ;;  %v2082_v63 = vadd.f32 %v5207_v61, %v5754_v50  ;;  %v1561_v0 = vpop.f32.mrb[9].mxu0  ;;  %v2073_v1 = vpop.f32.mrb[9].mxu1 }
  0xfb   : > { %3838 = vst.msk [vmem:[%s5773_s4 + $0x14] sm:$0xf] %vm3832_vm1, %v4678_v58  ;;  %3966 = vst.msk [vmem:[%s5773_s4 + $0x214] sm:$0xf] %vm3832_vm1, %v4806_v59  ;;  %v1562_v4 = vadd.f32 %v5754_v50, %v1561_v0  ;;  %v2074_v5 = vadd.f32 %v5754_v50, %v2073_v1  ;;  %v5080_v6 = vpop.f32.mrb[10].mxu0  ;;  %v5208_v7 = vpop.f32.mrb[10].mxu1 }
  0xfc   : > { %v2562_v10 = vmax.f32 %v1570_v62, 0.0  ;;  %v2690_v11 = vmax.f32 %v2082_v63, 0.0  ;;  %v1573_v12 = vadd.f32 %v5080_v6, %v5754_v50  ;;  %v2085_v13 = vadd.f32 %v5208_v7, %v5754_v50  ;;  %v1564_v14 = vpop.f32.mrb[11].mxu0  ;;  %v2076_v15 = vpop.f32.mrb[11].mxu1 }
  0xfd   : > { %v2560_v16 = vmax.f32 %v1562_v4, 0.0  ;;  %v2688_v17 = vmax.f32 %v2074_v5, 0.0  ;;  %v1565_v18 = vadd.f32 %v5754_v50, %v1564_v14  ;;  %v2077_v19 = vadd.f32 %v5754_v50, %v2076_v15 }
  0xfe   : > { %v4683_v20 = vpack.c.bf16 %v2562_v10, %v2562_v10  ;;  %v4811_v21 = vpack.c.bf16 %v2690_v11, %v2690_v11  ;;  %v2563_v22 = vmax.f32 %v1573_v12, 0.0  ;;  %v2691_v23 = vmax.f32 %v2085_v13, 0.0  ;;  %5186 = vmatmul.mubr.msk.bf16.gmra.mrb[116].mxu0 %vm1110_vm0, %v5463_v2  ;;  %5314 = vmatmul.mubr.msk.bf16.gmra.mrb[116].mxu1 %vm1110_vm0, %v5464_v3  ;;  %v5471_v11 = vld [vmem:[%s5531_s26 + $0x1f8] sm:$0xff]  }
  0xff   : > { %v4681_v24 = vpack.c.bf16 %v2560_v16, %v2560_v16  ;;  %v4809_v25 = vpack.c.bf16 %v2688_v17, %v2688_v17  ;;  %v2561_v26 = vmax.f32 %v1565_v18, 0.0  ;;  %v2689_v27 = vmax.f32 %v2077_v19, 0.0  ;;  %5189 = vmatprep.mubr.msk.bf16.mxu0 %vm1110_vm0, %v5465_v8  ;;  %5317 = vmatprep.mubr.msk.bf16.mxu1 %vm1110_vm0, %v5466_v9  ;;  %v5472_v12 = vld [vmem:[%s5531_s26 + $0x3f8] sm:$0xff]  }
 0x100   : > { %3843 = vst.msk [vmem:[%s5773_s4 + $0x28] sm:$0xf] %vm3832_vm1, %v4683_v20  ;;  %3971 = vst.msk [vmem:[%s5773_s4 + $0x228] sm:$0xf] %vm3832_vm1, %v4811_v21  ;;  %v4684_v28 = vpack.c.bf16 %v2563_v22, %v2563_v22  ;;  %v4812_v29 = vpack.c.bf16 %v2691_v23, %v2691_v23 }
 0x101   : > { %3841 = vst.msk [vmem:[%s5773_s4 + $0x20] sm:$0xf] %vm3832_vm1, %v4681_v24  ;;  %3969 = vst.msk [vmem:[%s5773_s4 + $0x220] sm:$0xf] %vm3832_vm1, %v4809_v25  ;;  %v4682_v30 = vpack.c.bf16 %v2561_v26, %v2561_v26  ;;  %v4810_v31 = vpack.c.bf16 %v2689_v27, %v2689_v27  ;;  %v5083_v32 = vpop.f32.mrb[12].mxu0  ;;  %v5211_v33 = vpop.f32.mrb[12].mxu1 }
 0x102   : > { %3844 = vst.msk [vmem:[%s5773_s4 + $0x2c] sm:$0xf] %vm3832_vm1, %v4684_v28  ;;  %3972 = vst.msk [vmem:[%s5773_s4 + $0x22c] sm:$0xf] %vm3832_vm1, %v4812_v29  ;;  %v1586_v34 = vadd.f32 %v5083_v32, %v5754_v50  ;;  %v2098_v35 = vadd.f32 %v5211_v33, %v5754_v50  ;;  %v1577_v36 = vpop.f32.mrb[13].mxu0  ;;  %v2089_v37 = vpop.f32.mrb[13].mxu1 }
 0x103   : > { %3842 = vst.msk [vmem:[%s5773_s4 + $0x24] sm:$0xf] %vm3832_vm1, %v4682_v30  ;;  %3970 = vst.msk [vmem:[%s5773_s4 + $0x224] sm:$0xf] %vm3832_vm1, %v4810_v31  ;;  %v1578_v40 = vadd.f32 %v5754_v50, %v1577_v36  ;;  %v2090_v41 = vadd.f32 %v5754_v50, %v2089_v37  ;;  %v5084_v42 = vpop.f32.mrb[14].mxu0  ;;  %v5212_v43 = vpop.f32.mrb[14].mxu1 }
 0x104   : > { %v2566_v46 = vmax.f32 %v1586_v34, 0.0  ;;  %v2694_v47 = vmax.f32 %v2098_v35, 0.0  ;;  %v1589_v48 = vadd.f32 %v5084_v42, %v5754_v50  ;;  %v2101_v49 = vadd.f32 %v5212_v43, %v5754_v50  ;;  %v1580_v51 = vpop.f32.mrb[15].mxu0  ;;  %v2092_v52 = vpop.f32.mrb[15].mxu1 }
 0x105   : > { %v2564_v53 = vmax.f32 %v1578_v40, 0.0  ;;  %v2692_v54 = vmax.f32 %v2090_v41, 0.0  ;;  %v1581_v55 = vadd.f32 %v5754_v50, %v1580_v51  ;;  %v2093_v56 = vadd.f32 %v5754_v50, %v2092_v52 }
 0x106   : > { %v4687_v57 = vpack.c.bf16 %v2566_v46, %v2566_v46  ;;  %v4815_v58 = vpack.c.bf16 %v2694_v47, %v2694_v47  ;;  %v2567_v59 = vmax.f32 %v1589_v48, 0.0  ;;  %v2695_v60 = vmax.f32 %v2101_v49, 0.0  ;;  %5190 = vmatmul.mubr.msk.bf16.gmra.mrb[120].mxu0 %vm1110_vm0, %v5467_v38  ;;  %5318 = vmatmul.mubr.msk.bf16.gmra.mrb[120].mxu1 %vm1110_vm0, %v5468_v39 }
 0x107   : > { %v4685_v61 = vpack.c.bf16 %v2564_v53, %v2564_v53  ;;  %v4813_v62 = vpack.c.bf16 %v2692_v54, %v2692_v54  ;;  %v2565_v63 = vmax.f32 %v1581_v55, 0.0  ;;  %v2693_v0 = vmax.f32 %v2093_v56, 0.0  ;;  %5193 = vmatprep.mubr.msk.bf16.mxu0 %vm1110_vm0, %v5469_v44  ;;  %5321 = vmatprep.mubr.msk.bf16.mxu1 %vm1110_vm0, %v5470_v45 }
 0x108   : > { %3847 = vst.msk [vmem:[%s5773_s4 + $0x38] sm:$0xf] %vm3832_vm1, %v4687_v57  ;;  %3975 = vst.msk [vmem:[%s5773_s4 + $0x238] sm:$0xf] %vm3832_vm1, %v4815_v58  ;;  %v4688_v1 = vpack.c.bf16 %v2567_v59, %v2567_v59  ;;  %v4816_v2 = vpack.c.bf16 %v2695_v60, %v2695_v60 }
 0x109   : > { %3845 = vst.msk [vmem:[%s5773_s4 + $0x30] sm:$0xf] %vm3832_vm1, %v4685_v61  ;;  %3973 = vst.msk [vmem:[%s5773_s4 + $0x230] sm:$0xf] %vm3832_vm1, %v4813_v62  ;;  %v4686_v3 = vpack.c.bf16 %v2565_v63, %v2565_v63  ;;  %v4814_v4 = vpack.c.bf16 %v2693_v0, %v2693_v0  ;;  %v5087_v5 = vpop.f32.mrb[16].mxu0  ;;  %v5215_v6 = vpop.f32.mrb[16].mxu1 }
 0x10a   : > { %3848 = vst.msk [vmem:[%s5773_s4 + $0x3c] sm:$0xf] %vm3832_vm1, %v4688_v1  ;;  %3976 = vst.msk [vmem:[%s5773_s4 + $0x23c] sm:$0xf] %vm3832_vm1, %v4816_v2  ;;  %v1602_v7 = vadd.f32 %v5087_v5, %v5754_v50  ;;  %v2114_v8 = vadd.f32 %v5215_v6, %v5754_v50  ;;  %v1593_v9 = vpop.f32.mrb[17].mxu0  ;;  %v2105_v10 = vpop.f32.mrb[17].mxu1 }
 0x10b   : > { %3846 = vst.msk [vmem:[%s5773_s4 + $0x34] sm:$0xf] %vm3832_vm1, %v4686_v3  ;;  %3974 = vst.msk [vmem:[%s5773_s4 + $0x234] sm:$0xf] %vm3832_vm1, %v4814_v4  ;;  %v1594_v13 = vadd.f32 %v5754_v50, %v1593_v9  ;;  %v2106_v14 = vadd.f32 %v5754_v50, %v2105_v10  ;;  %v5088_v15 = vpop.f32.mrb[18].mxu0  ;;  %v5216_v16 = vpop.f32.mrb[18].mxu1 }
 0x10c   : > { %v2570_v17 = vmax.f32 %v1602_v7, 0.0  ;;  %v2698_v18 = vmax.f32 %v2114_v8, 0.0  ;;  %v1605_v19 = vadd.f32 %v5088_v15, %v5754_v50  ;;  %v2117_v20 = vadd.f32 %v5216_v16, %v5754_v50  ;;  %v1596_v21 = vpop.f32.mrb[19].mxu0  ;;  %v2108_v22 = vpop.f32.mrb[19].mxu1 }
 0x10d   : > { %v2568_v23 = vmax.f32 %v1594_v13, 0.0  ;;  %v2696_v24 = vmax.f32 %v2106_v14, 0.0  ;;  %v1597_v25 = vadd.f32 %v5754_v50, %v1596_v21  ;;  %v2109_v26 = vadd.f32 %v5754_v50, %v2108_v22 }
 0x10e   : > { %v4691_v27 = vpack.c.bf16 %v2570_v17, %v2570_v17  ;;  %v4819_v28 = vpack.c.bf16 %v2698_v18, %v2698_v18  ;;  %v2571_v29 = vmax.f32 %v1605_v19, 0.0  ;;  %v2699_v30 = vmax.f32 %v2117_v20, 0.0  ;;  %5194 = vmatmul.mubr.msk.bf16.gmra.mrb[124].mxu0 %vm1110_vm0, %v5471_v11  ;;  %5322 = vmatmul.mubr.msk.bf16.gmra.mrb[124].mxu1 %vm1110_vm0, %v5472_v12 }
 0x10f   : > { %v4689_v31 = vpack.c.bf16 %v2568_v23, %v2568_v23  ;;  %v4817_v32 = vpack.c.bf16 %v2696_v24, %v2696_v24  ;;  %v2569_v33 = vmax.f32 %v1597_v25, 0.0  ;;  %v2697_v34 = vmax.f32 %v2109_v26, 0.0 }
 0x110   : > { %3851 = vst.msk [vmem:[%s5773_s4 + $0x48] sm:$0xf] %vm3832_vm1, %v4691_v27  ;;  %3979 = vst.msk [vmem:[%s5773_s4 + $0x248] sm:$0xf] %vm3832_vm1, %v4819_v28  ;;  %v4692_v35 = vpack.c.bf16 %v2571_v29, %v2571_v29  ;;  %v4820_v36 = vpack.c.bf16 %v2699_v30, %v2699_v30 }
 0x111   : > { %3849 = vst.msk [vmem:[%s5773_s4 + $0x40] sm:$0xf] %vm3832_vm1, %v4689_v31  ;;  %3977 = vst.msk [vmem:[%s5773_s4 + $0x240] sm:$0xf] %vm3832_vm1, %v4817_v32  ;;  %v4690_v37 = vpack.c.bf16 %v2569_v33, %v2569_v33  ;;  %v4818_v38 = vpack.c.bf16 %v2697_v34, %v2697_v34  ;;  %v5091_v39 = vpop.f32.mrb[20].mxu0  ;;  %v5219_v40 = vpop.f32.mrb[20].mxu1 }
 0x112   : > { %3852 = vst.msk [vmem:[%s5773_s4 + $0x4c] sm:$0xf] %vm3832_vm1, %v4692_v35  ;;  %3980 = vst.msk [vmem:[%s5773_s4 + $0x24c] sm:$0xf] %vm3832_vm1, %v4820_v36  ;;  %v1618_v41 = vadd.f32 %v5091_v39, %v5754_v50  ;;  %v2130_v42 = vadd.f32 %v5219_v40, %v5754_v50  ;;  %v1609_v43 = vpop.f32.mrb[21].mxu0  ;;  %v2121_v44 = vpop.f32.mrb[21].mxu1 }
 0x113   : > { %3850 = vst.msk [vmem:[%s5773_s4 + $0x44] sm:$0xf] %vm3832_vm1, %v4690_v37  ;;  %3978 = vst.msk [vmem:[%s5773_s4 + $0x244] sm:$0xf] %vm3832_vm1, %v4818_v38  ;;  %v1610_v45 = vadd.f32 %v5754_v50, %v1609_v43  ;;  %v2122_v46 = vadd.f32 %v5754_v50, %v2121_v44  ;;  %v5092_v47 = vpop.f32.mrb[22].mxu0  ;;  %v5220_v48 = vpop.f32.mrb[22].mxu1 }
 0x114   : > { %v2574_v49 = vmax.f32 %v1618_v41, 0.0  ;;  %v2702_v51 = vmax.f32 %v2130_v42, 0.0  ;;  %v1621_v52 = vadd.f32 %v5092_v47, %v5754_v50  ;;  %v2133_v53 = vadd.f32 %v5220_v48, %v5754_v50  ;;  %v1612_v54 = vpop.f32.mrb[23].mxu0  ;;  %v2124_v55 = vpop.f32.mrb[23].mxu1 }
 0x115   : > { %v2572_v56 = vmax.f32 %v1610_v45, 0.0  ;;  %v2700_v57 = vmax.f32 %v2122_v46, 0.0  ;;  %v1613_v58 = vadd.f32 %v5754_v50, %v1612_v54  ;;  %v2125_v59 = vadd.f32 %v5754_v50, %v2124_v55 }
 0x116   : > { %v4695_v60 = vpack.c.bf16 %v2574_v49, %v2574_v49  ;;  %v4823_v61 = vpack.c.bf16 %v2702_v51, %v2702_v51  ;;  %v2575_v62 = vmax.f32 %v1621_v52, 0.0  ;;  %v2703_v63 = vmax.f32 %v2133_v53, 0.0 }
 0x117   : > { %v4693_v0 = vpack.c.bf16 %v2572_v56, %v2572_v56  ;;  %v4821_v1 = vpack.c.bf16 %v2700_v57, %v2700_v57  ;;  %v2573_v2 = vmax.f32 %v1613_v58, 0.0  ;;  %v2701_v3 = vmax.f32 %v2125_v59, 0.0 }
 0x118   : > { %3855 = vst.msk [vmem:[%s5773_s4 + $0x58] sm:$0xf] %vm3832_vm1, %v4695_v60  ;;  %3983 = vst.msk [vmem:[%s5773_s4 + $0x258] sm:$0xf] %vm3832_vm1, %v4823_v61  ;;  %v4696_v4 = vpack.c.bf16 %v2575_v62, %v2575_v62  ;;  %v4824_v5 = vpack.c.bf16 %v2703_v63, %v2703_v63 }
 0x119   : > { %3853 = vst.msk [vmem:[%s5773_s4 + $0x50] sm:$0xf] %vm3832_vm1, %v4693_v0  ;;  %3981 = vst.msk [vmem:[%s5773_s4 + $0x250] sm:$0xf] %vm3832_vm1, %v4821_v1  ;;  %v4694_v6 = vpack.c.bf16 %v2573_v2, %v2573_v2  ;;  %v4822_v7 = vpack.c.bf16 %v2701_v3, %v2701_v3  ;;  %v5095_v8 = vpop.f32.mrb[24].mxu0  ;;  %v5223_v9 = vpop.f32.mrb[24].mxu1 }
 0x11a   : > { %3856 = vst.msk [vmem:[%s5773_s4 + $0x5c] sm:$0xf] %vm3832_vm1, %v4696_v4  ;;  %3984 = vst.msk [vmem:[%s5773_s4 + $0x25c] sm:$0xf] %vm3832_vm1, %v4824_v5  ;;  %v1634_v10 = vadd.f32 %v5095_v8, %v5754_v50  ;;  %v2146_v11 = vadd.f32 %v5223_v9, %v5754_v50  ;;  %v1625_v12 = vpop.f32.mrb[25].mxu0  ;;  %v2137_v13 = vpop.f32.mrb[25].mxu1 }
 0x11b   : > { %3854 = vst.msk [vmem:[%s5773_s4 + $0x54] sm:$0xf] %vm3832_vm1, %v4694_v6  ;;  %3982 = vst.msk [vmem:[%s5773_s4 + $0x254] sm:$0xf] %vm3832_vm1, %v4822_v7  ;;  %v1626_v14 = vadd.f32 %v5754_v50, %v1625_v12  ;;  %v2138_v15 = vadd.f32 %v5754_v50, %v2137_v13  ;;  %v5096_v16 = vpop.f32.mrb[26].mxu0  ;;  %v5224_v17 = vpop.f32.mrb[26].mxu1 }
 0x11c   : > { %v2578_v18 = vmax.f32 %v1634_v10, 0.0  ;;  %v2706_v19 = vmax.f32 %v2146_v11, 0.0  ;;  %v1637_v20 = vadd.f32 %v5096_v16, %v5754_v50  ;;  %v2149_v21 = vadd.f32 %v5224_v17, %v5754_v50  ;;  %v1628_v22 = vpop.f32.mrb[27].mxu0  ;;  %v2140_v23 = vpop.f32.mrb[27].mxu1 }
 0x11d   : > { %v2576_v24 = vmax.f32 %v1626_v14, 0.0  ;;  %v2704_v25 = vmax.f32 %v2138_v15, 0.0  ;;  %v1629_v26 = vadd.f32 %v5754_v50, %v1628_v22  ;;  %v2141_v27 = vadd.f32 %v5754_v50, %v2140_v23 }
 0x11e   : > { %v4699_v28 = vpack.c.bf16 %v2578_v18, %v2578_v18  ;;  %v4827_v29 = vpack.c.bf16 %v2706_v19, %v2706_v19  ;;  %v2579_v30 = vmax.f32 %v1637_v20, 0.0  ;;  %v2707_v31 = vmax.f32 %v2149_v21, 0.0 }
 0x11f   : > { %v4697_v32 = vpack.c.bf16 %v2576_v24, %v2576_v24  ;;  %v4825_v33 = vpack.c.bf16 %v2704_v25, %v2704_v25  ;;  %v2577_v34 = vmax.f32 %v1629_v26, 0.0  ;;  %v2705_v35 = vmax.f32 %v2141_v27, 0.0 }
 0x120   : > { %3859 = vst.msk [vmem:[%s5773_s4 + $0x68] sm:$0xf] %vm3832_vm1, %v4699_v28  ;;  %3987 = vst.msk [vmem:[%s5773_s4 + $0x268] sm:$0xf] %vm3832_vm1, %v4827_v29  ;;  %v4700_v36 = vpack.c.bf16 %v2579_v30, %v2579_v30  ;;  %v4828_v37 = vpack.c.bf16 %v2707_v31, %v2707_v31 }
 0x121   : > { %3857 = vst.msk [vmem:[%s5773_s4 + $0x60] sm:$0xf] %vm3832_vm1, %v4697_v32  ;;  %3985 = vst.msk [vmem:[%s5773_s4 + $0x260] sm:$0xf] %vm3832_vm1, %v4825_v33  ;;  %v4698_v38 = vpack.c.bf16 %v2577_v34, %v2577_v34  ;;  %v4826_v39 = vpack.c.bf16 %v2705_v35, %v2705_v35  ;;  %v5099_v40 = vpop.f32.mrb[28].mxu0  ;;  %v5227_v41 = vpop.f32.mrb[28].mxu1 }
 0x122   : > { %3860 = vst.msk [vmem:[%s5773_s4 + $0x6c] sm:$0xf] %vm3832_vm1, %v4700_v36  ;;  %3988 = vst.msk [vmem:[%s5773_s4 + $0x26c] sm:$0xf] %vm3832_vm1, %v4828_v37  ;;  %v1650_v42 = vadd.f32 %v5099_v40, %v5754_v50  ;;  %v2162_v43 = vadd.f32 %v5227_v41, %v5754_v50  ;;  %v1641_v44 = vpop.f32.mrb[29].mxu0  ;;  %v2153_v45 = vpop.f32.mrb[29].mxu1 }
 0x123   : > { %3858 = vst.msk [vmem:[%s5773_s4 + $0x64] sm:$0xf] %vm3832_vm1, %v4698_v38  ;;  %3986 = vst.msk [vmem:[%s5773_s4 + $0x264] sm:$0xf] %vm3832_vm1, %v4826_v39  ;;  %v1642_v46 = vadd.f32 %v5754_v50, %v1641_v44  ;;  %v2154_v47 = vadd.f32 %v5754_v50, %v2153_v45  ;;  %v5100_v48 = vpop.f32.mrb[30].mxu0  ;;  %v5228_v49 = vpop.f32.mrb[30].mxu1 }
 0x124   : > { %v2582_v51 = vmax.f32 %v1650_v42, 0.0  ;;  %v2710_v52 = vmax.f32 %v2162_v43, 0.0  ;;  %v1653_v53 = vadd.f32 %v5100_v48, %v5754_v50  ;;  %v2165_v54 = vadd.f32 %v5228_v49, %v5754_v50  ;;  %v1644_v55 = vpop.f32.mrb[31].mxu0  ;;  %v2156_v56 = vpop.f32.mrb[31].mxu1 }
 0x125   : > { %v2580_v57 = vmax.f32 %v1642_v46, 0.0  ;;  %v2708_v58 = vmax.f32 %v2154_v47, 0.0  ;;  %v1645_v59 = vadd.f32 %v5754_v50, %v1644_v55  ;;  %v2157_v60 = vadd.f32 %v5754_v50, %v2156_v56 }
 0x126   : > { %v4703_v61 = vpack.c.bf16 %v2582_v51, %v2582_v51  ;;  %v4831_v62 = vpack.c.bf16 %v2710_v52, %v2710_v52  ;;  %v2583_v63 = vmax.f32 %v1653_v53, 0.0  ;;  %v2711_v0 = vmax.f32 %v2165_v54, 0.0 }
 0x127   : > { %v4701_v1 = vpack.c.bf16 %v2580_v57, %v2580_v57  ;;  %v4829_v2 = vpack.c.bf16 %v2708_v58, %v2708_v58  ;;  %v2581_v3 = vmax.f32 %v1645_v59, 0.0  ;;  %v2709_v4 = vmax.f32 %v2157_v60, 0.0 }
 0x128   : > { %3863 = vst.msk [vmem:[%s5773_s4 + $0x78] sm:$0xf] %vm3832_vm1, %v4703_v61  ;;  %3991 = vst.msk [vmem:[%s5773_s4 + $0x278] sm:$0xf] %vm3832_vm1, %v4831_v62  ;;  %v4704_v5 = vpack.c.bf16 %v2583_v63, %v2583_v63  ;;  %v4832_v6 = vpack.c.bf16 %v2711_v0, %v2711_v0 }
 0x129   : > { %3861 = vst.msk [vmem:[%s5773_s4 + $0x70] sm:$0xf] %vm3832_vm1, %v4701_v1  ;;  %3989 = vst.msk [vmem:[%s5773_s4 + $0x270] sm:$0xf] %vm3832_vm1, %v4829_v2  ;;  %v4702_v7 = vpack.c.bf16 %v2581_v3, %v2581_v3  ;;  %v4830_v8 = vpack.c.bf16 %v2709_v4, %v2709_v4  ;;  %v5103_v9 = vpop.f32.mrb[32].mxu0  ;;  %v5231_v10 = vpop.f32.mrb[32].mxu1 }
 0x12a   : > { %3864 = vst.msk [vmem:[%s5773_s4 + $0x7c] sm:$0xf] %vm3832_vm1, %v4704_v5  ;;  %3992 = vst.msk [vmem:[%s5773_s4 + $0x27c] sm:$0xf] %vm3832_vm1, %v4832_v6  ;;  %v1666_v11 = vadd.f32 %v5103_v9, %v5754_v50  ;;  %v2178_v12 = vadd.f32 %v5231_v10, %v5754_v50  ;;  %v1657_v13 = vpop.f32.mrb[33].mxu0  ;;  %v2169_v14 = vpop.f32.mrb[33].mxu1 }
 0x12b   : > { %3862 = vst.msk [vmem:[%s5773_s4 + $0x74] sm:$0xf] %vm3832_vm1, %v4702_v7  ;;  %3990 = vst.msk [vmem:[%s5773_s4 + $0x274] sm:$0xf] %vm3832_vm1, %v4830_v8  ;;  %v1658_v15 = vadd.f32 %v5754_v50, %v1657_v13  ;;  %v2170_v16 = vadd.f32 %v5754_v50, %v2169_v14  ;;  %v5104_v17 = vpop.f32.mrb[34].mxu0  ;;  %v5232_v18 = vpop.f32.mrb[34].mxu1 }
 0x12c   : > { %v2586_v19 = vmax.f32 %v1666_v11, 0.0  ;;  %v2714_v20 = vmax.f32 %v2178_v12, 0.0  ;;  %v1669_v21 = vadd.f32 %v5104_v17, %v5754_v50  ;;  %v2181_v22 = vadd.f32 %v5232_v18, %v5754_v50  ;;  %v1660_v23 = vpop.f32.mrb[35].mxu0  ;;  %v2172_v24 = vpop.f32.mrb[35].mxu1 }
 0x12d   : > { %v2584_v25 = vmax.f32 %v1658_v15, 0.0  ;;  %v2712_v26 = vmax.f32 %v2170_v16, 0.0  ;;  %v1661_v27 = vadd.f32 %v5754_v50, %v1660_v23  ;;  %v2173_v28 = vadd.f32 %v5754_v50, %v2172_v24 }
 0x12e   : > { %v4707_v29 = vpack.c.bf16 %v2586_v19, %v2586_v19  ;;  %v4835_v30 = vpack.c.bf16 %v2714_v20, %v2714_v20  ;;  %v2587_v31 = vmax.f32 %v1669_v21, 0.0  ;;  %v2715_v32 = vmax.f32 %v2181_v22, 0.0 }
 0x12f   : > { %v4705_v33 = vpack.c.bf16 %v2584_v25, %v2584_v25  ;;  %v4833_v34 = vpack.c.bf16 %v2712_v26, %v2712_v26  ;;  %v2585_v35 = vmax.f32 %v1661_v27, 0.0  ;;  %v2713_v36 = vmax.f32 %v2173_v28, 0.0 }
 0x130   : > { %3867 = vst.msk [vmem:[%s5773_s4 + $0x88] sm:$0xf] %vm3832_vm1, %v4707_v29  ;;  %3995 = vst.msk [vmem:[%s5773_s4 + $0x288] sm:$0xf] %vm3832_vm1, %v4835_v30  ;;  %v4708_v37 = vpack.c.bf16 %v2587_v31, %v2587_v31  ;;  %v4836_v38 = vpack.c.bf16 %v2715_v32, %v2715_v32 }
 0x131   : > { %3865 = vst.msk [vmem:[%s5773_s4 + $0x80] sm:$0xf] %vm3832_vm1, %v4705_v33  ;;  %3993 = vst.msk [vmem:[%s5773_s4 + $0x280] sm:$0xf] %vm3832_vm1, %v4833_v34  ;;  %v4706_v39 = vpack.c.bf16 %v2585_v35, %v2585_v35  ;;  %v4834_v40 = vpack.c.bf16 %v2713_v36, %v2713_v36  ;;  %v5107_v41 = vpop.f32.mrb[36].mxu0  ;;  %v5235_v42 = vpop.f32.mrb[36].mxu1 }
 0x132   : > { %3868 = vst.msk [vmem:[%s5773_s4 + $0x8c] sm:$0xf] %vm3832_vm1, %v4708_v37  ;;  %3996 = vst.msk [vmem:[%s5773_s4 + $0x28c] sm:$0xf] %vm3832_vm1, %v4836_v38  ;;  %v1682_v43 = vadd.f32 %v5107_v41, %v5754_v50  ;;  %v2194_v44 = vadd.f32 %v5235_v42, %v5754_v50  ;;  %v1673_v45 = vpop.f32.mrb[37].mxu0  ;;  %v2185_v46 = vpop.f32.mrb[37].mxu1 }
 0x133   : > { %3866 = vst.msk [vmem:[%s5773_s4 + $0x84] sm:$0xf] %vm3832_vm1, %v4706_v39  ;;  %3994 = vst.msk [vmem:[%s5773_s4 + $0x284] sm:$0xf] %vm3832_vm1, %v4834_v40  ;;  %v1674_v47 = vadd.f32 %v5754_v50, %v1673_v45  ;;  %v2186_v48 = vadd.f32 %v5754_v50, %v2185_v46  ;;  %v5108_v49 = vpop.f32.mrb[38].mxu0  ;;  %v5236_v51 = vpop.f32.mrb[38].mxu1 }
 0x134   : > { %v2590_v52 = vmax.f32 %v1682_v43, 0.0  ;;  %v2718_v53 = vmax.f32 %v2194_v44, 0.0  ;;  %v1685_v54 = vadd.f32 %v5108_v49, %v5754_v50  ;;  %v2197_v55 = vadd.f32 %v5236_v51, %v5754_v50  ;;  %v1676_v56 = vpop.f32.mrb[39].mxu0  ;;  %v2188_v57 = vpop.f32.mrb[39].mxu1 }
 0x135   : > { %v2588_v58 = vmax.f32 %v1674_v47, 0.0  ;;  %v2716_v59 = vmax.f32 %v2186_v48, 0.0  ;;  %v1677_v60 = vadd.f32 %v5754_v50, %v1676_v56  ;;  %v2189_v61 = vadd.f32 %v5754_v50, %v2188_v57 }
 0x136   : > { %v4711_v62 = vpack.c.bf16 %v2590_v52, %v2590_v52  ;;  %v4839_v63 = vpack.c.bf16 %v2718_v53, %v2718_v53  ;;  %v2591_v0 = vmax.f32 %v1685_v54, 0.0  ;;  %v2719_v1 = vmax.f32 %v2197_v55, 0.0 }
 0x137   : > { %v4709_v2 = vpack.c.bf16 %v2588_v58, %v2588_v58  ;;  %v4837_v3 = vpack.c.bf16 %v2716_v59, %v2716_v59  ;;  %v2589_v4 = vmax.f32 %v1677_v60, 0.0  ;;  %v2717_v5 = vmax.f32 %v2189_v61, 0.0 }
 0x138   : > { %3871 = vst.msk [vmem:[%s5773_s4 + $0x98] sm:$0xf] %vm3832_vm1, %v4711_v62  ;;  %3999 = vst.msk [vmem:[%s5773_s4 + $0x298] sm:$0xf] %vm3832_vm1, %v4839_v63  ;;  %v4712_v6 = vpack.c.bf16 %v2591_v0, %v2591_v0  ;;  %v4840_v7 = vpack.c.bf16 %v2719_v1, %v2719_v1 }
 0x139   : > { %3869 = vst.msk [vmem:[%s5773_s4 + $0x90] sm:$0xf] %vm3832_vm1, %v4709_v2  ;;  %3997 = vst.msk [vmem:[%s5773_s4 + $0x290] sm:$0xf] %vm3832_vm1, %v4837_v3  ;;  %v4710_v8 = vpack.c.bf16 %v2589_v4, %v2589_v4  ;;  %v4838_v9 = vpack.c.bf16 %v2717_v5, %v2717_v5  ;;  %v5111_v10 = vpop.f32.mrb[40].mxu0  ;;  %v5239_v11 = vpop.f32.mrb[40].mxu1 }
 0x13a   : > { %3872 = vst.msk [vmem:[%s5773_s4 + $0x9c] sm:$0xf] %vm3832_vm1, %v4712_v6  ;;  %4000 = vst.msk [vmem:[%s5773_s4 + $0x29c] sm:$0xf] %vm3832_vm1, %v4840_v7  ;;  %v1698_v12 = vadd.f32 %v5111_v10, %v5754_v50  ;;  %v2210_v13 = vadd.f32 %v5239_v11, %v5754_v50  ;;  %v1689_v14 = vpop.f32.mrb[41].mxu0  ;;  %v2201_v15 = vpop.f32.mrb[41].mxu1 }
 0x13b   : > { %3870 = vst.msk [vmem:[%s5773_s4 + $0x94] sm:$0xf] %vm3832_vm1, %v4710_v8  ;;  %3998 = vst.msk [vmem:[%s5773_s4 + $0x294] sm:$0xf] %vm3832_vm1, %v4838_v9  ;;  %v1690_v16 = vadd.f32 %v5754_v50, %v1689_v14  ;;  %v2202_v17 = vadd.f32 %v5754_v50, %v2201_v15  ;;  %v5112_v18 = vpop.f32.mrb[42].mxu0  ;;  %v5240_v19 = vpop.f32.mrb[42].mxu1 }
 0x13c   : > { %v2594_v20 = vmax.f32 %v1698_v12, 0.0  ;;  %v2722_v21 = vmax.f32 %v2210_v13, 0.0  ;;  %v1701_v22 = vadd.f32 %v5112_v18, %v5754_v50  ;;  %v2213_v23 = vadd.f32 %v5240_v19, %v5754_v50  ;;  %v1692_v24 = vpop.f32.mrb[43].mxu0  ;;  %v2204_v25 = vpop.f32.mrb[43].mxu1  ;;  %v6088_v12 = vld [vmem:[%s6584_s2] ss:$0 sm:$0xff] }
 0x13d   : > { %v2592_v26 = vmax.f32 %v1690_v16, 0.0  ;;  %v2720_v27 = vmax.f32 %v2202_v17, 0.0  ;;  %v1693_v28 = vadd.f32 %v5754_v50, %v1692_v24  ;;  %v2205_v29 = vadd.f32 %v5754_v50, %v2204_v25 }
 0x13e   : > { %v4715_v30 = vpack.c.bf16 %v2594_v20, %v2594_v20  ;;  %v4843_v31 = vpack.c.bf16 %v2722_v21, %v2722_v21  ;;  %v2595_v32 = vmax.f32 %v1701_v22, 0.0  ;;  %v2723_v33 = vmax.f32 %v2213_v23, 0.0 }
 0x13f   : > { %v4713_v34 = vpack.c.bf16 %v2592_v26, %v2592_v26  ;;  %v4841_v35 = vpack.c.bf16 %v2720_v27, %v2720_v27  ;;  %v2593_v36 = vmax.f32 %v1693_v28, 0.0  ;;  %v2721_v37 = vmax.f32 %v2205_v29, 0.0 }
 0x140   : > { %3875 = vst.msk [vmem:[%s5773_s4 + $0xa8] sm:$0xf] %vm3832_vm1, %v4715_v30  ;;  %4003 = vst.msk [vmem:[%s5773_s4 + $0x2a8] sm:$0xf] %vm3832_vm1, %v4843_v31  ;;  %v4716_v38 = vpack.c.bf16 %v2595_v32, %v2595_v32  ;;  %v4844_v39 = vpack.c.bf16 %v2723_v33, %v2723_v33 }
 0x141   : > { %3873 = vst.msk [vmem:[%s5773_s4 + $0xa0] sm:$0xf] %vm3832_vm1, %v4713_v34  ;;  %4001 = vst.msk [vmem:[%s5773_s4 + $0x2a0] sm:$0xf] %vm3832_vm1, %v4841_v35  ;;  %v4714_v40 = vpack.c.bf16 %v2593_v36, %v2593_v36  ;;  %v4842_v41 = vpack.c.bf16 %v2721_v37, %v2721_v37  ;;  %v5115_v42 = vpop.f32.mrb[44].mxu0  ;;  %v5243_v43 = vpop.f32.mrb[44].mxu1 }
 0x142   : > { %3876 = vst.msk [vmem:[%s5773_s4 + $0xac] sm:$0xf] %vm3832_vm1, %v4716_v38  ;;  %4004 = vst.msk [vmem:[%s5773_s4 + $0x2ac] sm:$0xf] %vm3832_vm1, %v4844_v39  ;;  %v1714_v44 = vadd.f32 %v5115_v42, %v5754_v50  ;;  %v2226_v45 = vadd.f32 %v5243_v43, %v5754_v50  ;;  %v1705_v46 = vpop.f32.mrb[45].mxu0  ;;  %v2217_v47 = vpop.f32.mrb[45].mxu1 }
 0x143   : > { %3874 = vst.msk [vmem:[%s5773_s4 + $0xa4] sm:$0xf] %vm3832_vm1, %v4714_v40  ;;  %4002 = vst.msk [vmem:[%s5773_s4 + $0x2a4] sm:$0xf] %vm3832_vm1, %v4842_v41  ;;  %v1706_v48 = vadd.f32 %v5754_v50, %v1705_v46  ;;  %v2218_v49 = vadd.f32 %v5754_v50, %v2217_v47  ;;  %v5116_v51 = vpop.f32.mrb[46].mxu0  ;;  %v5244_v52 = vpop.f32.mrb[46].mxu1 }
 0x144   : > { %v2598_v53 = vmax.f32 %v1714_v44, 0.0  ;;  %v2726_v54 = vmax.f32 %v2226_v45, 0.0  ;;  %v1717_v55 = vadd.f32 %v5116_v51, %v5754_v50  ;;  %v2229_v56 = vadd.f32 %v5244_v52, %v5754_v50  ;;  %v1708_v57 = vpop.f32.mrb[47].mxu0  ;;  %v2220_v58 = vpop.f32.mrb[47].mxu1 }
 0x145   : > { %v2596_v59 = vmax.f32 %v1706_v48, 0.0  ;;  %v2724_v60 = vmax.f32 %v2218_v49, 0.0  ;;  %v1709_v61 = vadd.f32 %v5754_v50, %v1708_v57  ;;  %v2221_v62 = vadd.f32 %v5754_v50, %v2220_v58 }
 0x146   : > { %v4719_v63 = vpack.c.bf16 %v2598_v53, %v2598_v53  ;;  %v4847_v0 = vpack.c.bf16 %v2726_v54, %v2726_v54  ;;  %v2599_v1 = vmax.f32 %v1717_v55, 0.0  ;;  %v2727_v2 = vmax.f32 %v2229_v56, 0.0 }
 0x147   : > { %v4717_v3 = vpack.c.bf16 %v2596_v59, %v2596_v59  ;;  %v4845_v4 = vpack.c.bf16 %v2724_v60, %v2724_v60  ;;  %v2597_v5 = vmax.f32 %v1709_v61, 0.0  ;;  %v2725_v6 = vmax.f32 %v2221_v62, 0.0 }
 0x148   : > { %3879 = vst.msk [vmem:[%s5773_s4 + $0xb8] sm:$0xf] %vm3832_vm1, %v4719_v63  ;;  %4007 = vst.msk [vmem:[%s5773_s4 + $0x2b8] sm:$0xf] %vm3832_vm1, %v4847_v0  ;;  %v4720_v7 = vpack.c.bf16 %v2599_v1, %v2599_v1  ;;  %v4848_v8 = vpack.c.bf16 %v2727_v2, %v2727_v2 }
 0x149   : > { %3877 = vst.msk [vmem:[%s5773_s4 + $0xb0] sm:$0xf] %vm3832_vm1, %v4717_v3  ;;  %4005 = vst.msk [vmem:[%s5773_s4 + $0x2b0] sm:$0xf] %vm3832_vm1, %v4845_v4  ;;  %v4718_v50 = vpack.c.bf16 %v2597_v5, %v2597_v5  ;;  %v4846_v9 = vpack.c.bf16 %v2725_v6, %v2725_v6  ;;  %v5119_v10 = vpop.f32.mrb[48].mxu0  ;;  %v5247_v11 = vpop.f32.mrb[48].mxu1 }
 0x14a   : > { %3880 = vst.msk [vmem:[%s5773_s4 + $0xbc] sm:$0xf] %vm3832_vm1, %v4720_v7  ;;  %4008 = vst.msk [vmem:[%s5773_s4 + $0x2bc] sm:$0xf] %vm3832_vm1, %v4848_v8  ;;  %v1730_v13 = vadd.f32 %v6088_v12, %v5119_v10  ;;  %v2242_v14 = vadd.f32 %v6088_v12, %v5247_v11  ;;  %v1721_v15 = vpop.f32.mrb[49].mxu0  ;;  %v2233_v16 = vpop.f32.mrb[49].mxu1 }
 0x14b   : > { %3878 = vst.msk [vmem:[%s5773_s4 + $0xb4] sm:$0xf] %vm3832_vm1, %v4718_v50  ;;  %4006 = vst.msk [vmem:[%s5773_s4 + $0x2b4] sm:$0xf] %vm3832_vm1, %v4846_v9  ;;  %v1722_v17 = vadd.f32 %v6088_v12, %v1721_v15  ;;  %v2234_v18 = vadd.f32 %v6088_v12, %v2233_v16  ;;  %v5120_v19 = vpop.f32.mrb[50].mxu0  ;;  %v5248_v20 = vpop.f32.mrb[50].mxu1 }
 0x14c   : > { %v2602_v21 = vmax.f32 %v1730_v13, 0.0  ;;  %v2730_v22 = vmax.f32 %v2242_v14, 0.0  ;;  %v1733_v23 = vadd.f32 %v6088_v12, %v5120_v19  ;;  %v2245_v24 = vadd.f32 %v6088_v12, %v5248_v20  ;;  %v1724_v25 = vpop.f32.mrb[51].mxu0  ;;  %v2236_v26 = vpop.f32.mrb[51].mxu1 }
 0x14d   : > { %v2600_v27 = vmax.f32 %v1722_v17, 0.0  ;;  %v2728_v28 = vmax.f32 %v2234_v18, 0.0  ;;  %v1725_v29 = vadd.f32 %v6088_v12, %v1724_v25  ;;  %v2237_v30 = vadd.f32 %v6088_v12, %v2236_v26 }
 0x14e   : > { %v4723_v31 = vpack.c.bf16 %v2602_v21, %v2602_v21  ;;  %v4851_v32 = vpack.c.bf16 %v2730_v22, %v2730_v22  ;;  %v2603_v33 = vmax.f32 %v1733_v23, 0.0  ;;  %v2731_v34 = vmax.f32 %v2245_v24, 0.0 }
 0x14f   : > { %v4721_v35 = vpack.c.bf16 %v2600_v27, %v2600_v27  ;;  %v4849_v36 = vpack.c.bf16 %v2728_v28, %v2728_v28  ;;  %v2601_v37 = vmax.f32 %v1725_v29, 0.0  ;;  %v2729_v38 = vmax.f32 %v2237_v30, 0.0 }
 0x150   : > { %3883 = vst.msk [vmem:[%s5773_s4 + $0xc8] sm:$0xf] %vm3832_vm1, %v4723_v31  ;;  %4011 = vst.msk [vmem:[%s5773_s4 + $0x2c8] sm:$0xf] %vm3832_vm1, %v4851_v32  ;;  %v4724_v39 = vpack.c.bf16 %v2603_v33, %v2603_v33  ;;  %v4852_v40 = vpack.c.bf16 %v2731_v34, %v2731_v34 }
 0x151   : > { %3881 = vst.msk [vmem:[%s5773_s4 + $0xc0] sm:$0xf] %vm3832_vm1, %v4721_v35  ;;  %4009 = vst.msk [vmem:[%s5773_s4 + $0x2c0] sm:$0xf] %vm3832_vm1, %v4849_v36  ;;  %v4722_v41 = vpack.c.bf16 %v2601_v37, %v2601_v37  ;;  %v4850_v42 = vpack.c.bf16 %v2729_v38, %v2729_v38  ;;  %v5123_v43 = vpop.f32.mrb[52].mxu0  ;;  %v5251_v44 = vpop.f32.mrb[52].mxu1 }
 0x152   : > { %3884 = vst.msk [vmem:[%s5773_s4 + $0xcc] sm:$0xf] %vm3832_vm1, %v4724_v39  ;;  %4012 = vst.msk [vmem:[%s5773_s4 + $0x2cc] sm:$0xf] %vm3832_vm1, %v4852_v40  ;;  %v1746_v45 = vadd.f32 %v6088_v12, %v5123_v43  ;;  %v2258_v46 = vadd.f32 %v6088_v12, %v5251_v44  ;;  %v1737_v47 = vpop.f32.mrb[53].mxu0  ;;  %v2249_v48 = vpop.f32.mrb[53].mxu1 }
 0x153   : > { %3882 = vst.msk [vmem:[%s5773_s4 + $0xc4] sm:$0xf] %vm3832_vm1, %v4722_v41  ;;  %4010 = vst.msk [vmem:[%s5773_s4 + $0x2c4] sm:$0xf] %vm3832_vm1, %v4850_v42  ;;  %v1738_v49 = vadd.f32 %v6088_v12, %v1737_v47  ;;  %v2250_v51 = vadd.f32 %v6088_v12, %v2249_v48  ;;  %v5124_v52 = vpop.f32.mrb[54].mxu0  ;;  %v5252_v53 = vpop.f32.mrb[54].mxu1 }
 0x154   : > { %v2606_v54 = vmax.f32 %v1746_v45, 0.0  ;;  %v2734_v55 = vmax.f32 %v2258_v46, 0.0  ;;  %v1749_v56 = vadd.f32 %v6088_v12, %v5124_v52  ;;  %v2261_v57 = vadd.f32 %v6088_v12, %v5252_v53  ;;  %v1740_v58 = vpop.f32.mrb[55].mxu0  ;;  %v2252_v59 = vpop.f32.mrb[55].mxu1 }
 0x155   : > { %v2604_v60 = vmax.f32 %v1738_v49, 0.0  ;;  %v2732_v61 = vmax.f32 %v2250_v51, 0.0  ;;  %v1741_v62 = vadd.f32 %v6088_v12, %v1740_v58  ;;  %v2253_v63 = vadd.f32 %v6088_v12, %v2252_v59 }
 0x156   : > { %v4727_v0 = vpack.c.bf16 %v2606_v54, %v2606_v54  ;;  %v4855_v1 = vpack.c.bf16 %v2734_v55, %v2734_v55  ;;  %v2607_v2 = vmax.f32 %v1749_v56, 0.0  ;;  %v2735_v3 = vmax.f32 %v2261_v57, 0.0 }
 0x157   : > { %v4725_v4 = vpack.c.bf16 %v2604_v60, %v2604_v60  ;;  %v4853_v5 = vpack.c.bf16 %v2732_v61, %v2732_v61  ;;  %v2605_v6 = vmax.f32 %v1741_v62, 0.0  ;;  %v2733_v7 = vmax.f32 %v2253_v63, 0.0 }
 0x158   : > { %3887 = vst.msk [vmem:[%s5773_s4 + $0xd8] sm:$0xf] %vm3832_vm1, %v4727_v0  ;;  %4015 = vst.msk [vmem:[%s5773_s4 + $0x2d8] sm:$0xf] %vm3832_vm1, %v4855_v1  ;;  %v4728_v8 = vpack.c.bf16 %v2607_v2, %v2607_v2  ;;  %v4856_v50 = vpack.c.bf16 %v2735_v3, %v2735_v3 }
 0x159   : > { %3885 = vst.msk [vmem:[%s5773_s4 + $0xd0] sm:$0xf] %vm3832_vm1, %v4725_v4  ;;  %4013 = vst.msk [vmem:[%s5773_s4 + $0x2d0] sm:$0xf] %vm3832_vm1, %v4853_v5  ;;  %v4726_v9 = vpack.c.bf16 %v2605_v6, %v2605_v6  ;;  %v4854_v10 = vpack.c.bf16 %v2733_v7, %v2733_v7  ;;  %v5127_v11 = vpop.f32.mrb[56].mxu0  ;;  %v5255_v13 = vpop.f32.mrb[56].mxu1 }
 0x15a   : > { %3888 = vst.msk [vmem:[%s5773_s4 + $0xdc] sm:$0xf] %vm3832_vm1, %v4728_v8  ;;  %4016 = vst.msk [vmem:[%s5773_s4 + $0x2dc] sm:$0xf] %vm3832_vm1, %v4856_v50  ;;  %v1762_v14 = vadd.f32 %v6088_v12, %v5127_v11  ;;  %v2274_v15 = vadd.f32 %v6088_v12, %v5255_v13  ;;  %v1753_v16 = vpop.f32.mrb[57].mxu0  ;;  %v2265_v17 = vpop.f32.mrb[57].mxu1 }
 0x15b   : > { %3886 = vst.msk [vmem:[%s5773_s4 + $0xd4] sm:$0xf] %vm3832_vm1, %v4726_v9  ;;  %4014 = vst.msk [vmem:[%s5773_s4 + $0x2d4] sm:$0xf] %vm3832_vm1, %v4854_v10  ;;  %v1754_v18 = vadd.f32 %v6088_v12, %v1753_v16  ;;  %v2266_v19 = vadd.f32 %v6088_v12, %v2265_v17  ;;  %v5128_v20 = vpop.f32.mrb[58].mxu0  ;;  %v5256_v21 = vpop.f32.mrb[58].mxu1 }
 0x15c   : > { %v2610_v22 = vmax.f32 %v1762_v14, 0.0  ;;  %v2738_v23 = vmax.f32 %v2274_v15, 0.0  ;;  %v1765_v24 = vadd.f32 %v6088_v12, %v5128_v20  ;;  %v2277_v25 = vadd.f32 %v6088_v12, %v5256_v21  ;;  %v1756_v26 = vpop.f32.mrb[59].mxu0  ;;  %v2268_v27 = vpop.f32.mrb[59].mxu1 }
 0x15d   : > { %v2608_v28 = vmax.f32 %v1754_v18, 0.0  ;;  %v2736_v29 = vmax.f32 %v2266_v19, 0.0  ;;  %v1757_v30 = vadd.f32 %v6088_v12, %v1756_v26  ;;  %v2269_v31 = vadd.f32 %v6088_v12, %v2268_v27 }
 0x15e   : > { %v4731_v32 = vpack.c.bf16 %v2610_v22, %v2610_v22  ;;  %v4859_v33 = vpack.c.bf16 %v2738_v23, %v2738_v23  ;;  %v2611_v34 = vmax.f32 %v1765_v24, 0.0  ;;  %v2739_v35 = vmax.f32 %v2277_v25, 0.0 }
 0x15f   : > { %v4729_v36 = vpack.c.bf16 %v2608_v28, %v2608_v28  ;;  %v4857_v37 = vpack.c.bf16 %v2736_v29, %v2736_v29  ;;  %v2609_v38 = vmax.f32 %v1757_v30, 0.0  ;;  %v2737_v39 = vmax.f32 %v2269_v31, 0.0 }
 0x160   : > { %3891 = vst.msk [vmem:[%s5773_s4 + $0xe8] sm:$0xf] %vm3832_vm1, %v4731_v32  ;;  %4019 = vst.msk [vmem:[%s5773_s4 + $0x2e8] sm:$0xf] %vm3832_vm1, %v4859_v33  ;;  %v4732_v40 = vpack.c.bf16 %v2611_v34, %v2611_v34  ;;  %v4860_v41 = vpack.c.bf16 %v2739_v35, %v2739_v35 }
 0x161   : > { %3889 = vst.msk [vmem:[%s5773_s4 + $0xe0] sm:$0xf] %vm3832_vm1, %v4729_v36  ;;  %4017 = vst.msk [vmem:[%s5773_s4 + $0x2e0] sm:$0xf] %vm3832_vm1, %v4857_v37  ;;  %v4730_v42 = vpack.c.bf16 %v2609_v38, %v2609_v38  ;;  %v4858_v43 = vpack.c.bf16 %v2737_v39, %v2737_v39  ;;  %v5131_v44 = vpop.f32.mrb[60].mxu0  ;;  %v5259_v45 = vpop.f32.mrb[60].mxu1 }
 0x162   : > { %3892 = vst.msk [vmem:[%s5773_s4 + $0xec] sm:$0xf] %vm3832_vm1, %v4732_v40  ;;  %4020 = vst.msk [vmem:[%s5773_s4 + $0x2ec] sm:$0xf] %vm3832_vm1, %v4860_v41  ;;  %v1778_v46 = vadd.f32 %v6088_v12, %v5131_v44  ;;  %v2290_v47 = vadd.f32 %v6088_v12, %v5259_v45  ;;  %v1769_v48 = vpop.f32.mrb[61].mxu0  ;;  %v2281_v49 = vpop.f32.mrb[61].mxu1 }
 0x163   : > { %3890 = vst.msk [vmem:[%s5773_s4 + $0xe4] sm:$0xf] %vm3832_vm1, %v4730_v42  ;;  %4018 = vst.msk [vmem:[%s5773_s4 + $0x2e4] sm:$0xf] %vm3832_vm1, %v4858_v43  ;;  %v1770_v51 = vadd.f32 %v6088_v12, %v1769_v48  ;;  %v2282_v52 = vadd.f32 %v6088_v12, %v2281_v49  ;;  %v5132_v53 = vpop.f32.mrb[62].mxu0  ;;  %v5260_v54 = vpop.f32.mrb[62].mxu1 }
 0x164   : > { %v2614_v55 = vmax.f32 %v1778_v46, 0.0  ;;  %v2742_v56 = vmax.f32 %v2290_v47, 0.0  ;;  %v1781_v57 = vadd.f32 %v6088_v12, %v5132_v53  ;;  %v2293_v58 = vadd.f32 %v6088_v12, %v5260_v54  ;;  %v1772_v59 = vpop.f32.mrb[63].mxu0  ;;  %v2284_v60 = vpop.f32.mrb[63].mxu1 }
 0x165   : > { %v2612_v61 = vmax.f32 %v1770_v51, 0.0  ;;  %v2740_v62 = vmax.f32 %v2282_v52, 0.0  ;;  %v1773_v63 = vadd.f32 %v6088_v12, %v1772_v59  ;;  %v2285_v0 = vadd.f32 %v6088_v12, %v2284_v60 }
 0x166   : > { %v4735_v1 = vpack.c.bf16 %v2614_v55, %v2614_v55  ;;  %v4863_v2 = vpack.c.bf16 %v2742_v56, %v2742_v56  ;;  %v2615_v3 = vmax.f32 %v1781_v57, 0.0  ;;  %v2743_v4 = vmax.f32 %v2293_v58, 0.0 }
 0x167   : > { %v4733_v5 = vpack.c.bf16 %v2612_v61, %v2612_v61  ;;  %v4861_v6 = vpack.c.bf16 %v2740_v62, %v2740_v62  ;;  %v2613_v7 = vmax.f32 %v1773_v63, 0.0  ;;  %v2741_v8 = vmax.f32 %v2285_v0, 0.0 }
 0x168   : > { %3895 = vst.msk [vmem:[%s5773_s4 + $0xf8] sm:$0xf] %vm3832_vm1, %v4735_v1  ;;  %4023 = vst.msk [vmem:[%s5773_s4 + $0x2f8] sm:$0xf] %vm3832_vm1, %v4863_v2  ;;  %v4736_v50 = vpack.c.bf16 %v2615_v3, %v2615_v3  ;;  %v4864_v9 = vpack.c.bf16 %v2743_v4, %v2743_v4 }
 0x169   : > { %3893 = vst.msk [vmem:[%s5773_s4 + $0xf0] sm:$0xf] %vm3832_vm1, %v4733_v5  ;;  %4021 = vst.msk [vmem:[%s5773_s4 + $0x2f0] sm:$0xf] %vm3832_vm1, %v4861_v6  ;;  %v4734_v10 = vpack.c.bf16 %v2613_v7, %v2613_v7  ;;  %v4862_v11 = vpack.c.bf16 %v2741_v8, %v2741_v8  ;;  %v5135_v13 = vpop.f32.mrb[64].mxu0  ;;  %v5263_v14 = vpop.f32.mrb[64].mxu1 }
 0x16a   : > { %3896 = vst.msk [vmem:[%s5773_s4 + $0xfc] sm:$0xf] %vm3832_vm1, %v4736_v50  ;;  %4024 = vst.msk [vmem:[%s5773_s4 + $0x2fc] sm:$0xf] %vm3832_vm1, %v4864_v9  ;;  %v1794_v15 = vadd.f32 %v6088_v12, %v5135_v13  ;;  %v2306_v16 = vadd.f32 %v6088_v12, %v5263_v14  ;;  %v1785_v17 = vpop.f32.mrb[65].mxu0  ;;  %v2297_v18 = vpop.f32.mrb[65].mxu1 }
 0x16b   : > { %3894 = vst.msk [vmem:[%s5773_s4 + $0xf4] sm:$0xf] %vm3832_vm1, %v4734_v10  ;;  %4022 = vst.msk [vmem:[%s5773_s4 + $0x2f4] sm:$0xf] %vm3832_vm1, %v4862_v11  ;;  %v1786_v19 = vadd.f32 %v6088_v12, %v1785_v17  ;;  %v2298_v20 = vadd.f32 %v6088_v12, %v2297_v18  ;;  %v5136_v21 = vpop.f32.mrb[66].mxu0  ;;  %v5264_v22 = vpop.f32.mrb[66].mxu1 }
 0x16c   : > { %v2618_v23 = vmax.f32 %v1794_v15, 0.0  ;;  %v2746_v24 = vmax.f32 %v2306_v16, 0.0  ;;  %v1797_v25 = vadd.f32 %v6088_v12, %v5136_v21  ;;  %v2309_v26 = vadd.f32 %v6088_v12, %v5264_v22  ;;  %v1788_v27 = vpop.f32.mrb[67].mxu0  ;;  %v2300_v28 = vpop.f32.mrb[67].mxu1 }
 0x16d   : > { %v2616_v29 = vmax.f32 %v1786_v19, 0.0  ;;  %v2744_v30 = vmax.f32 %v2298_v20, 0.0  ;;  %v1789_v31 = vadd.f32 %v6088_v12, %v1788_v27  ;;  %v2301_v32 = vadd.f32 %v6088_v12, %v2300_v28 }
 0x16e   : > { %v4739_v33 = vpack.c.bf16 %v2618_v23, %v2618_v23  ;;  %v4867_v34 = vpack.c.bf16 %v2746_v24, %v2746_v24  ;;  %v2619_v35 = vmax.f32 %v1797_v25, 0.0  ;;  %v2747_v36 = vmax.f32 %v2309_v26, 0.0 }
 0x16f   : > { %v4737_v37 = vpack.c.bf16 %v2616_v29, %v2616_v29  ;;  %v4865_v38 = vpack.c.bf16 %v2744_v30, %v2744_v30  ;;  %v2617_v39 = vmax.f32 %v1789_v31, 0.0  ;;  %v2745_v40 = vmax.f32 %v2301_v32, 0.0 }
 0x170   : > { %3899 = vst.msk [vmem:[%s5773_s4 + $0x108] sm:$0xf] %vm3832_vm1, %v4739_v33  ;;  %4027 = vst.msk [vmem:[%s5773_s4 + $0x308] sm:$0xf] %vm3832_vm1, %v4867_v34  ;;  %v4740_v41 = vpack.c.bf16 %v2619_v35, %v2619_v35  ;;  %v4868_v42 = vpack.c.bf16 %v2747_v36, %v2747_v36 }
 0x171   : > { %3897 = vst.msk [vmem:[%s5773_s4 + $0x100] sm:$0xf] %vm3832_vm1, %v4737_v37  ;;  %4025 = vst.msk [vmem:[%s5773_s4 + $0x300] sm:$0xf] %vm3832_vm1, %v4865_v38  ;;  %v4738_v43 = vpack.c.bf16 %v2617_v39, %v2617_v39  ;;  %v4866_v44 = vpack.c.bf16 %v2745_v40, %v2745_v40  ;;  %v5139_v45 = vpop.f32.mrb[68].mxu0  ;;  %v5267_v46 = vpop.f32.mrb[68].mxu1 }
 0x172   : > { %3900 = vst.msk [vmem:[%s5773_s4 + $0x10c] sm:$0xf] %vm3832_vm1, %v4740_v41  ;;  %4028 = vst.msk [vmem:[%s5773_s4 + $0x30c] sm:$0xf] %vm3832_vm1, %v4868_v42  ;;  %v1810_v47 = vadd.f32 %v6088_v12, %v5139_v45  ;;  %v2322_v48 = vadd.f32 %v6088_v12, %v5267_v46  ;;  %v1801_v49 = vpop.f32.mrb[69].mxu0  ;;  %v2313_v51 = vpop.f32.mrb[69].mxu1 }
 0x173   : > { %3898 = vst.msk [vmem:[%s5773_s4 + $0x104] sm:$0xf] %vm3832_vm1, %v4738_v43  ;;  %4026 = vst.msk [vmem:[%s5773_s4 + $0x304] sm:$0xf] %vm3832_vm1, %v4866_v44  ;;  %v1802_v52 = vadd.f32 %v6088_v12, %v1801_v49  ;;  %v2314_v53 = vadd.f32 %v6088_v12, %v2313_v51  ;;  %v5140_v54 = vpop.f32.mrb[70].mxu0  ;;  %v5268_v55 = vpop.f32.mrb[70].mxu1 }
 0x174   : > { %v2622_v56 = vmax.f32 %v1810_v47, 0.0  ;;  %v2750_v57 = vmax.f32 %v2322_v48, 0.0  ;;  %v1813_v58 = vadd.f32 %v6088_v12, %v5140_v54  ;;  %v2325_v59 = vadd.f32 %v6088_v12, %v5268_v55  ;;  %v1804_v60 = vpop.f32.mrb[71].mxu0  ;;  %v2316_v61 = vpop.f32.mrb[71].mxu1 }
 0x175   : > { %v2620_v62 = vmax.f32 %v1802_v52, 0.0  ;;  %v2748_v63 = vmax.f32 %v2314_v53, 0.0  ;;  %v1805_v0 = vadd.f32 %v6088_v12, %v1804_v60  ;;  %v2317_v1 = vadd.f32 %v6088_v12, %v2316_v61 }
 0x176   : > { %v4743_v2 = vpack.c.bf16 %v2622_v56, %v2622_v56  ;;  %v4871_v3 = vpack.c.bf16 %v2750_v57, %v2750_v57  ;;  %v2623_v4 = vmax.f32 %v1813_v58, 0.0  ;;  %v2751_v5 = vmax.f32 %v2325_v59, 0.0 }
 0x177   : > { %v4741_v6 = vpack.c.bf16 %v2620_v62, %v2620_v62  ;;  %v4869_v7 = vpack.c.bf16 %v2748_v63, %v2748_v63  ;;  %v2621_v8 = vmax.f32 %v1805_v0, 0.0  ;;  %v2749_v50 = vmax.f32 %v2317_v1, 0.0 }
 0x178   : > { %3903 = vst.msk [vmem:[%s5773_s4 + $0x118] sm:$0xf] %vm3832_vm1, %v4743_v2  ;;  %4031 = vst.msk [vmem:[%s5773_s4 + $0x318] sm:$0xf] %vm3832_vm1, %v4871_v3  ;;  %v4744_v9 = vpack.c.bf16 %v2623_v4, %v2623_v4  ;;  %v4872_v10 = vpack.c.bf16 %v2751_v5, %v2751_v5 }
 0x179   : > { %3901 = vst.msk [vmem:[%s5773_s4 + $0x110] sm:$0xf] %vm3832_vm1, %v4741_v6  ;;  %4029 = vst.msk [vmem:[%s5773_s4 + $0x310] sm:$0xf] %vm3832_vm1, %v4869_v7  ;;  %v4742_v11 = vpack.c.bf16 %v2621_v8, %v2621_v8  ;;  %v4870_v13 = vpack.c.bf16 %v2749_v50, %v2749_v50  ;;  %v5143_v14 = vpop.f32.mrb[72].mxu0  ;;  %v5271_v15 = vpop.f32.mrb[72].mxu1 }
 0x17a   : > { %3904 = vst.msk [vmem:[%s5773_s4 + $0x11c] sm:$0xf] %vm3832_vm1, %v4744_v9  ;;  %4032 = vst.msk [vmem:[%s5773_s4 + $0x31c] sm:$0xf] %vm3832_vm1, %v4872_v10  ;;  %v1826_v16 = vadd.f32 %v6088_v12, %v5143_v14  ;;  %v2338_v17 = vadd.f32 %v6088_v12, %v5271_v15  ;;  %v1817_v18 = vpop.f32.mrb[73].mxu0  ;;  %v2329_v19 = vpop.f32.mrb[73].mxu1 }
 0x17b   : > { %3902 = vst.msk [vmem:[%s5773_s4 + $0x114] sm:$0xf] %vm3832_vm1, %v4742_v11  ;;  %4030 = vst.msk [vmem:[%s5773_s4 + $0x314] sm:$0xf] %vm3832_vm1, %v4870_v13  ;;  %v1818_v20 = vadd.f32 %v6088_v12, %v1817_v18  ;;  %v2330_v21 = vadd.f32 %v6088_v12, %v2329_v19  ;;  %v5144_v22 = vpop.f32.mrb[74].mxu0  ;;  %v5272_v23 = vpop.f32.mrb[74].mxu1 }
 0x17c   : > { %v2626_v24 = vmax.f32 %v1826_v16, 0.0  ;;  %v2754_v25 = vmax.f32 %v2338_v17, 0.0  ;;  %v1829_v26 = vadd.f32 %v6088_v12, %v5144_v22  ;;  %v2341_v27 = vadd.f32 %v6088_v12, %v5272_v23  ;;  %v1820_v28 = vpop.f32.mrb[75].mxu0  ;;  %v2332_v29 = vpop.f32.mrb[75].mxu1 }
 0x17d   : > { %v2624_v30 = vmax.f32 %v1818_v20, 0.0  ;;  %v2752_v31 = vmax.f32 %v2330_v21, 0.0  ;;  %v1821_v32 = vadd.f32 %v6088_v12, %v1820_v28  ;;  %v2333_v33 = vadd.f32 %v6088_v12, %v2332_v29 }
 0x17e   : > { %v4747_v34 = vpack.c.bf16 %v2626_v24, %v2626_v24  ;;  %v4875_v35 = vpack.c.bf16 %v2754_v25, %v2754_v25  ;;  %v2627_v36 = vmax.f32 %v1829_v26, 0.0  ;;  %v2755_v37 = vmax.f32 %v2341_v27, 0.0 }
 0x17f   : > { %v4745_v38 = vpack.c.bf16 %v2624_v30, %v2624_v30  ;;  %v4873_v39 = vpack.c.bf16 %v2752_v31, %v2752_v31  ;;  %v2625_v40 = vmax.f32 %v1821_v32, 0.0  ;;  %v2753_v41 = vmax.f32 %v2333_v33, 0.0 }
 0x180   : > { %3907 = vst.msk [vmem:[%s5773_s4 + $0x128] sm:$0xf] %vm3832_vm1, %v4747_v34  ;;  %4035 = vst.msk [vmem:[%s5773_s4 + $0x328] sm:$0xf] %vm3832_vm1, %v4875_v35  ;;  %v4748_v42 = vpack.c.bf16 %v2627_v36, %v2627_v36  ;;  %v4876_v43 = vpack.c.bf16 %v2755_v37, %v2755_v37 }
 0x181   : > { %3905 = vst.msk [vmem:[%s5773_s4 + $0x120] sm:$0xf] %vm3832_vm1, %v4745_v38  ;;  %4033 = vst.msk [vmem:[%s5773_s4 + $0x320] sm:$0xf] %vm3832_vm1, %v4873_v39  ;;  %v4746_v44 = vpack.c.bf16 %v2625_v40, %v2625_v40  ;;  %v4874_v45 = vpack.c.bf16 %v2753_v41, %v2753_v41  ;;  %v5147_v46 = vpop.f32.mrb[76].mxu0  ;;  %v5275_v47 = vpop.f32.mrb[76].mxu1 }
 0x182   : > { %3908 = vst.msk [vmem:[%s5773_s4 + $0x12c] sm:$0xf] %vm3832_vm1, %v4748_v42  ;;  %4036 = vst.msk [vmem:[%s5773_s4 + $0x32c] sm:$0xf] %vm3832_vm1, %v4876_v43  ;;  %v1842_v48 = vadd.f32 %v6088_v12, %v5147_v46  ;;  %v2354_v49 = vadd.f32 %v6088_v12, %v5275_v47  ;;  %v1833_v51 = vpop.f32.mrb[77].mxu0  ;;  %v2345_v52 = vpop.f32.mrb[77].mxu1 }
 0x183   : > { %3906 = vst.msk [vmem:[%s5773_s4 + $0x124] sm:$0xf] %vm3832_vm1, %v4746_v44  ;;  %4034 = vst.msk [vmem:[%s5773_s4 + $0x324] sm:$0xf] %vm3832_vm1, %v4874_v45  ;;  %v1834_v53 = vadd.f32 %v6088_v12, %v1833_v51  ;;  %v2346_v54 = vadd.f32 %v6088_v12, %v2345_v52  ;;  %v5148_v55 = vpop.f32.mrb[78].mxu0  ;;  %v5276_v56 = vpop.f32.mrb[78].mxu1 }
 0x184   : > { %v2630_v57 = vmax.f32 %v1842_v48, 0.0  ;;  %v2758_v58 = vmax.f32 %v2354_v49, 0.0  ;;  %v1845_v59 = vadd.f32 %v6088_v12, %v5148_v55  ;;  %v2357_v60 = vadd.f32 %v6088_v12, %v5276_v56  ;;  %v1836_v61 = vpop.f32.mrb[79].mxu0  ;;  %v2348_v62 = vpop.f32.mrb[79].mxu1 }
 0x185   : > { %v2628_v63 = vmax.f32 %v1834_v53, 0.0  ;;  %v2756_v0 = vmax.f32 %v2346_v54, 0.0  ;;  %v1837_v1 = vadd.f32 %v6088_v12, %v1836_v61  ;;  %v2349_v2 = vadd.f32 %v6088_v12, %v2348_v62 }
 0x186   : > { %v4751_v3 = vpack.c.bf16 %v2630_v57, %v2630_v57  ;;  %v4879_v4 = vpack.c.bf16 %v2758_v58, %v2758_v58  ;;  %v2631_v5 = vmax.f32 %v1845_v59, 0.0  ;;  %v2759_v6 = vmax.f32 %v2357_v60, 0.0 }
 0x187   : > { %v4749_v7 = vpack.c.bf16 %v2628_v63, %v2628_v63  ;;  %v4877_v8 = vpack.c.bf16 %v2756_v0, %v2756_v0  ;;  %v2629_v50 = vmax.f32 %v1837_v1, 0.0  ;;  %v2757_v9 = vmax.f32 %v2349_v2, 0.0 }
 0x188   : > { %3911 = vst.msk [vmem:[%s5773_s4 + $0x138] sm:$0xf] %vm3832_vm1, %v4751_v3  ;;  %4039 = vst.msk [vmem:[%s5773_s4 + $0x338] sm:$0xf] %vm3832_vm1, %v4879_v4  ;;  %v4752_v10 = vpack.c.bf16 %v2631_v5, %v2631_v5  ;;  %v4880_v11 = vpack.c.bf16 %v2759_v6, %v2759_v6 }
 0x189   : > { %3909 = vst.msk [vmem:[%s5773_s4 + $0x130] sm:$0xf] %vm3832_vm1, %v4749_v7  ;;  %4037 = vst.msk [vmem:[%s5773_s4 + $0x330] sm:$0xf] %vm3832_vm1, %v4877_v8  ;;  %v4750_v13 = vpack.c.bf16 %v2629_v50, %v2629_v50  ;;  %v4878_v14 = vpack.c.bf16 %v2757_v9, %v2757_v9  ;;  %v5151_v15 = vpop.f32.mrb[80].mxu0  ;;  %v5279_v16 = vpop.f32.mrb[80].mxu1 }
 0x18a   : > { %3912 = vst.msk [vmem:[%s5773_s4 + $0x13c] sm:$0xf] %vm3832_vm1, %v4752_v10  ;;  %4040 = vst.msk [vmem:[%s5773_s4 + $0x33c] sm:$0xf] %vm3832_vm1, %v4880_v11  ;;  %v1858_v17 = vadd.f32 %v6088_v12, %v5151_v15  ;;  %v2370_v18 = vadd.f32 %v6088_v12, %v5279_v16  ;;  %v1849_v19 = vpop.f32.mrb[81].mxu0  ;;  %v2361_v20 = vpop.f32.mrb[81].mxu1 }
 0x18b   : > { %3910 = vst.msk [vmem:[%s5773_s4 + $0x134] sm:$0xf] %vm3832_vm1, %v4750_v13  ;;  %4038 = vst.msk [vmem:[%s5773_s4 + $0x334] sm:$0xf] %vm3832_vm1, %v4878_v14  ;;  %v1850_v21 = vadd.f32 %v6088_v12, %v1849_v19  ;;  %v2362_v22 = vadd.f32 %v6088_v12, %v2361_v20  ;;  %v5152_v23 = vpop.f32.mrb[82].mxu0  ;;  %v5280_v24 = vpop.f32.mrb[82].mxu1 }
 0x18c   : > { %v2634_v25 = vmax.f32 %v1858_v17, 0.0  ;;  %v2762_v26 = vmax.f32 %v2370_v18, 0.0  ;;  %v1861_v27 = vadd.f32 %v6088_v12, %v5152_v23  ;;  %v2373_v28 = vadd.f32 %v6088_v12, %v5280_v24  ;;  %v1852_v29 = vpop.f32.mrb[83].mxu0  ;;  %v2364_v30 = vpop.f32.mrb[83].mxu1 }
 0x18d   : > { %v2632_v31 = vmax.f32 %v1850_v21, 0.0  ;;  %v2760_v32 = vmax.f32 %v2362_v22, 0.0  ;;  %v1853_v33 = vadd.f32 %v6088_v12, %v1852_v29  ;;  %v2365_v34 = vadd.f32 %v6088_v12, %v2364_v30 }
 0x18e   : > { %v4755_v35 = vpack.c.bf16 %v2634_v25, %v2634_v25  ;;  %v4883_v36 = vpack.c.bf16 %v2762_v26, %v2762_v26  ;;  %v2635_v37 = vmax.f32 %v1861_v27, 0.0  ;;  %v2763_v38 = vmax.f32 %v2373_v28, 0.0 }
 0x18f   : > { %v4753_v39 = vpack.c.bf16 %v2632_v31, %v2632_v31  ;;  %v4881_v40 = vpack.c.bf16 %v2760_v32, %v2760_v32  ;;  %v2633_v41 = vmax.f32 %v1853_v33, 0.0  ;;  %v2761_v42 = vmax.f32 %v2365_v34, 0.0 }
 0x190   : > { %3915 = vst.msk [vmem:[%s5773_s4 + $0x148] sm:$0xf] %vm3832_vm1, %v4755_v35  ;;  %4043 = vst.msk [vmem:[%s5773_s4 + $0x348] sm:$0xf] %vm3832_vm1, %v4883_v36  ;;  %v4756_v43 = vpack.c.bf16 %v2635_v37, %v2635_v37  ;;  %v4884_v44 = vpack.c.bf16 %v2763_v38, %v2763_v38 }
 0x191   : > { %3913 = vst.msk [vmem:[%s5773_s4 + $0x140] sm:$0xf] %vm3832_vm1, %v4753_v39  ;;  %4041 = vst.msk [vmem:[%s5773_s4 + $0x340] sm:$0xf] %vm3832_vm1, %v4881_v40  ;;  %v4754_v45 = vpack.c.bf16 %v2633_v41, %v2633_v41  ;;  %v4882_v46 = vpack.c.bf16 %v2761_v42, %v2761_v42  ;;  %v5155_v47 = vpop.f32.mrb[84].mxu0  ;;  %v5283_v48 = vpop.f32.mrb[84].mxu1 }
 0x192   : > { %3916 = vst.msk [vmem:[%s5773_s4 + $0x14c] sm:$0xf] %vm3832_vm1, %v4756_v43  ;;  %4044 = vst.msk [vmem:[%s5773_s4 + $0x34c] sm:$0xf] %vm3832_vm1, %v4884_v44  ;;  %v1874_v49 = vadd.f32 %v6088_v12, %v5155_v47  ;;  %v2386_v51 = vadd.f32 %v6088_v12, %v5283_v48  ;;  %v1865_v52 = vpop.f32.mrb[85].mxu0  ;;  %v2377_v53 = vpop.f32.mrb[85].mxu1 }
 0x193   : > { %3914 = vst.msk [vmem:[%s5773_s4 + $0x144] sm:$0xf] %vm3832_vm1, %v4754_v45  ;;  %4042 = vst.msk [vmem:[%s5773_s4 + $0x344] sm:$0xf] %vm3832_vm1, %v4882_v46  ;;  %v1866_v54 = vadd.f32 %v6088_v12, %v1865_v52  ;;  %v2378_v55 = vadd.f32 %v6088_v12, %v2377_v53  ;;  %v5156_v56 = vpop.f32.mrb[86].mxu0  ;;  %v5284_v57 = vpop.f32.mrb[86].mxu1 }
 0x194   : > { %v2638_v58 = vmax.f32 %v1874_v49, 0.0  ;;  %v2766_v59 = vmax.f32 %v2386_v51, 0.0  ;;  %v1877_v60 = vadd.f32 %v6088_v12, %v5156_v56  ;;  %v2389_v61 = vadd.f32 %v6088_v12, %v5284_v57  ;;  %v1868_v62 = vpop.f32.mrb[87].mxu0  ;;  %v2380_v63 = vpop.f32.mrb[87].mxu1 }
 0x195   : > { %v2636_v0 = vmax.f32 %v1866_v54, 0.0  ;;  %v2764_v1 = vmax.f32 %v2378_v55, 0.0  ;;  %v1869_v2 = vadd.f32 %v6088_v12, %v1868_v62  ;;  %v2381_v3 = vadd.f32 %v6088_v12, %v2380_v63 }
 0x196   : > { %v4759_v4 = vpack.c.bf16 %v2638_v58, %v2638_v58  ;;  %v4887_v5 = vpack.c.bf16 %v2766_v59, %v2766_v59  ;;  %v2639_v6 = vmax.f32 %v1877_v60, 0.0  ;;  %v2767_v7 = vmax.f32 %v2389_v61, 0.0 }
 0x197   : > { %v4757_v8 = vpack.c.bf16 %v2636_v0, %v2636_v0  ;;  %v4885_v50 = vpack.c.bf16 %v2764_v1, %v2764_v1  ;;  %v2637_v9 = vmax.f32 %v1869_v2, 0.0  ;;  %v2765_v10 = vmax.f32 %v2381_v3, 0.0 }
 0x198   : > { %3919 = vst.msk [vmem:[%s5773_s4 + $0x158] sm:$0xf] %vm3832_vm1, %v4759_v4  ;;  %4047 = vst.msk [vmem:[%s5773_s4 + $0x358] sm:$0xf] %vm3832_vm1, %v4887_v5  ;;  %v4760_v11 = vpack.c.bf16 %v2639_v6, %v2639_v6  ;;  %v4888_v13 = vpack.c.bf16 %v2767_v7, %v2767_v7 }
 0x199   : > { %3917 = vst.msk [vmem:[%s5773_s4 + $0x150] sm:$0xf] %vm3832_vm1, %v4757_v8  ;;  %4045 = vst.msk [vmem:[%s5773_s4 + $0x350] sm:$0xf] %vm3832_vm1, %v4885_v50  ;;  %v4758_v14 = vpack.c.bf16 %v2637_v9, %v2637_v9  ;;  %v4886_v15 = vpack.c.bf16 %v2765_v10, %v2765_v10  ;;  %v5159_v16 = vpop.f32.mrb[88].mxu0  ;;  %v5287_v17 = vpop.f32.mrb[88].mxu1 }
 0x19a   : > { %3920 = vst.msk [vmem:[%s5773_s4 + $0x15c] sm:$0xf] %vm3832_vm1, %v4760_v11  ;;  %4048 = vst.msk [vmem:[%s5773_s4 + $0x35c] sm:$0xf] %vm3832_vm1, %v4888_v13  ;;  %v1890_v18 = vadd.f32 %v6088_v12, %v5159_v16  ;;  %v2402_v19 = vadd.f32 %v6088_v12, %v5287_v17  ;;  %v1881_v20 = vpop.f32.mrb[89].mxu0  ;;  %v2393_v21 = vpop.f32.mrb[89].mxu1 }
 0x19b   : > { %3918 = vst.msk [vmem:[%s5773_s4 + $0x154] sm:$0xf] %vm3832_vm1, %v4758_v14  ;;  %4046 = vst.msk [vmem:[%s5773_s4 + $0x354] sm:$0xf] %vm3832_vm1, %v4886_v15  ;;  %v1882_v22 = vadd.f32 %v6088_v12, %v1881_v20  ;;  %v2394_v23 = vadd.f32 %v6088_v12, %v2393_v21  ;;  %v5160_v24 = vpop.f32.mrb[90].mxu0  ;;  %v5288_v25 = vpop.f32.mrb[90].mxu1 }
 0x19c   : > { %v2642_v26 = vmax.f32 %v1890_v18, 0.0  ;;  %v2770_v27 = vmax.f32 %v2402_v19, 0.0  ;;  %v1893_v28 = vadd.f32 %v6088_v12, %v5160_v24  ;;  %v2405_v29 = vadd.f32 %v6088_v12, %v5288_v25  ;;  %v1884_v30 = vpop.f32.mrb[91].mxu0  ;;  %v2396_v31 = vpop.f32.mrb[91].mxu1 }
 0x19d   : > { %v2640_v32 = vmax.f32 %v1882_v22, 0.0  ;;  %v2768_v33 = vmax.f32 %v2394_v23, 0.0  ;;  %v1885_v34 = vadd.f32 %v6088_v12, %v1884_v30  ;;  %v2397_v35 = vadd.f32 %v6088_v12, %v2396_v31 }
 0x19e   : > { %v4763_v36 = vpack.c.bf16 %v2642_v26, %v2642_v26  ;;  %v4891_v37 = vpack.c.bf16 %v2770_v27, %v2770_v27  ;;  %v2643_v38 = vmax.f32 %v1893_v28, 0.0  ;;  %v2771_v39 = vmax.f32 %v2405_v29, 0.0 }
 0x19f   : > { %v4761_v40 = vpack.c.bf16 %v2640_v32, %v2640_v32  ;;  %v4889_v41 = vpack.c.bf16 %v2768_v33, %v2768_v33  ;;  %v2641_v42 = vmax.f32 %v1885_v34, 0.0  ;;  %v2769_v43 = vmax.f32 %v2397_v35, 0.0 }
 0x1a0   : > { %3923 = vst.msk [vmem:[%s5773_s4 + $0x168] sm:$0xf] %vm3832_vm1, %v4763_v36  ;;  %4051 = vst.msk [vmem:[%s5773_s4 + $0x368] sm:$0xf] %vm3832_vm1, %v4891_v37  ;;  %v4764_v44 = vpack.c.bf16 %v2643_v38, %v2643_v38  ;;  %v4892_v45 = vpack.c.bf16 %v2771_v39, %v2771_v39 }
 0x1a1   : > { %3921 = vst.msk [vmem:[%s5773_s4 + $0x160] sm:$0xf] %vm3832_vm1, %v4761_v40  ;;  %4049 = vst.msk [vmem:[%s5773_s4 + $0x360] sm:$0xf] %vm3832_vm1, %v4889_v41  ;;  %v4762_v46 = vpack.c.bf16 %v2641_v42, %v2641_v42  ;;  %v4890_v47 = vpack.c.bf16 %v2769_v43, %v2769_v43  ;;  %v5163_v48 = vpop.f32.mrb[92].mxu0  ;;  %v5291_v49 = vpop.f32.mrb[92].mxu1 }
 0x1a2   : > { %3924 = vst.msk [vmem:[%s5773_s4 + $0x16c] sm:$0xf] %vm3832_vm1, %v4764_v44  ;;  %4052 = vst.msk [vmem:[%s5773_s4 + $0x36c] sm:$0xf] %vm3832_vm1, %v4892_v45  ;;  %v1906_v51 = vadd.f32 %v6088_v12, %v5163_v48  ;;  %v2418_v52 = vadd.f32 %v6088_v12, %v5291_v49  ;;  %v1897_v53 = vpop.f32.mrb[93].mxu0  ;;  %v2409_v54 = vpop.f32.mrb[93].mxu1 }
 0x1a3   : > { %3922 = vst.msk [vmem:[%s5773_s4 + $0x164] sm:$0xf] %vm3832_vm1, %v4762_v46  ;;  %4050 = vst.msk [vmem:[%s5773_s4 + $0x364] sm:$0xf] %vm3832_vm1, %v4890_v47  ;;  %v1898_v55 = vadd.f32 %v6088_v12, %v1897_v53  ;;  %v2410_v56 = vadd.f32 %v6088_v12, %v2409_v54  ;;  %v5164_v57 = vpop.f32.mrb[94].mxu0  ;;  %v5292_v58 = vpop.f32.mrb[94].mxu1 }
 0x1a4   : > { %v2646_v59 = vmax.f32 %v1906_v51, 0.0  ;;  %v2774_v60 = vmax.f32 %v2418_v52, 0.0  ;;  %v1909_v61 = vadd.f32 %v6088_v12, %v5164_v57  ;;  %v2421_v62 = vadd.f32 %v6088_v12, %v5292_v58  ;;  %v1900_v63 = vpop.f32.mrb[95].mxu0  ;;  %v2412_v0 = vpop.f32.mrb[95].mxu1  ;;  %v6405_v51 = vld [vmem:[%s6584_s2] ss:$0 sm:$0xff] }
 0x1a5   : > { %v2644_v1 = vmax.f32 %v1898_v55, 0.0  ;;  %v2772_v2 = vmax.f32 %v2410_v56, 0.0  ;;  %v1901_v3 = vadd.f32 %v6088_v12, %v1900_v63  ;;  %v2413_v4 = vadd.f32 %v6088_v12, %v2412_v0 }
 0x1a6   : > { %v4767_v5 = vpack.c.bf16 %v2646_v59, %v2646_v59  ;;  %v4895_v6 = vpack.c.bf16 %v2774_v60, %v2774_v60  ;;  %v2647_v7 = vmax.f32 %v1909_v61, 0.0  ;;  %v2775_v8 = vmax.f32 %v2421_v62, 0.0 }
 0x1a7   : > { %v4765_v50 = vpack.c.bf16 %v2644_v1, %v2644_v1  ;;  %v4893_v9 = vpack.c.bf16 %v2772_v2, %v2772_v2  ;;  %v2645_v10 = vmax.f32 %v1901_v3, 0.0  ;;  %v2773_v11 = vmax.f32 %v2413_v4, 0.0 }
 0x1a8   : > { %3927 = vst.msk [vmem:[%s5773_s4 + $0x178] sm:$0xf] %vm3832_vm1, %v4767_v5  ;;  %4055 = vst.msk [vmem:[%s5773_s4 + $0x378] sm:$0xf] %vm3832_vm1, %v4895_v6  ;;  %v4768_v13 = vpack.c.bf16 %v2647_v7, %v2647_v7  ;;  %v4896_v14 = vpack.c.bf16 %v2775_v8, %v2775_v8 }
 0x1a9   : > { %3925 = vst.msk [vmem:[%s5773_s4 + $0x170] sm:$0xf] %vm3832_vm1, %v4765_v50  ;;  %4053 = vst.msk [vmem:[%s5773_s4 + $0x370] sm:$0xf] %vm3832_vm1, %v4893_v9  ;;  %v4766_v15 = vpack.c.bf16 %v2645_v10, %v2645_v10  ;;  %v4894_v16 = vpack.c.bf16 %v2773_v11, %v2773_v11  ;;  %v5167_v17 = vpop.f32.mrb[96].mxu0  ;;  %v5295_v18 = vpop.f32.mrb[96].mxu1 }
 0x1aa   : > { %3928 = vst.msk [vmem:[%s5773_s4 + $0x17c] sm:$0xf] %vm3832_vm1, %v4768_v13  ;;  %4056 = vst.msk [vmem:[%s5773_s4 + $0x37c] sm:$0xf] %vm3832_vm1, %v4896_v14  ;;  %v1922_v19 = vadd.f32 %v6088_v12, %v5167_v17  ;;  %v2434_v20 = vadd.f32 %v6088_v12, %v5295_v18  ;;  %v1913_v21 = vpop.f32.mrb[97].mxu0  ;;  %v2425_v22 = vpop.f32.mrb[97].mxu1 }
 0x1ab   : > { %3926 = vst.msk [vmem:[%s5773_s4 + $0x174] sm:$0xf] %vm3832_vm1, %v4766_v15  ;;  %4054 = vst.msk [vmem:[%s5773_s4 + $0x374] sm:$0xf] %vm3832_vm1, %v4894_v16  ;;  %v1914_v23 = vadd.f32 %v6088_v12, %v1913_v21  ;;  %v2426_v24 = vadd.f32 %v6088_v12, %v2425_v22  ;;  %v5168_v25 = vpop.f32.mrb[98].mxu0  ;;  %v5296_v26 = vpop.f32.mrb[98].mxu1 }
 0x1ac   : > { %v2650_v27 = vmax.f32 %v1922_v19, 0.0  ;;  %v2778_v28 = vmax.f32 %v2434_v20, 0.0  ;;  %v1925_v29 = vadd.f32 %v6088_v12, %v5168_v25  ;;  %v2437_v30 = vadd.f32 %v6088_v12, %v5296_v26  ;;  %v1916_v31 = vpop.f32.mrb[99].mxu0  ;;  %v2428_v32 = vpop.f32.mrb[99].mxu1 }
 0x1ad   : > { %v2648_v33 = vmax.f32 %v1914_v23, 0.0  ;;  %v2776_v34 = vmax.f32 %v2426_v24, 0.0  ;;  %v1917_v35 = vadd.f32 %v6088_v12, %v1916_v31  ;;  %v2429_v36 = vadd.f32 %v6088_v12, %v2428_v32 }
 0x1ae   : > { %v4771_v37 = vpack.c.bf16 %v2650_v27, %v2650_v27  ;;  %v4899_v38 = vpack.c.bf16 %v2778_v28, %v2778_v28  ;;  %v2651_v39 = vmax.f32 %v1925_v29, 0.0  ;;  %v2779_v40 = vmax.f32 %v2437_v30, 0.0 }
 0x1af   : > { %v4769_v41 = vpack.c.bf16 %v2648_v33, %v2648_v33  ;;  %v4897_v42 = vpack.c.bf16 %v2776_v34, %v2776_v34  ;;  %v2649_v43 = vmax.f32 %v1917_v35, 0.0  ;;  %v2777_v44 = vmax.f32 %v2429_v36, 0.0 }
 0x1b0   : > { %3931 = vst.msk [vmem:[%s5773_s4 + $0x188] sm:$0xf] %vm3832_vm1, %v4771_v37  ;;  %4059 = vst.msk [vmem:[%s5773_s4 + $0x388] sm:$0xf] %vm3832_vm1, %v4899_v38  ;;  %v4772_v45 = vpack.c.bf16 %v2651_v39, %v2651_v39  ;;  %v4900_v46 = vpack.c.bf16 %v2779_v40, %v2779_v40 }
 0x1b1   : > { %3929 = vst.msk [vmem:[%s5773_s4 + $0x180] sm:$0xf] %vm3832_vm1, %v4769_v41  ;;  %4057 = vst.msk [vmem:[%s5773_s4 + $0x380] sm:$0xf] %vm3832_vm1, %v4897_v42  ;;  %v4770_v12 = vpack.c.bf16 %v2649_v43, %v2649_v43  ;;  %v4898_v47 = vpack.c.bf16 %v2777_v44, %v2777_v44  ;;  %v5171_v48 = vpop.f32.mrb[100].mxu0  ;;  %v5299_v49 = vpop.f32.mrb[100].mxu1 }
 0x1b2   : > { %3932 = vst.msk [vmem:[%s5773_s4 + $0x18c] sm:$0xf] %vm3832_vm1, %v4772_v45  ;;  %4060 = vst.msk [vmem:[%s5773_s4 + $0x38c] sm:$0xf] %vm3832_vm1, %v4900_v46  ;;  %v1938_v52 = vadd.f32 %v6405_v51, %v5171_v48  ;;  %v2450_v53 = vadd.f32 %v6405_v51, %v5299_v49  ;;  %v1929_v54 = vpop.f32.mrb[101].mxu0  ;;  %v2441_v55 = vpop.f32.mrb[101].mxu1 }
 0x1b3   : > { %3930 = vst.msk [vmem:[%s5773_s4 + $0x184] sm:$0xf] %vm3832_vm1, %v4770_v12  ;;  %4058 = vst.msk [vmem:[%s5773_s4 + $0x384] sm:$0xf] %vm3832_vm1, %v4898_v47  ;;  %v1930_v56 = vadd.f32 %v6405_v51, %v1929_v54  ;;  %v2442_v57 = vadd.f32 %v6405_v51, %v2441_v55  ;;  %v5172_v58 = vpop.f32.mrb[102].mxu0  ;;  %v5300_v59 = vpop.f32.mrb[102].mxu1 }
 0x1b4   : > { %v2654_v60 = vmax.f32 %v1938_v52, 0.0  ;;  %v2782_v61 = vmax.f32 %v2450_v53, 0.0  ;;  %v1941_v62 = vadd.f32 %v6405_v51, %v5172_v58  ;;  %v2453_v63 = vadd.f32 %v6405_v51, %v5300_v59  ;;  %v1932_v0 = vpop.f32.mrb[103].mxu0  ;;  %v2444_v1 = vpop.f32.mrb[103].mxu1 }
 0x1b5   : > { %v2652_v2 = vmax.f32 %v1930_v56, 0.0  ;;  %v2780_v3 = vmax.f32 %v2442_v57, 0.0  ;;  %v1933_v4 = vadd.f32 %v6405_v51, %v1932_v0  ;;  %v2445_v5 = vadd.f32 %v6405_v51, %v2444_v1 }
 0x1b6   : > { %v4775_v6 = vpack.c.bf16 %v2654_v60, %v2654_v60  ;;  %v4903_v7 = vpack.c.bf16 %v2782_v61, %v2782_v61  ;;  %v2655_v8 = vmax.f32 %v1941_v62, 0.0  ;;  %v2783_v50 = vmax.f32 %v2453_v63, 0.0 }
 0x1b7   : > { %v4773_v9 = vpack.c.bf16 %v2652_v2, %v2652_v2  ;;  %v4901_v10 = vpack.c.bf16 %v2780_v3, %v2780_v3  ;;  %v2653_v11 = vmax.f32 %v1933_v4, 0.0  ;;  %v2781_v13 = vmax.f32 %v2445_v5, 0.0 }
 0x1b8   : > { %3935 = vst.msk [vmem:[%s5773_s4 + $0x198] sm:$0xf] %vm3832_vm1, %v4775_v6  ;;  %4063 = vst.msk [vmem:[%s5773_s4 + $0x398] sm:$0xf] %vm3832_vm1, %v4903_v7  ;;  %v4776_v14 = vpack.c.bf16 %v2655_v8, %v2655_v8  ;;  %v4904_v15 = vpack.c.bf16 %v2783_v50, %v2783_v50 }
 0x1b9   : > { %3933 = vst.msk [vmem:[%s5773_s4 + $0x190] sm:$0xf] %vm3832_vm1, %v4773_v9  ;;  %4061 = vst.msk [vmem:[%s5773_s4 + $0x390] sm:$0xf] %vm3832_vm1, %v4901_v10  ;;  %v4774_v16 = vpack.c.bf16 %v2653_v11, %v2653_v11  ;;  %v4902_v17 = vpack.c.bf16 %v2781_v13, %v2781_v13  ;;  %v5175_v18 = vpop.f32.mrb[104].mxu0  ;;  %v5303_v19 = vpop.f32.mrb[104].mxu1 }
 0x1ba   : > { %3936 = vst.msk [vmem:[%s5773_s4 + $0x19c] sm:$0xf] %vm3832_vm1, %v4776_v14  ;;  %4064 = vst.msk [vmem:[%s5773_s4 + $0x39c] sm:$0xf] %vm3832_vm1, %v4904_v15  ;;  %v1954_v20 = vadd.f32 %v6405_v51, %v5175_v18  ;;  %v2466_v21 = vadd.f32 %v6405_v51, %v5303_v19  ;;  %v1945_v22 = vpop.f32.mrb[105].mxu0  ;;  %v2457_v23 = vpop.f32.mrb[105].mxu1 }
 0x1bb   : > { %3934 = vst.msk [vmem:[%s5773_s4 + $0x194] sm:$0xf] %vm3832_vm1, %v4774_v16  ;;  %4062 = vst.msk [vmem:[%s5773_s4 + $0x394] sm:$0xf] %vm3832_vm1, %v4902_v17  ;;  %v1946_v24 = vadd.f32 %v6405_v51, %v1945_v22  ;;  %v2458_v25 = vadd.f32 %v6405_v51, %v2457_v23  ;;  %v5176_v26 = vpop.f32.mrb[106].mxu0  ;;  %v5304_v27 = vpop.f32.mrb[106].mxu1 }
 0x1bc   : > { %v2658_v28 = vmax.f32 %v1954_v20, 0.0  ;;  %v2786_v29 = vmax.f32 %v2466_v21, 0.0  ;;  %v1957_v30 = vadd.f32 %v6405_v51, %v5176_v26  ;;  %v2469_v31 = vadd.f32 %v6405_v51, %v5304_v27  ;;  %v1948_v32 = vpop.f32.mrb[107].mxu0  ;;  %v2460_v33 = vpop.f32.mrb[107].mxu1 }
 0x1bd   : > { %v2656_v34 = vmax.f32 %v1946_v24, 0.0  ;;  %v2784_v35 = vmax.f32 %v2458_v25, 0.0  ;;  %v1949_v36 = vadd.f32 %v6405_v51, %v1948_v32  ;;  %v2461_v37 = vadd.f32 %v6405_v51, %v2460_v33 }
 0x1be   : > { %v4779_v38 = vpack.c.bf16 %v2658_v28, %v2658_v28  ;;  %v4907_v39 = vpack.c.bf16 %v2786_v29, %v2786_v29  ;;  %v2659_v40 = vmax.f32 %v1957_v30, 0.0  ;;  %v2787_v41 = vmax.f32 %v2469_v31, 0.0 }
 0x1bf   : > { %v4777_v42 = vpack.c.bf16 %v2656_v34, %v2656_v34  ;;  %v4905_v43 = vpack.c.bf16 %v2784_v35, %v2784_v35  ;;  %v2657_v44 = vmax.f32 %v1949_v36, 0.0  ;;  %v2785_v45 = vmax.f32 %v2461_v37, 0.0 }
 0x1c0   : > { %3939 = vst.msk [vmem:[%s5773_s4 + $0x1a8] sm:$0xf] %vm3832_vm1, %v4779_v38  ;;  %4067 = vst.msk [vmem:[%s5773_s4 + $0x3a8] sm:$0xf] %vm3832_vm1, %v4907_v39  ;;  %v4780_v46 = vpack.c.bf16 %v2659_v40, %v2659_v40  ;;  %v4908_v12 = vpack.c.bf16 %v2787_v41, %v2787_v41 }
 0x1c1   : > { %3937 = vst.msk [vmem:[%s5773_s4 + $0x1a0] sm:$0xf] %vm3832_vm1, %v4777_v42  ;;  %4065 = vst.msk [vmem:[%s5773_s4 + $0x3a0] sm:$0xf] %vm3832_vm1, %v4905_v43  ;;  %v4778_v47 = vpack.c.bf16 %v2657_v44, %v2657_v44  ;;  %v4906_v48 = vpack.c.bf16 %v2785_v45, %v2785_v45  ;;  %v5179_v49 = vpop.f32.mrb[108].mxu0  ;;  %v5307_v52 = vpop.f32.mrb[108].mxu1 }
 0x1c2   : > { %3940 = vst.msk [vmem:[%s5773_s4 + $0x1ac] sm:$0xf] %vm3832_vm1, %v4780_v46  ;;  %4068 = vst.msk [vmem:[%s5773_s4 + $0x3ac] sm:$0xf] %vm3832_vm1, %v4908_v12  ;;  %v1970_v53 = vadd.f32 %v6405_v51, %v5179_v49  ;;  %v2482_v54 = vadd.f32 %v6405_v51, %v5307_v52  ;;  %v1961_v55 = vpop.f32.mrb[109].mxu0  ;;  %v2473_v56 = vpop.f32.mrb[109].mxu1 }
 0x1c3   : > { %3938 = vst.msk [vmem:[%s5773_s4 + $0x1a4] sm:$0xf] %vm3832_vm1, %v4778_v47  ;;  %4066 = vst.msk [vmem:[%s5773_s4 + $0x3a4] sm:$0xf] %vm3832_vm1, %v4906_v48  ;;  %v1962_v57 = vadd.f32 %v6405_v51, %v1961_v55  ;;  %v2474_v58 = vadd.f32 %v6405_v51, %v2473_v56  ;;  %v5180_v59 = vpop.f32.mrb[110].mxu0  ;;  %v5308_v60 = vpop.f32.mrb[110].mxu1 }
 0x1c4   : > { %v2662_v61 = vmax.f32 %v1970_v53, 0.0  ;;  %v2790_v62 = vmax.f32 %v2482_v54, 0.0  ;;  %v1973_v63 = vadd.f32 %v6405_v51, %v5180_v59  ;;  %v2485_v0 = vadd.f32 %v6405_v51, %v5308_v60  ;;  %v1964_v1 = vpop.f32.mrb[111].mxu0  ;;  %v2476_v2 = vpop.f32.mrb[111].mxu1 }
 0x1c5   : > { %v2660_v3 = vmax.f32 %v1962_v57, 0.0  ;;  %v2788_v4 = vmax.f32 %v2474_v58, 0.0  ;;  %v1965_v5 = vadd.f32 %v6405_v51, %v1964_v1  ;;  %v2477_v6 = vadd.f32 %v6405_v51, %v2476_v2 }
 0x1c6   : > { %v4783_v7 = vpack.c.bf16 %v2662_v61, %v2662_v61  ;;  %v4911_v8 = vpack.c.bf16 %v2790_v62, %v2790_v62  ;;  %v2663_v50 = vmax.f32 %v1973_v63, 0.0  ;;  %v2791_v9 = vmax.f32 %v2485_v0, 0.0 }
 0x1c7   : > { %v4781_v10 = vpack.c.bf16 %v2660_v3, %v2660_v3  ;;  %v4909_v11 = vpack.c.bf16 %v2788_v4, %v2788_v4  ;;  %v2661_v13 = vmax.f32 %v1965_v5, 0.0  ;;  %v2789_v14 = vmax.f32 %v2477_v6, 0.0 }
 0x1c8   : > { %3943 = vst.msk [vmem:[%s5773_s4 + $0x1b8] sm:$0xf] %vm3832_vm1, %v4783_v7  ;;  %4071 = vst.msk [vmem:[%s5773_s4 + $0x3b8] sm:$0xf] %vm3832_vm1, %v4911_v8  ;;  %v4784_v15 = vpack.c.bf16 %v2663_v50, %v2663_v50  ;;  %v4912_v16 = vpack.c.bf16 %v2791_v9, %v2791_v9 }
 0x1c9   : > { %3941 = vst.msk [vmem:[%s5773_s4 + $0x1b0] sm:$0xf] %vm3832_vm1, %v4781_v10  ;;  %4069 = vst.msk [vmem:[%s5773_s4 + $0x3b0] sm:$0xf] %vm3832_vm1, %v4909_v11  ;;  %v4782_v17 = vpack.c.bf16 %v2661_v13, %v2661_v13  ;;  %v4910_v18 = vpack.c.bf16 %v2789_v14, %v2789_v14  ;;  %v5183_v19 = vpop.f32.mrb[112].mxu0  ;;  %v5311_v20 = vpop.f32.mrb[112].mxu1 }
 0x1ca   : > { %3944 = vst.msk [vmem:[%s5773_s4 + $0x1bc] sm:$0xf] %vm3832_vm1, %v4784_v15  ;;  %4072 = vst.msk [vmem:[%s5773_s4 + $0x3bc] sm:$0xf] %vm3832_vm1, %v4912_v16  ;;  %v1986_v21 = vadd.f32 %v6405_v51, %v5183_v19  ;;  %v2498_v22 = vadd.f32 %v6405_v51, %v5311_v20  ;;  %v1977_v23 = vpop.f32.mrb[113].mxu0  ;;  %v2489_v24 = vpop.f32.mrb[113].mxu1 }
 0x1cb   : > { %3942 = vst.msk [vmem:[%s5773_s4 + $0x1b4] sm:$0xf] %vm3832_vm1, %v4782_v17  ;;  %4070 = vst.msk [vmem:[%s5773_s4 + $0x3b4] sm:$0xf] %vm3832_vm1, %v4910_v18  ;;  %v1978_v25 = vadd.f32 %v6405_v51, %v1977_v23  ;;  %v2490_v26 = vadd.f32 %v6405_v51, %v2489_v24  ;;  %v5184_v27 = vpop.f32.mrb[114].mxu0  ;;  %v5312_v28 = vpop.f32.mrb[114].mxu1 }
 0x1cc   : > { %v2666_v29 = vmax.f32 %v1986_v21, 0.0  ;;  %v2794_v30 = vmax.f32 %v2498_v22, 0.0  ;;  %v1989_v31 = vadd.f32 %v6405_v51, %v5184_v27  ;;  %v2501_v32 = vadd.f32 %v6405_v51, %v5312_v28  ;;  %v1980_v33 = vpop.f32.mrb[115].mxu0  ;;  %v2492_v34 = vpop.f32.mrb[115].mxu1 }
 0x1cd   : > { %v2664_v35 = vmax.f32 %v1978_v25, 0.0  ;;  %v2792_v36 = vmax.f32 %v2490_v26, 0.0  ;;  %v1981_v37 = vadd.f32 %v6405_v51, %v1980_v33  ;;  %v2493_v38 = vadd.f32 %v6405_v51, %v2492_v34 }
 0x1ce   : > { %v4787_v39 = vpack.c.bf16 %v2666_v29, %v2666_v29  ;;  %v4915_v40 = vpack.c.bf16 %v2794_v30, %v2794_v30  ;;  %v2667_v41 = vmax.f32 %v1989_v31, 0.0  ;;  %v2795_v42 = vmax.f32 %v2501_v32, 0.0 }
 0x1cf   : > { %v4785_v43 = vpack.c.bf16 %v2664_v35, %v2664_v35  ;;  %v4913_v44 = vpack.c.bf16 %v2792_v36, %v2792_v36  ;;  %v2665_v45 = vmax.f32 %v1981_v37, 0.0  ;;  %v2793_v46 = vmax.f32 %v2493_v38, 0.0 }
 0x1d0   : > { %3947 = vst.msk [vmem:[%s5773_s4 + $0x1c8] sm:$0xf] %vm3832_vm1, %v4787_v39  ;;  %4075 = vst.msk [vmem:[%s5773_s4 + $0x3c8] sm:$0xf] %vm3832_vm1, %v4915_v40  ;;  %v4788_v12 = vpack.c.bf16 %v2667_v41, %v2667_v41  ;;  %v4916_v47 = vpack.c.bf16 %v2795_v42, %v2795_v42 }
 0x1d1   : > { %3945 = vst.msk [vmem:[%s5773_s4 + $0x1c0] sm:$0xf] %vm3832_vm1, %v4785_v43  ;;  %4073 = vst.msk [vmem:[%s5773_s4 + $0x3c0] sm:$0xf] %vm3832_vm1, %v4913_v44  ;;  %v4786_v48 = vpack.c.bf16 %v2665_v45, %v2665_v45  ;;  %v4914_v49 = vpack.c.bf16 %v2793_v46, %v2793_v46  ;;  %v5187_v52 = vpop.f32.mrb[116].mxu0  ;;  %v5315_v53 = vpop.f32.mrb[116].mxu1 }
 0x1d2   : > { %3948 = vst.msk [vmem:[%s5773_s4 + $0x1cc] sm:$0xf] %vm3832_vm1, %v4788_v12  ;;  %4076 = vst.msk [vmem:[%s5773_s4 + $0x3cc] sm:$0xf] %vm3832_vm1, %v4916_v47  ;;  %v2002_v54 = vadd.f32 %v6405_v51, %v5187_v52  ;;  %v2514_v55 = vadd.f32 %v6405_v51, %v5315_v53  ;;  %v1993_v56 = vpop.f32.mrb[117].mxu0  ;;  %v2505_v57 = vpop.f32.mrb[117].mxu1 }
 0x1d3   : > { %3946 = vst.msk [vmem:[%s5773_s4 + $0x1c4] sm:$0xf] %vm3832_vm1, %v4786_v48  ;;  %4074 = vst.msk [vmem:[%s5773_s4 + $0x3c4] sm:$0xf] %vm3832_vm1, %v4914_v49  ;;  %v1994_v58 = vadd.f32 %v6405_v51, %v1993_v56  ;;  %v2506_v59 = vadd.f32 %v6405_v51, %v2505_v57  ;;  %v5188_v60 = vpop.f32.mrb[118].mxu0  ;;  %v5316_v61 = vpop.f32.mrb[118].mxu1 }
 0x1d4   : > { %v2670_v62 = vmax.f32 %v2002_v54, 0.0  ;;  %v2798_v63 = vmax.f32 %v2514_v55, 0.0  ;;  %v2005_v0 = vadd.f32 %v6405_v51, %v5188_v60  ;;  %v2517_v1 = vadd.f32 %v6405_v51, %v5316_v61  ;;  %v1996_v2 = vpop.f32.mrb[119].mxu0  ;;  %v2508_v3 = vpop.f32.mrb[119].mxu1 }
 0x1d5   : > { %v2668_v4 = vmax.f32 %v1994_v58, 0.0  ;;  %v2796_v5 = vmax.f32 %v2506_v59, 0.0  ;;  %v1997_v6 = vadd.f32 %v6405_v51, %v1996_v2  ;;  %v2509_v7 = vadd.f32 %v6405_v51, %v2508_v3 }
 0x1d6   : > { %v4791_v8 = vpack.c.bf16 %v2670_v62, %v2670_v62  ;;  %v4919_v50 = vpack.c.bf16 %v2798_v63, %v2798_v63  ;;  %v2671_v9 = vmax.f32 %v2005_v0, 0.0  ;;  %v2799_v10 = vmax.f32 %v2517_v1, 0.0 }
 0x1d7   : > { %v4789_v11 = vpack.c.bf16 %v2668_v4, %v2668_v4  ;;  %v4917_v13 = vpack.c.bf16 %v2796_v5, %v2796_v5  ;;  %v2669_v14 = vmax.f32 %v1997_v6, 0.0  ;;  %v2797_v15 = vmax.f32 %v2509_v7, 0.0 }
 0x1d8   : > { %3951 = vst.msk [vmem:[%s5773_s4 + $0x1d8] sm:$0xf] %vm3832_vm1, %v4791_v8  ;;  %4079 = vst.msk [vmem:[%s5773_s4 + $0x3d8] sm:$0xf] %vm3832_vm1, %v4919_v50  ;;  %v4792_v16 = vpack.c.bf16 %v2671_v9, %v2671_v9  ;;  %v4920_v17 = vpack.c.bf16 %v2799_v10, %v2799_v10 }
 0x1d9   : > { %3949 = vst.msk [vmem:[%s5773_s4 + $0x1d0] sm:$0xf] %vm3832_vm1, %v4789_v11  ;;  %4077 = vst.msk [vmem:[%s5773_s4 + $0x3d0] sm:$0xf] %vm3832_vm1, %v4917_v13  ;;  %v4790_v18 = vpack.c.bf16 %v2669_v14, %v2669_v14  ;;  %v4918_v19 = vpack.c.bf16 %v2797_v15, %v2797_v15  ;;  %v5191_v20 = vpop.f32.mrb[120].mxu0  ;;  %v5319_v21 = vpop.f32.mrb[120].mxu1 }
 0x1da   : > { %3952 = vst.msk [vmem:[%s5773_s4 + $0x1dc] sm:$0xf] %vm3832_vm1, %v4792_v16  ;;  %4080 = vst.msk [vmem:[%s5773_s4 + $0x3dc] sm:$0xf] %vm3832_vm1, %v4920_v17  ;;  %v2018_v22 = vadd.f32 %v6405_v51, %v5191_v20  ;;  %v2530_v23 = vadd.f32 %v6405_v51, %v5319_v21  ;;  %v2009_v24 = vpop.f32.mrb[121].mxu0  ;;  %v2521_v25 = vpop.f32.mrb[121].mxu1 }
 0x1db   : > { %3950 = vst.msk [vmem:[%s5773_s4 + $0x1d4] sm:$0xf] %vm3832_vm1, %v4790_v18  ;;  %4078 = vst.msk [vmem:[%s5773_s4 + $0x3d4] sm:$0xf] %vm3832_vm1, %v4918_v19  ;;  %v2010_v26 = vadd.f32 %v6405_v51, %v2009_v24  ;;  %v2522_v27 = vadd.f32 %v6405_v51, %v2521_v25  ;;  %v5192_v28 = vpop.f32.mrb[122].mxu0  ;;  %v5320_v29 = vpop.f32.mrb[122].mxu1 }
 0x1dc   : > { %v2674_v30 = vmax.f32 %v2018_v22, 0.0  ;;  %v2802_v31 = vmax.f32 %v2530_v23, 0.0  ;;  %v2021_v32 = vadd.f32 %v6405_v51, %v5192_v28  ;;  %v2533_v33 = vadd.f32 %v6405_v51, %v5320_v29  ;;  %v2012_v34 = vpop.f32.mrb[123].mxu0  ;;  %v2524_v35 = vpop.f32.mrb[123].mxu1 }
 0x1dd   : > { %v2672_v36 = vmax.f32 %v2010_v26, 0.0  ;;  %v2800_v37 = vmax.f32 %v2522_v27, 0.0  ;;  %v2013_v38 = vadd.f32 %v6405_v51, %v2012_v34  ;;  %v2525_v39 = vadd.f32 %v6405_v51, %v2524_v35 }
 0x1de   : > { %v4795_v40 = vpack.c.bf16 %v2674_v30, %v2674_v30  ;;  %v4923_v41 = vpack.c.bf16 %v2802_v31, %v2802_v31  ;;  %v2675_v42 = vmax.f32 %v2021_v32, 0.0  ;;  %v2803_v43 = vmax.f32 %v2533_v33, 0.0 }
 0x1df   : > { %v4793_v44 = vpack.c.bf16 %v2672_v36, %v2672_v36  ;;  %v4921_v45 = vpack.c.bf16 %v2800_v37, %v2800_v37  ;;  %v2673_v46 = vmax.f32 %v2013_v38, 0.0  ;;  %v2801_v12 = vmax.f32 %v2525_v39, 0.0 }
 0x1e0   : > { %3955 = vst.msk [vmem:[%s5773_s4 + $0x1e8] sm:$0xf] %vm3832_vm1, %v4795_v40  ;;  %4083 = vst.msk [vmem:[%s5773_s4 + $0x3e8] sm:$0xf] %vm3832_vm1, %v4923_v41  ;;  %v4796_v47 = vpack.c.bf16 %v2675_v42, %v2675_v42  ;;  %v4924_v48 = vpack.c.bf16 %v2803_v43, %v2803_v43 }
 0x1e1   : > { %3953 = vst.msk [vmem:[%s5773_s4 + $0x1e0] sm:$0xf] %vm3832_vm1, %v4793_v44  ;;  %4081 = vst.msk [vmem:[%s5773_s4 + $0x3e0] sm:$0xf] %vm3832_vm1, %v4921_v45  ;;  %v4794_v49 = vpack.c.bf16 %v2673_v46, %v2673_v46  ;;  %v4922_v52 = vpack.c.bf16 %v2801_v12, %v2801_v12  ;;  %v5195_v53 = vpop.f32.mrb[124].mxu0  ;;  %v5323_v54 = vpop.f32.mrb[124].mxu1 }
 0x1e2   : > { %3956 = vst.msk [vmem:[%s5773_s4 + $0x1ec] sm:$0xf] %vm3832_vm1, %v4796_v47  ;;  %4084 = vst.msk [vmem:[%s5773_s4 + $0x3ec] sm:$0xf] %vm3832_vm1, %v4924_v48  ;;  %v2034_v55 = vadd.f32 %v6405_v51, %v5195_v53  ;;  %v2546_v56 = vadd.f32 %v6405_v51, %v5323_v54  ;;  %v2025_v57 = vpop.f32.mrb[125].mxu0  ;;  %v2537_v58 = vpop.f32.mrb[125].mxu1 }
 0x1e3   : > { %3954 = vst.msk [vmem:[%s5773_s4 + $0x1e4] sm:$0xf] %vm3832_vm1, %v4794_v49  ;;  %4082 = vst.msk [vmem:[%s5773_s4 + $0x3e4] sm:$0xf] %vm3832_vm1, %v4922_v52  ;;  %v2026_v59 = vadd.f32 %v6405_v51, %v2025_v57  ;;  %v2538_v60 = vadd.f32 %v6405_v51, %v2537_v58  ;;  %v5196_v61 = vpop.f32.mrb[126].mxu0  ;;  %v5324_v62 = vpop.f32.mrb[126].mxu1 }
 0x1e4   : > { %v2678_v63 = vmax.f32 %v2034_v55, 0.0  ;;  %v2806_v0 = vmax.f32 %v2546_v56, 0.0  ;;  %v2037_v1 = vadd.f32 %v6405_v51, %v5196_v61  ;;  %v2549_v2 = vadd.f32 %v6405_v51, %v5324_v62  ;;  %v2028_v3 = vpop.f32.mrb[127].mxu0  ;;  %v2540_v4 = vpop.f32.mrb[127].mxu1 }
 0x1e5   : > { %v2676_v5 = vmax.f32 %v2026_v59, 0.0  ;;  %v2804_v6 = vmax.f32 %v2538_v60, 0.0  ;;  %v2029_v7 = vadd.f32 %v6405_v51, %v2028_v3  ;;  %v2541_v8 = vadd.f32 %v6405_v51, %v2540_v4 }
 0x1e6   : > { %v4799_v50 = vpack.c.bf16 %v2678_v63, %v2678_v63  ;;  %v4927_v9 = vpack.c.bf16 %v2806_v0, %v2806_v0  ;;  %v2679_v10 = vmax.f32 %v2037_v1, 0.0  ;;  %v2807_v11 = vmax.f32 %v2549_v2, 0.0 }
 0x1e7   : > { %v4797_v13 = vpack.c.bf16 %v2676_v5, %v2676_v5  ;;  %v4925_v14 = vpack.c.bf16 %v2804_v6, %v2804_v6  ;;  %v2677_v15 = vmax.f32 %v2029_v7, 0.0  ;;  %v2805_v16 = vmax.f32 %v2541_v8, 0.0 }
 0x1e8   : > { %3959 = vst.msk [vmem:[%s5773_s4 + $0x1f8] sm:$0xf] %vm3832_vm1, %v4799_v50  ;;  %4087 = vst.msk [vmem:[%s5773_s4 + $0x3f8] sm:$0xf] %vm3832_vm1, %v4927_v9  ;;  %v4800_v17 = vpack.c.bf16 %v2679_v10, %v2679_v10  ;;  %v4928_v18 = vpack.c.bf16 %v2807_v11, %v2807_v11 }
 0x1e9   : > { %3957 = vst.msk [vmem:[%s5773_s4 + $0x1f0] sm:$0xf] %vm3832_vm1, %v4797_v13  ;;  %4085 = vst.msk [vmem:[%s5773_s4 + $0x3f0] sm:$0xf] %vm3832_vm1, %v4925_v14  ;;  %v4798_v51 = vpack.c.bf16 %v2677_v15, %v2677_v15  ;;  %v4926_v19 = vpack.c.bf16 %v2805_v16, %v2805_v16 }
 0x1ea   : > { %3960 = vst.msk [vmem:[%s5773_s4 + $0x1fc] sm:$0xf] %vm3832_vm1, %v4800_v17  ;;  %4088 = vst.msk [vmem:[%s5773_s4 + $0x3fc] sm:$0xf] %vm3832_vm1, %v4928_v18 }
 0x1eb   : > { %3958 = vst.msk [vmem:[%s5773_s4 + $0x1f4] sm:$0xf] %vm3832_vm1, %v4798_v51  ;;  %4086 = vst.msk [vmem:[%s5773_s4 + $0x3f4] sm:$0xf] %vm3832_vm1, %v4926_v19 }
 0x1ec PF: > { %s13_s12 = sadd.s32 1, %s5481_s12  }
 0x1ed   : > { %p10_p4 = scmp.ge.s32.totalorder %s13_s12, 5  }
 0x1ef   :  { %12 = sbr.rel (!%p10_p4) target bundleno = 1 (0x1), region = 62 }

// kernel: forward.5
= control target key start
LH: loop header
LB: loop body
LE: loop exit
PB: predicated region body
PF: predicated region fallthrough
CT: control target
= control target key end

     0   :  { %s1745_s12 = smov 0   ;;  %s2062_s0 = inlined_call_operand.vmem [shape: bf16[1072,72], index: 0, kind: input, shape index: {}]   ;;  %s2063_s1 = inlined_call_operand.vmem [shape: bf16[72,16], index: 1, kind: input, shape index: {}]   ;;  %s2064_s2 = inlined_call_operand.vmem [shape: f32[1,16], index: 2, kind: input, shape index: {}]   ;;  %s2065_s3 = inlined_call_operand.vmem [shape: bf16[1072,16], index: 3, kind: output, shape index: {}]  }
   0x1 LB: > { %s1324_s13 = sadd.s32 4294967295, %s1723_s12   ;;  %p1328_p0 = scmp.ge.s32.totalorder %s1723_s12, 1  ;;  %s1723_s12 = sphi %s1745_s12, %s13_s12  }
   0x2   : > { %p138_p1 = scmp.lt.s32.totalorder %s1723_s12, 3 }
   0x4   : > { %p139_p2 = pnand %p1328_p0, %p138_p1 }
   0x5   : > { %v1678_v0 = vld [vmem:[%s2063_s1] sm:$0xff] (!%p139_p2)   ;;  %v1679_v1 = vld [vmem:[%s2063_s1 + $0x8] sm:$0xff] (!%p139_p2)   ;;  %s162_s18 = smul.u32 (!%p139_p2), 67, %s1324_s13  ;;  %v1680_v2 = vld [vmem:[%s2063_s1 + $0x10] sm:$0xff] (!%p139_p2)   ;;  %vm453_vm0 = vcmask (!%p139_p2), 588800   ;;  %vm556_vm1 = vcmask (!%p139_p2), 1043456  }
   0x6   : > { %142 = sbr.rel (%p139_p2) target bundleno = 312 (0x138), region = 32  ;;  %1580 = vmatprep.subr.bf16.mxu0 (!%p139_p2), %v1678_v0  ;;  %1658 = vmatprep.subr.bf16.mxu1 (!%p139_p2), %v1678_v0  ;;  %v1681_v3 = vld [vmem:[%s2063_s1 + $0x18] sm:$0xff] (!%p139_p2)   ;;  %v1682_v6 = vld [vmem:[%s2063_s1 + $0x20] ss:$0 sps:$4 sm:$0xff] (!%p139_p2)   ;;  %vm1200_vm2 = vcmask (!%p139_p2), 125952  }
   0x7   : > { %1581 = vmatpush3.bf16.msra.mxu0 (!%p139_p2), %v1678_v0  ;;  %1663 = vmatpush3.bf16.msra.mxu1 (!%p139_p2), %v1678_v0  ;;  %p163_p3 = scmp.lt.s32.totalorder (!%p139_p2), %s162_s18, 133  ;;  %v558_v7 = vsel (!%p139_p2), %vm556_vm1, %v1682_v6, 0  ;;  %v1849_v40 = vld [vmem:[%s2064_s2] ss:$0 sm:$0xff] (!%p139_p2) }
   0x8   : > { %1582 = vmatprep.subr.bf16.mxu0 (!%p139_p2), %v1679_v1  ;;  %1659 = vmatprep.subr.bf16.mxu1 (!%p139_p2), %v1679_v1 }
   0xb   : > { %1583 = vmatpush3.bf16.msra.mxu0 (!%p139_p2), %v1679_v1  ;;  %1664 = vmatpush3.bf16.msra.mxu1 (!%p139_p2), %v1679_v1 }
   0xc   : > { %1584 = vmatprep.subr.bf16.mxu0 (!%p139_p2), %v1680_v2  ;;  %1660 = vmatprep.subr.bf16.mxu1 (!%p139_p2), %v1680_v2 }
   0xd   : > { %s2067_s18 = smov (!%p163_p3, %s162_s18), 133 }
   0xe   : > { %s1329_s21 = sshll.u32 %s2067_s18, 2 }
   0xf   : > { %s1773_s26 = scalar_lea.vmem %s2062_s0, %s1329_s21  ;;  %1585 = vmatpush3.bf16.msra.mxu0 %v1680_v2  ;;  %1665 = vmatpush3.bf16.msra.mxu1 %v1680_v2  ;;  %s1862_s6 = scalar_lea.vmem %s2065_s3, %s1329_s21 }
  0x10   : > { %v1683_v4 = vld [vmem:[%s1773_s26] sm:$0xff]   ;;  %v1685_v5 = vld [vmem:[%s1773_s26 + $0x90] sm:$0xff]   ;;  %1586 = vmatprep.subr.bf16.mxu0 %v1681_v3  ;;  %1661 = vmatprep.subr.bf16.mxu1 %v1681_v3  ;;  %v1684_v8 = vld [vmem:[%s1773_s26 + $0x8] sm:$0xff]  }
  0x11   : > { %1590 = vmatprep.mubr.msk.bf16.mxu0 %vm453_vm0, %v1683_v4  ;;  %1626 = vmatprep.mubr.msk.bf16.mxu1 %vm453_vm0, %v1685_v5  ;;  %v1686_v9 = vld [vmem:[%s1773_s26 + $0x98] sm:$0xff]   ;;  %v1687_v10 = vld [vmem:[%s1773_s26 + $0x10] sm:$0xff]   ;;  %v1689_v11 = vld [vmem:[%s1773_s26 + $0xa0] sm:$0xff]  }
  0x12   : > { %v1688_v12 = vld [vmem:[%s1773_s26 + $0x18] sm:$0xff]   ;;  %v1690_v13 = vld [vmem:[%s1773_s26 + $0xa8] sm:$0xff]   ;;  %v1691_v14 = vld [vmem:[%s1773_s26 + $0x20] sm:$0xff]  }
  0x13   : > { %1587 = vmatpush3.bf16.msra.mxu0 %v1681_v3  ;;  %1666 = vmatpush3.bf16.msra.mxu1 %v1681_v3  ;;  %v1693_v15 = vld [vmem:[%s1773_s26 + $0xb0] sm:$0xff]   ;;  %v1692_v16 = vld [vmem:[%s1773_s26 + $0x28] sm:$0xff]   ;;  %v1694_v17 = vld [vmem:[%s1773_s26 + $0xb8] sm:$0xff]  }
  0x14   : > { %1668 = vmatprep.subr.msk.bf16.mxu0 %vm556_vm1, %v1682_v6  ;;  %1669 = vmatprep.subr.msk.bf16.mxu1 %vm556_vm1, %v1682_v6  ;;  %v1695_v18 = vld [vmem:[%s1773_s26 + $0x30] sm:$0xff]   ;;  %v1697_v19 = vld [vmem:[%s1773_s26 + $0xc0] sm:$0xff]   ;;  %v1696_v20 = vld [vmem:[%s1773_s26 + $0x38] sm:$0xff]  }
  0x15   : > { %v1698_v21 = vld [vmem:[%s1773_s26 + $0xc8] sm:$0xff]   ;;  %v1699_v22 = vld [vmem:[%s1773_s26 + $0x40] sm:$0xff]   ;;  %v1701_v23 = vld [vmem:[%s1773_s26 + $0xd0] sm:$0xff]  }
  0x16   : > { %v1700_v24 = vld [vmem:[%s1773_s26 + $0x48] sm:$0xff]   ;;  %v1702_v25 = vld [vmem:[%s1773_s26 + $0xd8] sm:$0xff]   ;;  %v1703_v26 = vld [vmem:[%s1773_s26 + $0x50] sm:$0xff]  }
  0x17   : > { %1589 = vmatpush3.bf16.msra.mxu0 %v558_v7  ;;  %1667 = vmatpush3.bf16.msra.mxu1 %v558_v7  ;;  %v1705_v27 = vld [vmem:[%s1773_s26 + $0xe0] sm:$0xff]   ;;  %v1704_v28 = vld [vmem:[%s1773_s26 + $0x58] sm:$0xff]   ;;  %v1706_v29 = vld [vmem:[%s1773_s26 + $0xe8] sm:$0xff]  }
  0x18   : > { %v1707_v30 = vld [vmem:[%s1773_s26 + $0x60] sm:$0xff]   ;;  %v1709_v31 = vld [vmem:[%s1773_s26 + $0xf0] sm:$0xff]   ;;  %v1708_v32 = vld [vmem:[%s1773_s26 + $0x68] sm:$0xff]  }
  0x19   : > { %v1710_v33 = vld [vmem:[%s1773_s26 + $0xf8] sm:$0xff]   ;;  %v1711_v34 = vld [vmem:[%s1773_s26 + $0x70] sm:$0xff]   ;;  %v1713_v35 = vld [vmem:[%s1773_s26 + $0x100] sm:$0xff]  }
  0x1a   : > { %1591 = vmatmul.mubr.msk.bf16.vlgmr.msra.gmra.mrb[0].mxu0 %vm453_vm0, %v1684_v8  ;;  %1627 = vmatmul.mubr.msk.bf16.vlgmr.msra.gmra.mrb[0].mxu1 %vm453_vm0, %v1686_v9  ;;  %v1712_v36 = vld [vmem:[%s1773_s26 + $0x78] sm:$0xff]   ;;  %v1714_v37 = vld [vmem:[%s1773_s26 + $0x108] ss:$0 sps:$4 sm:$0xff]   ;;  %v1715_v38 = vld [vmem:[%s1773_s26 + $0x80] sm:$0xff]  }
  0x1b   : > { %1594 = vmatprep.mubr.msk.bf16.mxu0 %vm453_vm0, %v1687_v10  ;;  %1630 = vmatprep.mubr.msk.bf16.mxu1 %vm453_vm0, %v1689_v11  ;;  %v1716_v39 = vld [vmem:[%s1773_s26 + $0x88] sm:$0xff]  }
  0x22   : > { %1595 = vmatmul.mubr.msk.bf16.gmra.mrb[4].mxu0 %vm453_vm0, %v1688_v12  ;;  %1631 = vmatmul.mubr.msk.bf16.gmra.mrb[4].mxu1 %vm453_vm0, %v1690_v13 }
  0x23   : > { %1598 = vmatprep.mubr.msk.bf16.mxu0 %vm453_vm0, %v1691_v14  ;;  %1634 = vmatprep.mubr.msk.bf16.mxu1 %vm453_vm0, %v1693_v15 }
  0x2a   : > { %1599 = vmatmul.mubr.msk.bf16.gmra.mrb[8].mxu0 %vm453_vm0, %v1692_v16  ;;  %1635 = vmatmul.mubr.msk.bf16.gmra.mrb[8].mxu1 %vm453_vm0, %v1694_v17 }
  0x2b   : > { %1602 = vmatprep.mubr.msk.bf16.mxu0 %vm453_vm0, %v1695_v18  ;;  %1638 = vmatprep.mubr.msk.bf16.mxu1 %vm453_vm0, %v1697_v19 }
  0x32   : > { %1603 = vmatmul.mubr.msk.bf16.gmra.mrb[12].mxu0 %vm453_vm0, %v1696_v20  ;;  %1639 = vmatmul.mubr.msk.bf16.gmra.mrb[12].mxu1 %vm453_vm0, %v1698_v21 }
  0x33   : > { %1606 = vmatprep.mubr.msk.bf16.mxu0 %vm453_vm0, %v1699_v22  ;;  %1642 = vmatprep.mubr.msk.bf16.mxu1 %vm453_vm0, %v1701_v23 }
  0x3a   : > { %1607 = vmatmul.mubr.msk.bf16.gmra.mrb[16].mxu0 %vm453_vm0, %v1700_v24  ;;  %1643 = vmatmul.mubr.msk.bf16.gmra.mrb[16].mxu1 %vm453_vm0, %v1702_v25 }
  0x3b   : > { %1610 = vmatprep.mubr.msk.bf16.mxu0 %vm453_vm0, %v1703_v26  ;;  %1646 = vmatprep.mubr.msk.bf16.mxu1 %vm453_vm0, %v1705_v27 }
  0x42   : > { %1611 = vmatmul.mubr.msk.bf16.gmra.mrb[20].mxu0 %vm453_vm0, %v1704_v28  ;;  %1647 = vmatmul.mubr.msk.bf16.gmra.mrb[20].mxu1 %vm453_vm0, %v1706_v29 }
  0x43   : > { %1614 = vmatprep.mubr.msk.bf16.mxu0 %vm453_vm0, %v1707_v30  ;;  %1650 = vmatprep.mubr.msk.bf16.mxu1 %vm453_vm0, %v1709_v31 }
  0x4a   : > { %1615 = vmatmul.mubr.msk.bf16.gmra.mrb[24].mxu0 %vm453_vm0, %v1708_v32  ;;  %1651 = vmatmul.mubr.msk.bf16.gmra.mrb[24].mxu1 %vm453_vm0, %v1710_v33 }
  0x4b   : > { %1618 = vmatprep.mubr.msk.bf16.mxu0 %vm453_vm0, %v1711_v34  ;;  %1654 = vmatprep.mubr.msk.bf16.mxu1 %vm453_vm0, %v1713_v35 }
  0x52   : > { %1619 = vmatmul.mubr.msk.bf16.gmra.mrb[28].mxu0 %vm453_vm0, %v1712_v36  ;;  %1655 = vmatmul.mubr.msk.bf16.gmra.mrb[28].mxu1 %vm453_vm0, %v1714_v37 }
  0x53   : > { %1622 = vmatprep.mubr.msk.bf16.mxu0 %vm453_vm0, %v1715_v38 }
  0x5a   : > { %1623 = vmatmul.mubr.msk.bf16.gmra.mrb[32].mxu0 %vm453_vm0, %v1716_v39 }
  0xed   : > { %v1592_v41 = vpop.f32.mrb[0].mxu0  ;;  %v1628_v42 = vpop.f32.mrb[0].mxu1 }
  0xee   : > { %v603_v43 = vadd.f32 %v1592_v41, %v1849_v40  ;;  %v594_v44 = vpop.f32.mrb[1].mxu0  ;;  %v747_v45 = vadd.f32 %v1628_v42, %v1849_v40  ;;  %v738_v46 = vpop.f32.mrb[1].mxu1 }
  0xef   : > { %v595_v47 = vadd.f32 %v1849_v40, %v594_v44  ;;  %v1593_v48 = vpop.f32.mrb[2].mxu0  ;;  %v739_v49 = vadd.f32 %v1849_v40, %v738_v46  ;;  %v1629_v50 = vpop.f32.mrb[2].mxu1 }
  0xf0   : > { %v866_v51 = vmax.f32 %v603_v43, 0.0  ;;  %v606_v52 = vadd.f32 %v1593_v48, %v1849_v40  ;;  %v597_v53 = vpop.f32.mrb[3].mxu0  ;;  %v902_v54 = vmax.f32 %v747_v45, 0.0  ;;  %v750_v55 = vadd.f32 %v1629_v50, %v1849_v40  ;;  %v741_v56 = vpop.f32.mrb[3].mxu1 }
  0xf1   : > { %v864_v57 = vmax.f32 %v595_v47, 0.0  ;;  %v598_v58 = vadd.f32 %v1849_v40, %v597_v53  ;;  %v900_v59 = vmax.f32 %v739_v49, 0.0  ;;  %v742_v60 = vadd.f32 %v1849_v40, %v741_v56 }
  0xf2   : > { %v1476_v61 = vpack.c.bf16 %v866_v51, %v866_v51  ;;  %v867_v62 = vmax.f32 %v606_v52, 0.0  ;;  %v1512_v63 = vpack.c.bf16 %v902_v54, %v902_v54  ;;  %v903_v0 = vmax.f32 %v750_v55, 0.0 }
  0xf3   : > { %v1474_v1 = vpack.c.bf16 %v864_v57, %v864_v57  ;;  %v865_v2 = vmax.f32 %v598_v58, 0.0  ;;  %v1510_v3 = vpack.c.bf16 %v900_v59, %v900_v59  ;;  %v901_v4 = vmax.f32 %v742_v60, 0.0 }
  0xf4   : > { %1203 = vst.msk [vmem:[%s1862_s6 + $0x8] sm:$0xf] %vm1200_vm2, %v1476_v61  ;;  %v1477_v5 = vpack.c.bf16 %v867_v62, %v867_v62  ;;  %1239 = vst.msk [vmem:[%s1862_s6 + $0x98] sm:$0xf] %vm1200_vm2, %v1512_v63  ;;  %v1513_v6 = vpack.c.bf16 %v903_v0, %v903_v0 }
  0xf5   : > { %1201 = vst.msk [vmem:[%s1862_s6] sm:$0xf] %vm1200_vm2, %v1474_v1  ;;  %v1475_v7 = vpack.c.bf16 %v865_v2, %v865_v2  ;;  %1237 = vst.msk [vmem:[%s1862_s6 + $0x90] sm:$0xf] %vm1200_vm2, %v1510_v3  ;;  %v1596_v8 = vpop.f32.mrb[4].mxu0  ;;  %v1511_v9 = vpack.c.bf16 %v901_v4, %v901_v4  ;;  %v1632_v10 = vpop.f32.mrb[4].mxu1 }
  0xf6   : > { %1204 = vst.msk [vmem:[%s1862_s6 + $0xc] sm:$0xf] %vm1200_vm2, %v1477_v5  ;;  %1240 = vst.msk [vmem:[%s1862_s6 + $0x9c] sm:$0xf] %vm1200_vm2, %v1513_v6  ;;  %v619_v11 = vadd.f32 %v1596_v8, %v1849_v40  ;;  %v610_v12 = vpop.f32.mrb[5].mxu0  ;;  %v763_v13 = vadd.f32 %v1632_v10, %v1849_v40  ;;  %v754_v14 = vpop.f32.mrb[5].mxu1 }
  0xf7   : > { %1202 = vst.msk [vmem:[%s1862_s6 + $0x4] sm:$0xf] %vm1200_vm2, %v1475_v7  ;;  %1238 = vst.msk [vmem:[%s1862_s6 + $0x94] sm:$0xf] %vm1200_vm2, %v1511_v9  ;;  %v611_v15 = vadd.f32 %v1849_v40, %v610_v12  ;;  %v1597_v16 = vpop.f32.mrb[6].mxu0  ;;  %v755_v17 = vadd.f32 %v1849_v40, %v754_v14  ;;  %v1633_v18 = vpop.f32.mrb[6].mxu1 }
  0xf8   : > { %v870_v19 = vmax.f32 %v619_v11, 0.0  ;;  %v622_v20 = vadd.f32 %v1597_v16, %v1849_v40  ;;  %v613_v21 = vpop.f32.mrb[7].mxu0  ;;  %v906_v22 = vmax.f32 %v763_v13, 0.0  ;;  %v766_v23 = vadd.f32 %v1633_v18, %v1849_v40  ;;  %v757_v24 = vpop.f32.mrb[7].mxu1 }
  0xf9   : > { %v868_v25 = vmax.f32 %v611_v15, 0.0  ;;  %v614_v26 = vadd.f32 %v1849_v40, %v613_v21  ;;  %v904_v27 = vmax.f32 %v755_v17, 0.0  ;;  %v758_v28 = vadd.f32 %v1849_v40, %v757_v24 }
  0xfa   : > { %v1480_v29 = vpack.c.bf16 %v870_v19, %v870_v19  ;;  %v871_v30 = vmax.f32 %v622_v20, 0.0  ;;  %v1516_v31 = vpack.c.bf16 %v906_v22, %v906_v22  ;;  %v907_v32 = vmax.f32 %v766_v23, 0.0 }
  0xfb   : > { %v1478_v33 = vpack.c.bf16 %v868_v25, %v868_v25  ;;  %v869_v34 = vmax.f32 %v614_v26, 0.0  ;;  %v1514_v35 = vpack.c.bf16 %v904_v27, %v904_v27  ;;  %v905_v36 = vmax.f32 %v758_v28, 0.0 }
  0xfc   : > { %1207 = vst.msk [vmem:[%s1862_s6 + $0x18] sm:$0xf] %vm1200_vm2, %v1480_v29  ;;  %v1481_v37 = vpack.c.bf16 %v871_v30, %v871_v30  ;;  %1243 = vst.msk [vmem:[%s1862_s6 + $0xa8] sm:$0xf] %vm1200_vm2, %v1516_v31  ;;  %v1517_v38 = vpack.c.bf16 %v907_v32, %v907_v32 }
  0xfd   : > { %1205 = vst.msk [vmem:[%s1862_s6 + $0x10] sm:$0xf] %vm1200_vm2, %v1478_v33  ;;  %v1479_v39 = vpack.c.bf16 %v869_v34, %v869_v34  ;;  %1241 = vst.msk [vmem:[%s1862_s6 + $0xa0] sm:$0xf] %vm1200_vm2, %v1514_v35  ;;  %v1600_v41 = vpop.f32.mrb[8].mxu0  ;;  %v1515_v42 = vpack.c.bf16 %v905_v36, %v905_v36  ;;  %v1636_v43 = vpop.f32.mrb[8].mxu1 }
  0xfe   : > { %1208 = vst.msk [vmem:[%s1862_s6 + $0x1c] sm:$0xf] %vm1200_vm2, %v1481_v37  ;;  %1244 = vst.msk [vmem:[%s1862_s6 + $0xac] sm:$0xf] %vm1200_vm2, %v1517_v38  ;;  %v635_v44 = vadd.f32 %v1600_v41, %v1849_v40  ;;  %v626_v45 = vpop.f32.mrb[9].mxu0  ;;  %v779_v46 = vadd.f32 %v1636_v43, %v1849_v40  ;;  %v770_v47 = vpop.f32.mrb[9].mxu1 }
  0xff   : > { %1206 = vst.msk [vmem:[%s1862_s6 + $0x14] sm:$0xf] %vm1200_vm2, %v1479_v39  ;;  %1242 = vst.msk [vmem:[%s1862_s6 + $0xa4] sm:$0xf] %vm1200_vm2, %v1515_v42  ;;  %v627_v48 = vadd.f32 %v1849_v40, %v626_v45  ;;  %v1601_v49 = vpop.f32.mrb[10].mxu0  ;;  %v771_v50 = vadd.f32 %v1849_v40, %v770_v47  ;;  %v1637_v51 = vpop.f32.mrb[10].mxu1 }
 0x100   : > { %v874_v52 = vmax.f32 %v635_v44, 0.0  ;;  %v638_v53 = vadd.f32 %v1601_v49, %v1849_v40  ;;  %v629_v54 = vpop.f32.mrb[11].mxu0  ;;  %v910_v55 = vmax.f32 %v779_v46, 0.0  ;;  %v782_v56 = vadd.f32 %v1637_v51, %v1849_v40  ;;  %v773_v57 = vpop.f32.mrb[11].mxu1 }
 0x101   : > { %v872_v58 = vmax.f32 %v627_v48, 0.0  ;;  %v630_v59 = vadd.f32 %v1849_v40, %v629_v54  ;;  %v908_v60 = vmax.f32 %v771_v50, 0.0  ;;  %v774_v61 = vadd.f32 %v1849_v40, %v773_v57 }
 0x102   : > { %v1484_v62 = vpack.c.bf16 %v874_v52, %v874_v52  ;;  %v875_v63 = vmax.f32 %v638_v53, 0.0  ;;  %v1520_v0 = vpack.c.bf16 %v910_v55, %v910_v55  ;;  %v911_v1 = vmax.f32 %v782_v56, 0.0 }
 0x103   : > { %v1482_v2 = vpack.c.bf16 %v872_v58, %v872_v58  ;;  %v873_v3 = vmax.f32 %v630_v59, 0.0  ;;  %v1518_v4 = vpack.c.bf16 %v908_v60, %v908_v60  ;;  %v909_v5 = vmax.f32 %v774_v61, 0.0 }
 0x104   : > { %1211 = vst.msk [vmem:[%s1862_s6 + $0x28] sm:$0xf] %vm1200_vm2, %v1484_v62  ;;  %v1485_v6 = vpack.c.bf16 %v875_v63, %v875_v63  ;;  %1247 = vst.msk [vmem:[%s1862_s6 + $0xb8] sm:$0xf] %vm1200_vm2, %v1520_v0  ;;  %v1521_v7 = vpack.c.bf16 %v911_v1, %v911_v1 }
 0x105   : > { %1209 = vst.msk [vmem:[%s1862_s6 + $0x20] sm:$0xf] %vm1200_vm2, %v1482_v2  ;;  %v1483_v8 = vpack.c.bf16 %v873_v3, %v873_v3  ;;  %1245 = vst.msk [vmem:[%s1862_s6 + $0xb0] sm:$0xf] %vm1200_vm2, %v1518_v4  ;;  %v1604_v9 = vpop.f32.mrb[12].mxu0  ;;  %v1519_v10 = vpack.c.bf16 %v909_v5, %v909_v5  ;;  %v1640_v11 = vpop.f32.mrb[12].mxu1 }
 0x106   : > { %1212 = vst.msk [vmem:[%s1862_s6 + $0x2c] sm:$0xf] %vm1200_vm2, %v1485_v6  ;;  %1248 = vst.msk [vmem:[%s1862_s6 + $0xbc] sm:$0xf] %vm1200_vm2, %v1521_v7  ;;  %v651_v12 = vadd.f32 %v1604_v9, %v1849_v40  ;;  %v642_v13 = vpop.f32.mrb[13].mxu0  ;;  %v795_v14 = vadd.f32 %v1640_v11, %v1849_v40  ;;  %v786_v15 = vpop.f32.mrb[13].mxu1 }
 0x107   : > { %1210 = vst.msk [vmem:[%s1862_s6 + $0x24] sm:$0xf] %vm1200_vm2, %v1483_v8  ;;  %1246 = vst.msk [vmem:[%s1862_s6 + $0xb4] sm:$0xf] %vm1200_vm2, %v1519_v10  ;;  %v643_v16 = vadd.f32 %v1849_v40, %v642_v13  ;;  %v1605_v17 = vpop.f32.mrb[14].mxu0  ;;  %v787_v18 = vadd.f32 %v1849_v40, %v786_v15  ;;  %v1641_v19 = vpop.f32.mrb[14].mxu1 }
 0x108   : > { %v878_v20 = vmax.f32 %v651_v12, 0.0  ;;  %v654_v21 = vadd.f32 %v1605_v17, %v1849_v40  ;;  %v645_v22 = vpop.f32.mrb[15].mxu0  ;;  %v914_v23 = vmax.f32 %v795_v14, 0.0  ;;  %v798_v24 = vadd.f32 %v1641_v19, %v1849_v40  ;;  %v789_v25 = vpop.f32.mrb[15].mxu1 }
 0x109   : > { %v876_v26 = vmax.f32 %v643_v16, 0.0  ;;  %v646_v27 = vadd.f32 %v1849_v40, %v645_v22  ;;  %v912_v28 = vmax.f32 %v787_v18, 0.0  ;;  %v790_v29 = vadd.f32 %v1849_v40, %v789_v25 }
 0x10a   : > { %v1488_v30 = vpack.c.bf16 %v878_v20, %v878_v20  ;;  %v879_v31 = vmax.f32 %v654_v21, 0.0  ;;  %v1524_v32 = vpack.c.bf16 %v914_v23, %v914_v23  ;;  %v915_v33 = vmax.f32 %v798_v24, 0.0 }
 0x10b   : > { %v1486_v34 = vpack.c.bf16 %v876_v26, %v876_v26  ;;  %v877_v35 = vmax.f32 %v646_v27, 0.0  ;;  %v1522_v36 = vpack.c.bf16 %v912_v28, %v912_v28  ;;  %v913_v37 = vmax.f32 %v790_v29, 0.0 }
 0x10c   : > { %1215 = vst.msk [vmem:[%s1862_s6 + $0x38] sm:$0xf] %vm1200_vm2, %v1488_v30  ;;  %v1489_v38 = vpack.c.bf16 %v879_v31, %v879_v31  ;;  %1251 = vst.msk [vmem:[%s1862_s6 + $0xc8] sm:$0xf] %vm1200_vm2, %v1524_v32  ;;  %v1525_v39 = vpack.c.bf16 %v915_v33, %v915_v33 }
 0x10d   : > { %1213 = vst.msk [vmem:[%s1862_s6 + $0x30] sm:$0xf] %vm1200_vm2, %v1486_v34  ;;  %v1487_v41 = vpack.c.bf16 %v877_v35, %v877_v35  ;;  %1249 = vst.msk [vmem:[%s1862_s6 + $0xc0] sm:$0xf] %vm1200_vm2, %v1522_v36  ;;  %v1608_v42 = vpop.f32.mrb[16].mxu0  ;;  %v1523_v43 = vpack.c.bf16 %v913_v37, %v913_v37  ;;  %v1644_v44 = vpop.f32.mrb[16].mxu1 }
 0x10e   : > { %1216 = vst.msk [vmem:[%s1862_s6 + $0x3c] sm:$0xf] %vm1200_vm2, %v1489_v38  ;;  %1252 = vst.msk [vmem:[%s1862_s6 + $0xcc] sm:$0xf] %vm1200_vm2, %v1525_v39  ;;  %v667_v45 = vadd.f32 %v1608_v42, %v1849_v40  ;;  %v658_v46 = vpop.f32.mrb[17].mxu0  ;;  %v811_v47 = vadd.f32 %v1644_v44, %v1849_v40  ;;  %v802_v48 = vpop.f32.mrb[17].mxu1 }
 0x10f   : > { %1214 = vst.msk [vmem:[%s1862_s6 + $0x34] sm:$0xf] %vm1200_vm2, %v1487_v41  ;;  %1250 = vst.msk [vmem:[%s1862_s6 + $0xc4] sm:$0xf] %vm1200_vm2, %v1523_v43  ;;  %v659_v49 = vadd.f32 %v1849_v40, %v658_v46  ;;  %v1609_v50 = vpop.f32.mrb[18].mxu0  ;;  %v803_v51 = vadd.f32 %v1849_v40, %v802_v48  ;;  %v1645_v52 = vpop.f32.mrb[18].mxu1 }
 0x110   : > { %v882_v53 = vmax.f32 %v667_v45, 0.0  ;;  %v670_v54 = vadd.f32 %v1609_v50, %v1849_v40  ;;  %v661_v55 = vpop.f32.mrb[19].mxu0  ;;  %v918_v56 = vmax.f32 %v811_v47, 0.0  ;;  %v814_v57 = vadd.f32 %v1645_v52, %v1849_v40  ;;  %v805_v58 = vpop.f32.mrb[19].mxu1 }
 0x111   : > { %v880_v59 = vmax.f32 %v659_v49, 0.0  ;;  %v662_v60 = vadd.f32 %v1849_v40, %v661_v55  ;;  %v916_v61 = vmax.f32 %v803_v51, 0.0  ;;  %v806_v62 = vadd.f32 %v1849_v40, %v805_v58 }
 0x112   : > { %v1492_v63 = vpack.c.bf16 %v882_v53, %v882_v53  ;;  %v883_v0 = vmax.f32 %v670_v54, 0.0  ;;  %v1528_v1 = vpack.c.bf16 %v918_v56, %v918_v56  ;;  %v919_v2 = vmax.f32 %v814_v57, 0.0 }
 0x113   : > { %v1490_v3 = vpack.c.bf16 %v880_v59, %v880_v59  ;;  %v881_v4 = vmax.f32 %v662_v60, 0.0  ;;  %v1526_v5 = vpack.c.bf16 %v916_v61, %v916_v61  ;;  %v917_v6 = vmax.f32 %v806_v62, 0.0 }
 0x114   : > { %1219 = vst.msk [vmem:[%s1862_s6 + $0x48] sm:$0xf] %vm1200_vm2, %v1492_v63  ;;  %v1493_v7 = vpack.c.bf16 %v883_v0, %v883_v0  ;;  %1255 = vst.msk [vmem:[%s1862_s6 + $0xd8] sm:$0xf] %vm1200_vm2, %v1528_v1  ;;  %v1529_v8 = vpack.c.bf16 %v919_v2, %v919_v2 }
 0x115   : > { %1217 = vst.msk [vmem:[%s1862_s6 + $0x40] sm:$0xf] %vm1200_vm2, %v1490_v3  ;;  %v1491_v9 = vpack.c.bf16 %v881_v4, %v881_v4  ;;  %1253 = vst.msk [vmem:[%s1862_s6 + $0xd0] sm:$0xf] %vm1200_vm2, %v1526_v5  ;;  %v1612_v10 = vpop.f32.mrb[20].mxu0  ;;  %v1527_v11 = vpack.c.bf16 %v917_v6, %v917_v6  ;;  %v1648_v12 = vpop.f32.mrb[20].mxu1 }
 0x116   : > { %1220 = vst.msk [vmem:[%s1862_s6 + $0x4c] sm:$0xf] %vm1200_vm2, %v1493_v7  ;;  %1256 = vst.msk [vmem:[%s1862_s6 + $0xdc] sm:$0xf] %vm1200_vm2, %v1529_v8  ;;  %v683_v13 = vadd.f32 %v1612_v10, %v1849_v40  ;;  %v674_v14 = vpop.f32.mrb[21].mxu0  ;;  %v827_v15 = vadd.f32 %v1648_v12, %v1849_v40  ;;  %v818_v16 = vpop.f32.mrb[21].mxu1 }
 0x117   : > { %1218 = vst.msk [vmem:[%s1862_s6 + $0x44] sm:$0xf] %vm1200_vm2, %v1491_v9  ;;  %1254 = vst.msk [vmem:[%s1862_s6 + $0xd4] sm:$0xf] %vm1200_vm2, %v1527_v11  ;;  %v675_v17 = vadd.f32 %v1849_v40, %v674_v14  ;;  %v1613_v18 = vpop.f32.mrb[22].mxu0  ;;  %v819_v19 = vadd.f32 %v1849_v40, %v818_v16  ;;  %v1649_v20 = vpop.f32.mrb[22].mxu1 }
 0x118   : > { %v886_v21 = vmax.f32 %v683_v13, 0.0  ;;  %v686_v22 = vadd.f32 %v1613_v18, %v1849_v40  ;;  %v677_v23 = vpop.f32.mrb[23].mxu0  ;;  %v922_v24 = vmax.f32 %v827_v15, 0.0  ;;  %v830_v25 = vadd.f32 %v1649_v20, %v1849_v40  ;;  %v821_v26 = vpop.f32.mrb[23].mxu1 }
 0x119   : > { %v884_v27 = vmax.f32 %v675_v17, 0.0  ;;  %v678_v28 = vadd.f32 %v1849_v40, %v677_v23  ;;  %v920_v29 = vmax.f32 %v819_v19, 0.0  ;;  %v822_v30 = vadd.f32 %v1849_v40, %v821_v26 }
 0x11a   : > { %v1496_v31 = vpack.c.bf16 %v886_v21, %v886_v21  ;;  %v887_v32 = vmax.f32 %v686_v22, 0.0  ;;  %v1532_v33 = vpack.c.bf16 %v922_v24, %v922_v24  ;;  %v923_v34 = vmax.f32 %v830_v25, 0.0 }
 0x11b   : > { %v1494_v35 = vpack.c.bf16 %v884_v27, %v884_v27  ;;  %v885_v36 = vmax.f32 %v678_v28, 0.0  ;;  %v1530_v37 = vpack.c.bf16 %v920_v29, %v920_v29  ;;  %v921_v38 = vmax.f32 %v822_v30, 0.0 }
 0x11c   : > { %1223 = vst.msk [vmem:[%s1862_s6 + $0x58] sm:$0xf] %vm1200_vm2, %v1496_v31  ;;  %v1497_v39 = vpack.c.bf16 %v887_v32, %v887_v32  ;;  %1259 = vst.msk [vmem:[%s1862_s6 + $0xe8] sm:$0xf] %vm1200_vm2, %v1532_v33  ;;  %v1533_v41 = vpack.c.bf16 %v923_v34, %v923_v34 }
 0x11d   : > { %1221 = vst.msk [vmem:[%s1862_s6 + $0x50] sm:$0xf] %vm1200_vm2, %v1494_v35  ;;  %v1495_v42 = vpack.c.bf16 %v885_v36, %v885_v36  ;;  %1257 = vst.msk [vmem:[%s1862_s6 + $0xe0] sm:$0xf] %vm1200_vm2, %v1530_v37  ;;  %v1616_v43 = vpop.f32.mrb[24].mxu0  ;;  %v1531_v44 = vpack.c.bf16 %v921_v38, %v921_v38  ;;  %v1652_v45 = vpop.f32.mrb[24].mxu1 }
 0x11e   : > { %1224 = vst.msk [vmem:[%s1862_s6 + $0x5c] sm:$0xf] %vm1200_vm2, %v1497_v39  ;;  %1260 = vst.msk [vmem:[%s1862_s6 + $0xec] sm:$0xf] %vm1200_vm2, %v1533_v41  ;;  %v699_v46 = vadd.f32 %v1616_v43, %v1849_v40  ;;  %v690_v47 = vpop.f32.mrb[25].mxu0  ;;  %v843_v48 = vadd.f32 %v1652_v45, %v1849_v40  ;;  %v834_v49 = vpop.f32.mrb[25].mxu1 }
 0x11f   : > { %1222 = vst.msk [vmem:[%s1862_s6 + $0x54] sm:$0xf] %vm1200_vm2, %v1495_v42  ;;  %1258 = vst.msk [vmem:[%s1862_s6 + $0xe4] sm:$0xf] %vm1200_vm2, %v1531_v44  ;;  %v691_v50 = vadd.f32 %v1849_v40, %v690_v47  ;;  %v1617_v51 = vpop.f32.mrb[26].mxu0  ;;  %v835_v52 = vadd.f32 %v1849_v40, %v834_v49  ;;  %v1653_v53 = vpop.f32.mrb[26].mxu1 }
 0x120   : > { %v890_v54 = vmax.f32 %v699_v46, 0.0  ;;  %v702_v55 = vadd.f32 %v1617_v51, %v1849_v40  ;;  %v693_v56 = vpop.f32.mrb[27].mxu0  ;;  %v926_v57 = vmax.f32 %v843_v48, 0.0  ;;  %v846_v58 = vadd.f32 %v1653_v53, %v1849_v40  ;;  %v837_v59 = vpop.f32.mrb[27].mxu1 }
 0x121   : > { %v888_v60 = vmax.f32 %v691_v50, 0.0  ;;  %v694_v61 = vadd.f32 %v1849_v40, %v693_v56  ;;  %v924_v62 = vmax.f32 %v835_v52, 0.0  ;;  %v838_v63 = vadd.f32 %v1849_v40, %v837_v59 }
 0x122   : > { %v1500_v0 = vpack.c.bf16 %v890_v54, %v890_v54  ;;  %v891_v1 = vmax.f32 %v702_v55, 0.0  ;;  %v1536_v2 = vpack.c.bf16 %v926_v57, %v926_v57  ;;  %v927_v3 = vmax.f32 %v846_v58, 0.0 }
 0x123   : > { %v1498_v4 = vpack.c.bf16 %v888_v60, %v888_v60  ;;  %v889_v5 = vmax.f32 %v694_v61, 0.0  ;;  %v1534_v6 = vpack.c.bf16 %v924_v62, %v924_v62  ;;  %v925_v7 = vmax.f32 %v838_v63, 0.0 }
 0x124   : > { %1227 = vst.msk [vmem:[%s1862_s6 + $0x68] sm:$0xf] %vm1200_vm2, %v1500_v0  ;;  %v1501_v8 = vpack.c.bf16 %v891_v1, %v891_v1  ;;  %1263 = vst.msk [vmem:[%s1862_s6 + $0xf8] sm:$0xf] %vm1200_vm2, %v1536_v2  ;;  %v1537_v9 = vpack.c.bf16 %v927_v3, %v927_v3 }
 0x125   : > { %1225 = vst.msk [vmem:[%s1862_s6 + $0x60] sm:$0xf] %vm1200_vm2, %v1498_v4  ;;  %v1499_v10 = vpack.c.bf16 %v889_v5, %v889_v5  ;;  %1261 = vst.msk [vmem:[%s1862_s6 + $0xf0] sm:$0xf] %vm1200_vm2, %v1534_v6  ;;  %v1620_v11 = vpop.f32.mrb[28].mxu0  ;;  %v1535_v12 = vpack.c.bf16 %v925_v7, %v925_v7  ;;  %v1656_v13 = vpop.f32.mrb[28].mxu1 }
 0x126   : > { %1228 = vst.msk [vmem:[%s1862_s6 + $0x6c] sm:$0xf] %vm1200_vm2, %v1501_v8  ;;  %1264 = vst.msk [vmem:[%s1862_s6 + $0xfc] sm:$0xf] %vm1200_vm2, %v1537_v9  ;;  %v715_v14 = vadd.f32 %v1620_v11, %v1849_v40  ;;  %v706_v15 = vpop.f32.mrb[29].mxu0  ;;  %v859_v16 = vadd.f32 %v1656_v13, %v1849_v40  ;;  %v850_v17 = vpop.f32.mrb[29].mxu1 }
 0x127   : > { %1226 = vst.msk [vmem:[%s1862_s6 + $0x64] sm:$0xf] %vm1200_vm2, %v1499_v10  ;;  %1262 = vst.msk [vmem:[%s1862_s6 + $0xf4] sm:$0xf] %vm1200_vm2, %v1535_v12  ;;  %v707_v18 = vadd.f32 %v1849_v40, %v706_v15  ;;  %v1621_v19 = vpop.f32.mrb[30].mxu0  ;;  %v851_v20 = vadd.f32 %v1849_v40, %v850_v17  ;;  %v1657_v21 = vpop.f32.mrb[30].mxu1 }
 0x128   : > { %v894_v22 = vmax.f32 %v715_v14, 0.0  ;;  %v718_v23 = vadd.f32 %v1621_v19, %v1849_v40  ;;  %v709_v24 = vpop.f32.mrb[31].mxu0  ;;  %v930_v25 = vmax.f32 %v859_v16, 0.0  ;;  %v853_v26 = vpop.f32.mrb[31].mxu1 }
 0x129   : > { %v892_v27 = vmax.f32 %v707_v18, 0.0  ;;  %v710_v28 = vadd.f32 %v1849_v40, %v709_v24  ;;  %v928_v29 = vmax.f32 %v851_v20, 0.0  ;;  %v854_v30 = vadd.f32 %v1849_v40, %v853_v26 }
 0x12a   : > { %v1504_v31 = vpack.c.bf16 %v894_v22, %v894_v22  ;;  %v895_v32 = vmax.f32 %v718_v23, 0.0  ;;  %v1540_v33 = vpack.c.bf16 %v930_v25, %v930_v25 }
 0x12b   : > { %v1502_v34 = vpack.c.bf16 %v892_v27, %v892_v27  ;;  %v893_v35 = vmax.f32 %v710_v28, 0.0  ;;  %v1538_v36 = vpack.c.bf16 %v928_v29, %v928_v29  ;;  %v929_v37 = vmax.f32 %v854_v30, 0.0 }
 0x12c   : > { %1231 = vst.msk [vmem:[%s1862_s6 + $0x78] sm:$0xf] %vm1200_vm2, %v1504_v31  ;;  %v1505_v38 = vpack.c.bf16 %v895_v32, %v895_v32  ;;  %1267 = vst.msk [vmem:[%s1862_s6 + $0x108] sm:$0xf] %vm1200_vm2, %v1540_v33 }
 0x12d   : > { %1229 = vst.msk [vmem:[%s1862_s6 + $0x70] sm:$0xf] %vm1200_vm2, %v1502_v34  ;;  %v1503_v39 = vpack.c.bf16 %v893_v35, %v893_v35  ;;  %1265 = vst.msk [vmem:[%s1862_s6 + $0x100] sm:$0xf] %vm1200_vm2, %v1538_v36  ;;  %v1624_v41 = vpop.f32.mrb[32].mxu0  ;;  %v1539_v42 = vpack.c.bf16 %v929_v37, %v929_v37 }
 0x12e   : > { %1232 = vst.msk [vmem:[%s1862_s6 + $0x7c] sm:$0xf] %vm1200_vm2, %v1505_v38  ;;  %v731_v43 = vadd.f32 %v1624_v41, %v1849_v40  ;;  %v722_v44 = vpop.f32.mrb[33].mxu0 }
 0x12f   : > { %1230 = vst.msk [vmem:[%s1862_s6 + $0x74] sm:$0xf] %vm1200_vm2, %v1503_v39  ;;  %1266 = vst.msk [vmem:[%s1862_s6 + $0x104] sm:$0xf] %vm1200_vm2, %v1539_v42  ;;  %v723_v45 = vadd.f32 %v1849_v40, %v722_v44  ;;  %v1625_v46 = vpop.f32.mrb[34].mxu0 }
 0x130   : > { %v898_v47 = vmax.f32 %v731_v43, 0.0  ;;  %v734_v48 = vadd.f32 %v1625_v46, %v1849_v40  ;;  %v725_v49 = vpop.f32.mrb[35].mxu0 }
 0x131   : > { %v896_v50 = vmax.f32 %v723_v45, 0.0  ;;  %v726_v51 = vadd.f32 %v1849_v40, %v725_v49 }
 0x132   : > { %v1508_v52 = vpack.c.bf16 %v898_v47, %v898_v47  ;;  %v899_v53 = vmax.f32 %v734_v48, 0.0 }
 0x133   : > { %v1506_v54 = vpack.c.bf16 %v896_v50, %v896_v50  ;;  %v897_v55 = vmax.f32 %v726_v51, 0.0 }
 0x134   : > { %1235 = vst.msk [vmem:[%s1862_s6 + $0x88] sm:$0xf] %vm1200_vm2, %v1508_v52  ;;  %v1509_v56 = vpack.c.bf16 %v899_v53, %v899_v53 }
 0x135   : > { %1233 = vst.msk [vmem:[%s1862_s6 + $0x80] sm:$0xf] %vm1200_vm2, %v1506_v54  ;;  %v1507_v57 = vpack.c.bf16 %v897_v55, %v897_v55 }
 0x136   : > { %1236 = vst.msk [vmem:[%s1862_s6 + $0x8c] sm:$0xf] %vm1200_vm2, %v1509_v56 }
 0x137   : > { %1234 = vst.msk [vmem:[%s1862_s6 + $0x84] sm:$0xf] %vm1200_vm2, %v1507_v57 }
 0x138 PF: > { %s13_s12 = sadd.s32 1, %s1723_s12  }
 0x139   : > { %p10_p4 = scmp.ge.s32.totalorder %s13_s12, 4  }
 0x13b   :  { %12 = sbr.rel (!%p10_p4) target bundleno = 1 (0x1), region = 62 }

// kernel: forward.6
= control target key start
LH: loop header
LB: loop body
LE: loop exit
PB: predicated region body
PF: predicated region fallthrough
CT: control target
= control target key end

     0   :  { %s788_s12 = smov 0   ;;  %s917_s0 = inlined_call_operand.vmem [shape: bf16[256,144], index: 0, kind: input, shape index: {}]   ;;  %s918_s1 = inlined_call_operand.vmem [shape: bf16[144,32], index: 1, kind: input, shape index: {}]   ;;  %s919_s2 = inlined_call_operand.vmem [shape: f32[1,32], index: 2, kind: input, shape index: {}]   ;;  %s920_s3 = inlined_call_operand.vmem [shape: bf16[256,32], index: 3, kind: output, shape index: {}]  }
   0x1 LB: > { %s620_s13 = sadd.s32 4294967295, %s765_s12   ;;  %p624_p0 = scmp.ge.s32.totalorder %s765_s12, 1  ;;  %s765_s12 = sphi %s788_s12, %s13_s12  }
   0x2   : > { %p139_p1 = scmp.lt.s32.totalorder %s765_s12, 3 }
   0x4   : > { %p140_p2 = pnand %p624_p0, %p139_p1 }
   0x5   : > { %v726_v0 = vld [vmem:[%s918_s1] sm:$0xff] (!%p140_p2)   ;;  %v767_v1 = vmov (!%p140_p2), 0   ;;  %s625_s16 = sshll.u32 (!%p140_p2), %s620_s13, 4  ;;  %v727_v2 = vld [vmem:[%s918_s1 + $0x8] sm:$0xff] (!%p140_p2)   ;;  %v728_v3 = vld [vmem:[%s918_s1 + $0x10] sm:$0xff] (!%p140_p2)   ;;  %vm345_vm0 = vcmask (!%p140_p2), 130048  }
   0x6   : > { %143 = sbr.rel (%p140_p2) target bundleno = 287 (0x11f), region = 32  ;;  %370 = vmatprep.subr.bf16.mxu0 (!%p140_p2), %v767_v1  ;;  %699 = vmatprep.subr.bf16.mxu1 (!%p140_p2), %v767_v1  ;;  %p165_p3 = scmp.lt.s32.totalorder (!%p140_p2), %s625_s16, 31  ;;  %v729_v4 = vld [vmem:[%s918_s1 + $0x18] sm:$0xff] (!%p140_p2)   ;;  %v730_v7 = vld [vmem:[%s918_s1 + $0x20] sm:$0xff] (!%p140_p2)   ;;  %v731_v8 = vld [vmem:[%s918_s1 + $0x28] sm:$0xff] (!%p140_p2)   ;;  %vm547_vm1 = vcmask (!%p140_p2), 257024  }
   0x7   : > { %371 = vmatpush1.bf16.msra.mxu0 (!%p140_p2), %v726_v0  ;;  %708 = vmatpush1.bf16.msra.mxu1 (!%p140_p2), %v726_v0  ;;  %v732_v9 = vld [vmem:[%s918_s1 + $0x30] sm:$0xff] (!%p140_p2)   ;;  %v733_v10 = vld [vmem:[%s918_s1 + $0x38] sm:$0xff] (!%p140_p2)   ;;  %v734_v11 = vld [vmem:[%s918_s1 + $0x40] sm:$0xff] (!%p140_p2)  }
   0x8   : > { %372 = vmatprep.subr.bf16.mxu0 (!%p140_p2), %v767_v1  ;;  %700 = vmatprep.subr.bf16.mxu1 (!%p140_p2), %v767_v1  ;;  %v858_v26 = vld [vmem:[%s919_s2] ss:$0 sm:$0xff] (!%p140_p2) }
   0xb   : > { %373 = vmatpush1.bf16.msra.mxu0 (!%p140_p2), %v727_v2  ;;  %709 = vmatpush1.bf16.msra.mxu1 (!%p140_p2), %v727_v2 }
   0xc   : > { %374 = vmatprep.subr.bf16.mxu0 (!%p140_p2), %v767_v1  ;;  %701 = vmatprep.subr.bf16.mxu1 (!%p140_p2), %v767_v1 }
   0xd   : > { %s922_s16 = smov (!%p165_p3, %s625_s16), 31 }
   0xe   : > { %s682_s21 = sshll.u32 %s922_s16, 3  ;;  %s629_s13 = sshll.u32 %s922_s16, 2 }
   0xf   : > { %s811_s24 = scalar_lea.vmem %s917_s0, %s682_s21  ;;  %375 = vmatpush1.bf16.msra.mxu0 %v728_v3  ;;  %710 = vmatpush1.bf16.msra.mxu1 %v728_v3  ;;  %s868_s16 = scalar_lea.vmem %s920_s3, %s629_s13 }
  0x10   : > { %v737_v5 = vld [vmem:[%s811_s24 + $0x4] ss:$8 sps:$4 sm:$0xff]   ;;  %376 = vmatprep.subr.bf16.mxu0 %v767_v1  ;;  %702 = vmatprep.subr.bf16.mxu1 %v767_v1  ;;  %v735_v12 = vld [vmem:[%s811_s24] ss:$8 sps:$4 sm:$0xff]   ;;  %v741_v14 = vld [vmem:[%s811_s24 + $0x14] ss:$8 sps:$4 sm:$0xff]  }
  0x11   : > { %v740_v6 = vld [vmem:[%s811_s24 + $0x44] ss:$8 sps:$4 sm:$0xff]   ;;  %656 = vmatprep.mubr.msk.bf16.mxu0 %vm345_vm0, %v737_v5  ;;  %v738_v13 = vld [vmem:[%s811_s24 + $0x40] ss:$8 sps:$4 sm:$0xff]   ;;  %v743_v15 = vld [vmem:[%s811_s24 + $0x54] ss:$8 sps:$4 sm:$0xff]  }
  0x12   : > { %660 = vmatprep.mubr.msk.bf16.mxu1 %vm345_vm0, %v740_v6  ;;  %v745_v16 = vld [vmem:[%s811_s24 + $0x10] ss:$8 sps:$4 sm:$0xff]   ;;  %v747_v18 = vld [vmem:[%s811_s24 + $0x24] ss:$8 sps:$4 sm:$0xff]   ;;  %v751_v20 = vld [vmem:[%s811_s24 + $0x20] ss:$8 sps:$4 sm:$0xff]  }
  0x13   : > { %377 = vmatpush1.bf16.msra.mxu0 %v729_v4  ;;  %711 = vmatpush1.bf16.msra.mxu1 %v729_v4  ;;  %v746_v17 = vld [vmem:[%s811_s24 + $0x50] ss:$8 sps:$4 sm:$0xff]   ;;  %v749_v19 = vld [vmem:[%s811_s24 + $0x64] ss:$8 sps:$4 sm:$0xff]   ;;  %v752_v21 = vld [vmem:[%s811_s24 + $0x60] ss:$8 sps:$4 sm:$0xff]  }
  0x14   : > { %378 = vmatprep.subr.bf16.mxu0 %v767_v1  ;;  %703 = vmatprep.subr.bf16.mxu1 %v767_v1  ;;  %v753_v22 = vld [vmem:[%s811_s24 + $0x34] ss:$8 sps:$4 sm:$0xff]   ;;  %v757_v24 = vld [vmem:[%s811_s24 + $0x30] ss:$8 sps:$4 sm:$0xff]  }
  0x15   : > { %v755_v23 = vld [vmem:[%s811_s24 + $0x74] ss:$8 sps:$4 sm:$0xff]   ;;  %v758_v25 = vld [vmem:[%s811_s24 + $0x70] ss:$8 sps:$4 sm:$0xff]  }
  0x17   : > { %379 = vmatpush1.bf16.msra.mxu0 %v730_v7  ;;  %712 = vmatpush1.bf16.msra.mxu1 %v730_v7 }
  0x18   : > { %380 = vmatprep.subr.bf16.mxu0 %v767_v1  ;;  %704 = vmatprep.subr.bf16.mxu1 %v767_v1 }
  0x1b   : > { %381 = vmatpush1.bf16.msra.mxu0 %v731_v8  ;;  %713 = vmatpush1.bf16.msra.mxu1 %v731_v8 }
  0x1c   : > { %382 = vmatprep.subr.bf16.mxu0 %v767_v1  ;;  %705 = vmatprep.subr.bf16.mxu1 %v767_v1 }
  0x1f   : > { %383 = vmatpush1.bf16.msra.mxu0 %v732_v9  ;;  %714 = vmatpush1.bf16.msra.mxu1 %v732_v9 }
  0x20   : > { %384 = vmatprep.subr.bf16.mxu0 %v767_v1  ;;  %706 = vmatprep.subr.bf16.mxu1 %v767_v1 }
  0x23   : > { %385 = vmatpush1.bf16.msra.mxu0 %v733_v10  ;;  %715 = vmatpush1.bf16.msra.mxu1 %v733_v10 }
  0x24   : > { %386 = vmatprep.subr.bf16.mxu0 %v767_v1  ;;  %707 = vmatprep.subr.bf16.mxu1 %v767_v1 }
  0x27   : > { %387 = vmatpush1.bf16.msra.mxu0 %v734_v11  ;;  %716 = vmatpush1.bf16.msra.mxu1 %v734_v11 }
  0x2a   : > { %403 = vmatmul.mubr.bf16.vlgmr.msra.gmra.mrb[0].mxu0 %v735_v12  ;;  %435 = vmatmul.mubr.bf16.vlgmr.msra.gmra.mrb[0].mxu1 %v738_v13 }
  0x2b   : > { %657 = vmatprep.mubr.msk.bf16.mxu0 %vm345_vm0, %v741_v14  ;;  %661 = vmatprep.mubr.msk.bf16.mxu1 %vm345_vm0, %v743_v15 }
  0x32   : > { %411 = vmatmul.mubr.bf16.gmra.mrb[4].mxu0 %v745_v16  ;;  %443 = vmatmul.mubr.bf16.gmra.mrb[4].mxu1 %v746_v17 }
  0x33   : > { %658 = vmatprep.mubr.msk.bf16.mxu0 %vm345_vm0, %v747_v18  ;;  %662 = vmatprep.mubr.msk.bf16.mxu1 %vm345_vm0, %v749_v19 }
  0x3a   : > { %419 = vmatmul.mubr.bf16.gmra.mrb[8].mxu0 %v751_v20  ;;  %451 = vmatmul.mubr.bf16.gmra.mrb[8].mxu1 %v752_v21 }
  0x3b   : > { %659 = vmatprep.mubr.msk.bf16.mxu0 %vm345_vm0, %v753_v22  ;;  %663 = vmatprep.mubr.msk.bf16.mxu1 %vm345_vm0, %v755_v23 }
  0x42   : > { %427 = vmatmul.mubr.bf16.gmra.mrb[12].mxu0 %v757_v24  ;;  %459 = vmatmul.mubr.bf16.gmra.mrb[12].mxu1 %v758_v25 }
  0xfd   : > { %v404_v27 = vpop.f32.mrb[0].mxu0  ;;  %v436_v28 = vpop.f32.mrb[0].mxu1 }
  0xfe   : > { %v405_v29 = vadd.f32 %v858_v26, %v404_v27  ;;  %v437_v30 = vadd.f32 %v858_v26, %v436_v28  ;;  %v406_v31 = vpop.f32.mrb[1].mxu0  ;;  %v438_v32 = vpop.f32.mrb[1].mxu1 }
  0xff   : > { %v407_v33 = vpop.f32.mrb[2].mxu0  ;;  %v439_v34 = vpop.f32.mrb[2].mxu1 }
 0x100   : > { %v467_v35 = vmax.f32 %v405_v29, 0.0  ;;  %v475_v36 = vmax.f32 %v437_v30, 0.0  ;;  %v408_v37 = vadd.f32 %v858_v26, %v407_v33  ;;  %v440_v38 = vadd.f32 %v858_v26, %v439_v34  ;;  %v409_v39 = vpop.f32.mrb[3].mxu0  ;;  %v441_v40 = vpop.f32.mrb[3].mxu1 }
 0x102   : > { %v683_v41 = vpack.c.bf16 %v467_v35, %v467_v35  ;;  %v691_v42 = vpack.c.bf16 %v475_v36, %v475_v36  ;;  %v468_v43 = vmax.f32 %v408_v37, 0.0  ;;  %v476_v44 = vmax.f32 %v440_v38, 0.0 }
 0x104   : > { %548 = vst.msk [vmem:[%s868_s16] sm:$0xf] %vm547_vm1, %v683_v41  ;;  %556 = vst.msk [vmem:[%s868_s16 + $0x20] sm:$0xf] %vm547_vm1, %v691_v42  ;;  %v684_v45 = vpack.c.bf16 %v468_v43, %v468_v43  ;;  %v692_v46 = vpack.c.bf16 %v476_v44, %v476_v44 }
 0x105   : > { %v412_v47 = vpop.f32.mrb[4].mxu0  ;;  %v444_v48 = vpop.f32.mrb[4].mxu1 }
 0x106   : > { %549 = vst.msk [vmem:[%s868_s16 + $0x4] sm:$0xf] %vm547_vm1, %v684_v45  ;;  %557 = vst.msk [vmem:[%s868_s16 + $0x24] sm:$0xf] %vm547_vm1, %v692_v46  ;;  %v413_v49 = vadd.f32 %v858_v26, %v412_v47  ;;  %v445_v50 = vadd.f32 %v858_v26, %v444_v48  ;;  %v414_v51 = vpop.f32.mrb[5].mxu0  ;;  %v446_v52 = vpop.f32.mrb[5].mxu1 }
 0x107   : > { %v415_v53 = vpop.f32.mrb[6].mxu0  ;;  %v447_v54 = vpop.f32.mrb[6].mxu1 }
 0x108   : > { %v469_v55 = vmax.f32 %v413_v49, 0.0  ;;  %v477_v56 = vmax.f32 %v445_v50, 0.0  ;;  %v416_v57 = vadd.f32 %v858_v26, %v415_v53  ;;  %v448_v58 = vadd.f32 %v858_v26, %v447_v54  ;;  %v417_v59 = vpop.f32.mrb[7].mxu0  ;;  %v449_v60 = vpop.f32.mrb[7].mxu1 }
 0x10a   : > { %v685_v61 = vpack.c.bf16 %v469_v55, %v469_v55  ;;  %v693_v62 = vpack.c.bf16 %v477_v56, %v477_v56  ;;  %v470_v63 = vmax.f32 %v416_v57, 0.0  ;;  %v478_v0 = vmax.f32 %v448_v58, 0.0 }
 0x10c   : > { %550 = vst.msk [vmem:[%s868_s16 + $0x8] sm:$0xf] %vm547_vm1, %v685_v61  ;;  %558 = vst.msk [vmem:[%s868_s16 + $0x28] sm:$0xf] %vm547_vm1, %v693_v62  ;;  %v686_v1 = vpack.c.bf16 %v470_v63, %v470_v63  ;;  %v694_v2 = vpack.c.bf16 %v478_v0, %v478_v0 }
 0x10d   : > { %v420_v3 = vpop.f32.mrb[8].mxu0  ;;  %v452_v4 = vpop.f32.mrb[8].mxu1 }
 0x10e   : > { %551 = vst.msk [vmem:[%s868_s16 + $0xc] sm:$0xf] %vm547_vm1, %v686_v1  ;;  %559 = vst.msk [vmem:[%s868_s16 + $0x2c] sm:$0xf] %vm547_vm1, %v694_v2  ;;  %v421_v5 = vadd.f32 %v858_v26, %v420_v3  ;;  %v453_v6 = vadd.f32 %v858_v26, %v452_v4  ;;  %v422_v7 = vpop.f32.mrb[9].mxu0  ;;  %v454_v8 = vpop.f32.mrb[9].mxu1 }
 0x10f   : > { %v423_v9 = vpop.f32.mrb[10].mxu0  ;;  %v455_v10 = vpop.f32.mrb[10].mxu1 }
 0x110   : > { %v471_v11 = vmax.f32 %v421_v5, 0.0  ;;  %v479_v12 = vmax.f32 %v453_v6, 0.0  ;;  %v424_v13 = vadd.f32 %v858_v26, %v423_v9  ;;  %v456_v14 = vadd.f32 %v858_v26, %v455_v10  ;;  %v425_v15 = vpop.f32.mrb[11].mxu0  ;;  %v457_v16 = vpop.f32.mrb[11].mxu1 }
 0x112   : > { %v687_v17 = vpack.c.bf16 %v471_v11, %v471_v11  ;;  %v695_v18 = vpack.c.bf16 %v479_v12, %v479_v12  ;;  %v472_v19 = vmax.f32 %v424_v13, 0.0  ;;  %v480_v20 = vmax.f32 %v456_v14, 0.0 }
 0x114   : > { %552 = vst.msk [vmem:[%s868_s16 + $0x10] sm:$0xf] %vm547_vm1, %v687_v17  ;;  %560 = vst.msk [vmem:[%s868_s16 + $0x30] sm:$0xf] %vm547_vm1, %v695_v18  ;;  %v688_v21 = vpack.c.bf16 %v472_v19, %v472_v19  ;;  %v696_v22 = vpack.c.bf16 %v480_v20, %v480_v20 }
 0x115   : > { %v428_v23 = vpop.f32.mrb[12].mxu0  ;;  %v460_v24 = vpop.f32.mrb[12].mxu1 }
 0x116   : > { %553 = vst.msk [vmem:[%s868_s16 + $0x14] sm:$0xf] %vm547_vm1, %v688_v21  ;;  %561 = vst.msk [vmem:[%s868_s16 + $0x34] sm:$0xf] %vm547_vm1, %v696_v22  ;;  %v429_v25 = vadd.f32 %v858_v26, %v428_v23  ;;  %v461_v27 = vadd.f32 %v858_v26, %v460_v24  ;;  %v430_v28 = vpop.f32.mrb[13].mxu0  ;;  %v462_v29 = vpop.f32.mrb[13].mxu1 }
 0x117   : > { %v431_v30 = vpop.f32.mrb[14].mxu0  ;;  %v463_v31 = vpop.f32.mrb[14].mxu1 }
 0x118   : > { %v473_v32 = vmax.f32 %v429_v25, 0.0  ;;  %v481_v33 = vmax.f32 %v461_v27, 0.0  ;;  %v432_v34 = vadd.f32 %v858_v26, %v431_v30  ;;  %v464_v35 = vadd.f32 %v858_v26, %v463_v31  ;;  %v433_v36 = vpop.f32.mrb[15].mxu0  ;;  %v465_v37 = vpop.f32.mrb[15].mxu1 }
 0x11a   : > { %v689_v38 = vpack.c.bf16 %v473_v32, %v473_v32  ;;  %v697_v39 = vpack.c.bf16 %v481_v33, %v481_v33  ;;  %v474_v40 = vmax.f32 %v432_v34, 0.0  ;;  %v482_v41 = vmax.f32 %v464_v35, 0.0 }
 0x11c   : > { %554 = vst.msk [vmem:[%s868_s16 + $0x18] sm:$0xf] %vm547_vm1, %v689_v38  ;;  %562 = vst.msk [vmem:[%s868_s16 + $0x38] sm:$0xf] %vm547_vm1, %v697_v39  ;;  %v690_v42 = vpack.c.bf16 %v474_v40, %v474_v40  ;;  %v698_v43 = vpack.c.bf16 %v482_v41, %v482_v41 }
 0x11e   : > { %555 = vst.msk [vmem:[%s868_s16 + $0x1c] sm:$0xf] %vm547_vm1, %v690_v42  ;;  %563 = vst.msk [vmem:[%s868_s16 + $0x3c] sm:$0xf] %vm547_vm1, %v698_v43 }
 0x11f PF: > { %s13_s12 = sadd.s32 1, %s765_s12  }
 0x120   : > { %p10_p4 = scmp.ge.s32.totalorder %s13_s12, 4  }
 0x122   :  { %12 = sbr.rel (!%p10_p4) target bundleno = 1 (0x1), region = 62 }

// kernel: forward.7
= control target key start
LH: loop header
LB: loop body
LE: loop exit
PB: predicated region body
PF: predicated region fallthrough
CT: control target
= control target key end

     0   :  { %v4760_v1 = vmov 0   ;;  %v4761_v2 = vmov 0.0   ;;  %s4762_s21 = smov 64   ;;  %vm96_vm0 = vcmask 523264   ;;  %vm98_vm1 = vcmask 785408   ;;  %s6536_s0 = inlined_call_operand.vmem [shape: bf16[16,3872], index: 0, kind: input, shape index: {}]   ;;  %s6537_s1 = inlined_call_operand.vmem [shape: bf16[288,64], index: 1, kind: input, shape index: {}]   ;;  %s6538_s2 = inlined_call_operand.vmem [shape: f32[1,64], index: 2, kind: input, shape index: {}]   ;;  %s6539_s3 = inlined_call_operand.vmem [shape: bf16[576,128], index: 3, kind: input, shape index: {}]   ;;  %s6540_s5 = inlined_call_operand.vmem [shape: bf16[1152,256], index: 5, kind: input, shape index: {}]   ;;  %s6541_s4 = inlined_call_operand.vmem [shape: f32[1,128], index: 4, kind: input, shape index: {}]   ;;  %s6542_s7 = inlined_call_operand.vmem [shape: bf16[256,200], index: 7, kind: input, shape index: {}]   ;;  %s6543_s9 = inlined_call_operand.vmem [shape: bf16[200,7], index: 9, kind: input, shape index: {}]   ;;  %s6544_s6 = inlined_call_operand.vmem [shape: f32[1,256], index: 6, kind: input, shape index: {}]   ;;  %s6545_s8 = inlined_call_operand.vmem [shape: f32[1,200], index: 8, kind: input, shape index: {}]   ;;  %s6546_s10 = inlined_call_operand.vmem [shape: f32[1,7], index: 10, kind: input, shape index: {}]   ;;  %s6547_s11 = inlined_call_operand.vmem [shape: f32[16,128], index: 11, kind: output, shape index: {}]  }
   0x1   :  { %v4375_v0 = vld [vmem:[%s6536_s0 + $0xc] ss:$124 sps:$4 sm:$0xff]   ;;  %668 = vmatprep.subr.bf16.mxu0 %v4760_v1  ;;  %4205 = vmatprep.subr.bf16.mxu1 %v4761_v2  ;;  %v4832_v3 = vld [vmem:[%s6536_s0] ss:$124 sps:$4 sm:$0xff]   ;;  %v4843_v5 = vld [vmem:[%s6536_s0 + $0x18] ss:$124 sps:$4 sm:$0xff]  }
   0x2   :  { %114 = vrot.lane.b32.xlu0 %v4375_v0, %s4762_s21  ;;  %v4379_v4 = vld [vmem:[%s6536_s0 + $0x4] ss:$124 sps:$4 sm:$0xff]   ;;  %107 = vrot.lane.b32.xlu1 %v4832_v3, %s4762_s21  ;;  %v4848_v6 = vld [vmem:[%s6536_s0 + $0x14] ss:$124 sps:$4 sm:$0xff]   ;;  %vm4763_vm2 = vmmov 0   ;;  %vm94_vm3 = vcmask 261120  }
   0x3   :  { %v4851_v7 = vsel %vm98_vm1, %v4379_v4, %v4375_v0  ;;  %v4858_v8 = vld [vmem:[%s6536_s0 + $0x10] ss:$124 sps:$4 sm:$0xff]   ;;  %v104_v9 = vsel %vm96_vm0, %v4375_v0, %v4848_v6  ;;  %v4866_v10 = vld [vmem:[%s6536_s0 + $0x1c] ss:$124 sps:$4 sm:$0xff]   ;;  %v4873_v12 = vld [vmem:[%s6536_s0 + $0x8] ss:$124 sps:$4 sm:$0xff]   ;;  %4145 = vmatprep.mubr.msk.bf16.mxu1 %vm4763_vm2, %v4761_v2 }
   0x4   :  { %v105_v11 = vsel %vm98_vm1, %v104_v9, %v4848_v6  ;;  %v4397_v13 = vld [vmem:[%s6537_s1] sm:$0xff]   ;;  %v4400_v15 = vld [vmem:[%s6537_s1 + $0x8] sm:$0xff]   ;;  %v4894_v16 = vsel %vm98_vm1, %v4873_v12, %v4858_v8  ;;  %v4401_v18 = vld [vmem:[%s6537_s1 + $0x10] sm:$0xff]   ;;  %v100_v56 = vsel %vm98_vm1, %v4832_v3, %v4873_v12  ;;  %v140_v60 = vsel %vm96_vm0, %v4858_v8, %v4843_v5 }
   0x5   :  { %700 = vmatprep.mubr.bf16.mxu0 %v105_v11  ;;  %v4885_v14 = vld [vmem:[%s6536_s0 + $0x20] ss:$124 sps:$4 sm:$0xff]   ;;  %669 = vmatpush1.bf16.msra.mxu0 %v4397_v13  ;;  %v4901_v17 = vld [vmem:[%s6536_s0 + $0x2c] ss:$124 sps:$4 sm:$0xff]   ;;  %v4939_v23 = vld [vmem:[%s6536_s0 + $0x34] ss:$124 sps:$4 sm:$0xff]  }
   0x6   :  { %116 = vrot.lane.b32.xlu0 %v4843_v5, %s4762_s21  ;;  %112 = vrot.lane.b32.xlu1 %v4379_v4, %s4762_s21  ;;  %v4914_v19 = vld [vmem:[%s6536_s0 + $0x24] ss:$124 sps:$4 sm:$0xff]   ;;  %v4921_v20 = vld [vmem:[%s6536_s0 + $0x30] ss:$124 sps:$4 sm:$0xff]   ;;  %v141_v4 = vsel %vm98_vm1, %v140_v60, %v4843_v5  ;;  %v200_v60 = vsel %vm98_vm1, %v4843_v5, %v4885_v14  ;;  %vm3488_vm4 = vcmask 1043456   ;;  %vm3484_vm5 = vcmask 588800  }
   0x7   :  { %670 = vmatprep.subr.bf16.mxu0 %v4760_v1  ;;  %v4402_v21 = vld [vmem:[%s6537_s1 + $0x18] sm:$0xff]   ;;  %v4932_v22 = vld [vmem:[%s6536_s0 + $0x28] ss:$124 sps:$4 sm:$0xff]   ;;  %v204_v28 = vsel %vm96_vm0, %v4914_v19, %v4901_v17  ;;  %v4407_v31 = vld [vmem:[%s6537_s1 + $0x30] sm:$0xff]   ;;  %vm3553_vm6 = vcmask 7168   ;;  %vm3556_vm7 = vcmask 56320  }
   0x8   :  { %v4403_v24 = vld [vmem:[%s6537_s1 + $0x20] sm:$0xff]   ;;  %v4950_v25 = vld [vmem:[%s6536_s0 + $0x38] ss:$124 sps:$4 sm:$0xff]   ;;  %v4404_v27 = vld [vmem:[%s6537_s1 + $0x28] sm:$0xff]   ;;  %v4973_v30 = vsel %vm98_vm1, %v204_v28, %v4901_v17 }
   0x9   :  { %671 = vmatpush1.bf16.msra.mxu0 %v4400_v15  ;;  %v4957_v26 = vld [vmem:[%s6536_s0 + $0x44] ss:$124 sps:$4 sm:$0xff]   ;;  %v4968_v29 = vld [vmem:[%s6536_s0 + $0x3c] ss:$124 sps:$4 sm:$0xff]   ;;  %v4996_v34 = vld [vmem:[%s6536_s0 + $0x4c] ss:$124 sps:$4 sm:$0xff]  }
   0xa   :  { %145 = vrot.lane.b32.xlu0 %v4858_v8, %s4762_s21  ;;  %147 = vrot.lane.b32.xlu1 %v4866_v10, %s4762_s21  ;;  %v4985_v32 = vld [vmem:[%s6536_s0 + $0x48] ss:$124 sps:$4 sm:$0xff]   ;;  %v5003_v35 = vld [vmem:[%s6536_s0 + $0x58] ss:$124 sps:$4 sm:$0xff]  }
   0xb   :  { %672 = vmatprep.subr.bf16.mxu0 %v4760_v1  ;;  %v4427_v33 = vld [vmem:[%s6537_s1 + $0x80] sm:$0xff]   ;;  %v4410_v36 = vld [vmem:[%s6537_s1 + $0x38] sm:$0xff]   ;;  %v5022_v38 = vld [vmem:[%s6536_s0 + $0x50] ss:$124 sps:$4 sm:$0xff]  }
   0xc   :  { %4207 = vmatpush3.bf16.msra.mxu1 %v4427_v33  ;;  %v5015_v37 = vld [vmem:[%s6536_s0 + $0x40] ss:$124 sps:$4 sm:$0xff]   ;;  %v5040_v41 = vld [vmem:[%s6536_s0 + $0x54] ss:$124 sps:$4 sm:$0xff]   ;;  %v4419_v42 = vld [vmem:[%s6537_s1 + $0x48] sm:$0xff]  }
   0xd   :  { %673 = vmatpush1.bf16.msra.mxu0 %v4401_v18  ;;  %4206 = vmatprep.subr.bf16.mxu1 %v4761_v2  ;;  %v4415_v39 = vld [vmem:[%s6537_s1 + $0x40] sm:$0xff]   ;;  %v5031_v40 = vld [vmem:[%s6536_s0 + $0x5c] ss:$124 sps:$4 sm:$0xff]   ;;  %v4420_v45 = vld [vmem:[%s6537_s1 + $0x50] sm:$0xff]   ;;  %v264_v52 = vsel %vm96_vm0, %v4950_v25, %v5015_v37 }
   0xe   :  { %143 = vrot.lane.b32.xlu0 %v4873_v12, %s4762_s21  ;;  %172 = vrot.lane.b32.xlu1 %v4885_v14, %s4762_s21  ;;  %v5051_v43 = vld [vmem:[%s6536_s0 + $0x60] ss:$124 sps:$4 sm:$0xff]   ;;  %v5069_v46 = vld [vmem:[%s6536_s0 + $0x70] ss:$124 sps:$4 sm:$0xff]   ;;  %v5106_v53 = vsel %vm98_vm1, %v264_v52, %v5015_v37 }
   0xf   :  { %674 = vmatprep.subr.bf16.mxu0 %v4760_v1  ;;  %v5058_v44 = vld [vmem:[%s6536_s0 + $0x64] ss:$124 sps:$4 sm:$0xff]   ;;  %v4421_v48 = vld [vmem:[%s6537_s1 + $0x58] sm:$0xff]   ;;  %v5087_v49 = vld [vmem:[%s6536_s0 + $0x74] ss:$124 sps:$4 sm:$0xff]  }
  0x10   :  { %v5076_v47 = vld [vmem:[%s6536_s0 + $0x68] ss:$124 sps:$4 sm:$0xff]   ;;  %v4425_v54 = vld [vmem:[%s6537_s1 + $0x70] sm:$0xff]   ;;  %v4426_v55 = vld [vmem:[%s6537_s1 + $0x78] sm:$0xff]  }
  0x11   :  { %675 = vmatpush1.bf16.msra.mxu0 %v4402_v21  ;;  %v4422_v50 = vld [vmem:[%s6537_s1 + $0x60] sm:$0xff]   ;;  %v4424_v51 = vld [vmem:[%s6537_s1 + $0x68] sm:$0xff]   ;;  %v167_v21 = vsel %vm96_vm0, %v4848_v6, %v4866_v10 }
  0x12   :  { %179 = vrot.lane.b32.xlu0 %v4901_v17, %s4762_s21  ;;  %170 = vrot.lane.b32.xlu1 %v4848_v6, %s4762_s21  ;;  %v4437_v57 = vld [vmem:[%s6537_s1 + $0x88] sm:$0xff]  }
  0x13   :  { %676 = vmatprep.subr.bf16.mxu0 %v4760_v1  ;;  %4208 = vmatpush3.bf16.msra.mxu1 %v4437_v57 }
  0x15   :  { %677 = vmatpush1.bf16.msra.mxu0 %v4403_v24 }
  0x16   :  { %207 = vrot.lane.b32.xlu0 %v4914_v19, %s4762_s21  ;;  %209 = vrot.lane.b32.xlu1 %v4921_v20, %s4762_s21 }
  0x17   :  { %678 = vmatprep.subr.bf16.mxu0 %v4760_v1 }
  0x19   :  { %679 = vmatpush1.bf16.msra.mxu0 %v4404_v27 }
  0x1a   :  { %233 = vrot.lane.b32.xlu0 %v4932_v22, %s4762_s21  ;;  %235 = vrot.lane.b32.xlu1 %v4939_v23, %s4762_s21 }
  0x1b   :  { %680 = vmatprep.subr.bf16.mxu0 %v4760_v1 }
  0x1d   :  { %681 = vmatpush1.bf16.msra.mxu0 %v4407_v31  ;;  %v168_v31 = vsel %vm98_vm1, %v167_v21, %v4866_v10  ;;  %v4438_v21 = vld [vmem:[%s6536_s0 + $0x78] ss:$124 sps:$4 sm:$0xff]  }
  0x1e   :  { %267 = vrot.lane.b32.xlu0 %v4950_v25, %s4762_s21  ;;  %269 = vrot.lane.b32.xlu1 %v4957_v26, %s4762_s21 }
  0x1f   :  { %682 = vmatprep.subr.bf16.mxu0 %v4760_v1 }
  0x21   :  { %683 = vmatpush1.bf16.msra.mxu0 %v4410_v36 }
  0x22   :  { %295 = vrot.lane.b32.xlu0 %v4968_v29, %s4762_s21  ;;  %297 = vrot.lane.b32.xlu1 %v4985_v32, %s4762_s21 }
  0x23   :  { %684 = vmatprep.subr.bf16.mxu0 %v4760_v1 }
  0x25   :  { %685 = vmatpush1.bf16.msra.mxu0 %v4415_v39 }
  0x26   :  { %319 = vrot.lane.b32.xlu0 %v4996_v34, %s4762_s21  ;;  %326 = vrot.lane.b32.xlu1 %v5003_v35, %s4762_s21 }
  0x27   :  { %686 = vmatprep.subr.bf16.mxu0 %v4760_v1 }
  0x29   :  { %687 = vmatpush1.bf16.msra.mxu0 %v4419_v42 }
  0x2a   :  { %317 = vrot.lane.b32.xlu0 %v5015_v37, %s4762_s21  ;;  %354 = vrot.lane.b32.xlu1 %v5022_v38, %s4762_s21 }
  0x2b   :  { %688 = vmatprep.subr.bf16.mxu0 %v4760_v1 }
  0x2d   :  { %689 = vmatpush1.bf16.msra.mxu0 %v4420_v45 }
  0x2e   :  { %356 = vrot.lane.b32.xlu0 %v5031_v40, %s4762_s21  ;;  %382 = vrot.lane.b32.xlu1 %v5040_v41, %s4762_s21 }
  0x2f   :  { %690 = vmatprep.subr.bf16.mxu0 %v4760_v1 }
  0x31   :  { %691 = vmatpush1.bf16.msra.mxu0 %v4421_v48 }
  0x32   :  { %384 = vrot.lane.b32.xlu0 %v5051_v43, %s4762_s21  ;;  %416 = vrot.lane.b32.xlu1 %v5058_v44, %s4762_s21 }
  0x33   :  { %692 = vmatprep.subr.bf16.mxu0 %v4760_v1 }
  0x35   :  { %693 = vmatpush1.bf16.msra.mxu0 %v4422_v50 }
  0x36   :  { %418 = vrot.lane.b32.xlu0 %v5069_v46, %s4762_s21  ;;  %442 = vrot.lane.b32.xlu1 %v5076_v47, %s4762_s21 }
  0x37   :  { %694 = vmatprep.subr.bf16.mxu0 %v4760_v1 }
  0x39   :  { %695 = vmatpush1.bf16.msra.mxu0 %v4424_v51 }
  0x3a   :  { %444 = vrot.lane.b32.xlu0 %v5087_v49, %s4762_s21  ;;  %696 = vmatprep.subr.bf16.mxu0 %v4760_v1 }
  0x3d   :  { %697 = vmatpush1.bf16.msra.mxu0 %v4425_v54 }
  0x3e   :  { %698 = vmatprep.subr.bf16.mxu0 %v4760_v1 }
  0x41   :  { %699 = vmatpush1.bf16.msra.mxu0 %v4426_v55 }
  0x42   :  { %4057 = vmatprep.subr.bf16.mxu0 %v4761_v2 }
  0x44   :  { %701 = vmatmul.mubr.bf16.vlgmr.msra.gmra.mrb[0].mxu0 %v100_v56 }
  0x45   :  { %4058 = vmatpush3.bf16.msra.mxu0 %v4427_v33 }
  0x46   :  { %4059 = vmatprep.subr.bf16.mxu0 %v4761_v2 }
  0x49   :  { %4060 = vmatpush3.bf16.msra.mxu0 %v4437_v57 }
  0x74   :  { %v115_v58 = vpop.permute.xlu0 %114  ;;  %v108_v59 = vpop.permute.xlu1 %107 }
  0x78   :  { %v5127_v61 = vpop.permute.xlu0 %116  ;;  %v113_v62 = vpop.permute.xlu1 %112 }
  0x79   :  { %v125_v63 = vsel %vm96_vm0, %v115_v58, %v5127_v61  ;;  %v120_v0 = vsel %vm96_vm0, %v108_v59, %v113_v62 }
  0x7a   :  { %v126_v3 = vsel %vm98_vm1, %v125_v63, %v5127_v61  ;;  %v122_v9 = vsel %vm98_vm1, %v120_v0, %v115_v58  ;;  %v230_v63 = vsel %vm96_vm0, %v4932_v22, %v4921_v20 }
  0x7b   :  { %708 = vmatprep.mubr.bf16.mxu0 %v126_v3 }
  0x7c   :  { %v146_v11 = vpop.permute.xlu0 %145  ;;  %709 = vmatmul.mubr.bf16.gmra.mrb[4].mxu0 %v122_v9  ;;  %v5137_v8 = vpop.permute.xlu1 %147 }
  0x7d   :  { %716 = vmatprep.mubr.bf16.mxu0 %v141_v4  ;;  %v155_v12 = vsel %vm96_vm0, %v146_v11, %v5137_v8  ;;  %v211_v3 = vsel %vm96_vm0, %v5127_v61, %v5137_v8  ;;  %v231_v4 = vsel %vm98_vm1, %v230_v63, %v4921_v20 }
  0x7e   :  { %v156_v15 = vsel %vm98_vm1, %v155_v12, %v5137_v8 }
  0x80   :  { %v144_v13 = vpop.permute.xlu0 %143  ;;  %v173_v28 = vpop.permute.xlu1 %172 }
  0x81   :  { %v150_v24 = vsel %vm96_vm0, %v113_v62, %v144_v13 }
  0x82   :  { %v152_v33 = vsel %vm98_vm1, %v150_v24, %v146_v11  ;;  %v226_v11 = vsel %vm98_vm1, %v4866_v10, %v4914_v19 }
  0x84   :  { %v5143_v18 = vpop.permute.xlu0 %179  ;;  %717 = vmatmul.mubr.bf16.gmra.mrb[8].mxu0 %v4851_v7  ;;  %v171_v39 = vpop.permute.xlu1 %170 }
  0x85   :  { %724 = vmatprep.mubr.bf16.mxu0 %v156_v15  ;;  %v187_v7 = vsel %vm96_vm0, %v173_v28, %v5143_v18  ;;  %v182_v50 = vsel %vm96_vm0, %v171_v39, %v5127_v61  ;;  %v237_v15 = vsel %vm96_vm0, %v5137_v8, %v173_v28  ;;  %v288_v39 = vsel %vm98_vm1, %v4921_v20, %v4950_v25 }
  0x86   :  { %v188_v6 = vsel %vm98_vm1, %v187_v7, %v5143_v18  ;;  %v184_v54 = vsel %vm98_vm1, %v182_v50, %v173_v28 }
  0x88   :  { %v208_v27 = vpop.permute.xlu0 %207  ;;  %v5158_v45 = vpop.permute.xlu1 %209 }
  0x89   :  { %v216_v58 = vsel %vm96_vm0, %v208_v27, %v5158_v45  ;;  %v213_v9 = vsel %vm98_vm1, %v211_v3, %v208_v27  ;;  %v260_v27 = vsel %vm98_vm1, %v4901_v17, %v4939_v23 }
  0x8a   :  { %v217_v62 = vsel %vm98_vm1, %v216_v58, %v5158_v45 }
  0x8c   :  { %v234_v36 = vpop.permute.xlu0 %233  ;;  %725 = vmatmul.mubr.bf16.gmra.mrb[12].mxu0 %v152_v33  ;;  %v5166_v51 = vpop.permute.xlu1 %235 }
  0x8d   :  { %732 = vmatprep.mubr.bf16.mxu0 %v168_v31  ;;  %v242_v22 = vsel %vm96_vm0, %v234_v36, %v5166_v51  ;;  %v239_v19 = vsel %vm98_vm1, %v237_v15, %v234_v36  ;;  %v271_v31 = vsel %vm96_vm0, %v5143_v18, %v5158_v45  ;;  %v299_v50 = vsel %vm96_vm0, %v5158_v45, %v5166_v51 }
  0x8e   :  { %v243_v12 = vsel %vm98_vm1, %v242_v22, %v5166_v51  ;;  %v375_v15 = vsel %vm98_vm1, %v4985_v32, %v5022_v38 }
  0x90   :  { %v268_v42 = vpop.permute.xlu0 %267 }
  0x91   :  { %v273_v17 = vsel %vm98_vm1, %v271_v31, %v268_v42  ;;  %v409_v31 = vsel %vm98_vm1, %v5003_v35, %v5051_v43 }
  0x94   :  { %733 = vmatmul.mubr.bf16.gmra.mrb[16].mxu0 %v4894_v16  ;;  %v5160_v48 = vpop.permute.xlu0 %295  ;;  %v5171_v16 = vpop.permute.xlu1 %269 }
  0x95   :  { %740 = vmatprep.mubr.bf16.mxu0 %v188_v6  ;;  %v276_v24 = vsel %vm96_vm0, %v268_v42, %v5171_v16  ;;  %v314_v42 = vsel %vm96_vm0, %v5015_v37, %v4985_v32  ;;  %v311_v37 = vsel %vm98_vm1, %v4939_v23, %v4968_v29 }
  0x96   :  { %v277_v28 = vsel %vm98_vm1, %v276_v24, %v5171_v16 }
  0x98   :  { %v5168_v52 = vpop.permute.xlu0 %319  ;;  %v5247_v36 = vpop.permute.xlu1 %297 }
  0x99   :  { %v304_v7 = vsel %vm96_vm0, %v5160_v48, %v5247_v36  ;;  %v386_v24 = vsel %vm96_vm0, %v5247_v36, %v5168_v52 }
  0x9a   :  { %v305_v6 = vsel %vm98_vm1, %v304_v7, %v5247_v36 }
  0x9c   :  { %741 = vmatmul.mubr.bf16.gmra.mrb[20].mxu0 %v184_v54  ;;  %v318_v55 = vpop.permute.xlu0 %317  ;;  %v315_v54 = vsel %vm98_vm1, %v314_v42, %v4985_v32  ;;  %v5267_v25 = vpop.permute.xlu1 %326 }
  0x9d   :  { %748 = vmatprep.mubr.bf16.mxu0 %v4973_v30  ;;  %v329_v56 = vsel %vm96_vm0, %v318_v55, %v5171_v16  ;;  %v301_v55 = vsel %vm98_vm1, %v299_v50, %v5160_v48  ;;  %v351_v48 = vsel %vm96_vm0, %v5022_v38, %v5003_v35 }
  0x9e   :  { %v5178_v57 = vsel %vm98_vm1, %v329_v56, %v5168_v52  ;;  %v334_v56 = vsel %vm96_vm0, %v5168_v52, %v5267_v25  ;;  %v439_v52 = vsel %vm96_vm0, %v5076_v47, %v5069_v46 }
  0x9f   :  { %v335_v58 = vsel %vm98_vm1, %v334_v56, %v5267_v25  ;;  %v440_v7 = vsel %vm98_vm1, %v439_v52, %v5069_v46 }
  0xa0   :  { %v5182_v59 = vpop.permute.xlu0 %356 }
  0xa4   :  { %749 = vmatmul.mubr.bf16.gmra.mrb[24].mxu0 %v200_v60  ;;  %v5189_v30 = vpop.permute.xlu0 %384  ;;  %v352_v60 = vsel %vm98_vm1, %v351_v48, %v5003_v35 }
  0xa5   :  { %756 = vmatprep.mubr.bf16.mxu0 %v217_v62  ;;  %v355_v62 = vpop.permute.xlu1 %354 }
  0xa6   :  { %v363_v63 = vsel %vm96_vm0, %v355_v62, %v5182_v59 }
  0xa7   :  { %v364_v3 = vsel %vm98_vm1, %v363_v63, %v5182_v59 }
  0xa8   :  { %v5194_v0 = vpop.permute.xlu0 %418 }
  0xa9   :  { %4146 = vmatmul.mubr.msk.bf16.vlgmr.msra.gmra.mrb[0].mxu1 %vm94_vm3, %v5194_v0 }
  0xaa   :  { %4149 = vmatprep.mubr.msk.bf16.mxu1 %vm4763_vm2, %v4761_v2 }
  0xac   :  { %757 = vmatmul.mubr.bf16.gmra.mrb[28].mxu0 %v213_v9  ;;  %v5217_v13 = vpop.permute.xlu0 %444 }
  0xad   :  { %764 = vmatprep.mubr.bf16.mxu0 %v231_v4  ;;  %v379_v4 = vsel %vm96_vm0, %v5040_v41, %v5031_v40 }
  0xae   :  { %v380_v9 = vsel %vm98_vm1, %v379_v4, %v5031_v40 }
  0xb1   :  { %4150 = vmatmul.mubr.msk.bf16.gmra.mrb[4].mxu1 %vm94_vm3, %v5087_v49 }
  0xb2   :  { %4153 = vmatprep.mubr.msk.bf16.mxu1 %vm4763_vm2, %v4761_v2 }
  0xb4   :  { %765 = vmatmul.mubr.bf16.gmra.mrb[32].mxu0 %v226_v11  ;;  %v383_v11 = vpop.permute.xlu1 %382 }
  0xb5   :  { %772 = vmatprep.mubr.bf16.mxu0 %v243_v12  ;;  %v391_v12 = vsel %vm96_vm0, %v383_v11, %v5189_v30  ;;  %v388_v38 = vsel %vm98_vm1, %v386_v24, %v383_v11 }
  0xb6   :  { %v392_v41 = vsel %vm98_vm1, %v391_v12, %v5189_v30 }
  0xb9   :  { %4154 = vmatmul.mubr.msk.bf16.gmra.mrb[8].mxu1 %vm94_vm3, %v5217_v13 }
  0xba   :  { %4157 = vmatprep.mubr.msk.bf16.mxu1 %vm4763_vm2, %v4761_v2 }
  0xbc   :  { %773 = vmatmul.mubr.bf16.gmra.mrb[36].mxu0 %v239_v19  ;;  %v4431_v19 = vld [vmem:[%s6536_s0 + $0x6c] ss:$124 sps:$4 sm:$0xff]  }
  0xbd   :  { %780 = vmatprep.mubr.bf16.mxu0 %v5106_v53  ;;  %v292_v53 = vsel %vm96_vm0, %v4968_v29, %v4957_v26  ;;  %v347_v29 = vsel %vm98_vm1, %v4957_v26, %v4996_v34  ;;  %v463_v50 = vsel %vm96_vm0, %v4431_v19, %v5087_v49 }
  0xbe   :  { %v293_v33 = vsel %vm98_vm1, %v292_v53, %v4957_v26 }
  0xc1   :  { %4158 = vmatmul.mubr.msk.bf16.gmra.mrb[12].mxu1 %vm94_vm3, %v4438_v21  ;;  %v413_v21 = vsel %vm96_vm0, %v5058_v44, %v4431_v19 }
  0xc4   :  { %781 = vmatmul.mubr.bf16.gmra.mrb[40].mxu0 %v260_v27  ;;  %v414_v27 = vsel %vm98_vm1, %v413_v21, %v4431_v19 }
  0xc5   :  { %788 = vmatprep.mubr.bf16.mxu0 %v277_v28  ;;  %v417_v28 = vpop.permute.xlu1 %416 }
  0xc6   :  { %v425_v53 = vsel %vm96_vm0, %v417_v28, %v5194_v0 }
  0xc9   :  { %v443_v35 = vpop.permute.xlu1 %442 }
  0xcc   :  { %789 = vmatmul.mubr.bf16.gmra.mrb[44].mxu0 %v273_v17  ;;  %v420_v17 = vsel %vm96_vm0, %v5267_v25, %v5182_v59 }
  0xcd   :  { %796 = vmatprep.mubr.bf16.mxu0 %v293_v33  ;;  %v426_v33 = vsel %vm98_vm1, %v425_v53, %v5194_v0  ;;  %v451_v0 = vsel %vm96_vm0, %v443_v35, %v5217_v13 }
  0xce   :  { %v452_v42 = vsel %vm98_vm1, %v451_v0, %v5217_v13 }
  0xd4   :  { %797 = vmatmul.mubr.bf16.gmra.mrb[48].mxu0 %v288_v39  ;;  %v422_v39 = vsel %vm98_vm1, %v420_v17, %v417_v28 }
  0xd5   :  { %804 = vmatprep.mubr.bf16.mxu0 %v305_v6  ;;  %v435_v6 = vsel %vm98_vm1, %v5031_v40, %v5058_v44  ;;  %v460_v44 = vsel %vm98_vm1, %v5051_v43, %v5076_v47 }
  0xdc   :  { %805 = vmatmul.mubr.bf16.gmra.mrb[52].mxu0 %v301_v55  ;;  %v464_v55 = vsel %vm98_vm1, %v463_v50, %v5087_v49 }
  0xdd   :  { %812 = vmatprep.mubr.bf16.mxu0 %v315_v54  ;;  %v446_v54 = vsel %vm96_vm0, %v5182_v59, %v5189_v30 }
  0xde   :  { %v448_v56 = vsel %vm98_vm1, %v446_v54, %v443_v35 }
  0xe4   :  { %813 = vmatmul.mubr.bf16.gmra.mrb[56].mxu0 %v311_v37 }
  0xe5   :  { %820 = vmatprep.mubr.bf16.mxu0 %v335_v58 }
  0xec   :  { %821 = vmatmul.mubr.bf16.gmra.mrb[60].mxu0 %v5178_v57  ;;  %v358_v57 = vsel %vm96_vm0, %v5171_v16, %v5247_v36 }
  0xed   :  { %828 = vmatprep.mubr.bf16.mxu0 %v352_v60  ;;  %v360_v22 = vsel %vm98_vm1, %v358_v57, %v355_v62 }
  0xf4   :  { %829 = vmatmul.mubr.bf16.gmra.mrb[64].mxu0 %v347_v29 }
  0xf5   :  { %836 = vmatprep.mubr.bf16.mxu0 %v364_v3 }
  0xfc   :  { %837 = vmatmul.mubr.bf16.gmra.mrb[68].mxu0 %v360_v22 }
  0xfd   :  { %844 = vmatprep.mubr.bf16.mxu0 %v380_v9 }
 0x104   :  { %845 = vmatmul.mubr.bf16.gmra.mrb[72].mxu0 %v375_v15 }
 0x105   :  { %852 = vmatprep.mubr.bf16.mxu0 %v392_v41 }
 0x10c   :  { %853 = vmatmul.mubr.bf16.gmra.mrb[76].mxu0 %v388_v38 }
 0x10d   :  { %860 = vmatprep.mubr.bf16.mxu0 %v414_v27 }
 0x114   :  { %861 = vmatmul.mubr.bf16.gmra.mrb[80].mxu0 %v409_v31 }
 0x115   :  { %868 = vmatprep.mubr.bf16.mxu0 %v426_v33 }
 0x11c   :  { %869 = vmatmul.mubr.bf16.gmra.mrb[84].mxu0 %v422_v39 }
 0x11d   :  { %876 = vmatprep.mubr.bf16.mxu0 %v440_v7 }
 0x124   :  { %877 = vmatmul.mubr.bf16.gmra.mrb[88].mxu0 %v435_v6 }
 0x125   :  { %884 = vmatprep.mubr.bf16.mxu0 %v452_v42 }
 0x12c   :  { %885 = vmatmul.mubr.bf16.gmra.mrb[92].mxu0 %v448_v56 }
 0x12d   :  { %892 = vmatprep.mubr.bf16.mxu0 %v464_v55 }
 0x134   :  { %893 = vmatmul.mubr.bf16.gmra.mrb[96].mxu0 %v460_v44 }
 0x135   :  { %4061 = vmatprep.mubr.msk.bf16.mxu0 %vm4763_vm2, %v4761_v2 }
 0x13c   :  { %4062 = vmatmul.mubr.msk.bf16.vlgmr.msra.gmra.mrb[0].mxu0 %vm94_vm3, %v4843_v5 }
 0x13d   :  { %4065 = vmatprep.mubr.msk.bf16.mxu0 %vm4763_vm2, %v4761_v2 }
 0x144   :  { %4066 = vmatmul.mubr.msk.bf16.gmra.mrb[4].mxu0 %vm94_vm3, %v5127_v61 }
 0x145   :  { %4069 = vmatprep.mubr.msk.bf16.mxu0 %vm4763_vm2, %v4761_v2 }
 0x14c   :  { %4070 = vmatmul.mubr.msk.bf16.gmra.mrb[8].mxu0 %vm94_vm3, %v4866_v10 }
 0x14d   :  { %4073 = vmatprep.mubr.msk.bf16.mxu0 %vm4763_vm2, %v4761_v2 }
 0x154   :  { %4074 = vmatmul.mubr.msk.bf16.gmra.mrb[12].mxu0 %vm94_vm3, %v5137_v8 }
 0x155   :  { %4077 = vmatprep.mubr.msk.bf16.mxu0 %vm4763_vm2, %v4761_v2 }
 0x15c   :  { %4078 = vmatmul.mubr.msk.bf16.gmra.mrb[16].mxu0 %vm94_vm3, %v4885_v14 }
 0x15d   :  { %4081 = vmatprep.mubr.msk.bf16.mxu0 %vm4763_vm2, %v4761_v2 }
 0x164   :  { %4082 = vmatmul.mubr.msk.bf16.gmra.mrb[20].mxu0 %vm94_vm3, %v5143_v18 }
 0x165   :  { %4085 = vmatprep.mubr.msk.bf16.mxu0 %vm4763_vm2, %v4761_v2 }
 0x16c   :  { %4086 = vmatmul.mubr.msk.bf16.gmra.mrb[24].mxu0 %vm94_vm3, %v4921_v20 }
 0x16d   :  { %4089 = vmatprep.mubr.msk.bf16.mxu0 %vm4763_vm2, %v4761_v2 }
 0x174   :  { %4090 = vmatmul.mubr.msk.bf16.gmra.mrb[28].mxu0 %vm94_vm3, %v5158_v45 }
 0x175   :  { %4093 = vmatprep.mubr.msk.bf16.mxu0 %vm4763_vm2, %v4761_v2 }
 0x17c   :  { %4094 = vmatmul.mubr.msk.bf16.gmra.mrb[32].mxu0 %vm94_vm3, %v4939_v23  ;;  %v1103_v5 = vpop.f32.mrb[0].mxu1 }
 0x17d   :  { %4097 = vmatprep.mubr.msk.bf16.mxu0 %vm4763_vm2, %v4761_v2  ;;  %v4147_v10 = vpop.f32.mrb[1].mxu1 }
 0x17e   :  { %v1106_v14 = vpop.f32.mrb[2].mxu1 }
 0x17f   :  { %v4148_v47 = vpop.f32.mrb[3].mxu1 }
 0x184   :  { %4098 = vmatmul.mubr.msk.bf16.gmra.mrb[36].mxu0 %vm94_vm3, %v5166_v51  ;;  %v1111_v20 = vpop.f32.mrb[4].mxu1 }
 0x185   :  { %4101 = vmatprep.mubr.msk.bf16.mxu0 %vm4763_vm2, %v4761_v2  ;;  %v4151_v49 = vpop.f32.mrb[5].mxu1 }
 0x186   :  { %v1114_v61 = vpop.f32.mrb[6].mxu1 }
 0x187   :  { %v4152_v8 = vpop.f32.mrb[7].mxu1 }
 0x188   :  { %v4439_v8 = vld [vmem:[%s6539_s3 + $0x40] sm:$0xff]  }
 0x189   :  { %3904 = vmatprep.subr.bf16.mxu1 %v4439_v8 }
 0x18c   :  { %4102 = vmatmul.mubr.msk.bf16.gmra.mrb[40].mxu0 %vm94_vm3, %v4957_v26  ;;  %v1119_v23 = vpop.f32.mrb[8].mxu1  ;;  %v5437_v26 = vld [vmem:[%s6538_s2] ss:$0 sm:$0xff] }
 0x18d   :  { %4105 = vmatprep.mubr.msk.bf16.mxu0 %vm4763_vm2, %v4761_v2  ;;  %v4155_v18 = vpop.f32.mrb[9].mxu1 }
 0x18e   :  { %v1122_v45 = vpop.f32.mrb[10].mxu1 }
 0x18f   :  { %v4156_v13 = vpop.f32.mrb[11].mxu1 }
 0x194   :  { %4106 = vmatmul.mubr.msk.bf16.gmra.mrb[44].mxu0 %vm94_vm3, %v5171_v16  ;;  %v1127_v51 = vpop.f32.mrb[12].mxu1 }
 0x195   :  { %4109 = vmatprep.mubr.msk.bf16.mxu0 %vm4763_vm2, %v4761_v2  ;;  %v4159_v37 = vpop.f32.mrb[13].mxu1 }
 0x196   :  { %v1130_v58 = vpop.f32.mrb[14].mxu1  ;;  %v4441_v37 = vld [vmem:[%s6539_s3 + $0x48] sm:$0xff]  }
 0x197   :  { %v4160_v48 = vpop.f32.mrb[15].mxu1 }
 0x198   :  { %v4442_v48 = vld [vmem:[%s6539_s3 + $0x8] sm:$0xff]  }
 0x19c   :  { %4110 = vmatmul.mubr.msk.bf16.gmra.mrb[48].mxu0 %vm94_vm3, %v4985_v32 }
 0x19d   :  { %4113 = vmatprep.mubr.msk.bf16.mxu0 %vm4763_vm2, %v4761_v2 }
 0x1a4   :  { %4114 = vmatmul.mubr.msk.bf16.gmra.mrb[52].mxu0 %vm94_vm3, %v5247_v36 }
 0x1a5   :  { %4117 = vmatprep.mubr.msk.bf16.mxu0 %vm4763_vm2, %v4761_v2 }
 0x1ac   :  { %4118 = vmatmul.mubr.msk.bf16.gmra.mrb[56].mxu0 %vm94_vm3, %v4996_v34 }
 0x1ad   :  { %4121 = vmatprep.mubr.msk.bf16.mxu0 %vm4763_vm2, %v4761_v2 }
 0x1b4   :  { %4122 = vmatmul.mubr.msk.bf16.gmra.mrb[60].mxu0 %vm94_vm3, %v5267_v25 }
 0x1b5   :  { %4125 = vmatprep.mubr.msk.bf16.mxu0 %vm4763_vm2, %v4761_v2 }
 0x1bc   :  { %4126 = vmatmul.mubr.msk.bf16.gmra.mrb[64].mxu0 %vm94_vm3, %v5031_v40 }
 0x1bd   :  { %4129 = vmatprep.mubr.msk.bf16.mxu0 %vm4763_vm2, %v4761_v2 }
 0x1c4   :  { %4130 = vmatmul.mubr.msk.bf16.gmra.mrb[68].mxu0 %vm94_vm3, %v5182_v59 }
 0x1c5   :  { %4133 = vmatprep.mubr.msk.bf16.mxu0 %vm4763_vm2, %v4761_v2 }
 0x1cc   :  { %4134 = vmatmul.mubr.msk.bf16.gmra.mrb[72].mxu0 %vm94_vm3, %v5051_v43 }
 0x1cd   :  { %4137 = vmatprep.mubr.msk.bf16.mxu0 %vm4763_vm2, %v4761_v2 }
 0x1d4   :  { %4138 = vmatmul.mubr.msk.bf16.gmra.mrb[76].mxu0 %vm94_vm3, %v5189_v30 }
 0x1d5   :  { %4141 = vmatprep.mubr.msk.bf16.mxu0 %vm4763_vm2, %v4761_v2 }
 0x1dc   :  { %4142 = vmatmul.mubr.msk.bf16.gmra.mrb[80].mxu0 %vm94_vm3, %v5069_v46 }
 0x1ef   :  { %v870_v32 = vpop.f32.mrb[84].mxu0 }
 0x1f0   :  { %v871_v34 = vadd.f32 %v5437_v26, %v870_v32  ;;  %v872_v40 = vpop.f32.mrb[85].mxu0 }
 0x1f1   :  { %v873_v43 = vpop.f32.mrb[86].mxu0 }
 0x1f2   :  { %v1104_v16 = vadd.f32 %v1103_v5, %v871_v34  ;;  %v874_v59 = vadd.f32 %v5437_v26, %v873_v43  ;;  %v875_v30 = vpop.f32.mrb[87].mxu0 }
 0x1f4   :  { %v1107_v36 = vadd.f32 %v1106_v14, %v874_v59  ;;  %v1176_v25 = vmax.f32 %v1104_v16, 0.0  ;;  %v4443_v16 = vld [vmem:[%s6539_s3 + $0x50] sm:$0xff]  }
 0x1f5   :  { %v4444_v59 = vld [vmem:[%s6539_s3 + $0x10] sm:$0xff]  }
 0x1f6   :  { %v1177_v60 = vmax.f32 %v1107_v36, 0.0 }
 0x1f7   :  { %v878_v62 = vpop.f32.mrb[88].mxu0 }
 0x1f8   :  { %v879_v46 = vadd.f32 %v5437_v26, %v878_v62  ;;  %v880_v63 = vpop.f32.mrb[89].mxu0  ;;  %v5442_v29 = vpack.c.bf16 %v1177_v60, %v1176_v25  ;;  %v4445_v62 = vld [vmem:[%s6539_s3 + $0x58] sm:$0xff]  }
 0x1f9   :  { %v881_v3 = vpop.f32.mrb[90].mxu0  ;;  %v4446_v63 = vld [vmem:[%s6539_s3 + $0x18] sm:$0xff]  }
 0x1fa   :  { %v1112_v4 = vadd.f32 %v1111_v20, %v879_v46  ;;  %v882_v57 = vadd.f32 %v5437_v26, %v881_v3  ;;  %v883_v9 = vpop.f32.mrb[91].mxu0 }
 0x1fc   :  { %v1115_v22 = vadd.f32 %v1114_v61, %v882_v57  ;;  %v1178_v11 = vmax.f32 %v1112_v4, 0.0 }
 0x1fe   :  { %v1179_v12 = vmax.f32 %v1115_v22, 0.0  ;;  %v4447_v22 = vld [vmem:[%s6539_s3 + $0x60] sm:$0xff]  }
 0x1ff   :  { %v886_v15 = vpop.f32.mrb[92].mxu0 }
 0x200   :  { %v887_v41 = vadd.f32 %v5437_v26, %v886_v15  ;;  %v888_v19 = vpop.f32.mrb[93].mxu0  ;;  %v5446_v21 = vpack.c.bf16 %v1179_v12, %v1178_v11  ;;  %v4448_v11 = vld [vmem:[%s6539_s3 + $0x20] sm:$0xff]  }
 0x201   :  { %v889_v24 = vpop.f32.mrb[94].mxu0 }
 0x202   :  { %v1120_v27 = vadd.f32 %v1119_v23, %v887_v41  ;;  %v890_v38 = vadd.f32 %v5437_v26, %v889_v24  ;;  %v891_v28 = vpop.f32.mrb[95].mxu0  ;;  %v4440_v23 = vld [vmem:[%s6539_s3] sm:$0xff]   ;;  %v4449_v24 = vld [vmem:[%s6539_s3 + $0x68] sm:$0xff]  }
 0x203   :  { %3905 = vmatpush3.bf16.msra.mxu1 %v4440_v23 }
 0x204   :  { %v1123_v53 = vadd.f32 %v1122_v45, %v890_v38  ;;  %v1180_v31 = vmax.f32 %v1120_v27, 0.0  ;;  %3906 = vmatprep.subr.bf16.mxu1 %v4441_v37  ;;  %v4450_v38 = vld [vmem:[%s6539_s3 + $0x28] sm:$0xff]  }
 0x206   :  { %v1181_v33 = vmax.f32 %v1123_v53, 0.0 }
 0x207   :  { %v894_v52 = vpop.f32.mrb[96].mxu0  ;;  %3907 = vmatpush3.bf16.msra.mxu1 %v4442_v48 }
 0x208   :  { %v895_v17 = vadd.f32 %v5437_v26, %v894_v52  ;;  %v896_v7 = vpop.f32.mrb[97].mxu0  ;;  %v5450_v39 = vpack.c.bf16 %v1181_v33, %v1180_v31  ;;  %3908 = vmatprep.subr.bf16.mxu1 %v4443_v16  ;;  %v4451_v52 = vld [vmem:[%s6539_s3 + $0x70] sm:$0xff]  }
 0x209   :  { %v897_v35 = vpop.f32.mrb[98].mxu0 }
 0x20a   :  { %v898_v0 = vadd.f32 %v5437_v26, %v897_v35  ;;  %v1128_v6 = vadd.f32 %v1127_v51, %v895_v17  ;;  %v899_v42 = vpop.f32.mrb[99].mxu0  ;;  %v4452_v17 = vld [vmem:[%s6539_s3 + $0x30] sm:$0xff]  }
 0x20b   :  { %3909 = vmatpush3.bf16.msra.mxu1 %v4444_v59  ;;  %v4453_v42 = vld [vmem:[%s6539_s3 + $0x78] sm:$0xff]   ;;  %v4455_v59 = vld [vmem:[%s6539_s3 + $0xc0] sm:$0xff]  }
 0x20c   :  { %v1131_v50 = vadd.f32 %v1130_v58, %v898_v0  ;;  %v1182_v54 = vmax.f32 %v1128_v6, 0.0  ;;  %3910 = vmatprep.subr.bf16.mxu1 %v4445_v62 }
 0x20e   :  { %v1183_v55 = vmax.f32 %v1131_v50, 0.0 }
 0x20f   :  { %v935_v56 = vpop.f32.mrb[0].mxu0  ;;  %3911 = vmatpush3.bf16.msra.mxu1 %v4446_v63 }
 0x210   :  { %v5453_v44 = vpack.c.bf16 %v1183_v55, %v1182_v54  ;;  %v4209_v5 = vadd.f32 %v5437_v26, %v935_v56  ;;  %v4063_v10 = vpop.f32.mrb[1].mxu0  ;;  %3912 = vmatprep.subr.bf16.mxu1 %v4447_v22  ;;  %v4454_v54 = vld [vmem:[%s6539_s3 + $0x38] sm:$0xff]  }
 0x211   :  { %v938_v14 = vpop.f32.mrb[2].mxu0 }
 0x212   :  { %v4210_v47 = vadd.f32 %v5437_v26, %v938_v14  ;;  %v4064_v20 = vpop.f32.mrb[3].mxu0  ;;  %v1134_v49 = vmax.f32 %v4209_v5, 0.0 }
 0x213   :  { %3913 = vmatpush3.bf16.msra.mxu1 %v4448_v11 }
 0x214   :  { %v1135_v61 = vmax.f32 %v4210_v47, 0.0  ;;  %3914 = vmatprep.subr.bf16.mxu1 %v4449_v24 }
 0x216   :  { %v5463_v18 = vpack.c.bf16 %v1135_v61, %v1134_v49 }
 0x217   :  { %v943_v45 = vpop.f32.mrb[4].mxu0  ;;  %3915 = vmatpush3.bf16.msra.mxu1 %v4450_v38 }
 0x218   :  { %v4211_v13 = vadd.f32 %v5437_v26, %v943_v45  ;;  %v4067_v51 = vpop.f32.mrb[5].mxu0  ;;  %3916 = vmatprep.subr.bf16.mxu1 %v4451_v52 }
 0x219   :  { %v946_v58 = vpop.f32.mrb[6].mxu0 }
 0x21a   :  { %v1136_v32 = vmax.f32 %v4211_v13, 0.0  ;;  %v4212_v34 = vadd.f32 %v5437_v26, %v946_v58  ;;  %v4068_v40 = vpop.f32.mrb[7].mxu0 }
 0x21b   :  { %3917 = vmatpush3.bf16.msra.mxu1 %v4452_v17 }
 0x21c   :  { %v1137_v43 = vmax.f32 %v4212_v34, 0.0  ;;  %3918 = vmatprep.subr.bf16.mxu1 %v4453_v42 }
 0x21e   :  { %v5479_v30 = vpack.c.bf16 %v1137_v43, %v1136_v32 }
 0x21f   :  { %v951_v36 = vpop.f32.mrb[8].mxu0  ;;  %3919 = vmatpush3.bf16.msra.mxu1 %v4454_v54 }
 0x220   :  { %v4213_v25 = vadd.f32 %v5437_v26, %v951_v36  ;;  %1210 = vrot.lane.b32.xlu0 %v5479_v30, %s4762_s21  ;;  %v4071_v60 = vpop.f32.mrb[9].mxu0  ;;  %3974 = vmatprep.subr.bf16.mxu1 %v4455_v59 }
 0x221   :  { %v954_v46 = vpop.f32.mrb[10].mxu0 }
 0x222   :  { %v1138_v3 = vmax.f32 %v4213_v25, 0.0  ;;  %v4214_v4 = vadd.f32 %v5437_v26, %v954_v46  ;;  %v4072_v57 = vpop.f32.mrb[11].mxu0 }
 0x224   :  { %v1139_v9 = vmax.f32 %v4214_v4, 0.0 }
 0x226   :  { %v5497_v12 = vpack.c.bf16 %v1139_v9, %v1138_v3 }
 0x227   :  { %v959_v15 = vpop.f32.mrb[12].mxu0 }
 0x228   :  { %v4215_v41 = vadd.f32 %v5437_v26, %v959_v15  ;;  %1238 = vrot.lane.b32.xlu0 %v5497_v12, %s4762_s21  ;;  %v4075_v19 = vpop.f32.mrb[13].mxu0 }
 0x229   :  { %v962_v27 = vpop.f32.mrb[14].mxu0 }
 0x22a   :  { %v1140_v28 = vmax.f32 %v4215_v41, 0.0  ;;  %v4216_v53 = vadd.f32 %v5437_v26, %v962_v27  ;;  %v4076_v31 = vpop.f32.mrb[15].mxu0 }
 0x22c   :  { %v1141_v33 = vmax.f32 %v4216_v53, 0.0 }
 0x22e   :  { %v5515_v7 = vpack.c.bf16 %v1141_v33, %v1140_v28 }
 0x22f   :  { %v967_v35 = vpop.f32.mrb[16].mxu0 }
 0x230   :  { %v4217_v0 = vadd.f32 %v5437_v26, %v967_v35  ;;  %1266 = vrot.lane.b32.xlu0 %v5515_v7, %s4762_s21  ;;  %v4079_v6 = vpop.f32.mrb[17].mxu0 }
 0x231   :  { %v970_v50 = vpop.f32.mrb[18].mxu0 }
 0x232   :  { %v4218_v55 = vadd.f32 %v5437_v26, %v970_v50  ;;  %v4080_v56 = vpop.f32.mrb[19].mxu0  ;;  %v1142_v5 = vmax.f32 %v4217_v0, 0.0 }
 0x234   :  { %v1143_v10 = vmax.f32 %v4218_v55, 0.0 }
 0x236   :  { %v5527_v14 = vpack.c.bf16 %v1143_v10, %v1142_v5 }
 0x237   :  { %v975_v47 = vpop.f32.mrb[20].mxu0 }
 0x238   :  { %v4219_v20 = vadd.f32 %v5437_v26, %v975_v47  ;;  %v4083_v49 = vpop.f32.mrb[21].mxu0 }
 0x239   :  { %v978_v61 = vpop.f32.mrb[22].mxu0 }
 0x23a   :  { %v4220_v8 = vadd.f32 %v5437_v26, %v978_v61  ;;  %v4084_v23 = vpop.f32.mrb[23].mxu0  ;;  %v1144_v45 = vmax.f32 %v4219_v20, 0.0 }
 0x23c   :  { %v1145_v13 = vmax.f32 %v4220_v8, 0.0 }
 0x23e   :  { %v5531_v51 = vpack.c.bf16 %v1145_v13, %v1144_v45 }
 0x23f   :  { %v983_v37 = vpop.f32.mrb[24].mxu0 }
 0x240   :  { %v4221_v58 = vadd.f32 %v5437_v26, %v983_v37  ;;  %1213 = vrot.lane.b32.xlu1 %v5531_v51, %s4762_s21  ;;  %v4087_v48 = vpop.f32.mrb[25].mxu0 }
 0x241   :  { %v986_v32 = vpop.f32.mrb[26].mxu0 }
 0x242   :  { %v4222_v34 = vadd.f32 %v5437_v26, %v986_v32  ;;  %v4088_v40 = vpop.f32.mrb[27].mxu0  ;;  %v1146_v43 = vmax.f32 %v4221_v58, 0.0 }
 0x244   :  { %v1147_v16 = vmax.f32 %v4222_v34, 0.0 }
 0x246   :  { %v5540_v36 = vpack.c.bf16 %v1147_v16, %v1146_v43 }
 0x247   :  { %v991_v25 = vpop.f32.mrb[28].mxu0 }
 0x248   :  { %v4223_v60 = vadd.f32 %v5437_v26, %v991_v25  ;;  %1241 = vrot.lane.b32.xlu1 %v5540_v36, %s4762_s21  ;;  %v4091_v62 = vpop.f32.mrb[29].mxu0 }
 0x249   :  { %v994_v46 = vpop.f32.mrb[30].mxu0 }
 0x24a   :  { %v4224_v63 = vadd.f32 %v5437_v26, %v994_v46  ;;  %v4092_v3 = vpop.f32.mrb[31].mxu0  ;;  %v1148_v4 = vmax.f32 %v4223_v60, 0.0 }
 0x24c   :  { %v1149_v57 = vmax.f32 %v4224_v63, 0.0 }
 0x24e   :  { %v5546_v9 = vpack.c.bf16 %v1149_v57, %v1148_v4 }
 0x24f   :  { %v999_v22 = vpop.f32.mrb[32].mxu0 }
 0x250   :  { %v4225_v11 = vadd.f32 %v5437_v26, %v999_v22  ;;  %1216 = vrot.lane.b32.xlu1 %v5546_v9, %s4762_s21  ;;  %v4095_v15 = vpop.f32.mrb[33].mxu0 }
 0x251   :  { %v1002_v41 = vpop.f32.mrb[34].mxu0 }
 0x252   :  { %v4226_v19 = vadd.f32 %v5437_v26, %v1002_v41  ;;  %v4096_v24 = vpop.f32.mrb[35].mxu0  ;;  %v1150_v27 = vmax.f32 %v4225_v11, 0.0 }
 0x254   :  { %v1151_v38 = vmax.f32 %v4226_v19, 0.0 }
 0x256   :  { %v5552_v28 = vpack.c.bf16 %v1151_v38, %v1150_v27 }
 0x257   :  { %v1007_v53 = vpop.f32.mrb[36].mxu0 }
 0x258   :  { %v4227_v31 = vadd.f32 %v5437_v26, %v1007_v53  ;;  %v4099_v33 = vpop.f32.mrb[37].mxu0 }
 0x259   :  { %v1010_v52 = vpop.f32.mrb[38].mxu0 }
 0x25a   :  { %v4228_v17 = vadd.f32 %v5437_v26, %v1010_v52  ;;  %v4100_v35 = vpop.f32.mrb[39].mxu0  ;;  %v1152_v0 = vmax.f32 %v4227_v31, 0.0 }
 0x25c   :  { %v1153_v6 = vmax.f32 %v4228_v17, 0.0 }
 0x25e   :  { %v5556_v42 = vpack.c.bf16 %v1153_v6, %v1152_v0 }
 0x25f   :  { %v1015_v50 = vpop.f32.mrb[40].mxu0 }
 0x260   :  { %v4229_v54 = vadd.f32 %v5437_v26, %v1015_v50  ;;  %v4103_v55 = vpop.f32.mrb[41].mxu0 }
 0x261   :  { %v1018_v56 = vpop.f32.mrb[42].mxu0 }
 0x262   :  { %v4230_v5 = vadd.f32 %v5437_v26, %v1018_v56  ;;  %v4104_v10 = vpop.f32.mrb[43].mxu0  ;;  %v1154_v47 = vmax.f32 %v4229_v54, 0.0 }
 0x264   :  { %v1155_v20 = vmax.f32 %v4230_v5, 0.0 }
 0x266   :  { %v5560_v49 = vpack.c.bf16 %v1155_v20, %v1154_v47 }
 0x267   :  { %v1023_v61 = vpop.f32.mrb[44].mxu0 }
 0x268   :  { %v4231_v8 = vadd.f32 %v5437_v26, %v1023_v61  ;;  %1289 = vrot.lane.b32.xlu1 %v5560_v49, %s4762_s21  ;;  %v4107_v23 = vpop.f32.mrb[45].mxu0 }
 0x269   :  { %v1026_v45 = vpop.f32.mrb[46].mxu0 }
 0x26a   :  { %v4232_v13 = vadd.f32 %v5437_v26, %v1026_v45  ;;  %v4108_v37 = vpop.f32.mrb[47].mxu0  ;;  %v1156_v58 = vmax.f32 %v4231_v8, 0.0 }
 0x26c   :  { %v1157_v48 = vmax.f32 %v4232_v13, 0.0 }
 0x26e   :  { %v5566_v32 = vpack.c.bf16 %v1157_v48, %v1156_v58 }
 0x26f   :  { %v1031_v34 = vpop.f32.mrb[48].mxu0 }
 0x270   :  { %v4233_v40 = vadd.f32 %v5437_v26, %v1031_v34  ;;  %1219 = vrot.lane.b32.xlu0 %v5566_v32, %s4762_s21  ;;  %v4111_v43 = vpop.f32.mrb[49].mxu0 }
 0x271   :  { %v1034_v16 = vpop.f32.mrb[50].mxu0 }
 0x272   :  { %v4234_v59 = vadd.f32 %v5437_v26, %v1034_v16  ;;  %v4112_v25 = vpop.f32.mrb[51].mxu0  ;;  %v1158_v60 = vmax.f32 %v4233_v40, 0.0 }
 0x274   :  { %v1159_v62 = vmax.f32 %v4234_v59, 0.0  ;;  %1244 = vrot.lane.b32.xlu0 %v5552_v28, %s4762_s21 }
 0x276   :  { %v5574_v46 = vpack.c.bf16 %v1159_v62, %v1158_v60 }
 0x277   :  { %v1039_v63 = vpop.f32.mrb[52].mxu0 }
 0x278   :  { %v4235_v3 = vadd.f32 %v5437_v26, %v1039_v63  ;;  %1247 = vrot.lane.b32.xlu1 %v5574_v46, %s4762_s21  ;;  %v4115_v4 = vpop.f32.mrb[53].mxu0 }
 0x279   :  { %v1042_v57 = vpop.f32.mrb[54].mxu0 }
 0x27a   :  { %v4236_v22 = vadd.f32 %v5437_v26, %v1042_v57  ;;  %v4116_v11 = vpop.f32.mrb[55].mxu0  ;;  %v1160_v15 = vmax.f32 %v4235_v3, 0.0 }
 0x27c   :  { %v1161_v41 = vmax.f32 %v4236_v22, 0.0 }
 0x27e   :  { %v5580_v19 = vpack.c.bf16 %v1161_v41, %v1160_v15 }
 0x27f   :  { %v1047_v24 = vpop.f32.mrb[56].mxu0 }
 0x280   :  { %v4237_v27 = vadd.f32 %v5437_v26, %v1047_v24  ;;  %v4119_v38 = vpop.f32.mrb[57].mxu0 }
 0x281   :  { %v1050_v53 = vpop.f32.mrb[58].mxu0 }
 0x282   :  { %v4238_v31 = vadd.f32 %v5437_v26, %v1050_v53  ;;  %v4120_v33 = vpop.f32.mrb[59].mxu0  ;;  %v1162_v52 = vmax.f32 %v4237_v27, 0.0 }
 0x284   :  { %v1163_v17 = vmax.f32 %v4238_v31, 0.0 }
 0x286   :  { %v5584_v35 = vpack.c.bf16 %v1163_v17, %v1162_v52 }
 0x287   :  { %v1055_v0 = vpop.f32.mrb[60].mxu0 }
 0x288   :  { %v4239_v6 = vadd.f32 %v5437_v26, %v1055_v0  ;;  %v4123_v50 = vpop.f32.mrb[61].mxu0 }
 0x289   :  { %v1058_v54 = vpop.f32.mrb[62].mxu0 }
 0x28a   :  { %v4240_v55 = vadd.f32 %v5437_v26, %v1058_v54  ;;  %v4124_v56 = vpop.f32.mrb[63].mxu0  ;;  %v1164_v5 = vmax.f32 %v4239_v6, 0.0 }
 0x28c   :  { %v1165_v10 = vmax.f32 %v4240_v55, 0.0 }
 0x28e   :  { %v5588_v47 = vpack.c.bf16 %v1165_v10, %v1164_v5 }
 0x28f   :  { %v1063_v20 = vpop.f32.mrb[64].mxu0 }
 0x290   :  { %v4241_v61 = vadd.f32 %v5437_v26, %v1063_v20  ;;  %1331 = vrot.lane.b32.xlu1 %v5588_v47, %s4762_s21  ;;  %v4127_v8 = vpop.f32.mrb[65].mxu0 }
 0x291   :  { %v1066_v23 = vpop.f32.mrb[66].mxu0 }
 0x292   :  { %v4242_v45 = vadd.f32 %v5437_v26, %v1066_v23  ;;  %v4128_v13 = vpop.f32.mrb[67].mxu0  ;;  %v1166_v37 = vmax.f32 %v4241_v61, 0.0  ;;  %v1211_v5 = vpop.permute.xlu0 %1210  ;;  %v4456_v23 = vld [vmem:[%s6539_s3 + $0x80] sm:$0xff]  }
 0x293   :  { %v4457_v13 = vld [vmem:[%s6539_s3 + $0xc8] sm:$0xff]  }
 0x294   :  { %v1167_v58 = vmax.f32 %v4242_v45, 0.0 }
 0x296   :  { %v5594_v48 = vpack.c.bf16 %v1167_v58, %v1166_v37  ;;  %v1223_v37 = vsel %vm96_vm0, %v5463_v18, %v1211_v5  ;;  %v4460_v18 = vld [vmem:[%s6539_s3 + $0x90] sm:$0xff]  }
 0x297   :  { %v1071_v34 = vpop.f32.mrb[68].mxu0 }
 0x298   :  { %v4243_v40 = vadd.f32 %v5437_v26, %v1071_v34  ;;  %1292 = vrot.lane.b32.xlu0 %v5594_v48, %s4762_s21  ;;  %v4131_v43 = vpop.f32.mrb[69].mxu0 }
 0x299   :  { %v1074_v16 = vpop.f32.mrb[70].mxu0  ;;  %v4459_v43 = vld [vmem:[%s6539_s3 + $0xd0] sm:$0xff]  }
 0x29a   :  { %v4244_v59 = vadd.f32 %v5437_v26, %v1074_v16  ;;  %v4132_v25 = vpop.f32.mrb[71].mxu0  ;;  %v1168_v60 = vmax.f32 %v4243_v40, 0.0  ;;  %v4458_v40 = vld [vmem:[%s6539_s3 + $0x88] sm:$0xff]   ;;  %v1239_v16 = vpop.permute.xlu0 %1238 }
 0x29c   :  { %v1169_v62 = vmax.f32 %v4244_v59, 0.0  ;;  %1272 = vrot.lane.b32.xlu0 %v5580_v19, %s4762_s21 }
 0x29e   :  { %v5602_v63 = vpack.c.bf16 %v1169_v62, %v1168_v60  ;;  %v4461_v60 = vld [vmem:[%s6539_s3 + $0xd8] sm:$0xff]   ;;  %v1251_v62 = vsel %vm96_vm0, %v5479_v30, %v1239_v16 }
 0x29f   :  { %v1079_v3 = vpop.f32.mrb[72].mxu0 }
 0x2a0   :  { %v4245_v4 = vadd.f32 %v5437_v26, %v1079_v3  ;;  %1305 = vrot.lane.b32.xlu1 %v5602_v63, %s4762_s21  ;;  %v4135_v57 = vpop.f32.mrb[73].mxu0  ;;  %v4462_v3 = vld [vmem:[%s6539_s3 + $0x98] sm:$0xff]  }
 0x2a1   :  { %v1082_v22 = vpop.f32.mrb[74].mxu0 }
 0x2a2   :  { %v4246_v11 = vadd.f32 %v5437_v26, %v1082_v22  ;;  %v4136_v15 = vpop.f32.mrb[75].mxu0  ;;  %v1170_v41 = vmax.f32 %v4245_v4, 0.0  ;;  %v1267_v4 = vpop.permute.xlu0 %1266  ;;  %v4464_v22 = vld [vmem:[%s6539_s3 + $0xa0] sm:$0xff]  }
 0x2a3   :  { %v1275_v15 = vsel %vm96_vm0, %v5497_v12, %v1267_v4 }
 0x2a4   :  { %v1171_v24 = vmax.f32 %v4246_v11, 0.0  ;;  %1269 = vrot.lane.b32.xlu1 %v5556_v42, %s4762_s21  ;;  %v4465_v11 = vld [vmem:[%s6539_s3 + $0xe8] sm:$0xff]  }
 0x2a6   :  { %v5610_v27 = vpack.c.bf16 %v1171_v24, %v1170_v41  ;;  %v4466_v41 = vld [vmem:[%s6539_s3 + $0xa8] sm:$0xff]   ;;  %v4468_v24 = vld [vmem:[%s6539_s3 + $0xb0] sm:$0xff]  }
 0x2a7   :  { %v1087_v38 = vpop.f32.mrb[76].mxu0 }
 0x2a8   :  { %v4247_v53 = vadd.f32 %v5437_v26, %v1087_v38  ;;  %1314 = vrot.lane.b32.xlu1 %v5584_v35, %s4762_s21  ;;  %1317 = vrot.lane.b32.xlu0 %v5610_v27, %s4762_s21  ;;  %v4139_v31 = vpop.f32.mrb[77].mxu0  ;;  %v4470_v38 = vld [vmem:[%s6539_s3 + $0xb8] sm:$0xff]  }
 0x2a9   :  { %v1090_v33 = vpop.f32.mrb[78].mxu0 }
 0x2aa   :  { %v4248_v52 = vadd.f32 %v5437_v26, %v1090_v33  ;;  %v4140_v17 = vpop.f32.mrb[79].mxu0  ;;  %v1172_v0 = vmax.f32 %v4247_v53, 0.0 }
 0x2ac   :  { %v1173_v6 = vmax.f32 %v4248_v52, 0.0  ;;  %1344 = vrot.lane.b32.xlu1 %v5446_v21, %s4762_s21  ;;  %1334 = vrot.lane.b32.xlu0 %v5442_v29, %s4762_s21 }
 0x2ae   :  { %v5622_v50 = vpack.c.bf16 %v1173_v6, %v1172_v0 }
 0x2af   :  { %v1095_v54 = vpop.f32.mrb[80].mxu0 }
 0x2b0   :  { %v4249_v55 = vadd.f32 %v5437_v26, %v1095_v54  ;;  %v4143_v56 = vpop.f32.mrb[81].mxu0  ;;  %1353 = vrot.lane.b32.xlu1 %v5622_v50, %s4762_s21  ;;  %1356 = vrot.lane.b32.xlu0 %v5450_v39, %s4762_s21 }
 0x2b1   :  { %v1098_v10 = vpop.f32.mrb[82].mxu0 }
 0x2b2   :  { %v4250_v20 = vadd.f32 %v5437_v26, %v1098_v10  ;;  %v1214_v61 = vpop.permute.xlu1 %1213  ;;  %v4144_v8 = vpop.f32.mrb[83].mxu0  ;;  %v1174_v58 = vmax.f32 %v4249_v55, 0.0 }
 0x2b3   :  { %v1227_v45 = vsel %vm96_vm0, %v5497_v12, %v1214_v61  ;;  %v4469_v12 = vld [vmem:[%s6539_s3 + $0xf8] sm:$0xff]  }
 0x2b4   :  { %v1175_v34 = vmax.f32 %v4250_v20, 0.0  ;;  %1717 = vmatprep.mubr.bf16.mxu1 %v1227_v45  ;;  %v4473_v45 = vld [vmem:[%s6539_s3 + $0x110] sm:$0xff]  }
 0x2b5   :  { %1718 = vmatmul.mubr.bf16.vlgmr.msra.gmra.mrb[16].mxu1 %v1223_v37 }
 0x2b6   :  { %v5640_v26 = vpack.c.bf16 %v1175_v34, %v1174_v58  ;;  %3975 = vmatpush3.bf16.msra.mxu1 %v4456_v23 }
 0x2b7   :  { %3976 = vmatprep.subr.bf16.mxu1 %v4457_v13  ;;  %v4474_v13 = vld [vmem:[%s6539_s3 + $0x118] sm:$0xff]  }
 0x2ba   :  { %v1242_v59 = vpop.permute.xlu1 %1241  ;;  %3977 = vmatpush3.bf16.msra.mxu1 %v4458_v40 }
 0x2bb   :  { %v1255_v25 = vsel %vm96_vm0, %v5515_v7, %v1242_v59  ;;  %3978 = vmatprep.subr.bf16.mxu1 %v4459_v43  ;;  %v4463_v7 = vld [vmem:[%s6539_s3 + $0xe0] sm:$0xff]   ;;  %v1295_v33 = vsel %vm96_vm0, %v5531_v51, %v1242_v59 }
 0x2bc   :  { %1725 = vmatprep.mubr.bf16.mxu1 %v1255_v25 }
 0x2bd   :  { %1726 = vmatmul.mubr.bf16.gmra.mrb[20].mxu1 %v1251_v62 }
 0x2be   :  { %3979 = vmatpush3.bf16.msra.mxu1 %v4460_v18 }
 0x2bf   :  { %3980 = vmatprep.subr.bf16.mxu1 %v4461_v60 }
 0x2c2   :  { %v1217_v57 = vpop.permute.xlu1 %1216  ;;  %3981 = vmatpush3.bf16.msra.mxu1 %v4462_v3 }
 0x2c3   :  { %v1278_v30 = vsel %vm96_vm0, %v5527_v14, %v1217_v57  ;;  %3982 = vmatprep.subr.bf16.mxu1 %v4463_v7  ;;  %v4467_v14 = vld [vmem:[%s6539_s3 + $0xf0] sm:$0xff]   ;;  %v1231_v0 = vsel %vm96_vm0, %v5540_v36, %v1217_v57 }
 0x2c4   :  { %1733 = vmatprep.mubr.bf16.mxu1 %v1278_v30 }
 0x2c5   :  { %1734 = vmatmul.mubr.bf16.gmra.mrb[24].mxu1 %v1275_v15  ;;  %v4486_v15 = vld [vmem:[%s6540_s5 + $0x34] ss:$8 sps:$4 sm:$0xff]  }
 0x2c6   :  { %3983 = vmatpush3.bf16.msra.mxu1 %v4464_v22  ;;  %v4483_v22 = vld [vmem:[%s6540_s5 + $0x24] ss:$8 sps:$4 sm:$0xff]  }
 0x2c7   :  { %3984 = vmatprep.subr.bf16.mxu1 %v4465_v11 }
 0x2ca   :  { %3985 = vmatpush3.bf16.msra.mxu1 %v4466_v41  ;;  %v4484_v41 = vld [vmem:[%s6540_s5 + $0x30] ss:$8 sps:$4 sm:$0xff]  }
 0x2cb   :  { %3986 = vmatprep.subr.bf16.mxu1 %v4467_v14 }
 0x2ce   :  { %3987 = vmatpush3.bf16.msra.mxu1 %v4468_v24 }
 0x2cf   :  { %3988 = vmatprep.subr.bf16.mxu1 %v4469_v12 }
 0x2d2   :  { %3989 = vmatpush3.bf16.msra.mxu1 %v4470_v38 }
 0x2d3   :  { %4161 = vmatprep.subr.bf16.mxu1 %v4761_v2 }
 0x2da   :  { %v1290_v53 = vpop.permute.xlu1 %1289 }
 0x2db   :  { %v1298_v31 = vsel %vm96_vm0, %v5546_v9, %v1290_v53 }
 0x2dc   :  { %1741 = vmatprep.mubr.bf16.mxu1 %v1298_v31 }
 0x2dd   :  { %1742 = vmatmul.mubr.bf16.gmra.mrb[28].mxu1 %v1295_v33  ;;  %v4489_v33 = vld [vmem:[%s6540_s5 + $0x44] ss:$8 sps:$4 sm:$0xff]  }
 0x2e2   :  { %v1220_v52 = vpop.permute.xlu0 %1219 }
 0x2e3   :  { %v1307_v17 = vsel %vm96_vm0, %v5552_v28, %v1220_v52  ;;  %v1235_v10 = vsel %vm96_vm0, %v5560_v49, %v1220_v52  ;;  %v4471_v49 = vld [vmem:[%s6539_s3 + $0x100] sm:$0xff]  }
 0x2e4   :  { %1749 = vmatprep.mubr.bf16.mxu1 %v1307_v17  ;;  %v4490_v17 = vld [vmem:[%s6540_s5 + $0x50] ss:$8 sps:$4 sm:$0xff]  }
 0x2e5   :  { %1750 = vmatmul.mubr.bf16.gmra.mrb[32].mxu1 %v1231_v0 }
 0x2e6   :  { %v1245_v6 = vpop.permute.xlu0 %1244 }
 0x2e7   :  { %v1259_v56 = vsel %vm96_vm0, %v5546_v9, %v1245_v6 }
 0x2ea   :  { %v1248_v54 = vpop.permute.xlu1 %1247 }
 0x2eb   :  { %v1320_v55 = vsel %vm96_vm0, %v5556_v42, %v1248_v54  ;;  %v1263_v42 = vsel %vm96_vm0, %v5566_v32, %v1248_v54  ;;  %v4472_v32 = vld [vmem:[%s6539_s3 + $0x108] sm:$0xff]  }
 0x2ec   :  { %1757 = vmatprep.mubr.bf16.mxu1 %v1320_v55 }
 0x2ed   :  { %1758 = vmatmul.mubr.bf16.gmra.mrb[36].mxu1 %v1259_v56 }
 0x302   :  { %v1332_v51 = vpop.permute.xlu1 %1331 }
 0x303   :  { %v1337_v5 = vsel %vm96_vm0, %v5574_v46, %v1332_v51  ;;  %v4493_v51 = vld [vmem:[%s6540_s5 + $0x60] ss:$8 sps:$4 sm:$0xff]  }
 0x304   :  { %1765 = vmatprep.mubr.bf16.mxu1 %v1337_v5  ;;  %v4495_v5 = vld [vmem:[%s6540_s5 + $0x64] ss:$8 sps:$4 sm:$0xff]  }
 0x305   :  { %1766 = vmatmul.mubr.bf16.gmra.mrb[40].mxu1 %v1235_v10 }
 0x30a   :  { %v1293_v36 = vpop.permute.xlu0 %1292 }
 0x30b   :  { %v1346_v20 = vsel %vm96_vm0, %v5580_v19, %v1293_v36  ;;  %v1302_v34 = vsel %vm96_vm0, %v5588_v47, %v1293_v36  ;;  %v4498_v36 = vld [vmem:[%s6540_s5 + $0x74] ss:$8 sps:$4 sm:$0xff]  }
 0x30c   :  { %1773 = vmatprep.mubr.bf16.mxu1 %v1346_v20  ;;  %v4499_v20 = vld [vmem:[%s6540_s5 + $0x80] ss:$8 sps:$4 sm:$0xff]  }
 0x30d   :  { %1774 = vmatmul.mubr.bf16.gmra.mrb[44].mxu1 %v1263_v42 }
 0x30e   :  { %v1273_v9 = vpop.permute.xlu0 %1272 }
 0x30f   :  { %v1286_v23 = vsel %vm96_vm0, %v5574_v46, %v1273_v9  ;;  %v4505_v9 = vld [vmem:[%s6540_s5 + $0xa0] ss:$8 sps:$4 sm:$0xff]  }
 0x312   :  { %v1306_v61 = vpop.permute.xlu1 %1305 }
 0x313   :  { %v1359_v8 = vsel %vm96_vm0, %v5584_v35, %v1306_v61  ;;  %v1311_v40 = vsel %vm96_vm0, %v5594_v48, %v1306_v61 }
 0x314   :  { %1781 = vmatprep.mubr.bf16.mxu1 %v1359_v8 }
 0x315   :  { %1782 = vmatmul.mubr.bf16.gmra.mrb[48].mxu1 %v1286_v23 }
 0x316   :  { %1822 = vmatprep.mubr.bf16.mxu1 %v1235_v10  ;;  %v1270_v37 = vpop.permute.xlu1 %1269  ;;  %v4496_v10 = vld [vmem:[%s6540_s5 + $0x70] ss:$8 sps:$4 sm:$0xff]  }
 0x317   :  { %v1282_v58 = vsel %vm96_vm0, %v5552_v28, %v1270_v37  ;;  %v4510_v37 = vld [vmem:[%s6540_s5 + $0xb4] ss:$8 sps:$4 sm:$0xff]  }
 0x31a   :  { %v1318_v43 = vpop.permute.xlu0 %1317  ;;  %v1315_v59 = vpop.permute.xlu1 %1314 }
 0x31b   :  { %v1328_v16 = vsel %vm96_vm0, %v5602_v63, %v1318_v43  ;;  %v1324_v28 = vsel %vm96_vm0, %v5580_v19, %v1315_v59 }
 0x31d   :  { %1823 = vmatmul.mubr.bf16.vlgmr.msra.gmra.mrb[52].mxu1 %v1231_v0  ;;  %v4492_v0 = vld [vmem:[%s6540_s5 + $0x54] ss:$8 sps:$4 sm:$0xff]  }
 0x31e   :  { %4162 = vmatpush3.bf16.msra.mxu1 %v4471_v49  ;;  %1830 = vmatprep.mubr.bf16.mxu1 %v1263_v42  ;;  %v1335_v18 = vpop.permute.xlu0 %1334  ;;  %v1345_v25 = vpop.permute.xlu1 %1344 }
 0x31f   :  { %4163 = vmatprep.subr.bf16.mxu1 %v4761_v2  ;;  %v1341_v47 = vsel %vm96_vm0, %v5640_v26, %v1335_v18  ;;  %v1350_v48 = vsel %vm96_vm0, %v5442_v29, %v1345_v25  ;;  %v4475_v29 = vld [vmem:[%s6540_s5] ss:$8 sps:$4 sm:$0xff]   ;;  %v4514_v25 = vld [vmem:[%s6540_s5 + $0xd0] ss:$8 sps:$4 sm:$0xff]  }
 0x322   :  { %4164 = vmatpush3.bf16.msra.mxu1 %v4472_v32  ;;  %v1357_v60 = vpop.permute.xlu0 %1356  ;;  %v1354_v3 = vpop.permute.xlu1 %1353 }
 0x323   :  { %4165 = vmatprep.subr.bf16.mxu1 %v4761_v2  ;;  %v1367_v62 = vsel %vm96_vm0, %v5446_v21, %v1357_v60  ;;  %v1363_v7 = vsel %vm96_vm0, %v5610_v27, %v1354_v3  ;;  %v4519_v60 = vld [vmem:[%s6540_s5 + $0xe4] ss:$8 sps:$4 sm:$0xff]   ;;  %v4517_v3 = vld [vmem:[%s6540_s5 + $0xe0] ss:$8 sps:$4 sm:$0xff]  }
 0x325   :  { %1831 = vmatmul.mubr.bf16.gmra.mrb[56].mxu1 %v1259_v56 }
 0x326   :  { %1838 = vmatprep.mubr.bf16.mxu1 %v1286_v23  ;;  %4166 = vmatpush3.bf16.msra.mxu1 %v4473_v45 }
 0x327   :  { %4167 = vmatprep.subr.bf16.mxu1 %v4761_v2 }
 0x32a   :  { %4168 = vmatpush3.bf16.msra.mxu1 %v4474_v13  ;;  %v4508_v13 = vld [vmem:[%s6540_s5 + $0xb0] ss:$8 sps:$4 sm:$0xff]  }
 0x32d   :  { %1839 = vmatmul.mubr.bf16.gmra.mrb[60].mxu1 %v1282_v58  ;;  %v4511_v58 = vld [vmem:[%s6540_s5 + $0xc0] ss:$8 sps:$4 sm:$0xff]  }
 0x32e   :  { %1846 = vmatprep.mubr.bf16.mxu1 %v1302_v34  ;;  %v4513_v34 = vld [vmem:[%s6540_s5 + $0xc4] ss:$8 sps:$4 sm:$0xff]  }
 0x335   :  { %1847 = vmatmul.mubr.bf16.gmra.mrb[64].mxu1 %v1263_v42  ;;  %v4504_v42 = vld [vmem:[%s6540_s5 + $0x94] ss:$8 sps:$4 sm:$0xff]  }
 0x336   :  { %1854 = vmatprep.mubr.bf16.mxu1 %v1311_v40 }
 0x33d   :  { %1855 = vmatmul.mubr.bf16.gmra.mrb[68].mxu1 %v1286_v23 }
 0x33e   :  { %1862 = vmatprep.mubr.bf16.mxu1 %v1328_v16 }
 0x345   :  { %1863 = vmatmul.mubr.bf16.gmra.mrb[72].mxu1 %v1324_v28 }
 0x346   :  { %1870 = vmatprep.mubr.bf16.mxu1 %v1341_v47  ;;  %v4516_v47 = vld [vmem:[%s6540_s5 + $0xd4] ss:$8 sps:$4 sm:$0xff]  }
 0x34d   :  { %1871 = vmatmul.mubr.bf16.gmra.mrb[76].mxu1 %v1311_v40 }
 0x34e   :  { %1878 = vmatprep.mubr.bf16.mxu1 %v1350_v48 }
 0x355   :  { %1879 = vmatmul.mubr.bf16.gmra.mrb[80].mxu1 %v1328_v16 }
 0x356   :  { %1886 = vmatprep.mubr.bf16.mxu1 %v1367_v62 }
 0x35d   :  { %1887 = vmatmul.mubr.bf16.gmra.mrb[84].mxu1 %v1363_v7 }
 0x35e   :  { %4169 = vmatprep.mubr.msk.bf16.mxu1 %vm4763_vm2, %v4761_v2 }
 0x365   :  { %4170 = vmatmul.mubr.msk.bf16.vlgmr.msra.gmra.mrb[88].mxu1 %vm96_vm0, %v5574_v46  ;;  %v4477_v46 = vld [vmem:[%s6540_s5 + $0x4] ss:$8 sps:$4 sm:$0xff]  }
 0x366   :  { %4173 = vmatprep.mubr.msk.bf16.mxu1 %vm4763_vm2, %v4761_v2  ;;  %2903 = vmatprep.subr.bf16.mxu1 %v4477_v46 }
 0x367   :  { %2904 = vmatpush1.bf16.msra.mxu1 %v4475_v29 }
 0x36d   :  { %4174 = vmatmul.mubr.msk.bf16.gmra.mrb[92].mxu1 %vm96_vm0, %v5580_v19  ;;  %v4478_v19 = vld [vmem:[%s6540_s5 + $0x10] ss:$8 sps:$4 sm:$0xff]  }
 0x36e   :  { %4177 = vmatprep.mubr.msk.bf16.mxu1 %vm4763_vm2, %v4761_v2 }
 0x375   :  { %4178 = vmatmul.mubr.msk.bf16.gmra.mrb[96].mxu1 %vm96_vm0, %v5584_v35  ;;  %v4480_v35 = vld [vmem:[%s6540_s5 + $0x14] ss:$8 sps:$4 sm:$0xff]  }
 0x376   :  { %4181 = vmatprep.mubr.msk.bf16.mxu1 %vm4763_vm2, %v4761_v2  ;;  %2905 = vmatprep.subr.bf16.mxu1 %v4480_v35  ;;  %v4522_v35 = vld [vmem:[%s6540_s5 + $0xf4] ss:$8 sps:$4 sm:$0xff]  }
 0x377   :  { %2906 = vmatpush1.bf16.msra.mxu1 %v4478_v19 }
 0x378   :  { %2907 = vmatprep.subr.bf16.mxu1 %v4483_v22 }
 0x37d   :  { %4182 = vmatmul.mubr.msk.bf16.gmra.mrb[100].mxu1 %vm96_vm0, %v5602_v63 }
 0x37e   :  { %4185 = vmatprep.mubr.msk.bf16.mxu1 %vm4763_vm2, %v4761_v2 }
 0x385   :  { %4186 = vmatmul.mubr.msk.bf16.gmra.mrb[104].mxu1 %vm96_vm0, %v5610_v27  ;;  %v4481_v27 = vld [vmem:[%s6540_s5 + $0x20] ss:$8 sps:$4 sm:$0xff]  }
 0x386   :  { %4189 = vmatprep.mubr.msk.bf16.mxu1 %vm4763_vm2, %v4761_v2  ;;  %2908 = vmatpush1.bf16.msra.mxu1 %v4481_v27 }
 0x387   :  { %2909 = vmatprep.subr.bf16.mxu1 %v4486_v15 }
 0x388   :  { %v3920_v63 = vpop.f32.mrb[16].mxu1 }
 0x389   :  { %v3921_v26 = vpop.f32.mrb[17].mxu1 }
 0x38a   :  { %v5781_v4 = vadd.f32 %v3921_v26, %v3920_v63  ;;  %v3923_v57 = vpop.f32.mrb[18].mxu1  ;;  %2910 = vmatpush1.bf16.msra.mxu1 %v4484_v41  ;;  %v4520_v63 = vld [vmem:[%s6540_s5 + $0xf0] ss:$8 sps:$4 sm:$0xff]   ;;  %v4525_v26 = vld [vmem:[%s6540_s5 + $0x104] ss:$8 sps:$4 sm:$0xff]  }
 0x38b   :  { %v3924_v30 = vpop.f32.mrb[19].mxu1  ;;  %2911 = vmatprep.subr.bf16.mxu1 %v4489_v33 }
 0x38c   :  { %v5789_v11 = vadd.f32 %v3924_v30, %v3923_v57 }
 0x38d   :  { %4190 = vmatmul.mubr.msk.bf16.gmra.mrb[108].mxu1 %vm96_vm0, %v5622_v50  ;;  %v4487_v50 = vld [vmem:[%s6540_s5 + $0x40] ss:$8 sps:$4 sm:$0xff]  }
 0x38e   :  { %4193 = vmatprep.mubr.msk.bf16.mxu1 %vm4763_vm2, %v4761_v2  ;;  %2912 = vmatpush1.bf16.msra.mxu1 %v4487_v50 }
 0x38f   :  { %2913 = vmatprep.subr.bf16.mxu1 %v4492_v0 }
 0x390   :  { %v3926_v14 = vpop.f32.mrb[20].mxu1 }
 0x391   :  { %v3927_v24 = vpop.f32.mrb[21].mxu1 }
 0x392   :  { %v5801_v12 = vadd.f32 %v3927_v24, %v3926_v14  ;;  %v3929_v38 = vpop.f32.mrb[22].mxu1  ;;  %2914 = vmatpush1.bf16.msra.mxu1 %v4490_v17 }
 0x393   :  { %v3930_v53 = vpop.f32.mrb[23].mxu1  ;;  %2915 = vmatprep.subr.bf16.mxu1 %v4495_v5 }
 0x394   :  { %v5803_v31 = vadd.f32 %v3930_v53, %v3929_v38 }
 0x395   :  { %4194 = vmatmul.mubr.msk.bf16.gmra.mrb[112].mxu1 %vm96_vm0, %v5446_v21 }
 0x396   :  { %4197 = vmatprep.mubr.msk.bf16.mxu1 %vm4763_vm2, %v4761_v2  ;;  %2916 = vmatpush1.bf16.msra.mxu1 %v4493_v51  ;;  %v5921_v51 = vld [vmem:[%s6541_s4] ss:$0 sm:$0xff] }
 0x397   :  { %2917 = vmatprep.subr.bf16.mxu1 %v4498_v36  ;;  %v1720_v36 = vadd.f32 %v5781_v4, %v5921_v51  ;;  %v1731_v4 = vadd.f32 %v5803_v31, %v5921_v51 }
 0x398   :  { %v3932_v52 = vpop.f32.mrb[24].mxu1 }
 0x399   :  { %v3933_v6 = vpop.f32.mrb[25].mxu1 }
 0x39a   :  { %v5821_v54 = vadd.f32 %v3933_v6, %v3932_v52  ;;  %v3935_v55 = vpop.f32.mrb[26].mxu1  ;;  %2918 = vmatpush1.bf16.msra.mxu1 %v4496_v10 }
 0x39b   :  { %v3936_v21 = vpop.f32.mrb[27].mxu1 }
 0x39c   :  { %v5823_v56 = vadd.f32 %v3936_v21, %v3935_v55 }
 0x39d   :  { %4198 = vmatmul.mubr.msk.bf16.gmra.mrb[116].mxu1 %vm96_vm0, %v5450_v39  ;;  %v4501_v39 = vld [vmem:[%s6540_s5 + $0x84] ss:$8 sps:$4 sm:$0xff]  }
 0x39e   :  { %4201 = vmatprep.mubr.msk.bf16.mxu1 %vm4763_vm2, %v4761_v2  ;;  %2919 = vmatprep.subr.bf16.mxu1 %v4501_v39  ;;  %v4502_v2 = vld [vmem:[%s6540_s5 + $0x90] ss:$8 sps:$4 sm:$0xff]  }
 0x39f   :  { %2920 = vmatpush1.bf16.msra.mxu1 %v4499_v20 }
 0x3a0   :  { %2921 = vmatprep.subr.bf16.mxu1 %v4504_v42  ;;  %v1723_v42 = vadd.f32 %v5789_v11, %v5921_v51 }
 0x3a3   :  { %2922 = vmatpush1.bf16.msra.mxu1 %v4502_v2 }
 0x3a5   :  { %4202 = vmatmul.mubr.msk.bf16.gmra.mrb[120].mxu1 %vm96_vm0, %v5453_v44  ;;  %v4507_v44 = vld [vmem:[%s6540_s5 + $0xa4] ss:$8 sps:$4 sm:$0xff]  }
 0x3a6   :  { %2923 = vmatprep.subr.bf16.mxu1 %v4507_v44 }
 0x3a7   :  { %2924 = vmatpush1.bf16.msra.mxu1 %v4505_v9 }
 0x3a8   :  { %2925 = vmatprep.subr.bf16.mxu1 %v4510_v37 }
 0x3ab   :  { %2926 = vmatpush1.bf16.msra.mxu1 %v4508_v13 }
 0x3ac   :  { %2927 = vmatprep.subr.bf16.mxu1 %v4513_v34 }
 0x3af   :  { %2928 = vmatpush1.bf16.msra.mxu1 %v4511_v58 }
 0x3b0   :  { %v3938_v61 = vpop.f32.mrb[28].mxu1  ;;  %2929 = vmatprep.subr.bf16.mxu1 %v4516_v47 }
 0x3b1   :  { %v3939_v8 = vpop.f32.mrb[29].mxu1 }
 0x3b2   :  { %v5861_v23 = vadd.f32 %v3939_v8, %v3938_v61  ;;  %v3941_v49 = vpop.f32.mrb[30].mxu1 }
 0x3b3   :  { %v3942_v32 = vpop.f32.mrb[31].mxu1  ;;  %2930 = vmatpush1.bf16.msra.mxu1 %v4514_v25 }
 0x3b4   :  { %v5863_v45 = vadd.f32 %v3942_v32, %v3941_v49  ;;  %2931 = vmatprep.subr.bf16.mxu1 %v4519_v60  ;;  %v1728_v32 = vadd.f32 %v5801_v12, %v5921_v51  ;;  %v1739_v12 = vadd.f32 %v5823_v56, %v5921_v51 }
 0x3b7   :  { %2932 = vmatpush1.bf16.msra.mxu1 %v4517_v3 }
 0x3b8   :  { %v3944_v40 = vpop.f32.mrb[32].mxu1  ;;  %2933 = vmatprep.subr.bf16.mxu1 %v4522_v35 }
 0x3b9   :  { %v3945_v43 = vpop.f32.mrb[33].mxu1 }
 0x3ba   :  { %v5877_v16 = vadd.f32 %v3945_v43, %v3944_v40  ;;  %v3947_v59 = vpop.f32.mrb[34].mxu1 }
 0x3bb   :  { %v3948_v18 = vpop.f32.mrb[35].mxu1  ;;  %2934 = vmatpush1.bf16.msra.mxu1 %v4520_v63 }
 0x3bc   :  { %v5879_v28 = vadd.f32 %v3948_v18, %v3947_v59  ;;  %2946 = vmatprep.subr.bf16.mxu1 %v4525_v26  ;;  %v1736_v18 = vadd.f32 %v5821_v54, %v5921_v51  ;;  %v1747_v54 = vadd.f32 %v5863_v45, %v5921_v51 }
 0x3c0   :  { %v3950_v48 = vpop.f32.mrb[36].mxu1 }
 0x3c1   :  { %v3951_v62 = vpop.f32.mrb[37].mxu1 }
 0x3c2   :  { %v5893_v7 = vadd.f32 %v3951_v62, %v3950_v48  ;;  %v3953_v29 = vpop.f32.mrb[38].mxu1 }
 0x3c3   :  { %v3954_v46 = vpop.f32.mrb[39].mxu1 }
 0x3c4   :  { %v5895_v19 = vadd.f32 %v3954_v46, %v3953_v29  ;;  %v1744_v46 = vadd.f32 %v5861_v23, %v5921_v51  ;;  %v1755_v23 = vadd.f32 %v5879_v28, %v5921_v51 }
 0x3d8   :  { %v3956_v57 = vpop.f32.mrb[40].mxu1 }
 0x3d9   :  { %v3957_v27 = vpop.f32.mrb[41].mxu1 }
 0x3da   :  { %v5906_v22 = vadd.f32 %v3957_v27, %v3956_v57  ;;  %v3959_v30 = vpop.f32.mrb[42].mxu1 }
 0x3db   :  { %v3960_v15 = vpop.f32.mrb[43].mxu1 }
 0x3dc   :  { %v5908_v41 = vadd.f32 %v3960_v15, %v3959_v30 }
 0x3e0   :  { %v3962_v14 = vpop.f32.mrb[44].mxu1 }
 0x3e1   :  { %v3963_v24 = vpop.f32.mrb[45].mxu1 }
 0x3e2   :  { %v5910_v38 = vadd.f32 %v3963_v24, %v3962_v14  ;;  %v3965_v53 = vpop.f32.mrb[46].mxu1  ;;  %v1752_v14 = vadd.f32 %v5877_v16, %v5921_v51  ;;  %v1763_v16 = vadd.f32 %v5895_v19, %v5921_v51 }
 0x3e3   :  { %v3966_v50 = vpop.f32.mrb[47].mxu1 }
 0x3e4   :  { %v5912_v33 = vadd.f32 %v3966_v50, %v3965_v53 }
 0x3e8   :  { %v3968_v52 = vpop.f32.mrb[48].mxu1 }
 0x3e9   :  { %v3969_v17 = vpop.f32.mrb[49].mxu1 }
 0x3ea   :  { %v5914_v0 = vadd.f32 %v3969_v17, %v3968_v52  ;;  %v3971_v6 = vpop.f32.mrb[50].mxu1 }
 0x3eb   :  { %v3972_v55 = vpop.f32.mrb[51].mxu1 }
 0x3ec   :  { %v5916_v21 = vadd.f32 %v3972_v55, %v3971_v6 }
 0x3f0   :  { %v3990_v5 = vpop.f32.mrb[52].mxu1 }
 0x3f1   :  { %v3991_v10 = vpop.f32.mrb[53].mxu1 }
 0x3f2   :  { %v3992_v20 = vadd.f32 %v3991_v10, %v3990_v5  ;;  %v3993_v39 = vpop.f32.mrb[54].mxu1  ;;  %v1760_v5 = vadd.f32 %v5893_v7, %v5921_v51  ;;  %v1771_v7 = vadd.f32 %v5908_v41, %v5921_v51 }
 0x3f3   :  { %v3994_v2 = vpop.f32.mrb[55].mxu1 }
 0x3f4   :  { %v3995_v9 = vadd.f32 %v3994_v2, %v3993_v39  ;;  %v5927_v44 = vadd.f32 %v3992_v20, %v1720_v36 }
 0x3f6   :  { %v5929_v61 = vadd.f32 %v3995_v9, %v1723_v42 }
 0x3f8   :  { %v3996_v8 = vpop.f32.mrb[56].mxu1 }
 0x3f9   :  { %v3997_v49 = vpop.f32.mrb[57].mxu1 }
 0x3fa   :  { %v3998_v13 = vadd.f32 %v3997_v49, %v3996_v8  ;;  %v3999_v37 = vpop.f32.mrb[58].mxu1  ;;  %v1768_v8 = vadd.f32 %v5906_v22, %v5921_v51  ;;  %v1779_v22 = vadd.f32 %v5912_v33, %v5921_v51 }
 0x3fb   :  { %v4000_v58 = vpop.f32.mrb[59].mxu1 }
 0x3fc   :  { %v4001_v34 = vadd.f32 %v4000_v58, %v3999_v37  ;;  %v5935_v40 = vadd.f32 %v3998_v13, %v1728_v32 }
 0x3fe   :  { %v5937_v11 = vadd.f32 %v4001_v34, %v1731_v4 }
 0x400   :  { %v4002_v43 = vpop.f32.mrb[60].mxu1 }
 0x401   :  { %v4003_v59 = vpop.f32.mrb[61].mxu1 }
 0x402   :  { %v4004_v47 = vadd.f32 %v4003_v59, %v4002_v43  ;;  %v4005_v25 = vpop.f32.mrb[62].mxu1  ;;  %v1776_v43 = vadd.f32 %v5910_v38, %v5921_v51  ;;  %v1787_v38 = vadd.f32 %v5916_v21, %v5921_v51 }
 0x403   :  { %v4006_v48 = vpop.f32.mrb[63].mxu1 }
 0x404   :  { %v4007_v60 = vadd.f32 %v4006_v48, %v4005_v25  ;;  %v5943_v62 = vadd.f32 %v4004_v47, %v1736_v18 }
 0x406   :  { %v5945_v31 = vadd.f32 %v4007_v60, %v1739_v12 }
 0x408   :  { %v4008_v3 = vpop.f32.mrb[64].mxu1 }
 0x409   :  { %v4009_v29 = vpop.f32.mrb[65].mxu1 }
 0x40a   :  { %v4010_v35 = vadd.f32 %v4009_v29, %v4008_v3  ;;  %v4011_v63 = vpop.f32.mrb[66].mxu1  ;;  %v1784_v3 = vadd.f32 %v5914_v0, %v5921_v51 }
 0x40b   :  { %v4012_v26 = vpop.f32.mrb[67].mxu1 }
 0x40c   :  { %v4013_v57 = vadd.f32 %v4012_v26, %v4011_v63  ;;  %v5951_v27 = vadd.f32 %v4010_v35, %v1744_v46 }
 0x40e   :  { %v5953_v56 = vadd.f32 %v4013_v57, %v1747_v54 }
 0x410   :  { %v4014_v30 = vpop.f32.mrb[68].mxu1 }
 0x411   :  { %v4015_v15 = vpop.f32.mrb[69].mxu1 }
 0x412   :  { %v4016_v24 = vadd.f32 %v4015_v15, %v4014_v30  ;;  %v4017_v53 = vpop.f32.mrb[70].mxu1 }
 0x413   :  { %v4018_v50 = vpop.f32.mrb[71].mxu1 }
 0x414   :  { %v4019_v52 = vadd.f32 %v4018_v50, %v4017_v53  ;;  %v5959_v17 = vadd.f32 %v4016_v24, %v1752_v14 }
 0x416   :  { %v5961_v45 = vadd.f32 %v4019_v52, %v1755_v23 }
 0x418   :  { %v4020_v6 = vpop.f32.mrb[72].mxu1 }
 0x419   :  { %v4021_v55 = vpop.f32.mrb[73].mxu1 }
 0x41a   :  { %v4022_v10 = vadd.f32 %v4021_v55, %v4020_v6  ;;  %v4023_v36 = vpop.f32.mrb[74].mxu1 }
 0x41b   :  { %v4024_v20 = vpop.f32.mrb[75].mxu1 }
 0x41c   :  { %v4025_v39 = vadd.f32 %v4024_v20, %v4023_v36  ;;  %v5967_v2 = vadd.f32 %v4022_v10, %v1760_v5  ;;  %v4528_v20 = vld [vmem:[%s6540_s5 + $0x114] ss:$8 sps:$4 sm:$0xff]  }
 0x41e   :  { %v5969_v28 = vadd.f32 %v4025_v39, %v1763_v16 }
 0x420   :  { %v4026_v42 = vpop.f32.mrb[76].mxu1 }
 0x421   :  { %v4027_v9 = vpop.f32.mrb[77].mxu1 }
 0x422   :  { %v4028_v49 = vadd.f32 %v4027_v9, %v4026_v42  ;;  %v4029_v32 = vpop.f32.mrb[78].mxu1  ;;  %v4526_v9 = vld [vmem:[%s6540_s5 + $0x110] ss:$8 sps:$4 sm:$0xff]  }
 0x423   :  { %v4030_v13 = vpop.f32.mrb[79].mxu1 }
 0x424   :  { %v4031_v37 = vadd.f32 %v4030_v13, %v4029_v32  ;;  %v5975_v58 = vadd.f32 %v4028_v49, %v1768_v8  ;;  %v4531_v8 = vld [vmem:[%s6540_s5 + $0x124] ss:$8 sps:$4 sm:$0xff]  }
 0x426   :  { %v5977_v19 = vadd.f32 %v4031_v37, %v1771_v7  ;;  %v4534_v7 = vld [vmem:[%s6540_s5 + $0x134] ss:$8 sps:$4 sm:$0xff]  }
 0x428   :  { %v4032_v4 = vpop.f32.mrb[80].mxu1 }
 0x429   :  { %v4033_v34 = vpop.f32.mrb[81].mxu1 }
 0x42a   :  { %v4034_v59 = vadd.f32 %v4033_v34, %v4032_v4  ;;  %v4035_v18 = vpop.f32.mrb[82].mxu1 }
 0x42b   :  { %v4036_v47 = vpop.f32.mrb[83].mxu1 }
 0x42c   :  { %v4037_v25 = vadd.f32 %v4036_v47, %v4035_v18  ;;  %v5983_v48 = vadd.f32 %v4034_v59, %v1776_v43  ;;  %v4532_v18 = vld [vmem:[%s6540_s5 + $0x130] ss:$8 sps:$4 sm:$0xff]   ;;  %v4537_v47 = vld [vmem:[%s6540_s5 + $0x144] ss:$8 sps:$4 sm:$0xff]  }
 0x42e   :  { %v5985_v41 = vadd.f32 %v4037_v25, %v1779_v22 }
 0x430   :  { %v4038_v12 = vpop.f32.mrb[84].mxu1 }
 0x431   :  { %v4039_v60 = vpop.f32.mrb[85].mxu1 }
 0x432   :  { %v4040_v29 = vadd.f32 %v4039_v60, %v4038_v12  ;;  %v4041_v46 = vpop.f32.mrb[86].mxu1  ;;  %v4540_v60 = vld [vmem:[%s6540_s5 + $0x154] ss:$8 sps:$4 sm:$0xff]  }
 0x433   :  { %v4042_v35 = vpop.f32.mrb[87].mxu1 }
 0x434   :  { %v4043_v63 = vadd.f32 %v4042_v35, %v4041_v46  ;;  %v5991_v26 = vadd.f32 %v4040_v29, %v1784_v3 }
 0x436   :  { %v5993_v33 = vadd.f32 %v4043_v63, %v1787_v38  ;;  %v4538_v63 = vld [vmem:[%s6540_s5 + $0x150] ss:$8 sps:$4 sm:$0xff]  }
 0x438   :  { %v1929_v54 = vpop.f32.mrb[88].mxu1 }
 0x439   :  { %v1930_v57 = vadd.f32 %v1929_v54, %v5927_v44  ;;  %v4171_v30 = vpop.f32.mrb[89].mxu1  ;;  %v4523_v44 = vld [vmem:[%s6540_s5 + $0x100] ss:$8 sps:$4 sm:$0xff]   ;;  %v4543_v54 = vld [vmem:[%s6540_s5 + $0x164] ss:$8 sps:$4 sm:$0xff]  }
 0x43a   :  { %v1932_v15 = vpop.f32.mrb[90].mxu1 }
 0x43b   :  { %v1933_v14 = vadd.f32 %v1932_v15, %v5929_v61  ;;  %v4172_v24 = vpop.f32.mrb[91].mxu1  ;;  %v2000_v0 = vmax.f32 %v1930_v57, 0.0 }
 0x43d   :  { %v2001_v53 = vmax.f32 %v1933_v14, 0.0  ;;  %v4546_v14 = vld [vmem:[%s6540_s5 + $0x174] ss:$8 sps:$4 sm:$0xff]  }
 0x43f   :  { %v2018_v50 = vpack.c.bf16 %v2001_v53, %v2000_v0 }
 0x440   :  { %v1937_v23 = vpop.f32.mrb[92].mxu1 }
 0x441   :  { %v1938_v52 = vadd.f32 %v1937_v23, %v5935_v40  ;;  %v4175_v21 = vpop.f32.mrb[93].mxu1 }
 0x442   :  { %v1940_v51 = vpop.f32.mrb[94].mxu1  ;;  %v4549_v21 = vld [vmem:[%s6540_s5 + $0x184] ss:$8 sps:$4 sm:$0xff]  }
 0x443   :  { %v1941_v6 = vadd.f32 %v1940_v51, %v5937_v11  ;;  %v4176_v55 = vpop.f32.mrb[95].mxu1  ;;  %v2002_v5 = vmax.f32 %v1938_v52, 0.0  ;;  %v4544_v52 = vld [vmem:[%s6540_s5 + $0x170] ss:$8 sps:$4 sm:$0xff]  }
 0x445   :  { %v2003_v10 = vmax.f32 %v1941_v6, 0.0 }
 0x447   :  { %v2019_v36 = vpack.c.bf16 %v2003_v10, %v2002_v5  ;;  %v4552_v5 = vld [vmem:[%s6540_s5 + $0x194] ss:$8 sps:$4 sm:$0xff]  }
 0x448   :  { %v1945_v61 = vpop.f32.mrb[96].mxu1 }
 0x449   :  { %v1946_v16 = vadd.f32 %v1945_v61, %v5943_v62  ;;  %v4179_v40 = vpop.f32.mrb[97].mxu1  ;;  %2935 = vmatprep.mubr.bf16.mxu1 %v2019_v36 }
 0x44a   :  { %v1948_v39 = vpop.f32.mrb[98].mxu1  ;;  %2936 = vmatmul.mubr.bf16.vlgmr.msra.gmra.mrb[124].mxu1 %v2018_v50  ;;  %v4555_v40 = vld [vmem:[%s6540_s5 + $0x1a4] ss:$8 sps:$4 sm:$0xff]  }
 0x44b   :  { %v1949_v11 = vadd.f32 %v1948_v39, %v5945_v31  ;;  %2947 = vmatpush1.bf16.msra.mxu1 %v4523_v44  ;;  %v4180_v42 = vpop.f32.mrb[99].mxu1  ;;  %v2004_v49 = vmax.f32 %v1946_v16, 0.0  ;;  %v4529_v31 = vld [vmem:[%s6540_s5 + $0x120] ss:$8 sps:$4 sm:$0xff]   ;;  %v4550_v16 = vld [vmem:[%s6540_s5 + $0x190] ss:$8 sps:$4 sm:$0xff]  }
 0x44c   :  { %2948 = vmatprep.subr.bf16.mxu1 %v4528_v20 }
 0x44d   :  { %v2005_v32 = vmax.f32 %v1949_v11, 0.0 }
 0x44f   :  { %v6013_v62 = vpack.c.bf16 %v2005_v32, %v2004_v49  ;;  %2949 = vmatpush1.bf16.msra.mxu1 %v4526_v9  ;;  %v4558_v9 = vld [vmem:[%s6540_s5 + $0x1b4] ss:$8 sps:$4 sm:$0xff]  }
 0x450   :  { %v1953_v13 = vpop.f32.mrb[100].mxu1  ;;  %2950 = vmatprep.subr.bf16.mxu1 %v4531_v8 }
 0x451   :  { %v1954_v37 = vadd.f32 %v1953_v13, %v5951_v27  ;;  %v4183_v4 = vpop.f32.mrb[101].mxu1  ;;  %v4535_v27 = vld [vmem:[%s6540_s5 + $0x140] ss:$8 sps:$4 sm:$0xff]  }
 0x452   :  { %v1956_v34 = vpop.f32.mrb[102].mxu1 }
 0x453   :  { %v1957_v43 = vadd.f32 %v1956_v34, %v5953_v56  ;;  %2951 = vmatpush1.bf16.msra.mxu1 %v4529_v31  ;;  %v4184_v59 = vpop.f32.mrb[103].mxu1  ;;  %v2006_v22 = vmax.f32 %v1954_v37, 0.0  ;;  %v4561_v37 = vld [vmem:[%s6540_s5 + $0x1c4] ss:$8 sps:$4 sm:$0xff]  }
 0x454   :  { %2952 = vmatprep.subr.bf16.mxu1 %v4534_v7  ;;  %v4556_v7 = vld [vmem:[%s6540_s5 + $0x1b0] ss:$8 sps:$4 sm:$0xff]   ;;  %v4564_v59 = vld [vmem:[%s6540_s5 + $0x1d4] ss:$8 sps:$4 sm:$0xff]  }
 0x455   :  { %v2007_v25 = vmax.f32 %v1957_v43, 0.0 }
 0x457   :  { %v2021_v12 = vpack.c.bf16 %v2007_v25, %v2006_v22  ;;  %2953 = vmatpush1.bf16.msra.mxu1 %v4532_v18 }
 0x458   :  { %v1961_v56 = vpop.f32.mrb[104].mxu1  ;;  %2954 = vmatprep.subr.bf16.mxu1 %v4537_v47 }
 0x459   :  { %v1962_v3 = vadd.f32 %v1961_v56, %v5959_v17  ;;  %v4187_v29 = vpop.f32.mrb[105].mxu1  ;;  %2978 = vmatprep.mubr.bf16.mxu1 %v2021_v12  ;;  %v4541_v17 = vld [vmem:[%s6540_s5 + $0x160] ss:$8 sps:$4 sm:$0xff]   ;;  %v4567_v56 = vld [vmem:[%s6540_s5 + $0x1e4] ss:$8 sps:$4 sm:$0xff]  }
 0x45a   :  { %v1964_v46 = vpop.f32.mrb[106].mxu1 }
 0x45b   :  { %v1965_v35 = vadd.f32 %v1964_v46, %v5961_v45  ;;  %2955 = vmatpush1.bf16.msra.mxu1 %v4535_v27  ;;  %v4188_v38 = vpop.f32.mrb[107].mxu1  ;;  %v2008_v57 = vmax.f32 %v1962_v3, 0.0  ;;  %v4562_v27 = vld [vmem:[%s6540_s5 + $0x1d0] ss:$8 sps:$4 sm:$0xff]  }
 0x45c   :  { %2956 = vmatprep.subr.bf16.mxu1 %v4540_v60  ;;  %v4568_v46 = vld [vmem:[%s6540_s5 + $0x1f0] ss:$8 sps:$4 sm:$0xff]   ;;  %v4571_v38 = vld [vmem:[%s6540_s5 + $0x200] ss:$8 sps:$4 sm:$0xff]  }
 0x45d   :  { %v2009_v30 = vmax.f32 %v1965_v35, 0.0  ;;  %v4573_v35 = vld [vmem:[%s6540_s5 + $0x204] ss:$8 sps:$4 sm:$0xff]  }
 0x45f   :  { %v6043_v15 = vpack.c.bf16 %v2009_v30, %v2008_v57  ;;  %2957 = vmatpush1.bf16.msra.mxu1 %v4538_v63  ;;  %v4576_v63 = vld [vmem:[%s6540_s5 + $0x214] ss:$8 sps:$4 sm:$0xff]   ;;  %v4579_v57 = vld [vmem:[%s6540_s5 + $0x224] ss:$8 sps:$4 sm:$0xff]   ;;  %v4577_v30 = vld [vmem:[%s6540_s5 + $0x220] ss:$8 sps:$4 sm:$0xff]  }
 0x460   :  { %v1969_v45 = vpop.f32.mrb[108].mxu1  ;;  %2958 = vmatprep.subr.bf16.mxu1 %v4543_v54  ;;  %v4574_v54 = vld [vmem:[%s6540_s5 + $0x210] ss:$8 sps:$4 sm:$0xff]  }
 0x461   :  { %v1970_v24 = vadd.f32 %v1969_v45, %v5967_v2  ;;  %v4191_v0 = vpop.f32.mrb[109].mxu1  ;;  %v4547_v2 = vld [vmem:[%s6540_s5 + $0x180] ss:$8 sps:$4 sm:$0xff]   ;;  %v4585_v45 = vld [vmem:[%s6540_s5 + $0x244] ss:$8 sps:$4 sm:$0xff]  }
 0x462   :  { %v1972_v53 = vpop.f32.mrb[110].mxu1  ;;  %v4586_v0 = vld [vmem:[%s6540_s5 + $0x250] ss:$8 sps:$4 sm:$0xff]  }
 0x463   :  { %v1973_v50 = vadd.f32 %v1972_v53, %v5969_v28  ;;  %2959 = vmatpush1.bf16.msra.mxu1 %v4541_v17  ;;  %v4192_v23 = vpop.f32.mrb[111].mxu1  ;;  %v2010_v51 = vmax.f32 %v1970_v24, 0.0  ;;  %v4580_v17 = vld [vmem:[%s6540_s5 + $0x230] ss:$8 sps:$4 sm:$0xff]   ;;  %v4588_v24 = vld [vmem:[%s6540_s5 + $0x254] ss:$8 sps:$4 sm:$0xff]  }
 0x464   :  { %2960 = vmatprep.subr.bf16.mxu1 %v4546_v14  ;;  %v4583_v14 = vld [vmem:[%s6540_s5 + $0x240] ss:$8 sps:$4 sm:$0xff]   ;;  %v4591_v53 = vld [vmem:[%s6540_s5 + $0x264] ss:$8 sps:$4 sm:$0xff]   ;;  %v4594_v23 = vld [vmem:[%s6540_s5 + $0x274] ss:$8 sps:$4 sm:$0xff]  }
 0x465   :  { %v2011_v6 = vmax.f32 %v1973_v50, 0.0  ;;  %v4589_v50 = vld [vmem:[%s6540_s5 + $0x260] ss:$8 sps:$4 sm:$0xff]  }
 0x467   :  { %v6059_v55 = vpack.c.bf16 %v2011_v6, %v2010_v51  ;;  %2961 = vmatpush1.bf16.msra.mxu1 %v4544_v52  ;;  %v4592_v52 = vld [vmem:[%s6540_s5 + $0x270] ss:$8 sps:$4 sm:$0xff]   ;;  %v4595_v51 = vld [vmem:[%s6540_s5 + $0x280] ss:$8 sps:$4 sm:$0xff]   ;;  %v4600_v6 = vld [vmem:[%s6540_s5 + $0x294] ss:$8 sps:$4 sm:$0xff]  }
 0x468   :  { %v1977_v28 = vpop.f32.mrb[112].mxu1  ;;  %2962 = vmatprep.subr.bf16.mxu1 %v4549_v21  ;;  %v4597_v21 = vld [vmem:[%s6540_s5 + $0x284] ss:$8 sps:$4 sm:$0xff]  }
 0x469   :  { %v1978_v10 = vadd.f32 %v1977_v28, %v5975_v58  ;;  %v4195_v36 = vpop.f32.mrb[113].mxu1  ;;  %v4553_v58 = vld [vmem:[%s6540_s5 + $0x1a0] ss:$8 sps:$4 sm:$0xff]  }
 0x46a   :  { %v1980_v44 = vpop.f32.mrb[114].mxu1  ;;  %v4691_v28 = vld [vmem:[%s6542_s7] ss:$8 sps:$4 sm:$0xff]  }
 0x46b   :  { %v1981_v61 = vadd.f32 %v1980_v44, %v5977_v19  ;;  %2963 = vmatpush1.bf16.msra.mxu1 %v4547_v2  ;;  %v4196_v20 = vpop.f32.mrb[115].mxu1  ;;  %v2012_v39 = vmax.f32 %v1978_v10, 0.0  ;;  %v4603_v2 = vld [vmem:[%s6540_s5 + $0x2a4] ss:$8 sps:$4 sm:$0xff]   ;;  %v4696_v10 = vld [vmem:[%s6542_s7 + $0x14] ss:$8 sps:$4 sm:$0xff]  }
 0x46c   :  { %2964 = vmatprep.subr.bf16.mxu1 %v4552_v5  ;;  %v4693_v5 = vld [vmem:[%s6542_s7 + $0x4] ss:$8 sps:$4 sm:$0xff]   ;;  %v4601_v36 = vld [vmem:[%s6540_s5 + $0x2a0] ss:$8 sps:$4 sm:$0xff]   ;;  %v4606_v44 = vld [vmem:[%s6540_s5 + $0x2b4] ss:$8 sps:$4 sm:$0xff]  }
 0x46d   :  { %v2013_v11 = vmax.f32 %v1981_v61, 0.0  ;;  %3328 = vmatprep.subr.bf16.mxu0 %v4693_v5  ;;  %v4694_v61 = vld [vmem:[%s6542_s7 + $0x10] ss:$8 sps:$4 sm:$0xff]   ;;  %v4699_v20 = vld [vmem:[%s6542_s7 + $0x24] ss:$8 sps:$4 sm:$0xff]  }
 0x46e   :  { %3329 = vmatpush1.bf16.msra.mxu0 %v4691_v28  ;;  %v4651_v28 = vld [vmem:[%s6540_s5 + $0x3a4] ss:$8 sps:$4 sm:$0xff]   ;;  %v4649_v5 = vld [vmem:[%s6540_s5 + $0x3a0] ss:$8 sps:$4 sm:$0xff]  }
 0x46f   :  { %v6075_v42 = vpack.c.bf16 %v2013_v11, %v2012_v39  ;;  %2965 = vmatpush1.bf16.msra.mxu1 %v4550_v16  ;;  %3330 = vmatprep.subr.bf16.mxu0 %v4696_v10  ;;  %v4604_v16 = vld [vmem:[%s6540_s5 + $0x2b0] ss:$8 sps:$4 sm:$0xff]   ;;  %v4697_v39 = vld [vmem:[%s6542_s7 + $0x20] ss:$8 sps:$4 sm:$0xff]   ;;  %v4702_v11 = vld [vmem:[%s6542_s7 + $0x34] ss:$8 sps:$4 sm:$0xff]  }
 0x470   :  { %v1985_v19 = vpop.f32.mrb[116].mxu1  ;;  %2966 = vmatprep.subr.bf16.mxu1 %v4555_v40  ;;  %v4609_v40 = vld [vmem:[%s6540_s5 + $0x2c4] ss:$8 sps:$4 sm:$0xff]   ;;  %v4654_v10 = vld [vmem:[%s6540_s5 + $0x3b4] ss:$8 sps:$4 sm:$0xff]  }
 0x471   :  { %v1986_v8 = vadd.f32 %v1985_v19, %v5983_v48  ;;  %v4199_v49 = vpop.f32.mrb[117].mxu1  ;;  %v4559_v48 = vld [vmem:[%s6540_s5 + $0x1c0] ss:$8 sps:$4 sm:$0xff]   ;;  %v4612_v19 = vld [vmem:[%s6540_s5 + $0x2d4] ss:$8 sps:$4 sm:$0xff]  }
 0x472   :  { %v1988_v32 = vpop.f32.mrb[118].mxu1  ;;  %3331 = vmatpush1.bf16.msra.mxu0 %v4694_v61  ;;  %v4610_v49 = vld [vmem:[%s6540_s5 + $0x2d0] ss:$8 sps:$4 sm:$0xff]   ;;  %v4655_v61 = vld [vmem:[%s6540_s5 + $0x3c0] ss:$8 sps:$4 sm:$0xff]  }
 0x473   :  { %v1989_v31 = vadd.f32 %v1988_v32, %v5985_v41  ;;  %2967 = vmatpush1.bf16.msra.mxu1 %v4553_v58  ;;  %v4200_v13 = vpop.f32.mrb[119].mxu1  ;;  %v2014_v4 = vmax.f32 %v1986_v8, 0.0  ;;  %3332 = vmatprep.subr.bf16.mxu0 %v4699_v20  ;;  %v4607_v58 = vld [vmem:[%s6540_s5 + $0x2c0] ss:$8 sps:$4 sm:$0xff]   ;;  %v4705_v8 = vld [vmem:[%s6542_s7 + $0x44] ss:$8 sps:$4 sm:$0xff]  }
 0x474   :  { %2968 = vmatprep.subr.bf16.mxu1 %v4558_v9  ;;  %v4700_v9 = vld [vmem:[%s6542_s7 + $0x30] ss:$8 sps:$4 sm:$0xff]   ;;  %v4615_v32 = vld [vmem:[%s6540_s5 + $0x2e4] ss:$8 sps:$4 sm:$0xff]   ;;  %v4708_v13 = vld [vmem:[%s6542_s7 + $0x54] ss:$8 sps:$4 sm:$0xff]  }
 0x475   :  { %v2015_v34 = vmax.f32 %v1989_v31, 0.0  ;;  %v4703_v31 = vld [vmem:[%s6542_s7 + $0x40] ss:$8 sps:$4 sm:$0xff]   ;;  %v4660_v20 = vld [vmem:[%s6540_s5 + $0x3d4] ss:$8 sps:$4 sm:$0xff]  }
 0x476   :  { %3333 = vmatpush1.bf16.msra.mxu0 %v4697_v39  ;;  %v4661_v39 = vld [vmem:[%s6540_s5 + $0x3e0] ss:$8 sps:$4 sm:$0xff]  }
 0x477   :  { %v6091_v43 = vpack.c.bf16 %v2015_v34, %v2014_v4  ;;  %2969 = vmatpush1.bf16.msra.mxu1 %v4556_v7  ;;  %3334 = vmatprep.subr.bf16.mxu0 %v4702_v11  ;;  %v4613_v7 = vld [vmem:[%s6540_s5 + $0x2e0] ss:$8 sps:$4 sm:$0xff]   ;;  %v4618_v4 = vld [vmem:[%s6540_s5 + $0x2f4] ss:$8 sps:$4 sm:$0xff]   ;;  %v4711_v34 = vld [vmem:[%s6542_s7 + $0x64] ss:$8 sps:$4 sm:$0xff]  }
 0x478   :  { %v1993_v41 = vpop.f32.mrb[120].mxu1  ;;  %2970 = vmatprep.subr.bf16.mxu1 %v4561_v37  ;;  %v4706_v37 = vld [vmem:[%s6542_s7 + $0x50] ss:$8 sps:$4 sm:$0xff]   ;;  %v4666_v11 = vld [vmem:[%s6540_s5 + $0x3f4] ss:$8 sps:$4 sm:$0xff]  }
 0x479   :  { %v1994_v18 = vadd.f32 %v1993_v41, %v5991_v26  ;;  %v4203_v47 = vpop.f32.mrb[121].mxu1  ;;  %v4565_v26 = vld [vmem:[%s6540_s5 + $0x1e0] ss:$8 sps:$4 sm:$0xff]  }
 0x47a   :  { %v1996_v22 = vpop.f32.mrb[122].mxu1  ;;  %3335 = vmatpush1.bf16.msra.mxu0 %v4700_v9  ;;  %v4709_v41 = vld [vmem:[%s6542_s7 + $0x60] ss:$8 sps:$4 sm:$0xff]  }
 0x47b   :  { %v1997_v25 = vadd.f32 %v1996_v22, %v5993_v33  ;;  %2971 = vmatpush1.bf16.msra.mxu1 %v4559_v48  ;;  %v4204_v12 = vpop.f32.mrb[123].mxu1  ;;  %v2016_v60 = vmax.f32 %v1994_v18, 0.0  ;;  %v4570_v33 = vld [vmem:[%s6540_s5 + $0x1f4] ss:$8 sps:$4 sm:$0xff]   ;;  %3336 = vmatprep.subr.bf16.mxu0 %v4705_v8  ;;  %v4616_v48 = vld [vmem:[%s6540_s5 + $0x2f0] ss:$8 sps:$4 sm:$0xff]  }
 0x47c   :  { %2972 = vmatprep.subr.bf16.mxu1 %v4564_v59  ;;  %v4621_v59 = vld [vmem:[%s6540_s5 + $0x304] ss:$8 sps:$4 sm:$0xff]   ;;  %v4714_v18 = vld [vmem:[%s6542_s7 + $0x74] ss:$8 sps:$4 sm:$0xff]   ;;  %v4619_v47 = vld [vmem:[%s6540_s5 + $0x300] ss:$8 sps:$4 sm:$0xff]  }
 0x47d   :  { %v2017_v3 = vmax.f32 %v1997_v25, 0.0  ;;  %v4624_v22 = vld [vmem:[%s6540_s5 + $0x314] ss:$8 sps:$4 sm:$0xff]   ;;  %v4712_v25 = vld [vmem:[%s6542_s7 + $0x70] ss:$8 sps:$4 sm:$0xff]  }
 0x47e   :  { %3337 = vmatpush1.bf16.msra.mxu0 %v4703_v31  ;;  %v4717_v12 = vld [vmem:[%s6542_s7 + $0x84] ss:$8 sps:$4 sm:$0xff]   ;;  %v4667_v9 = vld [vmem:[%s6540_s5 + $0x400] ss:$8 sps:$4 sm:$0xff]   ;;  %v4672_v8 = vld [vmem:[%s6540_s5 + $0x414] ss:$8 sps:$4 sm:$0xff]  }
 0x47f   :  { %v6107_v29 = vpack.c.bf16 %v2017_v3, %v2016_v60  ;;  %2973 = vmatpush1.bf16.msra.mxu1 %v4562_v27  ;;  %3338 = vmatprep.subr.bf16.mxu0 %v4708_v13  ;;  %v4622_v27 = vld [vmem:[%s6540_s5 + $0x310] ss:$8 sps:$4 sm:$0xff]   ;;  %v4715_v60 = vld [vmem:[%s6542_s7 + $0x80] ss:$8 sps:$4 sm:$0xff]   ;;  %v4630_v3 = vld [vmem:[%s6540_s5 + $0x334] ss:$8 sps:$4 sm:$0xff]  }
 0x480   :  { %2974 = vmatprep.subr.bf16.mxu1 %v4567_v56  ;;  %v4627_v56 = vld [vmem:[%s6540_s5 + $0x324] ss:$8 sps:$4 sm:$0xff]   ;;  %v4673_v31 = vld [vmem:[%s6540_s5 + $0x420] ss:$8 sps:$4 sm:$0xff]   ;;  %v4676_v13 = vld [vmem:[%s6540_s5 + $0x430] ss:$8 sps:$4 sm:$0xff]  }
 0x482   :  { %3339 = vmatpush1.bf16.msra.mxu0 %v4706_v37  ;;  %v4679_v37 = vld [vmem:[%s6540_s5 + $0x440] ss:$8 sps:$4 sm:$0xff]  }
 0x483   :  { %2975 = vmatpush1.bf16.msra.mxu1 %v4565_v26  ;;  %3340 = vmatprep.subr.bf16.mxu0 %v4711_v34  ;;  %v4718_v26 = vld [vmem:[%s6542_s7 + $0x90] ss:$8 sps:$4 sm:$0xff]  }
 0x484   :  { %2976 = vmatprep.subr.bf16.mxu1 %v4570_v33  ;;  %v4723_v33 = vld [vmem:[%s6542_s7 + $0xa4] ss:$8 sps:$4 sm:$0xff]   ;;  %v4682_v34 = vld [vmem:[%s6540_s5 + $0x450] ss:$8 sps:$4 sm:$0xff]  }
 0x486   :  { %3341 = vmatpush1.bf16.msra.mxu0 %v4709_v41  ;;  %v4685_v41 = vld [vmem:[%s6540_s5 + $0x460] ss:$8 sps:$4 sm:$0xff]  }
 0x487   :  { %2977 = vmatpush1.bf16.msra.mxu1 %v4568_v46  ;;  %3342 = vmatprep.subr.bf16.mxu0 %v4714_v18  ;;  %v4628_v46 = vld [vmem:[%s6540_s5 + $0x330] ss:$8 sps:$4 sm:$0xff]  }
 0x488   :  { %2989 = vmatprep.subr.bf16.mxu1 %v4573_v35  ;;  %v4633_v35 = vld [vmem:[%s6540_s5 + $0x344] ss:$8 sps:$4 sm:$0xff]   ;;  %v4688_v18 = vld [vmem:[%s6540_s5 + $0x470] ss:$8 sps:$4 sm:$0xff]  }
 0x48a   :  { %2979 = vmatmul.mubr.bf16.vlgmr.msra.gmra.mrb[124].mxu1 %v6013_v62  ;;  %v4582_v62 = vld [vmem:[%s6540_s5 + $0x234] ss:$8 sps:$4 sm:$0xff]   ;;  %3343 = vmatpush1.bf16.msra.mxu0 %v4712_v25  ;;  %v2173_v25 = vlaneseq }
 0x48b   :  { %2990 = vmatpush1.bf16.msra.mxu1 %v4571_v38  ;;  %3021 = vmatprep.mubr.bf16.mxu1 %v6059_v55  ;;  %v4598_v55 = vld [vmem:[%s6540_s5 + $0x290] ss:$8 sps:$4 sm:$0xff]   ;;  %v4721_v38 = vld [vmem:[%s6542_s7 + $0xa0] ss:$8 sps:$4 sm:$0xff]  }
 0x48c   :  { %2991 = vmatprep.subr.bf16.mxu1 %v4576_v63  ;;  %3344 = vmatprep.subr.bf16.mxu0 %v4717_v12  ;;  %v4726_v63 = vld [vmem:[%s6542_s7 + $0xb4] ss:$8 sps:$4 sm:$0xff]   ;;  %v6462_v12 = vshrl.u32 %v2173_v25, 7 }
 0x48e   :  { %3345 = vmatpush1.bf16.msra.mxu0 %v4715_v60 }
 0x48f   :  { %2992 = vmatpush1.bf16.msra.mxu1 %v4574_v54  ;;  %v4631_v54 = vld [vmem:[%s6540_s5 + $0x340] ss:$8 sps:$4 sm:$0xff]  }
 0x490   :  { %2993 = vmatprep.subr.bf16.mxu1 %v4579_v57  ;;  %v4636_v57 = vld [vmem:[%s6540_s5 + $0x354] ss:$8 sps:$4 sm:$0xff]  }
 0x493   :  { %2994 = vmatpush1.bf16.msra.mxu1 %v4577_v30  ;;  %v4724_v30 = vld [vmem:[%s6542_s7 + $0xb0] ss:$8 sps:$4 sm:$0xff]  }
 0x494   :  { %2995 = vmatprep.subr.bf16.mxu1 %v4582_v62  ;;  %v4729_v62 = vld [vmem:[%s6542_s7 + $0xc4] ss:$8 sps:$4 sm:$0xff]  }
 0x497   :  { %2996 = vmatpush1.bf16.msra.mxu1 %v4580_v17  ;;  %v4634_v17 = vld [vmem:[%s6540_s5 + $0x350] ss:$8 sps:$4 sm:$0xff]  }
 0x498   :  { %2997 = vmatprep.subr.bf16.mxu1 %v4585_v45  ;;  %v4639_v45 = vld [vmem:[%s6540_s5 + $0x364] ss:$8 sps:$4 sm:$0xff]  }
 0x49b   :  { %2998 = vmatpush1.bf16.msra.mxu1 %v4583_v14  ;;  %v4727_v14 = vld [vmem:[%s6542_s7 + $0xc0] ss:$8 sps:$4 sm:$0xff]  }
 0x49c   :  { %2999 = vmatprep.subr.bf16.mxu1 %v4588_v24  ;;  %v4732_v24 = vld [vmem:[%s6542_s7 + $0xd4] ss:$8 sps:$4 sm:$0xff]  }
 0x49f   :  { %3000 = vmatpush1.bf16.msra.mxu1 %v4586_v0  ;;  %v4637_v0 = vld [vmem:[%s6540_s5 + $0x360] ss:$8 sps:$4 sm:$0xff]  }
 0x4a0   :  { %3001 = vmatprep.subr.bf16.mxu1 %v4591_v53  ;;  %v4642_v53 = vld [vmem:[%s6540_s5 + $0x374] ss:$8 sps:$4 sm:$0xff]  }
 0x4a3   :  { %3002 = vmatpush1.bf16.msra.mxu1 %v4589_v50  ;;  %v4730_v50 = vld [vmem:[%s6542_s7 + $0xd0] ss:$8 sps:$4 sm:$0xff]  }
 0x4a4   :  { %3003 = vmatprep.subr.bf16.mxu1 %v4594_v23  ;;  %v4735_v23 = vld [vmem:[%s6542_s7 + $0xe4] ss:$8 sps:$4 sm:$0xff]  }
 0x4a7   :  { %3004 = vmatpush1.bf16.msra.mxu1 %v4592_v52  ;;  %v4640_v52 = vld [vmem:[%s6540_s5 + $0x370] ss:$8 sps:$4 sm:$0xff]  }
 0x4a8   :  { %3005 = vmatprep.subr.bf16.mxu1 %v4597_v21  ;;  %v4645_v21 = vld [vmem:[%s6540_s5 + $0x384] ss:$8 sps:$4 sm:$0xff]  }
 0x4ab   :  { %3006 = vmatpush1.bf16.msra.mxu1 %v4595_v51  ;;  %v4733_v51 = vld [vmem:[%s6542_s7 + $0xe0] ss:$8 sps:$4 sm:$0xff]  }
 0x4ac   :  { %3007 = vmatprep.subr.bf16.mxu1 %v4600_v6  ;;  %v4643_v6 = vld [vmem:[%s6540_s5 + $0x380] ss:$8 sps:$4 sm:$0xff]  }
 0x4af   :  { %3008 = vmatpush1.bf16.msra.mxu1 %v4598_v55  ;;  %v4648_v55 = vld [vmem:[%s6540_s5 + $0x394] ss:$8 sps:$4 sm:$0xff]  }
 0x4b0   :  { %3009 = vmatprep.subr.bf16.mxu1 %v4603_v2  ;;  %v4646_v2 = vld [vmem:[%s6540_s5 + $0x390] ss:$8 sps:$4 sm:$0xff]  }
 0x4b3   :  { %3010 = vmatpush1.bf16.msra.mxu1 %v4601_v36  ;;  %v4652_v36 = vld [vmem:[%s6540_s5 + $0x3b0] ss:$8 sps:$4 sm:$0xff]  }
 0x4b4   :  { %3011 = vmatprep.subr.bf16.mxu1 %v4606_v44  ;;  %v4657_v44 = vld [vmem:[%s6540_s5 + $0x3c4] ss:$8 sps:$4 sm:$0xff]  }
 0x4b7   :  { %3012 = vmatpush1.bf16.msra.mxu1 %v4604_v16  ;;  %v4658_v16 = vld [vmem:[%s6540_s5 + $0x3d0] ss:$8 sps:$4 sm:$0xff]  }
 0x4b8   :  { %3013 = vmatprep.subr.bf16.mxu1 %v4609_v40  ;;  %v4663_v40 = vld [vmem:[%s6540_s5 + $0x3e4] ss:$8 sps:$4 sm:$0xff]  }
 0x4bb   :  { %3014 = vmatpush1.bf16.msra.mxu1 %v4607_v58  ;;  %v4664_v58 = vld [vmem:[%s6540_s5 + $0x3f0] ss:$8 sps:$4 sm:$0xff]  }
 0x4bc   :  { %3015 = vmatprep.subr.bf16.mxu1 %v4612_v19  ;;  %v4669_v19 = vld [vmem:[%s6540_s5 + $0x404] ss:$8 sps:$4 sm:$0xff]  }
 0x4bf   :  { %3016 = vmatpush1.bf16.msra.mxu1 %v4610_v49  ;;  %v4670_v49 = vld [vmem:[%s6540_s5 + $0x410] ss:$8 sps:$4 sm:$0xff]  }
 0x4c0   :  { %3017 = vmatprep.subr.bf16.mxu1 %v4615_v32  ;;  %v4675_v32 = vld [vmem:[%s6540_s5 + $0x424] ss:$8 sps:$4 sm:$0xff]  }
 0x4c3   :  { %3018 = vmatpush1.bf16.msra.mxu1 %v4613_v7  ;;  %v4681_v7 = vld [vmem:[%s6540_s5 + $0x444] ss:$8 sps:$4 sm:$0xff]  }
 0x4c4   :  { %3019 = vmatprep.subr.bf16.mxu1 %v4618_v4  ;;  %v4684_v4 = vld [vmem:[%s6540_s5 + $0x454] ss:$8 sps:$4 sm:$0xff]  }
 0x4c7   :  { %3020 = vmatpush1.bf16.msra.mxu1 %v4616_v48  ;;  %v4687_v48 = vld [vmem:[%s6540_s5 + $0x464] ss:$8 sps:$4 sm:$0xff]  }
 0x4c8   :  { %3032 = vmatprep.subr.bf16.mxu1 %v4621_v59  ;;  %v4690_v59 = vld [vmem:[%s6540_s5 + $0x474] ss:$8 sps:$4 sm:$0xff]  }
 0x4ca   :  { %3022 = vmatmul.mubr.bf16.vlgmr.msra.gmra.mrb[124].mxu1 %v6043_v15  ;;  %v4720_v15 = vld [vmem:[%s6542_s7 + $0x94] ss:$8 sps:$4 sm:$0xff]  }
 0x4cb   :  { %3033 = vmatpush1.bf16.msra.mxu1 %v4619_v47  ;;  %3064 = vmatprep.mubr.bf16.mxu1 %v6091_v43  ;;  %v4625_v43 = vld [vmem:[%s6540_s5 + $0x320] ss:$8 sps:$4 sm:$0xff]   ;;  %v4736_v47 = vld [vmem:[%s6542_s7 + $0xf0] ss:$8 sps:$4 sm:$0xff]  }
 0x4cc   :  { %3034 = vmatprep.subr.bf16.mxu1 %v4624_v22  ;;  %3346 = vmatprep.subr.bf16.mxu0 %v4720_v15  ;;  %v4738_v22 = vld [vmem:[%s6542_s7 + $0xf4] ss:$8 sps:$4 sm:$0xff]  }
 0x4cd   :  { %3347 = vmatpush1.bf16.msra.mxu0 %v4718_v26 }
 0x4ce   :  { %3348 = vmatprep.subr.bf16.mxu0 %v4723_v33 }
 0x4cf   :  { %3035 = vmatpush1.bf16.msra.mxu1 %v4622_v27  ;;  %v2175_v27 = vsub.s32 0, %v6462_v12 }
 0x4d0   :  { %3036 = vmatprep.subr.bf16.mxu1 %v4627_v56  ;;  %v2179_v56 = vsub.s32 1, %v6462_v12 }
 0x4d1   :  { %3349 = vmatpush1.bf16.msra.mxu0 %v4721_v38 }
 0x4d2   :  { %3350 = vmatprep.subr.bf16.mxu0 %v4726_v63 }
 0x4d3   :  { %3037 = vmatpush1.bf16.msra.mxu1 %v4625_v43 }
 0x4d4   :  { %3038 = vmatprep.subr.bf16.mxu1 %v4630_v3 }
 0x4d5   :  { %3351 = vmatpush1.bf16.msra.mxu0 %v4724_v30 }
 0x4d6   :  { %3352 = vmatprep.subr.bf16.mxu0 %v4729_v62 }
 0x4d7   :  { %3039 = vmatpush1.bf16.msra.mxu1 %v4628_v46 }
 0x4d8   :  { %3040 = vmatprep.subr.bf16.mxu1 %v4633_v35 }
 0x4d9   :  { %3353 = vmatpush1.bf16.msra.mxu0 %v4727_v14  ;;  %v4739_v14 = vld [vmem:[%s6543_s9] sm:$0xff]  }
 0x4da   :  { %3354 = vmatprep.subr.bf16.mxu0 %v4732_v24  ;;  %v4740_v24 = vld [vmem:[%s6543_s9 + $0x8] sm:$0xff]  }
 0x4db   :  { %3041 = vmatpush1.bf16.msra.mxu1 %v4631_v54 }
 0x4dc   :  { %3042 = vmatprep.subr.bf16.mxu1 %v4636_v57 }
 0x4dd   :  { %3355 = vmatpush1.bf16.msra.mxu0 %v4730_v50  ;;  %v4743_v50 = vld [vmem:[%s6543_s9 + $0x20] sm:$0xff]  }
 0x4de   :  { %3356 = vmatprep.subr.bf16.mxu0 %v4735_v23  ;;  %v4744_v23 = vld [vmem:[%s6543_s9 + $0x28] sm:$0xff]  }
 0x4df   :  { %3043 = vmatpush1.bf16.msra.mxu1 %v4634_v17 }
 0x4e0   :  { %3044 = vmatprep.subr.bf16.mxu1 %v4639_v45 }
 0x4e1   :  { %3357 = vmatpush1.bf16.msra.mxu0 %v4733_v51  ;;  %v4747_v51 = vld [vmem:[%s6543_s9 + $0x40] sm:$0xff]  }
 0x4e2   :  { %3358 = vmatprep.subr.bf16.mxu0 %v4738_v22 }
 0x4e3   :  { %3045 = vmatpush1.bf16.msra.mxu1 %v4637_v0  ;;  %v4741_v0 = vld [vmem:[%s6543_s9 + $0x10] sm:$0xff]  }
 0x4e4   :  { %3046 = vmatprep.subr.bf16.mxu1 %v4642_v53  ;;  %v4742_v53 = vld [vmem:[%s6543_s9 + $0x18] sm:$0xff]  }
 0x4e5   :  { %3359 = vmatpush1.bf16.msra.mxu0 %v4736_v47 }
 0x4e6   :  { %3492 = vmatprep.subr.bf16.mxu0 %v4760_v1 }
 0x4e7   :  { %3047 = vmatpush1.bf16.msra.mxu1 %v4640_v52  ;;  %v4745_v52 = vld [vmem:[%s6543_s9 + $0x30] sm:$0xff]  }
 0x4e8   :  { %3048 = vmatprep.subr.bf16.mxu1 %v4645_v21  ;;  %v4746_v21 = vld [vmem:[%s6543_s9 + $0x38] sm:$0xff]  }
 0x4eb   :  { %3049 = vmatpush1.bf16.msra.mxu1 %v4643_v6  ;;  %v4748_v6 = vld [vmem:[%s6543_s9 + $0x48] sm:$0xff]  }
 0x4ec   :  { %3050 = vmatprep.subr.bf16.mxu1 %v4648_v55  ;;  %v4749_v55 = vld [vmem:[%s6543_s9 + $0x50] sm:$0xff]  }
 0x4ef   :  { %3051 = vmatpush1.bf16.msra.mxu1 %v4646_v2  ;;  %v4750_v2 = vld [vmem:[%s6543_s9 + $0x58] sm:$0xff]  }
 0x4f0   :  { %3052 = vmatprep.subr.bf16.mxu1 %v4651_v28  ;;  %v4751_v28 = vld [vmem:[%s6543_s9 + $0x60] ss:$0 sps:$4 sm:$0xff]  }
 0x4f3   :  { %3053 = vmatpush1.bf16.msra.mxu1 %v4649_v5  ;;  %v3490_v5 = vsel %vm3488_vm4, %v4751_v28, 0 }
 0x4f4   :  { %3054 = vmatprep.subr.bf16.mxu1 %v4654_v10  ;;  %v3156_v10 = vld [vmem:[%s6545_s8] sm:$0x3] }
 0x4f7   :  { %3055 = vmatpush1.bf16.msra.mxu1 %v4652_v36  ;;  %v3161_v36 = vrot.slane %v3156_v10, %v2175_v27 }
 0x4f8   :  { %3056 = vmatprep.subr.bf16.mxu1 %v4657_v44  ;;  %v3165_v44 = vrot.slane %v3156_v10, %v2179_v56 }
 0x4fb   :  { %3057 = vmatpush1.bf16.msra.mxu1 %v4655_v61 }
 0x4fc   :  { %3058 = vmatprep.subr.bf16.mxu1 %v4660_v20 }
 0x4ff   :  { %3059 = vmatpush1.bf16.msra.mxu1 %v4658_v16 }
 0x500   :  { %3060 = vmatprep.subr.bf16.mxu1 %v4663_v40 }
 0x503   :  { %3061 = vmatpush1.bf16.msra.mxu1 %v4661_v39 }
 0x504   :  { %3062 = vmatprep.subr.bf16.mxu1 %v4666_v11 }
 0x507   :  { %3063 = vmatpush1.bf16.msra.mxu1 %v4664_v58 }
 0x508   :  { %3075 = vmatprep.subr.bf16.mxu1 %v4669_v19 }
 0x50a   :  { %3065 = vmatmul.mubr.bf16.vlgmr.msra.gmra.mrb[124].mxu1 %v6075_v42  ;;  %v4678_v42 = vld [vmem:[%s6540_s5 + $0x434] ss:$8 sps:$4 sm:$0xff]  }
 0x50b   :  { %3076 = vmatpush1.bf16.msra.mxu1 %v4667_v9  ;;  %3107 = vmatprep.mubr.bf16.mxu1 %v4760_v1 }
 0x50c   :  { %3077 = vmatprep.subr.bf16.mxu1 %v4672_v8 }
 0x50f   :  { %3078 = vmatpush1.bf16.msra.mxu1 %v4670_v49 }
 0x510   :  { %3079 = vmatprep.subr.bf16.mxu1 %v4675_v32 }
 0x513   :  { %3080 = vmatpush1.bf16.msra.mxu1 %v4673_v31 }
 0x514   :  { %3081 = vmatprep.subr.bf16.mxu1 %v4678_v42  ;;  %v3862_v42 = vld [vmem:[%s6546_s10] ss:$0 sm:$0xff] }
 0x517   :  { %3082 = vmatpush1.bf16.msra.mxu1 %v4676_v13 }
 0x518   :  { %3083 = vmatprep.subr.bf16.mxu1 %v4681_v7 }
 0x51b   :  { %3084 = vmatpush1.bf16.msra.mxu1 %v4679_v37 }
 0x51c   :  { %3085 = vmatprep.subr.bf16.mxu1 %v4684_v4 }
 0x51f   :  { %3086 = vmatpush1.bf16.msra.mxu1 %v4682_v34 }
 0x520   :  { %3087 = vmatprep.subr.bf16.mxu1 %v4687_v48 }
 0x523   :  { %3088 = vmatpush1.bf16.msra.mxu1 %v4685_v41 }
 0x524   :  { %3089 = vmatprep.subr.bf16.mxu1 %v4690_v59 }
 0x527   :  { %3090 = vmatpush1.bf16.msra.mxu1 %v4688_v18 }
 0x52a   :  { %3108 = vmatmul.mubr.bf16.vlgmr.msra.gmra.mrb[124].mxu1 %v6107_v29  ;;  %v2171_v29 = vld [vmem:[%s6544_s6] sm:$0x3] }
 0x52b   :  { %v2176_v60 = vrot.slane %v2171_v29, %v2175_v27  ;;  %v2180_v15 = vrot.slane %v2171_v29, %v2179_v56 }
 0x5fd   :  { %v3109_v43 = vpop.f32.mrb[124].mxu1 }
 0x5fe   :  { %v4267_v3 = vadd.f32 %v3109_v43, %v2176_v60  ;;  %v3111_v26 = vpop.f32.mrb[125].mxu1 }
 0x5ff   :  { %v4268_v33 = vadd.f32 %v3111_v26, %v2180_v15  ;;  %v3113_v46 = vpop.f32.mrb[126].mxu1 }
 0x600   :  { %v4269_v35 = vadd.f32 %v3113_v46, %v2176_v60  ;;  %v3115_v38 = vpop.f32.mrb[127].mxu1  ;;  %v3118_v54 = vmax.f32 %v4267_v3, 0.0 }
 0x601   :  { %v4270_v63 = vadd.f32 %v3115_v38, %v2180_v15  ;;  %v3119_v30 = vmax.f32 %v4268_v33, 0.0 }
 0x602   :  { %v3120_v57 = vmax.f32 %v4269_v35, 0.0 }
 0x603   :  { %v3121_v62 = vmax.f32 %v4270_v63, 0.0 }
 0x604   :  { %v3122_v17 = vpack.c.bf16 %v3120_v57, %v3118_v54 }
 0x605   :  { %v3123_v45 = vpack.c.bf16 %v3121_v62, %v3119_v30 }
 0x607   :  { %3360 = vmatprep.mubr.bf16.mxu0 %v3123_v45 }
 0x608   :  { %3361 = vmatmul.mubr.bf16.vlgmr.msra.gmra.mrb[100].mxu0 %v3122_v17 }
 0x609   :  { %3493 = vmatpush1.bf16.msra.mxu0 %v4739_v14 }
 0x60a   :  { %3494 = vmatprep.subr.bf16.mxu0 %v4760_v1 }
 0x60d   :  { %3495 = vmatpush1.bf16.msra.mxu0 %v4740_v24 }
 0x60e   :  { %3496 = vmatprep.subr.bf16.mxu0 %v4760_v1 }
 0x611   :  { %3497 = vmatpush1.bf16.msra.mxu0 %v4741_v0 }
 0x612   :  { %3498 = vmatprep.subr.bf16.mxu0 %v4760_v1 }
 0x615   :  { %3499 = vmatpush1.bf16.msra.mxu0 %v4742_v53 }
 0x616   :  { %3500 = vmatprep.subr.bf16.mxu0 %v4760_v1 }
 0x619   :  { %3501 = vmatpush1.bf16.msra.mxu0 %v4743_v50 }
 0x61a   :  { %3502 = vmatprep.subr.bf16.mxu0 %v4760_v1 }
 0x61d   :  { %3503 = vmatpush1.bf16.msra.mxu0 %v4744_v23 }
 0x61e   :  { %3504 = vmatprep.subr.bf16.mxu0 %v4760_v1 }
 0x621   :  { %3505 = vmatpush1.bf16.msra.mxu0 %v4745_v52 }
 0x622   :  { %3506 = vmatprep.subr.bf16.mxu0 %v4760_v1 }
 0x625   :  { %3507 = vmatpush1.bf16.msra.mxu0 %v4746_v21 }
 0x626   :  { %3508 = vmatprep.subr.bf16.mxu0 %v4760_v1 }
 0x629   :  { %3509 = vmatpush1.bf16.msra.mxu0 %v4747_v51 }
 0x62a   :  { %3510 = vmatprep.subr.bf16.mxu0 %v4760_v1 }
 0x62d   :  { %3511 = vmatpush1.bf16.msra.mxu0 %v4748_v6 }
 0x62e   :  { %3512 = vmatprep.subr.bf16.mxu0 %v4760_v1 }
 0x631   :  { %3513 = vmatpush1.bf16.msra.mxu0 %v4749_v55 }
 0x632   :  { %3514 = vmatprep.subr.bf16.mxu0 %v4760_v1 }
 0x635   :  { %3515 = vmatpush1.bf16.msra.mxu0 %v4750_v2 }
 0x636   :  { %3516 = vmatprep.subr.bf16.mxu0 %v4760_v1 }
 0x639   :  { %3517 = vmatpush1.bf16.msra.mxu0 %v3490_v5 }
 0x6db   :  { %v3362_v61 = vpop.f32.mrb[100].mxu0 }
 0x6dc   :  { %v3363_v20 = vadd.f32 %v3362_v61, %v3161_v36  ;;  %v3364_v16 = vpop.f32.mrb[101].mxu0 }
 0x6dd   :  { %v3365_v40 = vadd.f32 %v3364_v16, %v3165_v44  ;;  %v3366_v1 = vpop.f32.mrb[102].mxu0 }
 0x6de   :  { %v3367_v39 = vadd.f32 %v3366_v1, %v3161_v36  ;;  %v3368_v11 = vpop.f32.mrb[103].mxu0  ;;  %v3371_v19 = vmax.f32 %v3363_v20, 0.0 }
 0x6df   :  { %v3369_v58 = vadd.f32 %v3368_v11, %v3165_v44  ;;  %v3372_v8 = vmax.f32 %v3365_v40, 0.0 }
 0x6e0   :  { %v3373_v9 = vmax.f32 %v3367_v39, 0.0 }
 0x6e1   :  { %v3374_v49 = vmax.f32 %v3369_v58, 0.0 }
 0x6e2   :  { %v3375_v32 = vpack.c.bf16 %v3373_v9, %v3371_v19 }
 0x6e3   :  { %v3376_v31 = vpack.c.bf16 %v3374_v49, %v3372_v8 }
 0x6e5   :  { %3876 = vmatprep.mubr.msk.bf16.mxu0 %vm3484_vm5, %v3376_v31 }
 0x6e6   :  { %3525 = vmatmul.mubr.bf16.vlgmr.msra.gmra.mrb[104].mxu0 %v3375_v32 }
 0x7b9   :  { %v3526_v13 = vpop.f32.mrb[104].mxu0 }
 0x7ba   :  { %v3527_v7 = vadd.f32 %v3862_v42, %v3526_v13  ;;  %v3528_v37 = vpop.f32.mrb[105].mxu0 }
 0x7bb   :  { %v3529_v4 = vpop.f32.mrb[106].mxu0 }
 0x7bc   :  { %v3535_v34 = vand.u32 2147483647, %v3527_v7  ;;  %v3530_v48 = vadd.f32 %v3862_v42, %v3529_v4  ;;  %v3531_v41 = vpop.f32.mrb[107].mxu0  ;;  %v3533_v15 = vmax.f32 %v3527_v7, 0.0 }
 0x7be   :  { %v3537_v59 = vsub.f32 0.0, %v3535_v34  ;;  %v3536_v18 = vand.u32 2147483647, %v3530_v48  ;;  %v3534_v33 = vmax.f32 %v3530_v48, 0.0 }
 0x7c0   :  { %v3539_v47 = vmul.f32 1.442695, %v3537_v59  ;;  %v3538_v22 = vsub.f32 0.0, %v3536_v18 }
 0x7c2   :  { %4752 = vpow2.f32 %v3539_v47  ;;  %v3541_v25 = vmul.f32 1.442695, %v3538_v22 }
 0x7c4   :  { %4754 = vpow2.f32 %v3541_v25 }
 0x7cc   :  { %v4753_v12 = vpop.eup %4752 }
 0x7cd   :  { %v3543_v27 = vadd.f32 1.0, %v4753_v12 }
 0x7ce   :  { %v4755_v29 = vpop.eup %4754 }
 0x7cf   :  { %4756 = vlog2.f32 %v3543_v27  ;;  %v3544_v56 = vadd.f32 1.0, %v4755_v29 }
 0x7d1   :  { %4758 = vlog2.f32 %v3544_v56 }
 0x7d9   :  { %v4757_v60 = vpop.eup %4756 }
 0x7da   :  { %v3546_v43 = vmul.f32 0.6931472, %v4757_v60 }
 0x7db   :  { %v4759_v3 = vpop.eup %4758 }
 0x7dc   :  { %v3549_v26 = vadd.f32 %v3546_v43, %v3533_v15  ;;  %v3548_v46 = vmul.f32 0.6931472, %v4759_v3 }
 0x7de   :  { %v3551_v35 = vadd.f32 1.0, %v3549_v26  ;;  %v3550_v38 = vadd.f32 %v3548_v46, %v3534_v33 }
 0x7e0   :  { %v3554_v63 = vsel %vm3553_vm6, %v3527_v7, %v3551_v35  ;;  %v3552_v54 = vadd.f32 1.0, %v3550_v38 }
 0x7e1   :  { %v3557_v57 = vsel %vm3556_vm7, %v3554_v63, 0.0 }
 0x7e2   :  { %3559 = vst [vmem:[%s6547_s11] sm:$0xff] %v3557_v57  ;;  %v3555_v30 = vsel %vm3553_vm6, %v3530_v48, %v3552_v54 }
 0x7e3   :  { %v3558_v62 = vsel %vm3556_vm7, %v3555_v30, 0.0 }
 0x7e4   :  { %3560 = vst [vmem:[%s6547_s11 + $0x8] sm:$0xff] %v3558_v62 }

</bundles_post_ra>
